<compile_context>
chip_gen: v7x
topology: tpu7x:2x2x1
jax: 0.10.0
libtpu: 0.0.40
codegen_flags: <defaults>
</compile_context>

<pallas_src>
import functools

import jax
import jax.numpy as jnp
from jax.experimental import pallas as pl
from jax.experimental.pallas import tpu as pltpu

PART = 6
FEAT_DIM = 2048
BOTTLENECK = 256
BN_EPS = 1e-5
LANE = 128
MAX_TILE_N = 32      # batch tile (bounds VMEM independent of N)
MAX_TILE_K = 1024    # class tile (bounds VMEM for large class counts)


def _round_up(x, m):
    return (x + m - 1) // m * m


def _class_tiling(class_num):
    """Padded class width Kp and class tile TILE_K (Kp % TILE_K == 0)."""
    kp = _round_up(class_num, LANE)
    if kp <= MAX_TILE_K:
        return kp, kp
    return _round_up(class_num, MAX_TILE_K), MAX_TILE_K


# ---------------------------------------------------------------------------
# Fused head kernel.  Grid = (n_tiles, k_tiles); all 6 parts handled per step.
#   x_ref  : (PART, TILE_N, C)      pooled part features, bf16
#   w1_ref : (PART, C, B)           bf16, eval-BN folded in
#   b1_ref : (PART, 1, B)           f32, eval-BN folded in
#   w2_ref : (PART, B, TILE_K)      bf16 classifier slice
#   b2_ref : (PART, 1, TILE_K)      f32
#   o_ref  : (PART, TILE_N, TILE_K) f32
#   h_ref  : (PART, TILE_N, B)      f32 VMEM scratch (bottleneck activations)
# Dropout (p=0.5, both on pooled features and inside ClassBlock) is identity
# in eval mode.
# ---------------------------------------------------------------------------
def _pcb_head_kernel(x_ref, w1_ref, b1_ref, w2_ref, b2_ref, o_ref, h_ref):
    # Bottleneck Linear(2048->256) (+ folded BN): compute once per N tile
    # (first class tile) and reuse for all class tiles via the VMEM scratch.
    @pl.when(pl.program_id(1) == 0)
    def _():
        h_ref[...] = jnp.einsum(
            "pnc,pcb->pnb", x_ref[...], w1_ref[...],
            preferred_element_type=jnp.float32) + b1_ref[...]

    # Classifier Linear(256 -> class tile): bf16 operands, f32 MXU accumulate.
    logits = jnp.einsum(
        "pnb,pbk->pnk", h_ref[...].astype(jnp.bfloat16), w2_ref[...],
        preferred_element_type=jnp.float32) + b2_ref[...]
    o_ref[...] = logits


def pcb_head(feat_nchw, params, class_num):
    N, C, H, W = feat_nchw.shape
    assert C == FEAT_DIM
    # Uniform bins == PyTorch AdaptiveAvgPool2d((6,1)) when H % 6 == 0.
    assert H % PART == 0, "kernel assumes H divisible by PART (uniform adaptive bins)"
    S = (H // PART) * W

    # AdaptiveAvgPool2d((6,1)) in the *source* NCHW layout: reduce the two
    # minor dims with plain XLA (reads the layer4 tensor exactly once, no
    # full-tensor transpose); only the tiny (N, C, PART) result moves after.
    pooled = jnp.mean(feat_nchw.reshape(N, C, PART, S).astype(jnp.float32), axis=-1)
    pooled = jnp.transpose(pooled, (2, 0, 1)).astype(jnp.bfloat16)  # (PART, N, C)

    w1, b1, w2, b2 = params["w1"], params["b1"], params["w2"], params["b2"]
    B = w1.shape[-1]
    Kp = w2.shape[-1]                       # pre-padded at init
    K = class_num
    TILE_K = Kp if Kp <= MAX_TILE_K else MAX_TILE_K
    assert Kp % TILE_K == 0

    TILE_N = N if N <= MAX_TILE_N else MAX_TILE_N
    N_pad = _round_up(N, TILE_N)
    if N_pad != N:                          # tiny pad of the pooled tensor only
        pooled = jnp.pad(pooled, ((0, 0), (0, N_pad - N), (0, 0)))

    n_tiles = N_pad // TILE_N
    k_tiles = Kp // TILE_K

    # VMEM budget from the actual block sizes (x2 double-buffering) + scratch.
    vmem_bytes = 2 * (
        PART * TILE_N * C * 2          # pooled (bf16)
        + PART * C * B * 2             # W1 (bf16)
        + PART * B * 4                 # b1
        + PART * B * TILE_K * 2        # W2 slice (bf16)
        + PART * TILE_K * 4            # b2 slice
        + PART * TILE_N * TILE_K * 4   # output tile
    ) + PART * TILE_N * B * 4          # h scratch
    vmem_limit = vmem_bytes + (16 << 20)

    out = pl.pallas_call(
        _pcb_head_kernel,
        out_shape=jax.ShapeDtypeStruct((PART, N_pad, Kp), jnp.float32),
        grid=(n_tiles, k_tiles),
        in_specs=[
            pl.BlockSpec((PART, TILE_N, C), lambda n, k: (0, n, 0)),   # pooled
            pl.BlockSpec((PART, C, B),      lambda n, k: (0, 0, 0)),   # W1 (resident)
            pl.BlockSpec((PART, 1, B),      lambda n, k: (0, 0, 0)),   # b1 (resident)
            pl.BlockSpec((PART, B, TILE_K), lambda n, k: (0, 0, k)),   # W2 slice
            pl.BlockSpec((PART, 1, TILE_K), lambda n, k: (0, 0, k)),   # b2 slice
        ],
        out_specs=pl.BlockSpec((PART, TILE_N, TILE_K), lambda n, k: (0, n, k)),
        scratch_shapes=[pltpu.VMEM((PART, TILE_N, B), jnp.float32)],
        compiler_params=pltpu.CompilerParams(
            dimension_semantics=("parallel", "arbitrary"),
            vmem_limit_bytes=vmem_limit),
    )(pooled, w1, b1, w2, b2)

    # Matches `list(predict.values())`: one (N, class_num) array per part.
    return [out[i, :N, :K] for i in range(PART)]


# ---------------------------------------------------------------------------
# Deterministic parameter init mirroring weights_init_kaiming / _classifier,
# with eval-BN folded into the first linear and the classifier pre-padded to
# the lane-dense / K-tiled width.  Matmul weights stored in bf16, (in, out).
# ---------------------------------------------------------------------------
def init_params(key, class_num):
    k1, k2, k3 = jax.random.split(key, 3)
    B = BOTTLENECK
    # Linear(2048, 256): kaiming_normal_(mode='fan_out', a=0) -> std = sqrt(2/256)
    w1 = jax.random.normal(k1, (PART, FEAT_DIM, B), jnp.float32) * jnp.sqrt(2.0 / B)
    b1 = jnp.zeros((PART, 1, B), jnp.float32)
    # BatchNorm1d(256) eval: weight ~ N(1, 0.02), bias = 0, running stats (0, 1)
    gamma = 1.0 + 0.02 * jax.random.normal(k2, (PART, 1, B), jnp.float32)
    beta = jnp.zeros((PART, 1, B), jnp.float32)
    running_mean = jnp.zeros((PART, 1, B), jnp.float32)
    running_var = jnp.ones((PART, 1, B), jnp.float32)
    bn_scale = gamma / jnp.sqrt(running_var + BN_EPS)
    bn_shift = beta - running_mean * bn_scale
    # Fold eval BN into the first linear: y = (x@w1 + b1)*scale + shift.
    w1_folded = (w1 * bn_scale).astype(jnp.bfloat16)
    b1_folded = b1 * bn_scale + bn_shift
    # Classifier Linear(256, class_num): normal std=0.001, bias = 0; pre-padded.
    Kp, _ = _class_tiling(class_num)
    w2 = 0.001 * jax.random.normal(k3, (PART, B, class_num), jnp.float32)
    w2_padded = jnp.zeros((PART, B, Kp), jnp.float32).at[:, :, :class_num].set(w2)
    b2_padded = jnp.zeros((PART, 1, Kp), jnp.float32)
    return dict(
        w1=w1_folded,                       # bf16, BN-folded
        b1=b1_folded,                       # f32, BN-folded
        w2=w2_padded.astype(jnp.bfloat16),  # bf16, pre-padded to Kp
        b2=b2_padded,                       # f32, pre-padded to Kp
    )


if __name__ == "__main__":
    class_num = 32
    key = jax.random.PRNGKey(0)
    kx, kp = jax.random.split(key)

    # Small layer4-style feature map: N=2, C=2048, H=12, W=4 (NCHW, as PyTorch).
    x = jax.random.normal(kx, (2, FEAT_DIM, 12, 4), jnp.float32)
    params = init_params(kp, class_num)

    fn = jax.jit(functools.partial(pcb_head, class_num=class_num))
    preds = jax.block_until_ready(fn(x, params))

    assert len(preds) == PART
    assert all(p.shape == (2, class_num) for p in preds)
    assert all(bool(jnp.all(jnp.isfinite(p))) for p in preds)
    print("KERNEL_OK")
</pallas_src>

<mosaic_0001>
module attributes {stable_mosaic.version = 11 : i64} {
  func.func @_pcb_head_kernel(%arg0: i32, %arg1: i32, %arg2: memref<6x2x2048xbf16, #tpu.memory_space<vmem>>, %arg3: memref<6x2048x256xbf16, #tpu.memory_space<vmem>>, %arg4: memref<6x1x256xf32, #tpu.memory_space<vmem>>, %arg5: memref<6x256x128xbf16, #tpu.memory_space<vmem>>, %arg6: memref<6x1x128xf32, #tpu.memory_space<vmem>>, %arg7: memref<6x2x128xf32, #tpu.memory_space<vmem>>, %arg8: memref<6x2x256xf32, #tpu.memory_space<vmem>>) attributes {dimension_semantics = [#tpu.dimension_semantics<parallel>, #tpu.dimension_semantics<arbitrary>], iteration_bounds = array<i64: 1, 1>, scalar_prefetch = 0 : i64, scratch_operands = 1 : i64, tpu.core_type = #tpu.core_type<tc>, window_params = [{transform_indices = @transform_0, window_bounds = array<i64: 6, 2, 2048>}, {pipeline_mode = #tpu.pipeline_mode<synchronous>, transform_indices = @transform_1, window_bounds = array<i64: 6, 2048, 256>}, {pipeline_mode = #tpu.pipeline_mode<synchronous>, transform_indices = @transform_2, window_bounds = array<i64: 6, 1, 256>}, {transform_indices = @transform_3, window_bounds = array<i64: 6, 256, 128>}, {transform_indices = @transform_4, window_bounds = array<i64: 6, 1, 128>}, {transform_indices = @transform_5, window_bounds = array<i64: 6, 2, 128>}]} {
    %c0_i32 = arith.constant 0 : i32
    %0 = arith.cmpi eq, %arg1, %c0_i32 : i32
    %1 = arith.extui %0 : i1 to i32
    %c0_i32_0 = arith.constant 0 : i32
    %2 = arith.cmpi ne, %1, %c0_i32_0 : i32
    scf.if %2 {
      %c0_12 = arith.constant 0 : index
      %c0_13 = arith.constant 0 : index
      %c0_14 = arith.constant 0 : index
      %11 = vector.load %arg2[%c0_12, %c0_13, %c0_14] : memref<6x2x2048xbf16, #tpu.memory_space<vmem>>, vector<6x2x2048xbf16>
      %c0_15 = arith.constant 0 : index
      %c0_16 = arith.constant 0 : index
      %c0_17 = arith.constant 0 : index
      %12 = vector.load %arg3[%c0_15, %c0_16, %c0_17] : memref<6x2048x256xbf16, #tpu.memory_space<vmem>>, vector<6x2048x256xbf16>
      "tpu.trace_start"() <{level = 10 : i32, message = "pnc,pcb->pnb"}> : () -> ()
      %cst_18 = arith.constant dense<0.000000e+00> : vector<6x2x256xf32>
      %13 = tpu.matmul %11, %12, %cst_18 {dimension_numbers = #tpu.dot_dimension_numbers<[2], [1], [1], [2], [0, 0, 0, 1, 1, 2], [0], [0]>} : vector<6x2x2048xbf16>, vector<6x2048x256xbf16>, vector<6x2x256xf32> -> vector<6x2x256xf32>
      "tpu.trace_stop"() : () -> ()
      %c0_19 = arith.constant 0 : index
      %c0_20 = arith.constant 0 : index
      %c0_21 = arith.constant 0 : index
      %14 = vector.load %arg4[%c0_19, %c0_20, %c0_21] : memref<6x1x256xf32, #tpu.memory_space<vmem>>, vector<6x1x256xf32>
      %15 = vector.broadcast %14 : vector<6x1x256xf32> to vector<6x2x256xf32>
      %16 = arith.addf %13, %15 : vector<6x2x256xf32>
      %c0_22 = arith.constant 0 : index
      %c0_23 = arith.constant 0 : index
      %c0_24 = arith.constant 0 : index
      %17 = vector.load %arg8[%c0_22, %c0_23, %c0_24] : memref<6x2x256xf32, #tpu.memory_space<vmem>>, vector<6x2x256xf32>
      tpu.vector_store %arg8[%c0_22, %c0_23, %c0_24], %16 {strides = array<i32>} : memref<6x2x256xf32, #tpu.memory_space<vmem>>, vector<6x2x256xf32>,
    } else {
    }
    %c0 = arith.constant 0 : index
    %c0_1 = arith.constant 0 : index
    %c0_2 = arith.constant 0 : index
    %3 = vector.load %arg8[%c0, %c0_1, %c0_2] : memref<6x2x256xf32, #tpu.memory_space<vmem>>, vector<6x2x256xf32>
    %4 = arith.truncf %3 : vector<6x2x256xf32> to vector<6x2x256xbf16>
    %c0_3 = arith.constant 0 : index
    %c0_4 = arith.constant 0 : index
    %c0_5 = arith.constant 0 : index
    %5 = vector.load %arg5[%c0_3, %c0_4, %c0_5] : memref<6x256x128xbf16, #tpu.memory_space<vmem>>, vector<6x256x128xbf16>
    "tpu.trace_start"() <{level = 10 : i32, message = "pnb,pbk->pnk"}> : () -> ()
    %cst = arith.constant dense<0.000000e+00> : vector<6x2x128xf32>
    %6 = tpu.matmul %4, %5, %cst {dimension_numbers = #tpu.dot_dimension_numbers<[2], [1], [1], [2], [0, 0, 0, 1, 1, 2], [0], [0]>} : vector<6x2x256xbf16>, vector<6x256x128xbf16>, vector<6x2x128xf32> -> vector<6x2x128xf32>
    "tpu.trace_stop"() : () -> ()
    %c0_6 = arith.constant 0 : index
    %c0_7 = arith.constant 0 : index
    %c0_8 = arith.constant 0 : index
    %7 = vector.load %arg6[%c0_6, %c0_7, %c0_8] : memref<6x1x128xf32, #tpu.memory_space<vmem>>, vector<6x1x128xf32>
    %8 = vector.broadcast %7 : vector<6x1x128xf32> to vector<6x2x128xf32>
    %9 = arith.addf %6, %8 : vector<6x2x128xf32>
    %c0_9 = arith.constant 0 : index
    %c0_10 = arith.constant 0 : index
    %c0_11 = arith.constant 0 : index
    %10 = vector.load %arg7[%c0_9, %c0_10, %c0_11] : memref<6x2x128xf32, #tpu.memory_space<vmem>>, vector<6x2x128xf32>
    tpu.vector_store %arg7[%c0_9, %c0_10, %c0_11], %9 {strides = array<i32>} : memref<6x2x128xf32, #tpu.memory_space<vmem>>, vector<6x2x128xf32>,
    return
  }
  func.func @transform_0(%arg0: i32, %arg1: i32) -> (i32, i32, i32) {
    %c0_i32 = arith.constant 0 : i32
    %c0_i32_0 = arith.constant 0 : i32
    %c0_i32_1 = arith.constant 0 : i32
    return %c0_i32, %arg0, %c0_i32_0 : i32, i32, i32
  }
  func.func @transform_1(%arg0: i32, %arg1: i32) -> (i32, i32, i32) {
    %c0_i32 = arith.constant 0 : i32
    %c0_i32_0 = arith.constant 0 : i32
    %c0_i32_1 = arith.constant 0 : i32
    %c0_i32_2 = arith.constant 0 : i32
    return %c0_i32, %c0_i32_0, %c0_i32_1 : i32, i32, i32
  }
  func.func @transform_2(%arg0: i32, %arg1: i32) -> (i32, i32, i32) {
    %c0_i32 = arith.constant 0 : i32
    %c0_i32_0 = arith.constant 0 : i32
    %c0_i32_1 = arith.constant 0 : i32
    %c0_i32_2 = arith.constant 0 : i32
    return %c0_i32, %c0_i32_0, %c0_i32_1 : i32, i32, i32
  }
  func.func @transform_3(%arg0: i32, %arg1: i32) -> (i32, i32, i32) {
    %c0_i32 = arith.constant 0 : i32
    %c0_i32_0 = arith.constant 0 : i32
    %c0_i32_1 = arith.constant 0 : i32
    return %c0_i32, %c0_i32_0, %arg1 : i32, i32, i32
  }
  func.func @transform_4(%arg0: i32, %arg1: i32) -> (i32, i32, i32) {
    %c0_i32 = arith.constant 0 : i32
    %c0_i32_0 = arith.constant 0 : i32
    %c0_i32_1 = arith.constant 0 : i32
    return %c0_i32, %c0_i32_0, %arg1 : i32, i32, i32
  }
  func.func @transform_5(%arg0: i32, %arg1: i32) -> (i32, i32, i32) {
    %c0_i32 = arith.constant 0 : i32
    %c0_i32_0 = arith.constant 0 : i32
    return %c0_i32, %arg0, %arg1 : i32, i32, i32
  }
}

</mosaic_0001>

<bundles_post_ra>
// kernel: pcb_head.1
= control target key start
LH: loop header
LB: loop body
LE: loop exit
PB: predicated region body
PF: predicated region fallthrough
CT: control target
= control target key end

     0   :  { %10 = vsyncpa [#allocation4], 0  ;;  %s18402_s0 = inlined_call_operand.vmem [shape: bf16[6,2,2048], index: 0, kind: input, shape index: {}]   ;;  %s18403_s1 = inlined_call_operand.hbm [shape: bf16[6,2048,256], index: 1, kind: input, shape index: {}]   ;;  %s18404_s2 = inlined_call_operand.hbm [shape: f32[6,1,256], index: 2, kind: input, shape index: {}]   ;;  %s18405_s3 = inlined_call_operand.hbm [shape: bf16[6,256,128], index: 3, kind: input, shape index: {}]   ;;  %s18406_s4 = inlined_call_operand.hbm [shape: f32[6,1,128], index: 4, kind: input, shape index: {}]   ;;  %s18407_s5 = inlined_call_operand.vmem [shape: f32[6,2,128], index: 5, kind: output, shape index: {}]  }
   0x1   :  { %11 = vsyncpa [#allocation6], 0 }
   0x2   :  { %12 = vsyncpa [#allocation9], 0  ;;  %s17756_s18 = smov [#allocation5]   ;;  %s17662_s22 = scalar_lea.hbm %s18404_s2, 192 }
   0x3   :  { %s32_s19 = sshll.u32 %s17756_s18, 4  ;;  %p17663_p0 = scmp.ne.s32.totalorder %s18404_s2, %s17662_s22  ;;  %s33_s19 = int_to_ptr.vmem [resolvable:$true] %s32_s19 }
   0x4   :  { %p17666_p1 = scmp.lt.u32.totalorder %s17662_s22, %s18404_s2 }
   0x6   :  { %p17668_p2 = pnand %p17666_p1, %p17663_p0 }
   0x8   :  { %17671 = shalt.err (!%p17668_p2)
}
   0x9   :  { %s17672_s27 = scalar_lea.vmem %s33_s19, 192  ;;  %p17677_p4 = scmp.lt.s32.totalorder %s33_s19, %s33_s19 }
   0xa   :  { %p17673_p3 = scmp.ne.s32.totalorder %s33_s19, %s17672_s27  ;;  %p17678_p5 = scmp.lt.s32.totalorder %s17672_s27, %s17672_s27 }
   0xc   :  { %p17679_p6 = por %p17678_p5, %p17677_p4 }
   0xe   :  { %p17680_p7 = pnand %p17679_p6, %p17673_p3 }
  0x10   :  { %17683 = shalt.err (!%p17680_p7)
}
  0x11   :  { %s17757_s28 = smov 32   ;;  %s17758_s29 = smov 2  }
  0x12   :  { %38 = dma.hbm_to_vmem [thread:$0]  %s18404_s2, 192, %s33_s19, [#allocation6], %s17757_s28, %s17757_s28, %s17758_s29  }
  0x13   :  { %s17759_s7 = smov [#allocation3]   ;;  %s17684_s11 = scalar_lea.hbm %s18403_s1, 196608 }
  0x14   :  { %s20_s8 = sshll.u32 %s17759_s7, 4  ;;  %p17685_p8 = scmp.ne.s32.totalorder %s18403_s1, %s17684_s11  ;;  %s21_s8 = int_to_ptr.vmem [resolvable:$true] %s20_s8 }
  0x15   :  { %p17688_p9 = scmp.lt.u32.totalorder %s17684_s11, %s18403_s1 }
  0x17   :  { %p17690_p10 = pnand %p17688_p9, %p17685_p8 }
  0x19   :  { %17693 = shalt.err (!%p17690_p10)
}
  0x1a   :  { %s17694_s16 = scalar_lea.vmem %s21_s8, 196608  ;;  %p17699_p12 = scmp.lt.s32.totalorder %s21_s8, %s21_s8 }
  0x1b   :  { %p17695_p11 = scmp.ne.s32.totalorder %s21_s8, %s17694_s16  ;;  %p17700_p13 = scmp.lt.s32.totalorder %s17694_s16, %s17694_s16 }
  0x1d   :  { %p17701_p0 = por %p17700_p13, %p17699_p12 }
  0x1f   :  { %p17702_p1 = pnand %p17701_p0, %p17695_p11 }
  0x21   :  { %17705 = shalt.err (!%p17702_p1)
}
  0x22   :  { %s17760_s2 = smov 128   ;;  %s17761_s17 = smov 8  }
  0x23   :  { %26 = dma.hbm_to_vmem [thread:$0]  %s18403_s1, 196608, %s21_s8, [#allocation4], %s17760_s2, %s17760_s2, %s17761_s17  }
  0x24   :  { %s17762_s20 = smov [#allocation7]   ;;  %s17706_s24 = scalar_lea.hbm %s18405_s3, 12288 }
  0x25   :  { %s44_s21 = sshll.u32 %s17762_s20, 4  ;;  %p17707_p2 = scmp.ne.s32.totalorder %s18405_s3, %s17706_s24  ;;  %s45_s21 = int_to_ptr.vmem [resolvable:$true] %s44_s21 }
  0x26   :  { %p17710_p3 = scmp.lt.u32.totalorder %s17706_s24, %s18405_s3 }
  0x28   :  { %p17712_p4 = pnand %p17710_p3, %p17707_p2 }
  0x2a   :  { %17715 = shalt.err (!%p17712_p4)
}
  0x2b   :  { %s17716_s29 = scalar_lea.vmem %s45_s21, 12288  ;;  %p17721_p6 = scmp.lt.s32.totalorder %s45_s21, %s45_s21 }
  0x2c   :  { %p17717_p5 = scmp.ne.s32.totalorder %s45_s21, %s17716_s29  ;;  %p17722_p7 = scmp.lt.s32.totalorder %s17716_s29, %s17716_s29 }
  0x2e   :  { %p17723_p8 = por %p17722_p7, %p17721_p6 }
  0x30   :  { %p17724_p9 = pnand %p17723_p8, %p17717_p5 }
  0x32   :  { %17727 = shalt.err (!%p17724_p9)
}
  0x33   :  { %s17763_s1 = smov 64   ;;  %s17764_s30 = smov 4  }
  0x34   :  { %50 = dma.hbm_to_vmem [thread:$0]  %s18405_s3, 12288, %s45_s21, [#allocation6], %s17763_s1, %s17763_s1, %s17764_s30  }
  0x35   :  { %s17765_s8 = smov [#allocation8]   ;;  %s17728_s12 = scalar_lea.hbm %s18406_s4, 96 }
  0x36   :  { %s56_s9 = sshll.u32 %s17765_s8, 4  ;;  %p17729_p10 = scmp.ne.s32.totalorder %s18406_s4, %s17728_s12  ;;  %s57_s9 = int_to_ptr.vmem [resolvable:$true] %s56_s9 }
  0x37   :  { %p17732_p11 = scmp.lt.u32.totalorder %s17728_s12, %s18406_s4 }
  0x39   :  { %p17734_p12 = pnand %p17732_p11, %p17729_p10 }
  0x3b   :  { %17737 = shalt.err (!%p17734_p12)
}
  0x3c   :  { %s17738_s2 = scalar_lea.vmem %s57_s9, 96  ;;  %p17743_p0 = scmp.lt.s32.totalorder %s57_s9, %s57_s9 }
  0x3d   :  { %p17739_p13 = scmp.ne.s32.totalorder %s57_s9, %s17738_s2  ;;  %p17744_p1 = scmp.lt.s32.totalorder %s17738_s2, %s17738_s2 }
  0x3f   :  { %p17745_p2 = por %p17744_p1, %p17743_p0 }
  0x41   :  { %p17746_p3 = pnand %p17745_p2, %p17739_p13 }
  0x43   :  { %17749 = shalt.err (!%p17746_p3)
}
  0x44   :  { %s17766_s3 = smov 16   ;;  %s17767_s17 = smov 1  }
  0x45   :  { %62 = dma.hbm_to_vmem [thread:$0]  %s18406_s4, 96, %s57_s9, [#allocation9], %s17766_s3, %s17766_s3, %s17767_s17  }
  0x46   :  { %17750 = dma.done.wait [#allocation4], 196608  }
  0x47   :  { %17751 = vsyncadd [#allocation4], 4294770688 }
  0x48   :  { %17752 = dma.done.wait [#allocation6], 12480  }
  0x49   :  { %17753 = vsyncadd [#allocation6], 4294954816 }
  0x4a   :  { %17754 = dma.done.wait [#allocation9], 96  }
  0x4b   :  { %17755 = vsyncadd [#allocation9], 4294967200  ;;  %v15238_v0 = vld [vmem:[#allocation3 + $0x4] ss:$8 sps:$4 sm:$0xff]   ;;  %v15242_v2 = vld [vmem:[#allocation3] ss:$8 sps:$4 sm:$0xff]   ;;  %v1640_v36 = vlaneseq }
  0x4c   :  { %v15240_v1 = vld [vmem:[#allocation3 + $0x804] ss:$8 sps:$4 sm:$0xff]   ;;  %3096 = vmatprep.subr.bf16.mxu0 %v15238_v0  ;;  %v15243_v3 = vld [vmem:[#allocation3 + $0x800] ss:$8 sps:$4 sm:$0xff]   ;;  %v15244_v4 = vld [vmem:[#allocation3 + $0x14] ss:$8 sps:$4 sm:$0xff]  }
  0x4d   :  { %4820 = vmatprep.subr.bf16.mxu1 %v15240_v1  ;;  %3097 = vmatpush1.bf16.msra.mxu0 %v15242_v2  ;;  %v15246_v5 = vld [vmem:[#allocation3 + $0x814] ss:$8 sps:$4 sm:$0xff]   ;;  %v15248_v6 = vld [vmem:[#allocation3 + $0x10] ss:$8 sps:$4 sm:$0xff]   ;;  %v15250_v8 = vld [vmem:[#allocation3 + $0x24] ss:$8 sps:$4 sm:$0xff]  }
  0x4e   :  { %4821 = vmatpush1.bf16.msra.mxu1 %v15243_v3  ;;  %3098 = vmatprep.subr.bf16.mxu0 %v15244_v4  ;;  %v15249_v7 = vld [vmem:[#allocation3 + $0x810] ss:$8 sps:$4 sm:$0xff]   ;;  %v15252_v9 = vld [vmem:[#allocation3 + $0x824] ss:$8 sps:$4 sm:$0xff]   ;;  %v15254_v10 = vld [vmem:[#allocation3 + $0x20] ss:$8 sps:$4 sm:$0xff]  }
  0x4f   :  { %4822 = vmatprep.subr.bf16.mxu1 %v15246_v5  ;;  %v15255_v11 = vld [vmem:[#allocation3 + $0x820] ss:$8 sps:$4 sm:$0xff]   ;;  %v15256_v12 = vld [vmem:[#allocation3 + $0x34] ss:$8 sps:$4 sm:$0xff]   ;;  %v15260_v14 = vld [vmem:[#allocation3 + $0x30] ss:$8 sps:$4 sm:$0xff]  }
  0x50   :  { %v15258_v13 = vld [vmem:[#allocation3 + $0x834] ss:$8 sps:$4 sm:$0xff]   ;;  %v15261_v15 = vld [vmem:[#allocation3 + $0x830] ss:$8 sps:$4 sm:$0xff]   ;;  %v15262_v16 = vld [vmem:[#allocation3 + $0x44] ss:$8 sps:$4 sm:$0xff]  }
  0x51   :  { %3099 = vmatpush1.bf16.msra.mxu0 %v15248_v6  ;;  %v15264_v17 = vld [vmem:[#allocation3 + $0x844] ss:$8 sps:$4 sm:$0xff]   ;;  %v15266_v18 = vld [vmem:[#allocation3 + $0x40] ss:$8 sps:$4 sm:$0xff]   ;;  %v15268_v20 = vld [vmem:[#allocation3 + $0x54] ss:$8 sps:$4 sm:$0xff]  }
  0x52   :  { %4823 = vmatpush1.bf16.msra.mxu1 %v15249_v7  ;;  %3100 = vmatprep.subr.bf16.mxu0 %v15250_v8  ;;  %v15267_v19 = vld [vmem:[#allocation3 + $0x840] ss:$8 sps:$4 sm:$0xff]   ;;  %v15270_v21 = vld [vmem:[#allocation3 + $0x854] ss:$8 sps:$4 sm:$0xff]   ;;  %v15272_v22 = vld [vmem:[#allocation3 + $0x50] ss:$8 sps:$4 sm:$0xff]  }
  0x53   :  { %4824 = vmatprep.subr.bf16.mxu1 %v15252_v9  ;;  %v15273_v23 = vld [vmem:[#allocation3 + $0x850] ss:$8 sps:$4 sm:$0xff]   ;;  %v15274_v24 = vld [vmem:[#allocation3 + $0x64] ss:$8 sps:$4 sm:$0xff]   ;;  %v15278_v26 = vld [vmem:[#allocation3 + $0x60] ss:$8 sps:$4 sm:$0xff]  }
  0x54   :  { %v15276_v25 = vld [vmem:[#allocation3 + $0x864] ss:$8 sps:$4 sm:$0xff]   ;;  %v15279_v27 = vld [vmem:[#allocation3 + $0x860] ss:$8 sps:$4 sm:$0xff]   ;;  %v15280_v28 = vld [vmem:[#allocation3 + $0x74] ss:$8 sps:$4 sm:$0xff]  }
  0x55   :  { %3101 = vmatpush1.bf16.msra.mxu0 %v15254_v10  ;;  %v15282_v29 = vld [vmem:[#allocation3 + $0x874] ss:$8 sps:$4 sm:$0xff]   ;;  %v15284_v30 = vld [vmem:[#allocation3 + $0x70] ss:$8 sps:$4 sm:$0xff]   ;;  %v15286_v32 = vld [vmem:[#allocation3 + $0x84] ss:$8 sps:$4 sm:$0xff]  }
  0x56   :  { %4825 = vmatpush1.bf16.msra.mxu1 %v15255_v11  ;;  %3102 = vmatprep.subr.bf16.mxu0 %v15256_v12  ;;  %v15285_v31 = vld [vmem:[#allocation3 + $0x870] ss:$8 sps:$4 sm:$0xff]   ;;  %v15288_v33 = vld [vmem:[#allocation3 + $0x884] ss:$8 sps:$4 sm:$0xff]   ;;  %v15290_v34 = vld [vmem:[#allocation3 + $0x80] ss:$8 sps:$4 sm:$0xff]  }
  0x57   :  { %4826 = vmatprep.subr.bf16.mxu1 %v15258_v13  ;;  %v15291_v35 = vld [vmem:[#allocation3 + $0x880] ss:$8 sps:$4 sm:$0xff]   ;;  %v17768_v37 = vmov 1966171168   ;;  %v15292_v39 = vld [vmem:[#allocation3 + $0x94] ss:$8 sps:$4 sm:$0xff]  }
  0x58   :  { %v1704_v38 = vunpack.c.l.s4 %v17768_v37  ;;  %v15294_v40 = vld [vmem:[#allocation3 + $0x894] ss:$8 sps:$4 sm:$0xff]   ;;  %v15296_v41 = vld [vmem:[#allocation3 + $0x90] ss:$8 sps:$4 sm:$0xff]   ;;  %v17847_v42 = vshrl.u32 %v1640_v36, 7  ;;  %v17855_v52 = vld [vmem:[%s18402_s0] sm:$0xff] }
  0x59   :  { %3103 = vmatpush1.bf16.msra.mxu0 %v15260_v14  ;;  %v15297_v44 = vld [vmem:[#allocation3 + $0x890] ss:$8 sps:$4 sm:$0xff]   ;;  %v15298_v45 = vld [vmem:[#allocation3 + $0xa4] ss:$8 sps:$4 sm:$0xff]   ;;  %v15302_v47 = vld [vmem:[#allocation3 + $0xa0] ss:$8 sps:$4 sm:$0xff]  }
  0x5a   :  { %4827 = vmatpush1.bf16.msra.mxu1 %v15261_v15  ;;  %3104 = vmatprep.subr.bf16.mxu0 %v15262_v16  ;;  %v1705_v43 = vunpack.c.0.s8 %v1704_v38  ;;  %v15300_v46 = vld [vmem:[#allocation3 + $0x8a4] ss:$8 sps:$4 sm:$0xff]   ;;  %v15303_v48 = vld [vmem:[#allocation3 + $0x8a0] ss:$8 sps:$4 sm:$0xff]   ;;  %v15304_v50 = vld [vmem:[#allocation3 + $0xb4] ss:$8 sps:$4 sm:$0xff]  }
  0x5b   :  { %4828 = vmatprep.subr.bf16.mxu1 %v15264_v17  ;;  %v15306_v51 = vld [vmem:[#allocation3 + $0x8b4] ss:$8 sps:$4 sm:$0xff]   ;;  %v15308_v53 = vld [vmem:[#allocation3 + $0xb0] ss:$8 sps:$4 sm:$0xff]   ;;  %v15310_v57 = vld [vmem:[#allocation3 + $0xc4] ss:$8 sps:$4 sm:$0xff]  }
  0x5c   :  { %v17850_v49 = vsub.s32 %v1705_v43, %v17847_v42  ;;  %v15309_v55 = vld [vmem:[#allocation3 + $0x8b0] ss:$8 sps:$4 sm:$0xff]   ;;  %v15312_v58 = vld [vmem:[#allocation3 + $0x8c4] ss:$8 sps:$4 sm:$0xff]   ;;  %v15314_v63 = vld [vmem:[#allocation3 + $0xc0] ss:$8 sps:$4 sm:$0xff]  }
  0x5d   :  { %3105 = vmatpush1.bf16.msra.mxu0 %v15266_v18  ;;  %v17862_v56 = vld [vmem:[%s18402_s0 + $0x10] sm:$0xff]  ;;  %v15315_v0 = vld [vmem:[#allocation3 + $0x8c0] ss:$8 sps:$4 sm:$0xff]   ;;  %v15322_v6 = vld [vmem:[#allocation3 + $0xe4] ss:$8 sps:$4 sm:$0xff]  }
  0x5e   :  { %4829 = vmatpush1.bf16.msra.mxu1 %v15267_v19  ;;  %3106 = vmatprep.subr.bf16.mxu0 %v15268_v20  ;;  %v1709_v54 = vrot.slane %v17855_v52, %v17850_v49  ;;  %v3433_v60 = vrot.slane %v17862_v56, %v17850_v49  ;;  %v15316_v1 = vld [vmem:[#allocation3 + $0xd4] ss:$8 sps:$4 sm:$0xff]   ;;  %v15320_v4 = vld [vmem:[#allocation3 + $0xd0] ss:$8 sps:$4 sm:$0xff]   ;;  %v15324_v7 = vld [vmem:[#allocation3 + $0x8e4] ss:$8 sps:$4 sm:$0xff]  }
  0x5f   :  { %4830 = vmatprep.subr.bf16.mxu1 %v15270_v21  ;;  %v15318_v2 = vld [vmem:[#allocation3 + $0x8d4] ss:$8 sps:$4 sm:$0xff]   ;;  %v15321_v5 = vld [vmem:[#allocation3 + $0x8d0] ss:$8 sps:$4 sm:$0xff]   ;;  %v15326_v8 = vld [vmem:[#allocation3 + $0xe0] ss:$8 sps:$4 sm:$0xff]  }
  0x60   :  { %v1717_v59 = vcombine.high %v1709_v54, %v1709_v54  ;;  %v3441_v62 = vcombine.high %v3433_v60, %v3433_v60  ;;  %v15327_v9 = vld [vmem:[#allocation3 + $0x8e0] ss:$8 sps:$4 sm:$0xff]   ;;  %v15328_v10 = vld [vmem:[#allocation3 + $0xf4] ss:$8 sps:$4 sm:$0xff]   ;;  %v15332_v12 = vld [vmem:[#allocation3 + $0xf0] ss:$8 sps:$4 sm:$0xff]   ;;  %v17869_v16 = vrot.slane %v1709_v54, %v17850_v49  ;;  %v17872_v17 = vrot.slane %v3433_v60, %v17850_v49 }
  0x61   :  { %3107 = vmatpush1.bf16.msra.mxu0 %v15272_v22  ;;  %v15330_v11 = vld [vmem:[#allocation3 + $0x8f4] ss:$8 sps:$4 sm:$0xff]   ;;  %v15333_v13 = vld [vmem:[#allocation3 + $0x8f0] ss:$8 sps:$4 sm:$0xff]   ;;  %v15337_v14 = vld [vmem:[#allocation3 + $0x104] ss:$8 sps:$4 sm:$0xff]  }
  0x62   :  { %4831 = vmatpush1.bf16.msra.mxu1 %v15273_v23  ;;  %3108 = vmatprep.subr.bf16.mxu0 %v15274_v24  ;;  %v1739_v61 = vrot.slane %v1717_v59, %v17850_v49  ;;  %v3463_v3 = vrot.slane %v3441_v62, %v17850_v49  ;;  %v15341_v15 = vld [vmem:[#allocation3 + $0x904] ss:$8 sps:$4 sm:$0xff]   ;;  %v15335_v18 = vld [vmem:[#allocation3 + $0x100] ss:$8 sps:$4 sm:$0xff]   ;;  %v15344_v20 = vld [vmem:[#allocation3 + $0x114] ss:$8 sps:$4 sm:$0xff]  }
  0x63   :  { %4832 = vmatprep.subr.bf16.mxu1 %v15276_v25  ;;  %v15339_v19 = vld [vmem:[#allocation3 + $0x900] ss:$8 sps:$4 sm:$0xff]   ;;  %v15347_v21 = vld [vmem:[#allocation3 + $0x914] ss:$8 sps:$4 sm:$0xff]   ;;  %v15342_v24 = vld [vmem:[#allocation3 + $0x110] ss:$8 sps:$4 sm:$0xff]  }
  0x64   :  { %3128 = vmatprep.mubr.bf16.mxu0 %v1739_v61  ;;  %4852 = vmatprep.mubr.bf16.mxu1 %v3463_v3  ;;  %v1749_v22 = vcombine.high %v1739_v61, %v1739_v61  ;;  %v3473_v23 = vcombine.high %v3463_v3, %v3463_v3  ;;  %v15345_v25 = vld [vmem:[#allocation3 + $0x910] ss:$8 sps:$4 sm:$0xff]   ;;  %v15360_v36 = vld [vmem:[#allocation3 + $0x140] ss:$8 sps:$4 sm:$0xff]   ;;  %v15368_v38 = vld [vmem:[#allocation3 + $0x154] ss:$8 sps:$4 sm:$0xff]  }
  0x65   :  { %3109 = vmatpush1.bf16.msra.mxu0 %v15278_v26  ;;  %v15350_v26 = vld [vmem:[#allocation3 + $0x124] ss:$8 sps:$4 sm:$0xff]   ;;  %v15363_v37 = vld [vmem:[#allocation3 + $0x940] ss:$8 sps:$4 sm:$0xff]   ;;  %v15395_v59 = vld [vmem:[#allocation3 + $0x994] ss:$8 sps:$4 sm:$0xff]  }
  0x66   :  { %4833 = vmatpush1.bf16.msra.mxu1 %v15279_v27  ;;  %3110 = vmatprep.subr.bf16.mxu0 %v15280_v28  ;;  %v15353_v27 = vld [vmem:[#allocation3 + $0x924] ss:$8 sps:$4 sm:$0xff]   ;;  %v15348_v28 = vld [vmem:[#allocation3 + $0x120] ss:$8 sps:$4 sm:$0xff]   ;;  %v15390_v60 = vld [vmem:[#allocation3 + $0x190] ss:$8 sps:$4 sm:$0xff]  }
  0x67   :  { %4834 = vmatprep.subr.bf16.mxu1 %v15282_v29  ;;  %v15351_v29 = vld [vmem:[#allocation3 + $0x920] ss:$8 sps:$4 sm:$0xff]   ;;  %v15374_v43 = vld [vmem:[#allocation3 + $0x164] ss:$8 sps:$4 sm:$0xff]   ;;  %v15393_v61 = vld [vmem:[#allocation3 + $0x990] ss:$8 sps:$4 sm:$0xff]  }
  0x68   :  { %v15389_v54 = vld [vmem:[#allocation3 + $0x984] ss:$8 sps:$4 sm:$0xff]   ;;  %v15407_v3 = vld [vmem:[#allocation3 + $0x9b4] ss:$8 sps:$4 sm:$0xff]  }
  0x69   :  { %3111 = vmatpush1.bf16.msra.mxu0 %v15284_v30  ;;  %v15356_v30 = vld [vmem:[#allocation3 + $0x134] ss:$8 sps:$4 sm:$0xff]   ;;  %v15398_v62 = vld [vmem:[#allocation3 + $0x1a4] ss:$8 sps:$4 sm:$0xff]  }
  0x6a   :  { %4835 = vmatpush1.bf16.msra.mxu1 %v15285_v31  ;;  %3112 = vmatprep.subr.bf16.mxu0 %v15286_v32  ;;  %v15359_v31 = vld [vmem:[#allocation3 + $0x934] ss:$8 sps:$4 sm:$0xff]   ;;  %v15354_v32 = vld [vmem:[#allocation3 + $0x130] ss:$8 sps:$4 sm:$0xff]  }
  0x6b   :  { %4836 = vmatprep.subr.bf16.mxu1 %v15288_v33  ;;  %v15357_v33 = vld [vmem:[#allocation3 + $0x930] ss:$8 sps:$4 sm:$0xff]  }
  0x6d   :  { %3113 = vmatpush1.bf16.msra.mxu0 %v15290_v34  ;;  %v15362_v34 = vld [vmem:[#allocation3 + $0x144] ss:$8 sps:$4 sm:$0xff]  }
  0x6e   :  { %4837 = vmatpush1.bf16.msra.mxu1 %v15291_v35  ;;  %3114 = vmatprep.subr.bf16.mxu0 %v15292_v39  ;;  %v15365_v35 = vld [vmem:[#allocation3 + $0x944] ss:$8 sps:$4 sm:$0xff]   ;;  %v15371_v39 = vld [vmem:[#allocation3 + $0x954] ss:$8 sps:$4 sm:$0xff]  }
  0x6f   :  { %4838 = vmatprep.subr.bf16.mxu1 %v15294_v40  ;;  %v15366_v40 = vld [vmem:[#allocation3 + $0x150] ss:$8 sps:$4 sm:$0xff]  }
  0x71   :  { %3115 = vmatpush1.bf16.msra.mxu0 %v15296_v41  ;;  %v15369_v41 = vld [vmem:[#allocation3 + $0x950] ss:$8 sps:$4 sm:$0xff]  }
  0x72   :  { %4839 = vmatpush1.bf16.msra.mxu1 %v15297_v44  ;;  %3116 = vmatprep.subr.bf16.mxu0 %v15298_v45  ;;  %v15377_v44 = vld [vmem:[#allocation3 + $0x964] ss:$8 sps:$4 sm:$0xff]   ;;  %v15372_v45 = vld [vmem:[#allocation3 + $0x160] ss:$8 sps:$4 sm:$0xff]  }
  0x73   :  { %4840 = vmatprep.subr.bf16.mxu1 %v15300_v46  ;;  %v15375_v46 = vld [vmem:[#allocation3 + $0x960] ss:$8 sps:$4 sm:$0xff]  }
  0x75   :  { %3117 = vmatpush1.bf16.msra.mxu0 %v15302_v47  ;;  %v15380_v47 = vld [vmem:[#allocation3 + $0x174] ss:$8 sps:$4 sm:$0xff]  }
  0x76   :  { %4841 = vmatpush1.bf16.msra.mxu1 %v15303_v48  ;;  %3118 = vmatprep.subr.bf16.mxu0 %v15304_v50  ;;  %v15383_v48 = vld [vmem:[#allocation3 + $0x974] ss:$8 sps:$4 sm:$0xff]   ;;  %v15378_v50 = vld [vmem:[#allocation3 + $0x170] ss:$8 sps:$4 sm:$0xff]  }
  0x77   :  { %4842 = vmatprep.subr.bf16.mxu1 %v15306_v51  ;;  %v15381_v51 = vld [vmem:[#allocation3 + $0x970] ss:$8 sps:$4 sm:$0xff]  }
  0x79   :  { %3119 = vmatpush1.bf16.msra.mxu0 %v15308_v53  ;;  %v15386_v53 = vld [vmem:[#allocation3 + $0x184] ss:$8 sps:$4 sm:$0xff]  }
  0x7a   :  { %4843 = vmatpush1.bf16.msra.mxu1 %v15309_v55  ;;  %3120 = vmatprep.subr.bf16.mxu0 %v15310_v57  ;;  %v15384_v55 = vld [vmem:[#allocation3 + $0x180] ss:$8 sps:$4 sm:$0xff]  }
  0x7b   :  { %4844 = vmatprep.subr.bf16.mxu1 %v15312_v58  ;;  %v15387_v57 = vld [vmem:[#allocation3 + $0x980] ss:$8 sps:$4 sm:$0xff]   ;;  %v15392_v58 = vld [vmem:[#allocation3 + $0x194] ss:$8 sps:$4 sm:$0xff]  }
  0x7d   :  { %3121 = vmatpush1.bf16.msra.mxu0 %v15314_v63  ;;  %v15401_v63 = vld [vmem:[#allocation3 + $0x9a4] ss:$8 sps:$4 sm:$0xff]  }
  0x7e   :  { %4845 = vmatpush1.bf16.msra.mxu1 %v15315_v0  ;;  %3122 = vmatprep.subr.bf16.mxu0 %v15316_v1  ;;  %v15396_v0 = vld [vmem:[#allocation3 + $0x1a0] ss:$8 sps:$4 sm:$0xff]  }
  0x7f   :  { %4846 = vmatprep.subr.bf16.mxu1 %v15318_v2  ;;  %v15399_v1 = vld [vmem:[#allocation3 + $0x9a0] ss:$8 sps:$4 sm:$0xff]   ;;  %v15404_v2 = vld [vmem:[#allocation3 + $0x1b4] ss:$8 sps:$4 sm:$0xff]  }
  0x81   :  { %3123 = vmatpush1.bf16.msra.mxu0 %v15320_v4  ;;  %v15402_v4 = vld [vmem:[#allocation3 + $0x1b0] ss:$8 sps:$4 sm:$0xff]  }
  0x82   :  { %4847 = vmatpush1.bf16.msra.mxu1 %v15321_v5  ;;  %3124 = vmatprep.subr.bf16.mxu0 %v15322_v6  ;;  %v15405_v5 = vld [vmem:[#allocation3 + $0x9b0] ss:$8 sps:$4 sm:$0xff]   ;;  %v15410_v6 = vld [vmem:[#allocation3 + $0x1c4] ss:$8 sps:$4 sm:$0xff]  }
  0x83   :  { %4848 = vmatprep.subr.bf16.mxu1 %v15324_v7  ;;  %v15413_v7 = vld [vmem:[#allocation3 + $0x9c4] ss:$8 sps:$4 sm:$0xff]  }
  0x85   :  { %3125 = vmatpush1.bf16.msra.mxu0 %v15326_v8  ;;  %v15408_v8 = vld [vmem:[#allocation3 + $0x1c0] ss:$8 sps:$4 sm:$0xff]  }
  0x86   :  { %4849 = vmatpush1.bf16.msra.mxu1 %v15327_v9  ;;  %3126 = vmatprep.subr.bf16.mxu0 %v15328_v10  ;;  %v15411_v9 = vld [vmem:[#allocation3 + $0x9c0] ss:$8 sps:$4 sm:$0xff]   ;;  %v15416_v10 = vld [vmem:[#allocation3 + $0x1d4] ss:$8 sps:$4 sm:$0xff]  }
  0x87   :  { %4850 = vmatprep.subr.bf16.mxu1 %v15330_v11  ;;  %v15419_v11 = vld [vmem:[#allocation3 + $0x9d4] ss:$8 sps:$4 sm:$0xff]  }
  0x89   :  { %3127 = vmatpush1.bf16.msra.mxu0 %v15332_v12  ;;  %v15414_v12 = vld [vmem:[#allocation3 + $0x1d0] ss:$8 sps:$4 sm:$0xff]  }
  0x8a   :  { %4851 = vmatpush1.bf16.msra.mxu1 %v15333_v13  ;;  %3137 = vmatprep.subr.bf16.mxu0 %v15337_v14  ;;  %v15417_v13 = vld [vmem:[#allocation3 + $0x9d0] ss:$8 sps:$4 sm:$0xff]   ;;  %v15422_v14 = vld [vmem:[#allocation3 + $0x1e4] ss:$8 sps:$4 sm:$0xff]  }
  0x8b   :  { %4861 = vmatprep.subr.bf16.mxu1 %v15341_v15  ;;  %v15425_v15 = vld [vmem:[#allocation3 + $0x9e4] ss:$8 sps:$4 sm:$0xff]  }
  0x8c   :  { %3129 = vmatmul.mubr.bf16.vlgmr.msra.gmra.mrb[0].mxu0 %v17869_v16 }
  0x8d   :  { %4853 = vmatmul.mubr.bf16.vlgmr.msra.gmra.mrb[0].mxu1 %v17872_v17  ;;  %3138 = vmatpush1.bf16.msra.mxu0 %v15335_v18  ;;  %v1702_v18 = vcombine.high %v17855_v52, %v17855_v52  ;;  %v15426_v52 = vld [vmem:[#allocation3 + $0x1f0] ss:$8 sps:$4 sm:$0xff]  }
  0x8e   :  { %4862 = vmatpush1.bf16.msra.mxu1 %v15339_v19  ;;  %3139 = vmatprep.subr.bf16.mxu0 %v15344_v20  ;;  %v3426_v19 = vcombine.high %v17862_v56, %v17862_v56  ;;  %v15420_v20 = vld [vmem:[#allocation3 + $0x1e0] ss:$8 sps:$4 sm:$0xff]   ;;  %v15434_v56 = vld [vmem:[#allocation3 + $0x204] ss:$8 sps:$4 sm:$0xff]  }
  0x8f   :  { %4863 = vmatprep.subr.bf16.mxu1 %v15347_v21  ;;  %3169 = vmatprep.mubr.bf16.mxu0 %v1749_v22  ;;  %v15423_v21 = vld [vmem:[#allocation3 + $0x9e0] ss:$8 sps:$4 sm:$0xff]   ;;  %v15428_v22 = vld [vmem:[#allocation3 + $0x1f4] ss:$8 sps:$4 sm:$0xff]  }
  0x90   :  { %4893 = vmatprep.mubr.bf16.mxu1 %v3473_v23  ;;  %v15431_v23 = vld [vmem:[#allocation3 + $0x9f4] ss:$8 sps:$4 sm:$0xff]  }
  0x91   :  { %3140 = vmatpush1.bf16.msra.mxu0 %v15342_v24  ;;  %v17881_v24 = vrot.slane %v1702_v18, %v17850_v49  ;;  %v15498_v18 = vld [vmem:[#allocation3 + $0x2b0] ss:$8 sps:$4 sm:$0xff]  }
  0x92   :  { %4864 = vmatpush1.bf16.msra.mxu1 %v15345_v25  ;;  %3141 = vmatprep.subr.bf16.mxu0 %v15350_v26  ;;  %v17884_v25 = vrot.slane %v3426_v19, %v17850_v49  ;;  %v15429_v26 = vld [vmem:[#allocation3 + $0x9f0] ss:$8 sps:$4 sm:$0xff]  }
  0x93   :  { %4865 = vmatprep.subr.bf16.mxu1 %v15353_v27  ;;  %v15437_v27 = vld [vmem:[#allocation3 + $0xa04] ss:$8 sps:$4 sm:$0xff]   ;;  %v15501_v19 = vld [vmem:[#allocation3 + $0xab0] ss:$8 sps:$4 sm:$0xff]  }
  0x95   :  { %3142 = vmatpush1.bf16.msra.mxu0 %v15348_v28  ;;  %v1718_v28 = vcombine.high %v17881_v24, %v17881_v24 }
  0x96   :  { %4866 = vmatpush1.bf16.msra.mxu1 %v15351_v29  ;;  %3143 = vmatprep.subr.bf16.mxu0 %v15356_v30  ;;  %v3442_v29 = vcombine.high %v17884_v25, %v17884_v25  ;;  %v1747_v30 = vcombine.high %v17869_v16, %v17869_v16  ;;  %v15438_v16 = vld [vmem:[#allocation3 + $0x210] ss:$8 sps:$4 sm:$0xff]  }
  0x97   :  { %4867 = vmatprep.subr.bf16.mxu1 %v15359_v31  ;;  %v3471_v31 = vcombine.high %v17872_v17, %v17872_v17  ;;  %v15441_v17 = vld [vmem:[#allocation3 + $0xa10] ss:$8 sps:$4 sm:$0xff]  }
  0x99   :  { %3144 = vmatpush1.bf16.msra.mxu0 %v15354_v32  ;;  %v15432_v32 = vld [vmem:[#allocation3 + $0x200] ss:$8 sps:$4 sm:$0xff]  }
  0x9a   :  { %4868 = vmatpush1.bf16.msra.mxu1 %v15357_v33  ;;  %3145 = vmatprep.subr.bf16.mxu0 %v15362_v34  ;;  %v15435_v33 = vld [vmem:[#allocation3 + $0xa00] ss:$8 sps:$4 sm:$0xff]   ;;  %v15440_v34 = vld [vmem:[#allocation3 + $0x214] ss:$8 sps:$4 sm:$0xff]  }
  0x9b   :  { %4869 = vmatprep.subr.bf16.mxu1 %v15365_v35  ;;  %v15443_v35 = vld [vmem:[#allocation3 + $0xa14] ss:$8 sps:$4 sm:$0xff]  }
  0x9d   :  { %3146 = vmatpush1.bf16.msra.mxu0 %v15360_v36  ;;  %v17895_v36 = vrot.slane %v1718_v28, %v17850_v49  ;;  %v15518_v28 = vld [vmem:[#allocation3 + $0x2e4] ss:$8 sps:$4 sm:$0xff]  }
  0x9e   :  { %4870 = vmatpush1.bf16.msra.mxu1 %v15363_v37  ;;  %3147 = vmatprep.subr.bf16.mxu0 %v15368_v38  ;;  %v17898_v37 = vrot.slane %v3442_v29, %v17850_v49  ;;  %v15446_v38 = vld [vmem:[#allocation3 + $0x224] ss:$8 sps:$4 sm:$0xff]  }
  0x9f   :  { %4871 = vmatprep.subr.bf16.mxu1 %v15371_v39  ;;  %v15449_v39 = vld [vmem:[#allocation3 + $0xa24] ss:$8 sps:$4 sm:$0xff]  }
  0xa0   :  { %v15521_v29 = vld [vmem:[#allocation3 + $0xae4] ss:$8 sps:$4 sm:$0xff]  }
  0xa1   :  { %3148 = vmatpush1.bf16.msra.mxu0 %v15366_v40  ;;  %v15444_v40 = vld [vmem:[#allocation3 + $0x220] ss:$8 sps:$4 sm:$0xff]  }
  0xa2   :  { %4872 = vmatpush1.bf16.msra.mxu1 %v15369_v41  ;;  %3149 = vmatprep.subr.bf16.mxu0 %v15374_v43  ;;  %v15447_v41 = vld [vmem:[#allocation3 + $0xa20] ss:$8 sps:$4 sm:$0xff]   ;;  %v15452_v43 = vld [vmem:[#allocation3 + $0x234] ss:$8 sps:$4 sm:$0xff]  }
  0xa3   :  { %4873 = vmatprep.subr.bf16.mxu1 %v15377_v44  ;;  %v15455_v44 = vld [vmem:[#allocation3 + $0xa34] ss:$8 sps:$4 sm:$0xff]  }
  0xa5   :  { %3150 = vmatpush1.bf16.msra.mxu0 %v15372_v45  ;;  %v15450_v45 = vld [vmem:[#allocation3 + $0x230] ss:$8 sps:$4 sm:$0xff]  }
  0xa6   :  { %4874 = vmatpush1.bf16.msra.mxu1 %v15375_v46  ;;  %3151 = vmatprep.subr.bf16.mxu0 %v15380_v47  ;;  %v15453_v46 = vld [vmem:[#allocation3 + $0xa30] ss:$8 sps:$4 sm:$0xff]   ;;  %v15458_v47 = vld [vmem:[#allocation3 + $0x244] ss:$8 sps:$4 sm:$0xff]  }
  0xa7   :  { %4875 = vmatprep.subr.bf16.mxu1 %v15383_v48  ;;  %v15461_v48 = vld [vmem:[#allocation3 + $0xa44] ss:$8 sps:$4 sm:$0xff]  }
  0xa9   :  { %3152 = vmatpush1.bf16.msra.mxu0 %v15378_v50  ;;  %v15456_v50 = vld [vmem:[#allocation3 + $0x240] ss:$8 sps:$4 sm:$0xff]  }
  0xaa   :  { %4876 = vmatpush1.bf16.msra.mxu1 %v15381_v51  ;;  %3153 = vmatprep.subr.bf16.mxu0 %v15386_v53  ;;  %v15459_v51 = vld [vmem:[#allocation3 + $0xa40] ss:$8 sps:$4 sm:$0xff]   ;;  %v15464_v53 = vld [vmem:[#allocation3 + $0x254] ss:$8 sps:$4 sm:$0xff]  }
  0xab   :  { %4877 = vmatprep.subr.bf16.mxu1 %v15389_v54  ;;  %v15467_v54 = vld [vmem:[#allocation3 + $0xa54] ss:$8 sps:$4 sm:$0xff]  }
  0xad   :  { %3154 = vmatpush1.bf16.msra.mxu0 %v15384_v55  ;;  %v15462_v55 = vld [vmem:[#allocation3 + $0x250] ss:$8 sps:$4 sm:$0xff]  }
  0xae   :  { %4878 = vmatpush1.bf16.msra.mxu1 %v15387_v57  ;;  %3155 = vmatprep.subr.bf16.mxu0 %v15392_v58  ;;  %v15465_v57 = vld [vmem:[#allocation3 + $0xa50] ss:$8 sps:$4 sm:$0xff]   ;;  %v15470_v58 = vld [vmem:[#allocation3 + $0x264] ss:$8 sps:$4 sm:$0xff]  }
  0xaf   :  { %4879 = vmatprep.subr.bf16.mxu1 %v15395_v59  ;;  %v15473_v59 = vld [vmem:[#allocation3 + $0xa64] ss:$8 sps:$4 sm:$0xff]  }
  0xb1   :  { %3156 = vmatpush1.bf16.msra.mxu0 %v15390_v60  ;;  %v15468_v60 = vld [vmem:[#allocation3 + $0x260] ss:$8 sps:$4 sm:$0xff]  }
  0xb2   :  { %4880 = vmatpush1.bf16.msra.mxu1 %v15393_v61  ;;  %3157 = vmatprep.subr.bf16.mxu0 %v15398_v62  ;;  %v15471_v61 = vld [vmem:[#allocation3 + $0xa60] ss:$8 sps:$4 sm:$0xff]   ;;  %v15476_v62 = vld [vmem:[#allocation3 + $0x274] ss:$8 sps:$4 sm:$0xff]  }
  0xb3   :  { %4881 = vmatprep.subr.bf16.mxu1 %v15401_v63  ;;  %v15479_v63 = vld [vmem:[#allocation3 + $0xa74] ss:$8 sps:$4 sm:$0xff]  }
  0xb5   :  { %3158 = vmatpush1.bf16.msra.mxu0 %v15396_v0  ;;  %v15474_v0 = vld [vmem:[#allocation3 + $0x270] ss:$8 sps:$4 sm:$0xff]  }
  0xb6   :  { %4882 = vmatpush1.bf16.msra.mxu1 %v15399_v1  ;;  %3159 = vmatprep.subr.bf16.mxu0 %v15404_v2  ;;  %v15477_v1 = vld [vmem:[#allocation3 + $0xa70] ss:$8 sps:$4 sm:$0xff]   ;;  %v15482_v2 = vld [vmem:[#allocation3 + $0x284] ss:$8 sps:$4 sm:$0xff]  }
  0xb7   :  { %4883 = vmatprep.subr.bf16.mxu1 %v15407_v3  ;;  %v15485_v3 = vld [vmem:[#allocation3 + $0xa84] ss:$8 sps:$4 sm:$0xff]  }
  0xb9   :  { %3160 = vmatpush1.bf16.msra.mxu0 %v15402_v4  ;;  %v15480_v4 = vld [vmem:[#allocation3 + $0x280] ss:$8 sps:$4 sm:$0xff]  }
  0xba   :  { %4884 = vmatpush1.bf16.msra.mxu1 %v15405_v5  ;;  %3161 = vmatprep.subr.bf16.mxu0 %v15410_v6  ;;  %v15483_v5 = vld [vmem:[#allocation3 + $0xa80] ss:$8 sps:$4 sm:$0xff]   ;;  %v15488_v6 = vld [vmem:[#allocation3 + $0x294] ss:$8 sps:$4 sm:$0xff]  }
  0xbb   :  { %4885 = vmatprep.subr.bf16.mxu1 %v15413_v7  ;;  %v15491_v7 = vld [vmem:[#allocation3 + $0xa94] ss:$8 sps:$4 sm:$0xff]  }
  0xbd   :  { %3162 = vmatpush1.bf16.msra.mxu0 %v15408_v8  ;;  %v15486_v8 = vld [vmem:[#allocation3 + $0x290] ss:$8 sps:$4 sm:$0xff]  }
  0xbe   :  { %4886 = vmatpush1.bf16.msra.mxu1 %v15411_v9  ;;  %3163 = vmatprep.subr.bf16.mxu0 %v15416_v10  ;;  %v15489_v9 = vld [vmem:[#allocation3 + $0xa90] ss:$8 sps:$4 sm:$0xff]   ;;  %v15494_v10 = vld [vmem:[#allocation3 + $0x2a4] ss:$8 sps:$4 sm:$0xff]  }
  0xbf   :  { %4887 = vmatprep.subr.bf16.mxu1 %v15419_v11  ;;  %v15497_v11 = vld [vmem:[#allocation3 + $0xaa4] ss:$8 sps:$4 sm:$0xff]  }
  0xc1   :  { %3164 = vmatpush1.bf16.msra.mxu0 %v15414_v12  ;;  %v15492_v12 = vld [vmem:[#allocation3 + $0x2a0] ss:$8 sps:$4 sm:$0xff]  }
  0xc2   :  { %4888 = vmatpush1.bf16.msra.mxu1 %v15417_v13  ;;  %3165 = vmatprep.subr.bf16.mxu0 %v15422_v14  ;;  %v15495_v13 = vld [vmem:[#allocation3 + $0xaa0] ss:$8 sps:$4 sm:$0xff]   ;;  %v15500_v14 = vld [vmem:[#allocation3 + $0x2b4] ss:$8 sps:$4 sm:$0xff]  }
  0xc3   :  { %4889 = vmatprep.subr.bf16.mxu1 %v15425_v15  ;;  %v15503_v15 = vld [vmem:[#allocation3 + $0xab4] ss:$8 sps:$4 sm:$0xff]  }
  0xc5   :  { %3166 = vmatpush1.bf16.msra.mxu0 %v15420_v20  ;;  %v15506_v20 = vld [vmem:[#allocation3 + $0x2c4] ss:$8 sps:$4 sm:$0xff]  }
  0xc6   :  { %4890 = vmatpush1.bf16.msra.mxu1 %v15423_v21  ;;  %3167 = vmatprep.subr.bf16.mxu0 %v15428_v22  ;;  %v15509_v21 = vld [vmem:[#allocation3 + $0xac4] ss:$8 sps:$4 sm:$0xff]   ;;  %v15504_v22 = vld [vmem:[#allocation3 + $0x2c0] ss:$8 sps:$4 sm:$0xff]  }
  0xc7   :  { %4891 = vmatprep.subr.bf16.mxu1 %v15431_v23  ;;  %v15507_v23 = vld [vmem:[#allocation3 + $0xac0] ss:$8 sps:$4 sm:$0xff]  }
  0xc9   :  { %3168 = vmatpush1.bf16.msra.mxu0 %v15426_v52  ;;  %v15512_v52 = vld [vmem:[#allocation3 + $0x2d4] ss:$8 sps:$4 sm:$0xff]  }
  0xca   :  { %4892 = vmatpush1.bf16.msra.mxu1 %v15429_v26  ;;  %3178 = vmatprep.subr.bf16.mxu0 %v15434_v56  ;;  %v15515_v26 = vld [vmem:[#allocation3 + $0xad4] ss:$8 sps:$4 sm:$0xff]   ;;  %v15510_v56 = vld [vmem:[#allocation3 + $0x2d0] ss:$8 sps:$4 sm:$0xff]  }
  0xcb   :  { %4902 = vmatprep.subr.bf16.mxu1 %v15437_v27  ;;  %v15513_v27 = vld [vmem:[#allocation3 + $0xad0] ss:$8 sps:$4 sm:$0xff]  }
  0xcc   :  { %3170 = vmatmul.mubr.bf16.vlgmr.msra.gmra.mrb[0].mxu0 %v1747_v30  ;;  %v15516_v30 = vld [vmem:[#allocation3 + $0x2e0] ss:$8 sps:$4 sm:$0xff]  }
  0xcd   :  { %4894 = vmatmul.mubr.bf16.vlgmr.msra.gmra.mrb[0].mxu1 %v3471_v31  ;;  %3179 = vmatpush1.bf16.msra.mxu0 %v15432_v32  ;;  %v15519_v31 = vld [vmem:[#allocation3 + $0xae0] ss:$8 sps:$4 sm:$0xff]   ;;  %v15524_v32 = vld [vmem:[#allocation3 + $0x2f4] ss:$8 sps:$4 sm:$0xff]  }
  0xce   :  { %4903 = vmatpush1.bf16.msra.mxu1 %v15435_v33  ;;  %3180 = vmatprep.subr.bf16.mxu0 %v15440_v34  ;;  %v15527_v33 = vld [vmem:[#allocation3 + $0xaf4] ss:$8 sps:$4 sm:$0xff]   ;;  %v15522_v34 = vld [vmem:[#allocation3 + $0x2f0] ss:$8 sps:$4 sm:$0xff]  }
  0xcf   :  { %4904 = vmatprep.subr.bf16.mxu1 %v15443_v35  ;;  %3210 = vmatprep.mubr.bf16.mxu0 %v17895_v36  ;;  %v15525_v35 = vld [vmem:[#allocation3 + $0xaf0] ss:$8 sps:$4 sm:$0xff]  }
  0xd0   :  { %4934 = vmatprep.mubr.bf16.mxu1 %v17898_v37 }
  0xd1   :  { %3181 = vmatpush1.bf16.msra.mxu0 %v15438_v16  ;;  %v15530_v16 = vld [vmem:[#allocation3 + $0x304] ss:$8 sps:$4 sm:$0xff]  }
  0xd2   :  { %4905 = vmatpush1.bf16.msra.mxu1 %v15441_v17  ;;  %3182 = vmatprep.subr.bf16.mxu0 %v15446_v38  ;;  %v15533_v17 = vld [vmem:[#allocation3 + $0xb04] ss:$8 sps:$4 sm:$0xff]   ;;  %v17904_v38 = vrot.slane %v17881_v24, %v17850_v49  ;;  %v15534_v24 = vld [vmem:[#allocation3 + $0x310] ss:$8 sps:$4 sm:$0xff]  }
  0xd3   :  { %4906 = vmatprep.subr.bf16.mxu1 %v15449_v39  ;;  %v17908_v39 = vrot.slane %v17884_v25, %v17850_v49  ;;  %v15537_v25 = vld [vmem:[#allocation3 + $0xb10] ss:$8 sps:$4 sm:$0xff]  }
  0xd5   :  { %3183 = vmatpush1.bf16.msra.mxu0 %v15444_v40  ;;  %v15528_v40 = vld [vmem:[#allocation3 + $0x300] ss:$8 sps:$4 sm:$0xff]  }
  0xd6   :  { %4907 = vmatpush1.bf16.msra.mxu1 %v15447_v41  ;;  %3184 = vmatprep.subr.bf16.mxu0 %v15452_v43  ;;  %v15531_v41 = vld [vmem:[#allocation3 + $0xb00] ss:$8 sps:$4 sm:$0xff]   ;;  %v15536_v43 = vld [vmem:[#allocation3 + $0x314] ss:$8 sps:$4 sm:$0xff]  }
  0xd7   :  { %4908 = vmatprep.subr.bf16.mxu1 %v15455_v44  ;;  %v15539_v44 = vld [vmem:[#allocation3 + $0xb14] ss:$8 sps:$4 sm:$0xff]  }
  0xd9   :  { %3185 = vmatpush1.bf16.msra.mxu0 %v15450_v45  ;;  %v1750_v45 = vcombine.high %v17895_v36, %v17895_v36  ;;  %v15540_v36 = vld [vmem:[#allocation3 + $0x320] ss:$8 sps:$4 sm:$0xff]  }
  0xda   :  { %4909 = vmatpush1.bf16.msra.mxu1 %v15453_v46  ;;  %3186 = vmatprep.subr.bf16.mxu0 %v15458_v47  ;;  %v3474_v46 = vcombine.high %v17898_v37, %v17898_v37  ;;  %v15542_v47 = vld [vmem:[#allocation3 + $0x324] ss:$8 sps:$4 sm:$0xff]   ;;  %v15548_v37 = vld [vmem:[#allocation3 + $0x334] ss:$8 sps:$4 sm:$0xff]  }
  0xdb   :  { %4910 = vmatprep.subr.bf16.mxu1 %v15461_v48  ;;  %v15545_v48 = vld [vmem:[#allocation3 + $0xb24] ss:$8 sps:$4 sm:$0xff]  }
  0xdd   :  { %3187 = vmatpush1.bf16.msra.mxu0 %v15456_v50  ;;  %v15543_v50 = vld [vmem:[#allocation3 + $0xb20] ss:$8 sps:$4 sm:$0xff]  }
  0xde   :  { %4911 = vmatpush1.bf16.msra.mxu1 %v15459_v51  ;;  %3188 = vmatprep.subr.bf16.mxu0 %v15464_v53  ;;  %v15551_v51 = vld [vmem:[#allocation3 + $0xb34] ss:$8 sps:$4 sm:$0xff]   ;;  %v15546_v53 = vld [vmem:[#allocation3 + $0x330] ss:$8 sps:$4 sm:$0xff]  }
  0xdf   :  { %4912 = vmatprep.subr.bf16.mxu1 %v15467_v54  ;;  %v15549_v54 = vld [vmem:[#allocation3 + $0xb30] ss:$8 sps:$4 sm:$0xff]  }
  0xe1   :  { %3189 = vmatpush1.bf16.msra.mxu0 %v15462_v55  ;;  %v15554_v55 = vld [vmem:[#allocation3 + $0x344] ss:$8 sps:$4 sm:$0xff]  }
  0xe2   :  { %4913 = vmatpush1.bf16.msra.mxu1 %v15465_v57  ;;  %3190 = vmatprep.subr.bf16.mxu0 %v15470_v58  ;;  %v15557_v57 = vld [vmem:[#allocation3 + $0xb44] ss:$8 sps:$4 sm:$0xff]   ;;  %v15552_v58 = vld [vmem:[#allocation3 + $0x340] ss:$8 sps:$4 sm:$0xff]  }
  0xe3   :  { %4914 = vmatprep.subr.bf16.mxu1 %v15473_v59  ;;  %v15555_v59 = vld [vmem:[#allocation3 + $0xb40] ss:$8 sps:$4 sm:$0xff]  }
  0xe5   :  { %3191 = vmatpush1.bf16.msra.mxu0 %v15468_v60  ;;  %v15560_v60 = vld [vmem:[#allocation3 + $0x354] ss:$8 sps:$4 sm:$0xff]  }
  0xe6   :  { %4915 = vmatpush1.bf16.msra.mxu1 %v15471_v61  ;;  %3192 = vmatprep.subr.bf16.mxu0 %v15476_v62  ;;  %v15563_v61 = vld [vmem:[#allocation3 + $0xb54] ss:$8 sps:$4 sm:$0xff]   ;;  %v15558_v62 = vld [vmem:[#allocation3 + $0x350] ss:$8 sps:$4 sm:$0xff]  }
  0xe7   :  { %4916 = vmatprep.subr.bf16.mxu1 %v15479_v63  ;;  %v15561_v63 = vld [vmem:[#allocation3 + $0xb50] ss:$8 sps:$4 sm:$0xff]  }
  0xe9   :  { %3193 = vmatpush1.bf16.msra.mxu0 %v15474_v0  ;;  %v15566_v0 = vld [vmem:[#allocation3 + $0x364] ss:$8 sps:$4 sm:$0xff]  }
  0xea   :  { %4917 = vmatpush1.bf16.msra.mxu1 %v15477_v1  ;;  %3194 = vmatprep.subr.bf16.mxu0 %v15482_v2  ;;  %v15569_v1 = vld [vmem:[#allocation3 + $0xb64] ss:$8 sps:$4 sm:$0xff]   ;;  %v15564_v2 = vld [vmem:[#allocation3 + $0x360] ss:$8 sps:$4 sm:$0xff]  }
  0xeb   :  { %4918 = vmatprep.subr.bf16.mxu1 %v15485_v3  ;;  %v15567_v3 = vld [vmem:[#allocation3 + $0xb60] ss:$8 sps:$4 sm:$0xff]  }
  0xed   :  { %3195 = vmatpush1.bf16.msra.mxu0 %v15480_v4  ;;  %v15572_v4 = vld [vmem:[#allocation3 + $0x374] ss:$8 sps:$4 sm:$0xff]  }
  0xee   :  { %4919 = vmatpush1.bf16.msra.mxu1 %v15483_v5  ;;  %3196 = vmatprep.subr.bf16.mxu0 %v15488_v6  ;;  %v15575_v5 = vld [vmem:[#allocation3 + $0xb74] ss:$8 sps:$4 sm:$0xff]   ;;  %v15570_v6 = vld [vmem:[#allocation3 + $0x370] ss:$8 sps:$4 sm:$0xff]  }
  0xef   :  { %4920 = vmatprep.subr.bf16.mxu1 %v15491_v7  ;;  %v15573_v7 = vld [vmem:[#allocation3 + $0xb70] ss:$8 sps:$4 sm:$0xff]  }
  0xf1   :  { %3197 = vmatpush1.bf16.msra.mxu0 %v15486_v8  ;;  %v15578_v8 = vld [vmem:[#allocation3 + $0x384] ss:$8 sps:$4 sm:$0xff]  }
  0xf2   :  { %4921 = vmatpush1.bf16.msra.mxu1 %v15489_v9  ;;  %3198 = vmatprep.subr.bf16.mxu0 %v15494_v10  ;;  %v15581_v9 = vld [vmem:[#allocation3 + $0xb84] ss:$8 sps:$4 sm:$0xff]   ;;  %v15576_v10 = vld [vmem:[#allocation3 + $0x380] ss:$8 sps:$4 sm:$0xff]  }
  0xf3   :  { %4922 = vmatprep.subr.bf16.mxu1 %v15497_v11  ;;  %v15579_v11 = vld [vmem:[#allocation3 + $0xb80] ss:$8 sps:$4 sm:$0xff]  }
  0xf5   :  { %3199 = vmatpush1.bf16.msra.mxu0 %v15492_v12  ;;  %v15584_v12 = vld [vmem:[#allocation3 + $0x394] ss:$8 sps:$4 sm:$0xff]  }
  0xf6   :  { %4923 = vmatpush1.bf16.msra.mxu1 %v15495_v13  ;;  %3200 = vmatprep.subr.bf16.mxu0 %v15500_v14  ;;  %v15587_v13 = vld [vmem:[#allocation3 + $0xb94] ss:$8 sps:$4 sm:$0xff]   ;;  %v15582_v14 = vld [vmem:[#allocation3 + $0x390] ss:$8 sps:$4 sm:$0xff]  }
  0xf7   :  { %4924 = vmatprep.subr.bf16.mxu1 %v15503_v15  ;;  %v15585_v15 = vld [vmem:[#allocation3 + $0xb90] ss:$8 sps:$4 sm:$0xff]  }
  0xf9   :  { %3201 = vmatpush1.bf16.msra.mxu0 %v15498_v18  ;;  %v15590_v18 = vld [vmem:[#allocation3 + $0x3a4] ss:$8 sps:$4 sm:$0xff]  }
  0xfa   :  { %4925 = vmatpush1.bf16.msra.mxu1 %v15501_v19  ;;  %3202 = vmatprep.subr.bf16.mxu0 %v15506_v20  ;;  %v15593_v19 = vld [vmem:[#allocation3 + $0xba4] ss:$8 sps:$4 sm:$0xff]   ;;  %v15588_v20 = vld [vmem:[#allocation3 + $0x3a0] ss:$8 sps:$4 sm:$0xff]  }
  0xfb   :  { %4926 = vmatprep.subr.bf16.mxu1 %v15509_v21  ;;  %v15591_v21 = vld [vmem:[#allocation3 + $0xba0] ss:$8 sps:$4 sm:$0xff]  }
  0xfd   :  { %3203 = vmatpush1.bf16.msra.mxu0 %v15504_v22  ;;  %v15596_v22 = vld [vmem:[#allocation3 + $0x3b4] ss:$8 sps:$4 sm:$0xff]  }
  0xfe   :  { %4927 = vmatpush1.bf16.msra.mxu1 %v15507_v23  ;;  %3204 = vmatprep.subr.bf16.mxu0 %v15512_v52  ;;  %v15599_v23 = vld [vmem:[#allocation3 + $0xbb4] ss:$8 sps:$4 sm:$0xff]   ;;  %v15594_v52 = vld [vmem:[#allocation3 + $0x3b0] ss:$8 sps:$4 sm:$0xff]  }
  0xff   :  { %4928 = vmatprep.subr.bf16.mxu1 %v15515_v26  ;;  %v15597_v26 = vld [vmem:[#allocation3 + $0xbb0] ss:$8 sps:$4 sm:$0xff]  }
 0x101   :  { %3205 = vmatpush1.bf16.msra.mxu0 %v15510_v56  ;;  %v15602_v56 = vld [vmem:[#allocation3 + $0x3c4] ss:$8 sps:$4 sm:$0xff]  }
 0x102   :  { %4929 = vmatpush1.bf16.msra.mxu1 %v15513_v27  ;;  %3206 = vmatprep.subr.bf16.mxu0 %v15518_v28  ;;  %v15605_v27 = vld [vmem:[#allocation3 + $0xbc4] ss:$8 sps:$4 sm:$0xff]   ;;  %v15600_v28 = vld [vmem:[#allocation3 + $0x3c0] ss:$8 sps:$4 sm:$0xff]  }
 0x103   :  { %4930 = vmatprep.subr.bf16.mxu1 %v15521_v29  ;;  %v15603_v29 = vld [vmem:[#allocation3 + $0xbc0] ss:$8 sps:$4 sm:$0xff]  }
 0x105   :  { %3207 = vmatpush1.bf16.msra.mxu0 %v15516_v30  ;;  %v15608_v30 = vld [vmem:[#allocation3 + $0x3d4] ss:$8 sps:$4 sm:$0xff]  }
 0x106   :  { %4931 = vmatpush1.bf16.msra.mxu1 %v15519_v31  ;;  %3208 = vmatprep.subr.bf16.mxu0 %v15524_v32  ;;  %v15611_v31 = vld [vmem:[#allocation3 + $0xbd4] ss:$8 sps:$4 sm:$0xff]   ;;  %v15606_v32 = vld [vmem:[#allocation3 + $0x3d0] ss:$8 sps:$4 sm:$0xff]  }
 0x107   :  { %4932 = vmatprep.subr.bf16.mxu1 %v15527_v33  ;;  %v15609_v33 = vld [vmem:[#allocation3 + $0xbd0] ss:$8 sps:$4 sm:$0xff]  }
 0x109   :  { %3209 = vmatpush1.bf16.msra.mxu0 %v15522_v34  ;;  %v15614_v34 = vld [vmem:[#allocation3 + $0x3e4] ss:$8 sps:$4 sm:$0xff]  }
 0x10a   :  { %4933 = vmatpush1.bf16.msra.mxu1 %v15525_v35  ;;  %3219 = vmatprep.subr.bf16.mxu0 %v15530_v16  ;;  %v15617_v35 = vld [vmem:[#allocation3 + $0xbe4] ss:$8 sps:$4 sm:$0xff]   ;;  %v15612_v16 = vld [vmem:[#allocation3 + $0x3e0] ss:$8 sps:$4 sm:$0xff]  }
 0x10b   :  { %4943 = vmatprep.subr.bf16.mxu1 %v15533_v17  ;;  %v15615_v17 = vld [vmem:[#allocation3 + $0xbe0] ss:$8 sps:$4 sm:$0xff]  }
 0x10c   :  { %3211 = vmatmul.mubr.bf16.vlgmr.msra.gmra.mrb[0].mxu0 %v17904_v38 }
 0x10d   :  { %4935 = vmatmul.mubr.bf16.vlgmr.msra.gmra.mrb[0].mxu1 %v17908_v39  ;;  %3220 = vmatpush1.bf16.msra.mxu0 %v15528_v40  ;;  %v17919_v40 = vld.sshfl [vmem:[%s18402_s0 + $0x8] sm:$0xff pattern:$0x75316420] }
 0x10e   :  { %4944 = vmatpush1.bf16.msra.mxu1 %v15531_v41  ;;  %3221 = vmatprep.subr.bf16.mxu0 %v15536_v43  ;;  %v17924_v41 = vld.sshfl [vmem:[%s18402_s0 + $0x18] sm:$0xff pattern:$0x75316420]  ;;  %v15620_v43 = vld [vmem:[#allocation3 + $0x3f4] ss:$8 sps:$4 sm:$0xff]  }
 0x10f   :  { %4945 = vmatprep.subr.bf16.mxu1 %v15539_v44  ;;  %3251 = vmatprep.mubr.bf16.mxu0 %v1750_v45  ;;  %v15623_v44 = vld [vmem:[#allocation3 + $0xbf4] ss:$8 sps:$4 sm:$0xff]   ;;  %v15618_v45 = vld [vmem:[#allocation3 + $0x3f0] ss:$8 sps:$4 sm:$0xff]  }
 0x110   :  { %4975 = vmatprep.mubr.bf16.mxu1 %v3474_v46  ;;  %v15621_v46 = vld [vmem:[#allocation3 + $0xbf0] ss:$8 sps:$4 sm:$0xff]  }
 0x111   :  { %3222 = vmatpush1.bf16.msra.mxu0 %v15534_v24  ;;  %v15626_v24 = vld [vmem:[#allocation3 + $0x404] ss:$8 sps:$4 sm:$0xff]  }
 0x112   :  { %4946 = vmatpush1.bf16.msra.mxu1 %v15537_v25  ;;  %3223 = vmatprep.subr.bf16.mxu0 %v15542_v47  ;;  %v15629_v25 = vld [vmem:[#allocation3 + $0xc04] ss:$8 sps:$4 sm:$0xff]   ;;  %v1766_v47 = vcombine.high %v17919_v40, %v17919_v40 }
 0x113   :  { %4947 = vmatprep.subr.bf16.mxu1 %v15545_v48  ;;  %v3490_v48 = vcombine.high %v17924_v41, %v17924_v41 }
 0x115   :  { %3224 = vmatpush1.bf16.msra.mxu0 %v15540_v36  ;;  %v15624_v36 = vld [vmem:[#allocation3 + $0x400] ss:$8 sps:$4 sm:$0xff]  }
 0x116   :  { %4948 = vmatpush1.bf16.msra.mxu1 %v15543_v50  ;;  %3225 = vmatprep.subr.bf16.mxu0 %v15548_v37  ;;  %v15627_v50 = vld [vmem:[#allocation3 + $0xc00] ss:$8 sps:$4 sm:$0xff]   ;;  %v1748_v37 = vcombine.high %v17904_v38, %v17904_v38  ;;  %v15638_v38 = vld [vmem:[#allocation3 + $0x424] ss:$8 sps:$4 sm:$0xff]  }
 0x117   :  { %4949 = vmatprep.subr.bf16.mxu1 %v15551_v51  ;;  %v3472_v51 = vcombine.high %v17908_v39, %v17908_v39  ;;  %v15641_v39 = vld [vmem:[#allocation3 + $0xc24] ss:$8 sps:$4 sm:$0xff]  }
 0x119   :  { %3226 = vmatpush1.bf16.msra.mxu0 %v15546_v53  ;;  %v15632_v53 = vld [vmem:[#allocation3 + $0x414] ss:$8 sps:$4 sm:$0xff]  }
 0x11a   :  { %4950 = vmatpush1.bf16.msra.mxu1 %v15549_v54  ;;  %3227 = vmatprep.subr.bf16.mxu0 %v15554_v55  ;;  %v15635_v54 = vld [vmem:[#allocation3 + $0xc14] ss:$8 sps:$4 sm:$0xff]   ;;  %v17935_v55 = vrot.slane %v1766_v47, %v17850_v49  ;;  %v15710_v47 = vld [vmem:[#allocation3 + $0x4e4] ss:$8 sps:$4 sm:$0xff]  }
 0x11b   :  { %4951 = vmatprep.subr.bf16.mxu1 %v15557_v57  ;;  %v17938_v57 = vrot.slane %v3490_v48, %v17850_v49  ;;  %v15713_v48 = vld [vmem:[#allocation3 + $0xce4] ss:$8 sps:$4 sm:$0xff]  }
 0x11d   :  { %3228 = vmatpush1.bf16.msra.mxu0 %v15552_v58  ;;  %v15630_v58 = vld [vmem:[#allocation3 + $0x410] ss:$8 sps:$4 sm:$0xff]  }
 0x11e   :  { %4952 = vmatpush1.bf16.msra.mxu1 %v15555_v59  ;;  %3229 = vmatprep.subr.bf16.mxu0 %v15560_v60  ;;  %v15633_v59 = vld [vmem:[#allocation3 + $0xc10] ss:$8 sps:$4 sm:$0xff]   ;;  %v15636_v60 = vld [vmem:[#allocation3 + $0x420] ss:$8 sps:$4 sm:$0xff]  }
 0x11f   :  { %4953 = vmatprep.subr.bf16.mxu1 %v15563_v61  ;;  %v15639_v61 = vld [vmem:[#allocation3 + $0xc20] ss:$8 sps:$4 sm:$0xff]  }
 0x121   :  { %3230 = vmatpush1.bf16.msra.mxu0 %v15558_v62  ;;  %v15644_v62 = vld [vmem:[#allocation3 + $0x434] ss:$8 sps:$4 sm:$0xff]  }
 0x122   :  { %4954 = vmatpush1.bf16.msra.mxu1 %v15561_v63  ;;  %3231 = vmatprep.subr.bf16.mxu0 %v15566_v0  ;;  %v15647_v63 = vld [vmem:[#allocation3 + $0xc34] ss:$8 sps:$4 sm:$0xff]   ;;  %v15642_v0 = vld [vmem:[#allocation3 + $0x430] ss:$8 sps:$4 sm:$0xff]  }
 0x123   :  { %4955 = vmatprep.subr.bf16.mxu1 %v15569_v1  ;;  %v15645_v1 = vld [vmem:[#allocation3 + $0xc30] ss:$8 sps:$4 sm:$0xff]  }
 0x125   :  { %3232 = vmatpush1.bf16.msra.mxu0 %v15564_v2  ;;  %v15650_v2 = vld [vmem:[#allocation3 + $0x444] ss:$8 sps:$4 sm:$0xff]  }
 0x126   :  { %4956 = vmatpush1.bf16.msra.mxu1 %v15567_v3  ;;  %3233 = vmatprep.subr.bf16.mxu0 %v15572_v4  ;;  %v15653_v3 = vld [vmem:[#allocation3 + $0xc44] ss:$8 sps:$4 sm:$0xff]   ;;  %v15648_v4 = vld [vmem:[#allocation3 + $0x440] ss:$8 sps:$4 sm:$0xff]  }
 0x127   :  { %4957 = vmatprep.subr.bf16.mxu1 %v15575_v5  ;;  %v15651_v5 = vld [vmem:[#allocation3 + $0xc40] ss:$8 sps:$4 sm:$0xff]  }
 0x129   :  { %3234 = vmatpush1.bf16.msra.mxu0 %v15570_v6  ;;  %v15656_v6 = vld [vmem:[#allocation3 + $0x454] ss:$8 sps:$4 sm:$0xff]  }
 0x12a   :  { %4958 = vmatpush1.bf16.msra.mxu1 %v15573_v7  ;;  %3235 = vmatprep.subr.bf16.mxu0 %v15578_v8  ;;  %v15659_v7 = vld [vmem:[#allocation3 + $0xc54] ss:$8 sps:$4 sm:$0xff]   ;;  %v15654_v8 = vld [vmem:[#allocation3 + $0x450] ss:$8 sps:$4 sm:$0xff]  }
 0x12b   :  { %4959 = vmatprep.subr.bf16.mxu1 %v15581_v9  ;;  %v15657_v9 = vld [vmem:[#allocation3 + $0xc50] ss:$8 sps:$4 sm:$0xff]  }
 0x12d   :  { %3236 = vmatpush1.bf16.msra.mxu0 %v15576_v10  ;;  %v15662_v10 = vld [vmem:[#allocation3 + $0x464] ss:$8 sps:$4 sm:$0xff]  }
 0x12e   :  { %4960 = vmatpush1.bf16.msra.mxu1 %v15579_v11  ;;  %3237 = vmatprep.subr.bf16.mxu0 %v15584_v12  ;;  %v15665_v11 = vld [vmem:[#allocation3 + $0xc64] ss:$8 sps:$4 sm:$0xff]   ;;  %v15660_v12 = vld [vmem:[#allocation3 + $0x460] ss:$8 sps:$4 sm:$0xff]  }
 0x12f   :  { %4961 = vmatprep.subr.bf16.mxu1 %v15587_v13  ;;  %v15663_v13 = vld [vmem:[#allocation3 + $0xc60] ss:$8 sps:$4 sm:$0xff]  }
 0x131   :  { %3238 = vmatpush1.bf16.msra.mxu0 %v15582_v14  ;;  %v15668_v14 = vld [vmem:[#allocation3 + $0x474] ss:$8 sps:$4 sm:$0xff]  }
 0x132   :  { %4962 = vmatpush1.bf16.msra.mxu1 %v15585_v15  ;;  %3239 = vmatprep.subr.bf16.mxu0 %v15590_v18  ;;  %v15671_v15 = vld [vmem:[#allocation3 + $0xc74] ss:$8 sps:$4 sm:$0xff]   ;;  %v15666_v18 = vld [vmem:[#allocation3 + $0x470] ss:$8 sps:$4 sm:$0xff]  }
 0x133   :  { %4963 = vmatprep.subr.bf16.mxu1 %v15593_v19  ;;  %v15669_v19 = vld [vmem:[#allocation3 + $0xc70] ss:$8 sps:$4 sm:$0xff]  }
 0x135   :  { %3240 = vmatpush1.bf16.msra.mxu0 %v15588_v20  ;;  %v15674_v20 = vld [vmem:[#allocation3 + $0x484] ss:$8 sps:$4 sm:$0xff]  }
 0x136   :  { %4964 = vmatpush1.bf16.msra.mxu1 %v15591_v21  ;;  %3241 = vmatprep.subr.bf16.mxu0 %v15596_v22  ;;  %v15677_v21 = vld [vmem:[#allocation3 + $0xc84] ss:$8 sps:$4 sm:$0xff]   ;;  %v15672_v22 = vld [vmem:[#allocation3 + $0x480] ss:$8 sps:$4 sm:$0xff]  }
 0x137   :  { %4965 = vmatprep.subr.bf16.mxu1 %v15599_v23  ;;  %v15675_v23 = vld [vmem:[#allocation3 + $0xc80] ss:$8 sps:$4 sm:$0xff]  }
 0x139   :  { %3242 = vmatpush1.bf16.msra.mxu0 %v15594_v52  ;;  %v15680_v52 = vld [vmem:[#allocation3 + $0x494] ss:$8 sps:$4 sm:$0xff]  }
 0x13a   :  { %4966 = vmatpush1.bf16.msra.mxu1 %v15597_v26  ;;  %3243 = vmatprep.subr.bf16.mxu0 %v15602_v56  ;;  %v15683_v26 = vld [vmem:[#allocation3 + $0xc94] ss:$8 sps:$4 sm:$0xff]   ;;  %v15678_v56 = vld [vmem:[#allocation3 + $0x490] ss:$8 sps:$4 sm:$0xff]  }
 0x13b   :  { %4967 = vmatprep.subr.bf16.mxu1 %v15605_v27  ;;  %v15681_v27 = vld [vmem:[#allocation3 + $0xc90] ss:$8 sps:$4 sm:$0xff]  }
 0x13d   :  { %3244 = vmatpush1.bf16.msra.mxu0 %v15600_v28  ;;  %v15686_v28 = vld [vmem:[#allocation3 + $0x4a4] ss:$8 sps:$4 sm:$0xff]  }
 0x13e   :  { %4968 = vmatpush1.bf16.msra.mxu1 %v15603_v29  ;;  %3245 = vmatprep.subr.bf16.mxu0 %v15608_v30  ;;  %v15689_v29 = vld [vmem:[#allocation3 + $0xca4] ss:$8 sps:$4 sm:$0xff]   ;;  %v15684_v30 = vld [vmem:[#allocation3 + $0x4a0] ss:$8 sps:$4 sm:$0xff]  }
 0x13f   :  { %4969 = vmatprep.subr.bf16.mxu1 %v15611_v31  ;;  %v15687_v31 = vld [vmem:[#allocation3 + $0xca0] ss:$8 sps:$4 sm:$0xff]  }
 0x141   :  { %3246 = vmatpush1.bf16.msra.mxu0 %v15606_v32  ;;  %v15692_v32 = vld [vmem:[#allocation3 + $0x4b4] ss:$8 sps:$4 sm:$0xff]  }
 0x142   :  { %4970 = vmatpush1.bf16.msra.mxu1 %v15609_v33  ;;  %3247 = vmatprep.subr.bf16.mxu0 %v15614_v34  ;;  %v15695_v33 = vld [vmem:[#allocation3 + $0xcb4] ss:$8 sps:$4 sm:$0xff]   ;;  %v15690_v34 = vld [vmem:[#allocation3 + $0x4b0] ss:$8 sps:$4 sm:$0xff]  }
 0x143   :  { %4971 = vmatprep.subr.bf16.mxu1 %v15617_v35  ;;  %v15693_v35 = vld [vmem:[#allocation3 + $0xcb0] ss:$8 sps:$4 sm:$0xff]  }
 0x145   :  { %3248 = vmatpush1.bf16.msra.mxu0 %v15612_v16  ;;  %v15698_v16 = vld [vmem:[#allocation3 + $0x4c4] ss:$8 sps:$4 sm:$0xff]  }
 0x146   :  { %4972 = vmatpush1.bf16.msra.mxu1 %v15615_v17  ;;  %3249 = vmatprep.subr.bf16.mxu0 %v15620_v43  ;;  %v15701_v17 = vld [vmem:[#allocation3 + $0xcc4] ss:$8 sps:$4 sm:$0xff]   ;;  %v15696_v43 = vld [vmem:[#allocation3 + $0x4c0] ss:$8 sps:$4 sm:$0xff]  }
 0x147   :  { %4973 = vmatprep.subr.bf16.mxu1 %v15623_v44  ;;  %v15699_v44 = vld [vmem:[#allocation3 + $0xcc0] ss:$8 sps:$4 sm:$0xff]  }
 0x149   :  { %3250 = vmatpush1.bf16.msra.mxu0 %v15618_v45  ;;  %v15704_v45 = vld [vmem:[#allocation3 + $0x4d4] ss:$8 sps:$4 sm:$0xff]  }
 0x14a   :  { %4974 = vmatpush1.bf16.msra.mxu1 %v15621_v46  ;;  %3260 = vmatprep.subr.bf16.mxu0 %v15626_v24  ;;  %v15707_v46 = vld [vmem:[#allocation3 + $0xcd4] ss:$8 sps:$4 sm:$0xff]   ;;  %v15702_v24 = vld [vmem:[#allocation3 + $0x4d0] ss:$8 sps:$4 sm:$0xff]  }
 0x14b   :  { %4984 = vmatprep.subr.bf16.mxu1 %v15629_v25  ;;  %v15705_v25 = vld [vmem:[#allocation3 + $0xcd0] ss:$8 sps:$4 sm:$0xff]  }
 0x14c   :  { %3252 = vmatmul.mubr.bf16.vlgmr.msra.gmra.mrb[0].mxu0 %v1748_v37  ;;  %v15716_v37 = vld [vmem:[#allocation3 + $0x4f4] ss:$8 sps:$4 sm:$0xff]  }
 0x14d   :  { %4976 = vmatmul.mubr.bf16.vlgmr.msra.gmra.mrb[0].mxu1 %v3472_v51  ;;  %3261 = vmatpush1.bf16.msra.mxu0 %v15624_v36  ;;  %v15708_v36 = vld [vmem:[#allocation3 + $0x4e0] ss:$8 sps:$4 sm:$0xff]   ;;  %v15719_v51 = vld [vmem:[#allocation3 + $0xcf4] ss:$8 sps:$4 sm:$0xff]  }
 0x14e   :  { %4985 = vmatpush1.bf16.msra.mxu1 %v15627_v50  ;;  %3262 = vmatprep.subr.bf16.mxu0 %v15632_v53  ;;  %v15711_v50 = vld [vmem:[#allocation3 + $0xce0] ss:$8 sps:$4 sm:$0xff]   ;;  %v15714_v53 = vld [vmem:[#allocation3 + $0x4f0] ss:$8 sps:$4 sm:$0xff]  }
 0x14f   :  { %4986 = vmatprep.subr.bf16.mxu1 %v15635_v54  ;;  %3292 = vmatprep.mubr.bf16.mxu0 %v17935_v55  ;;  %v15717_v54 = vld [vmem:[#allocation3 + $0xcf0] ss:$8 sps:$4 sm:$0xff]  }
 0x150   :  { %5016 = vmatprep.mubr.bf16.mxu1 %v17938_v57 }
 0x151   :  { %3263 = vmatpush1.bf16.msra.mxu0 %v15630_v58  ;;  %v15722_v58 = vld [vmem:[#allocation3 + $0x504] ss:$8 sps:$4 sm:$0xff]  }
 0x152   :  { %4987 = vmatpush1.bf16.msra.mxu1 %v15633_v59  ;;  %3264 = vmatprep.subr.bf16.mxu0 %v15638_v38  ;;  %v15725_v59 = vld [vmem:[#allocation3 + $0xd04] ss:$8 sps:$4 sm:$0xff]   ;;  %v17944_v38 = vrot.slane %v17919_v40, %v17850_v49  ;;  %v15726_v40 = vld [vmem:[#allocation3 + $0x510] ss:$8 sps:$4 sm:$0xff]  }
 0x153   :  { %4988 = vmatprep.subr.bf16.mxu1 %v15641_v39  ;;  %v17948_v39 = vrot.slane %v17924_v41, %v17850_v49  ;;  %v15729_v41 = vld [vmem:[#allocation3 + $0xd10] ss:$8 sps:$4 sm:$0xff]  }
 0x155   :  { %3265 = vmatpush1.bf16.msra.mxu0 %v15636_v60  ;;  %v15720_v60 = vld [vmem:[#allocation3 + $0x500] ss:$8 sps:$4 sm:$0xff]  }
 0x156   :  { %4989 = vmatpush1.bf16.msra.mxu1 %v15639_v61  ;;  %3266 = vmatprep.subr.bf16.mxu0 %v15644_v62  ;;  %v15723_v61 = vld [vmem:[#allocation3 + $0xd00] ss:$8 sps:$4 sm:$0xff]   ;;  %v15728_v62 = vld [vmem:[#allocation3 + $0x514] ss:$8 sps:$4 sm:$0xff]  }
 0x157   :  { %4990 = vmatprep.subr.bf16.mxu1 %v15647_v63  ;;  %v15731_v63 = vld [vmem:[#allocation3 + $0xd14] ss:$8 sps:$4 sm:$0xff]  }
 0x159   :  { %3267 = vmatpush1.bf16.msra.mxu0 %v15642_v0  ;;  %v1798_v0 = vcombine.high %v17935_v55, %v17935_v55  ;;  %v15732_v55 = vld [vmem:[#allocation3 + $0x520] ss:$8 sps:$4 sm:$0xff]  }
 0x15a   :  { %4991 = vmatpush1.bf16.msra.mxu1 %v15645_v1  ;;  %3268 = vmatprep.subr.bf16.mxu0 %v15650_v2  ;;  %v3522_v1 = vcombine.high %v17938_v57, %v17938_v57  ;;  %v15734_v2 = vld [vmem:[#allocation3 + $0x524] ss:$8 sps:$4 sm:$0xff]   ;;  %v15740_v57 = vld [vmem:[#allocation3 + $0x534] ss:$8 sps:$4 sm:$0xff]  }
 0x15b   :  { %4992 = vmatprep.subr.bf16.mxu1 %v15653_v3  ;;  %v15737_v3 = vld [vmem:[#allocation3 + $0xd24] ss:$8 sps:$4 sm:$0xff]  }
 0x15d   :  { %3269 = vmatpush1.bf16.msra.mxu0 %v15648_v4  ;;  %v15735_v4 = vld [vmem:[#allocation3 + $0xd20] ss:$8 sps:$4 sm:$0xff]  }
 0x15e   :  { %4993 = vmatpush1.bf16.msra.mxu1 %v15651_v5  ;;  %3270 = vmatprep.subr.bf16.mxu0 %v15656_v6  ;;  %v15743_v5 = vld [vmem:[#allocation3 + $0xd34] ss:$8 sps:$4 sm:$0xff]   ;;  %v15738_v6 = vld [vmem:[#allocation3 + $0x530] ss:$8 sps:$4 sm:$0xff]  }
 0x15f   :  { %4994 = vmatprep.subr.bf16.mxu1 %v15659_v7  ;;  %v15741_v7 = vld [vmem:[#allocation3 + $0xd30] ss:$8 sps:$4 sm:$0xff]  }
 0x161   :  { %3271 = vmatpush1.bf16.msra.mxu0 %v15654_v8  ;;  %v15746_v8 = vld [vmem:[#allocation3 + $0x544] ss:$8 sps:$4 sm:$0xff]  }
 0x162   :  { %4995 = vmatpush1.bf16.msra.mxu1 %v15657_v9  ;;  %3272 = vmatprep.subr.bf16.mxu0 %v15662_v10  ;;  %v15749_v9 = vld [vmem:[#allocation3 + $0xd44] ss:$8 sps:$4 sm:$0xff]   ;;  %v15744_v10 = vld [vmem:[#allocation3 + $0x540] ss:$8 sps:$4 sm:$0xff]  }
 0x163   :  { %4996 = vmatprep.subr.bf16.mxu1 %v15665_v11  ;;  %v15747_v11 = vld [vmem:[#allocation3 + $0xd40] ss:$8 sps:$4 sm:$0xff]  }
 0x165   :  { %3273 = vmatpush1.bf16.msra.mxu0 %v15660_v12  ;;  %v15752_v12 = vld [vmem:[#allocation3 + $0x554] ss:$8 sps:$4 sm:$0xff]  }
 0x166   :  { %4997 = vmatpush1.bf16.msra.mxu1 %v15663_v13  ;;  %3274 = vmatprep.subr.bf16.mxu0 %v15668_v14  ;;  %v15755_v13 = vld [vmem:[#allocation3 + $0xd54] ss:$8 sps:$4 sm:$0xff]   ;;  %v15750_v14 = vld [vmem:[#allocation3 + $0x550] ss:$8 sps:$4 sm:$0xff]  }
 0x167   :  { %4998 = vmatprep.subr.bf16.mxu1 %v15671_v15  ;;  %v15753_v15 = vld [vmem:[#allocation3 + $0xd50] ss:$8 sps:$4 sm:$0xff]  }
 0x169   :  { %3275 = vmatpush1.bf16.msra.mxu0 %v15666_v18  ;;  %v15758_v18 = vld [vmem:[#allocation3 + $0x564] ss:$8 sps:$4 sm:$0xff]  }
 0x16a   :  { %4999 = vmatpush1.bf16.msra.mxu1 %v15669_v19  ;;  %3276 = vmatprep.subr.bf16.mxu0 %v15674_v20  ;;  %v15761_v19 = vld [vmem:[#allocation3 + $0xd64] ss:$8 sps:$4 sm:$0xff]   ;;  %v15756_v20 = vld [vmem:[#allocation3 + $0x560] ss:$8 sps:$4 sm:$0xff]  }
 0x16b   :  { %5000 = vmatprep.subr.bf16.mxu1 %v15677_v21  ;;  %v15759_v21 = vld [vmem:[#allocation3 + $0xd60] ss:$8 sps:$4 sm:$0xff]  }
 0x16d   :  { %3277 = vmatpush1.bf16.msra.mxu0 %v15672_v22  ;;  %v15764_v22 = vld [vmem:[#allocation3 + $0x574] ss:$8 sps:$4 sm:$0xff]  }
 0x16e   :  { %5001 = vmatpush1.bf16.msra.mxu1 %v15675_v23  ;;  %3278 = vmatprep.subr.bf16.mxu0 %v15680_v52  ;;  %v15767_v23 = vld [vmem:[#allocation3 + $0xd74] ss:$8 sps:$4 sm:$0xff]   ;;  %v15762_v52 = vld [vmem:[#allocation3 + $0x570] ss:$8 sps:$4 sm:$0xff]  }
 0x16f   :  { %5002 = vmatprep.subr.bf16.mxu1 %v15683_v26  ;;  %v15765_v26 = vld [vmem:[#allocation3 + $0xd70] ss:$8 sps:$4 sm:$0xff]  }
 0x171   :  { %3279 = vmatpush1.bf16.msra.mxu0 %v15678_v56  ;;  %v15770_v56 = vld [vmem:[#allocation3 + $0x584] ss:$8 sps:$4 sm:$0xff]  }
 0x172   :  { %5003 = vmatpush1.bf16.msra.mxu1 %v15681_v27  ;;  %3280 = vmatprep.subr.bf16.mxu0 %v15686_v28  ;;  %v15773_v27 = vld [vmem:[#allocation3 + $0xd84] ss:$8 sps:$4 sm:$0xff]   ;;  %v15768_v28 = vld [vmem:[#allocation3 + $0x580] ss:$8 sps:$4 sm:$0xff]  }
 0x173   :  { %5004 = vmatprep.subr.bf16.mxu1 %v15689_v29  ;;  %v15771_v29 = vld [vmem:[#allocation3 + $0xd80] ss:$8 sps:$4 sm:$0xff]  }
 0x175   :  { %3281 = vmatpush1.bf16.msra.mxu0 %v15684_v30  ;;  %v15776_v30 = vld [vmem:[#allocation3 + $0x594] ss:$8 sps:$4 sm:$0xff]  }
 0x176   :  { %5005 = vmatpush1.bf16.msra.mxu1 %v15687_v31  ;;  %3282 = vmatprep.subr.bf16.mxu0 %v15692_v32  ;;  %v15779_v31 = vld [vmem:[#allocation3 + $0xd94] ss:$8 sps:$4 sm:$0xff]   ;;  %v15774_v32 = vld [vmem:[#allocation3 + $0x590] ss:$8 sps:$4 sm:$0xff]  }
 0x177   :  { %5006 = vmatprep.subr.bf16.mxu1 %v15695_v33  ;;  %v15777_v33 = vld [vmem:[#allocation3 + $0xd90] ss:$8 sps:$4 sm:$0xff]  }
 0x179   :  { %3283 = vmatpush1.bf16.msra.mxu0 %v15690_v34  ;;  %v15782_v34 = vld [vmem:[#allocation3 + $0x5a4] ss:$8 sps:$4 sm:$0xff]  }
 0x17a   :  { %5007 = vmatpush1.bf16.msra.mxu1 %v15693_v35  ;;  %3284 = vmatprep.subr.bf16.mxu0 %v15698_v16  ;;  %v15785_v35 = vld [vmem:[#allocation3 + $0xda4] ss:$8 sps:$4 sm:$0xff]   ;;  %v15780_v16 = vld [vmem:[#allocation3 + $0x5a0] ss:$8 sps:$4 sm:$0xff]  }
 0x17b   :  { %5008 = vmatprep.subr.bf16.mxu1 %v15701_v17  ;;  %v15783_v17 = vld [vmem:[#allocation3 + $0xda0] ss:$8 sps:$4 sm:$0xff]  }
 0x17d   :  { %3285 = vmatpush1.bf16.msra.mxu0 %v15696_v43  ;;  %v15788_v43 = vld [vmem:[#allocation3 + $0x5b4] ss:$8 sps:$4 sm:$0xff]  }
 0x17e   :  { %5009 = vmatpush1.bf16.msra.mxu1 %v15699_v44  ;;  %3286 = vmatprep.subr.bf16.mxu0 %v15704_v45  ;;  %v15791_v44 = vld [vmem:[#allocation3 + $0xdb4] ss:$8 sps:$4 sm:$0xff]   ;;  %v15786_v45 = vld [vmem:[#allocation3 + $0x5b0] ss:$8 sps:$4 sm:$0xff]  }
 0x17f   :  { %5010 = vmatprep.subr.bf16.mxu1 %v15707_v46  ;;  %v15789_v46 = vld [vmem:[#allocation3 + $0xdb0] ss:$8 sps:$4 sm:$0xff]  }
 0x181   :  { %3287 = vmatpush1.bf16.msra.mxu0 %v15702_v24  ;;  %v15794_v24 = vld [vmem:[#allocation3 + $0x5c4] ss:$8 sps:$4 sm:$0xff]  }
 0x182   :  { %5011 = vmatpush1.bf16.msra.mxu1 %v15705_v25  ;;  %3288 = vmatprep.subr.bf16.mxu0 %v15710_v47  ;;  %v15797_v25 = vld [vmem:[#allocation3 + $0xdc4] ss:$8 sps:$4 sm:$0xff]   ;;  %v15792_v47 = vld [vmem:[#allocation3 + $0x5c0] ss:$8 sps:$4 sm:$0xff]  }
 0x183   :  { %5012 = vmatprep.subr.bf16.mxu1 %v15713_v48  ;;  %v15795_v48 = vld [vmem:[#allocation3 + $0xdc0] ss:$8 sps:$4 sm:$0xff]  }
 0x185   :  { %3289 = vmatpush1.bf16.msra.mxu0 %v15708_v36  ;;  %v15800_v36 = vld [vmem:[#allocation3 + $0x5d4] ss:$8 sps:$4 sm:$0xff]  }
 0x186   :  { %5013 = vmatpush1.bf16.msra.mxu1 %v15711_v50  ;;  %3290 = vmatprep.subr.bf16.mxu0 %v15716_v37  ;;  %v15803_v50 = vld [vmem:[#allocation3 + $0xdd4] ss:$8 sps:$4 sm:$0xff]   ;;  %v15798_v37 = vld [vmem:[#allocation3 + $0x5d0] ss:$8 sps:$4 sm:$0xff]  }
 0x187   :  { %5014 = vmatprep.subr.bf16.mxu1 %v15719_v51  ;;  %v15801_v51 = vld [vmem:[#allocation3 + $0xdd0] ss:$8 sps:$4 sm:$0xff]  }
 0x189   :  { %3291 = vmatpush1.bf16.msra.mxu0 %v15714_v53  ;;  %v15806_v53 = vld [vmem:[#allocation3 + $0x5e4] ss:$8 sps:$4 sm:$0xff]  }
 0x18a   :  { %5015 = vmatpush1.bf16.msra.mxu1 %v15717_v54  ;;  %3301 = vmatprep.subr.bf16.mxu0 %v15722_v58  ;;  %v15809_v54 = vld [vmem:[#allocation3 + $0xde4] ss:$8 sps:$4 sm:$0xff]   ;;  %v17650_v58 = vld [vmem:[%s18402_s0 + $0x8] sm:$0xff] }
 0x18b   :  { %5025 = vmatprep.subr.bf16.mxu1 %v15725_v59  ;;  %v1751_v59 = vcombine.high %v17650_v58, %v17650_v58  ;;  %v15884_v58 = vld [vmem:[#allocation3 + $0x6b4] ss:$8 sps:$4 sm:$0xff]  }
 0x18c   :  { %3293 = vmatmul.mubr.bf16.vlgmr.msra.gmra.mrb[0].mxu0 %v17944_v38 }
 0x18d   :  { %5017 = vmatmul.mubr.bf16.vlgmr.msra.gmra.mrb[0].mxu1 %v17948_v39  ;;  %3302 = vmatpush1.bf16.msra.mxu0 %v15720_v60  ;;  %v17651_v60 = vld [vmem:[%s18402_s0 + $0x18] sm:$0xff] }
 0x18e   :  { %5026 = vmatpush1.bf16.msra.mxu1 %v15723_v61  ;;  %3303 = vmatprep.subr.bf16.mxu0 %v15728_v62  ;;  %v3475_v61 = vcombine.high %v17651_v60, %v17651_v60  ;;  %v15804_v62 = vld [vmem:[#allocation3 + $0x5e0] ss:$8 sps:$4 sm:$0xff]   ;;  %v15882_v60 = vld [vmem:[#allocation3 + $0x6b0] ss:$8 sps:$4 sm:$0xff]  }
 0x18f   :  { %5027 = vmatprep.subr.bf16.mxu1 %v15731_v63  ;;  %3333 = vmatprep.mubr.bf16.mxu0 %v1798_v0  ;;  %v15807_v63 = vld [vmem:[#allocation3 + $0xde0] ss:$8 sps:$4 sm:$0xff]   ;;  %v15812_v0 = vld [vmem:[#allocation3 + $0x5f4] ss:$8 sps:$4 sm:$0xff]  }
 0x190   :  { %5057 = vmatprep.mubr.bf16.mxu1 %v3522_v1  ;;  %v15815_v1 = vld [vmem:[#allocation3 + $0xdf4] ss:$8 sps:$4 sm:$0xff]  }
 0x191   :  { %3304 = vmatpush1.bf16.msra.mxu0 %v15726_v40  ;;  %v17963_v40 = vrot.slane %v1751_v59, %v17850_v49  ;;  %v15887_v59 = vld [vmem:[#allocation3 + $0xeb4] ss:$8 sps:$4 sm:$0xff]  }
 0x192   :  { %5028 = vmatpush1.bf16.msra.mxu1 %v15729_v41  ;;  %3305 = vmatprep.subr.bf16.mxu0 %v15734_v2  ;;  %v17966_v41 = vrot.slane %v3475_v61, %v17850_v49  ;;  %v15810_v2 = vld [vmem:[#allocation3 + $0x5f0] ss:$8 sps:$4 sm:$0xff]  }
 0x193   :  { %5029 = vmatprep.subr.bf16.mxu1 %v15737_v3  ;;  %v15813_v3 = vld [vmem:[#allocation3 + $0xdf0] ss:$8 sps:$4 sm:$0xff]  }
 0x194   :  { %v15885_v61 = vld [vmem:[#allocation3 + $0xeb0] ss:$8 sps:$4 sm:$0xff]  }
 0x195   :  { %3306 = vmatpush1.bf16.msra.mxu0 %v15732_v55  ;;  %v15818_v55 = vld [vmem:[#allocation3 + $0x604] ss:$8 sps:$4 sm:$0xff]  }
 0x196   :  { %5030 = vmatpush1.bf16.msra.mxu1 %v15735_v4  ;;  %3307 = vmatprep.subr.bf16.mxu0 %v15740_v57  ;;  %v15821_v4 = vld [vmem:[#allocation3 + $0xe04] ss:$8 sps:$4 sm:$0xff]   ;;  %v15816_v57 = vld [vmem:[#allocation3 + $0x600] ss:$8 sps:$4 sm:$0xff]  }
 0x197   :  { %5031 = vmatprep.subr.bf16.mxu1 %v15743_v5  ;;  %v15819_v5 = vld [vmem:[#allocation3 + $0xe00] ss:$8 sps:$4 sm:$0xff]  }
 0x199   :  { %3308 = vmatpush1.bf16.msra.mxu0 %v15738_v6  ;;  %v1767_v6 = vcombine.high %v17963_v40, %v17963_v40 }
 0x19a   :  { %5032 = vmatpush1.bf16.msra.mxu1 %v15741_v7  ;;  %3309 = vmatprep.subr.bf16.mxu0 %v15746_v8  ;;  %v3491_v7 = vcombine.high %v17966_v41, %v17966_v41  ;;  %v1796_v8 = vcombine.high %v17944_v38, %v17944_v38  ;;  %v15822_v38 = vld [vmem:[#allocation3 + $0x610] ss:$8 sps:$4 sm:$0xff]  }
 0x19b   :  { %5033 = vmatprep.subr.bf16.mxu1 %v15749_v9  ;;  %v3520_v9 = vcombine.high %v17948_v39, %v17948_v39  ;;  %v15830_v39 = vld [vmem:[#allocation3 + $0x624] ss:$8 sps:$4 sm:$0xff]  }
 0x19d   :  { %3310 = vmatpush1.bf16.msra.mxu0 %v15744_v10  ;;  %v15824_v10 = vld [vmem:[#allocation3 + $0x614] ss:$8 sps:$4 sm:$0xff]  }
 0x19e   :  { %5034 = vmatpush1.bf16.msra.mxu1 %v15747_v11  ;;  %3311 = vmatprep.subr.bf16.mxu0 %v15752_v12  ;;  %v15827_v11 = vld [vmem:[#allocation3 + $0xe14] ss:$8 sps:$4 sm:$0xff]   ;;  %v17977_v12 = vrot.slane %v1767_v6, %v17850_v49  ;;  %v15900_v6 = vld [vmem:[#allocation3 + $0x6e0] ss:$8 sps:$4 sm:$0xff]  }
 0x19f   :  { %5035 = vmatprep.subr.bf16.mxu1 %v15755_v13  ;;  %v17980_v13 = vrot.slane %v3491_v7, %v17850_v49  ;;  %v15903_v7 = vld [vmem:[#allocation3 + $0xee0] ss:$8 sps:$4 sm:$0xff]  }
 0x1a1   :  { %3312 = vmatpush1.bf16.msra.mxu0 %v15750_v14  ;;  %v15825_v14 = vld [vmem:[#allocation3 + $0xe10] ss:$8 sps:$4 sm:$0xff]  }
 0x1a2   :  { %5036 = vmatpush1.bf16.msra.mxu1 %v15753_v15  ;;  %3313 = vmatprep.subr.bf16.mxu0 %v15758_v18  ;;  %v15833_v15 = vld [vmem:[#allocation3 + $0xe24] ss:$8 sps:$4 sm:$0xff]   ;;  %v15828_v18 = vld [vmem:[#allocation3 + $0x620] ss:$8 sps:$4 sm:$0xff]  }
 0x1a3   :  { %5037 = vmatprep.subr.bf16.mxu1 %v15761_v19  ;;  %v15831_v19 = vld [vmem:[#allocation3 + $0xe20] ss:$8 sps:$4 sm:$0xff]  }
 0x1a5   :  { %3314 = vmatpush1.bf16.msra.mxu0 %v15756_v20  ;;  %v15836_v20 = vld [vmem:[#allocation3 + $0x634] ss:$8 sps:$4 sm:$0xff]  }
 0x1a6   :  { %5038 = vmatpush1.bf16.msra.mxu1 %v15759_v21  ;;  %3315 = vmatprep.subr.bf16.mxu0 %v15764_v22  ;;  %v15839_v21 = vld [vmem:[#allocation3 + $0xe34] ss:$8 sps:$4 sm:$0xff]   ;;  %v15834_v22 = vld [vmem:[#allocation3 + $0x630] ss:$8 sps:$4 sm:$0xff]  }
 0x1a7   :  { %5039 = vmatprep.subr.bf16.mxu1 %v15767_v23  ;;  %v15837_v23 = vld [vmem:[#allocation3 + $0xe30] ss:$8 sps:$4 sm:$0xff]  }
 0x1a9   :  { %3316 = vmatpush1.bf16.msra.mxu0 %v15762_v52  ;;  %v15842_v52 = vld [vmem:[#allocation3 + $0x644] ss:$8 sps:$4 sm:$0xff]  }
 0x1aa   :  { %5040 = vmatpush1.bf16.msra.mxu1 %v15765_v26  ;;  %3317 = vmatprep.subr.bf16.mxu0 %v15770_v56  ;;  %v15845_v26 = vld [vmem:[#allocation3 + $0xe44] ss:$8 sps:$4 sm:$0xff]   ;;  %v15840_v56 = vld [vmem:[#allocation3 + $0x640] ss:$8 sps:$4 sm:$0xff]  }
 0x1ab   :  { %5041 = vmatprep.subr.bf16.mxu1 %v15773_v27  ;;  %v15843_v27 = vld [vmem:[#allocation3 + $0xe40] ss:$8 sps:$4 sm:$0xff]  }
 0x1ad   :  { %3318 = vmatpush1.bf16.msra.mxu0 %v15768_v28  ;;  %v15848_v28 = vld [vmem:[#allocation3 + $0x654] ss:$8 sps:$4 sm:$0xff]  }
 0x1ae   :  { %5042 = vmatpush1.bf16.msra.mxu1 %v15771_v29  ;;  %3319 = vmatprep.subr.bf16.mxu0 %v15776_v30  ;;  %v15851_v29 = vld [vmem:[#allocation3 + $0xe54] ss:$8 sps:$4 sm:$0xff]   ;;  %v15846_v30 = vld [vmem:[#allocation3 + $0x650] ss:$8 sps:$4 sm:$0xff]  }
 0x1af   :  { %5043 = vmatprep.subr.bf16.mxu1 %v15779_v31  ;;  %v15849_v31 = vld [vmem:[#allocation3 + $0xe50] ss:$8 sps:$4 sm:$0xff]  }
 0x1b1   :  { %3320 = vmatpush1.bf16.msra.mxu0 %v15774_v32  ;;  %v15854_v32 = vld [vmem:[#allocation3 + $0x664] ss:$8 sps:$4 sm:$0xff]  }
 0x1b2   :  { %5044 = vmatpush1.bf16.msra.mxu1 %v15777_v33  ;;  %3321 = vmatprep.subr.bf16.mxu0 %v15782_v34  ;;  %v15857_v33 = vld [vmem:[#allocation3 + $0xe64] ss:$8 sps:$4 sm:$0xff]   ;;  %v15852_v34 = vld [vmem:[#allocation3 + $0x660] ss:$8 sps:$4 sm:$0xff]  }
 0x1b3   :  { %5045 = vmatprep.subr.bf16.mxu1 %v15785_v35  ;;  %v15855_v35 = vld [vmem:[#allocation3 + $0xe60] ss:$8 sps:$4 sm:$0xff]  }
 0x1b5   :  { %3322 = vmatpush1.bf16.msra.mxu0 %v15780_v16  ;;  %v15860_v16 = vld [vmem:[#allocation3 + $0x674] ss:$8 sps:$4 sm:$0xff]  }
 0x1b6   :  { %5046 = vmatpush1.bf16.msra.mxu1 %v15783_v17  ;;  %3323 = vmatprep.subr.bf16.mxu0 %v15788_v43  ;;  %v15863_v17 = vld [vmem:[#allocation3 + $0xe74] ss:$8 sps:$4 sm:$0xff]   ;;  %v15858_v43 = vld [vmem:[#allocation3 + $0x670] ss:$8 sps:$4 sm:$0xff]  }
 0x1b7   :  { %5047 = vmatprep.subr.bf16.mxu1 %v15791_v44  ;;  %v15861_v44 = vld [vmem:[#allocation3 + $0xe70] ss:$8 sps:$4 sm:$0xff]  }
 0x1b9   :  { %3324 = vmatpush1.bf16.msra.mxu0 %v15786_v45  ;;  %v15866_v45 = vld [vmem:[#allocation3 + $0x684] ss:$8 sps:$4 sm:$0xff]  }
 0x1ba   :  { %5048 = vmatpush1.bf16.msra.mxu1 %v15789_v46  ;;  %3325 = vmatprep.subr.bf16.mxu0 %v15794_v24  ;;  %v15869_v46 = vld [vmem:[#allocation3 + $0xe84] ss:$8 sps:$4 sm:$0xff]   ;;  %v15864_v24 = vld [vmem:[#allocation3 + $0x680] ss:$8 sps:$4 sm:$0xff]  }
 0x1bb   :  { %5049 = vmatprep.subr.bf16.mxu1 %v15797_v25  ;;  %v15867_v25 = vld [vmem:[#allocation3 + $0xe80] ss:$8 sps:$4 sm:$0xff]  }
 0x1bd   :  { %3326 = vmatpush1.bf16.msra.mxu0 %v15792_v47  ;;  %v15872_v47 = vld [vmem:[#allocation3 + $0x694] ss:$8 sps:$4 sm:$0xff]  }
 0x1be   :  { %5050 = vmatpush1.bf16.msra.mxu1 %v15795_v48  ;;  %3327 = vmatprep.subr.bf16.mxu0 %v15800_v36  ;;  %v15875_v48 = vld [vmem:[#allocation3 + $0xe94] ss:$8 sps:$4 sm:$0xff]   ;;  %v15870_v36 = vld [vmem:[#allocation3 + $0x690] ss:$8 sps:$4 sm:$0xff]  }
 0x1bf   :  { %5051 = vmatprep.subr.bf16.mxu1 %v15803_v50  ;;  %v15873_v50 = vld [vmem:[#allocation3 + $0xe90] ss:$8 sps:$4 sm:$0xff]  }
 0x1c1   :  { %3328 = vmatpush1.bf16.msra.mxu0 %v15798_v37  ;;  %v15878_v37 = vld [vmem:[#allocation3 + $0x6a4] ss:$8 sps:$4 sm:$0xff]  }
 0x1c2   :  { %5052 = vmatpush1.bf16.msra.mxu1 %v15801_v51  ;;  %3329 = vmatprep.subr.bf16.mxu0 %v15806_v53  ;;  %v15881_v51 = vld [vmem:[#allocation3 + $0xea4] ss:$8 sps:$4 sm:$0xff]   ;;  %v15876_v53 = vld [vmem:[#allocation3 + $0x6a0] ss:$8 sps:$4 sm:$0xff]  }
 0x1c3   :  { %5053 = vmatprep.subr.bf16.mxu1 %v15809_v54  ;;  %v15879_v54 = vld [vmem:[#allocation3 + $0xea0] ss:$8 sps:$4 sm:$0xff]  }
 0x1c5   :  { %3330 = vmatpush1.bf16.msra.mxu0 %v15804_v62  ;;  %v15890_v62 = vld [vmem:[#allocation3 + $0x6c4] ss:$8 sps:$4 sm:$0xff]  }
 0x1c6   :  { %5054 = vmatpush1.bf16.msra.mxu1 %v15807_v63  ;;  %3331 = vmatprep.subr.bf16.mxu0 %v15812_v0  ;;  %v15893_v63 = vld [vmem:[#allocation3 + $0xec4] ss:$8 sps:$4 sm:$0xff]   ;;  %v15888_v0 = vld [vmem:[#allocation3 + $0x6c0] ss:$8 sps:$4 sm:$0xff]  }
 0x1c7   :  { %5055 = vmatprep.subr.bf16.mxu1 %v15815_v1  ;;  %v15891_v1 = vld [vmem:[#allocation3 + $0xec0] ss:$8 sps:$4 sm:$0xff]  }
 0x1c9   :  { %3332 = vmatpush1.bf16.msra.mxu0 %v15810_v2  ;;  %v15896_v2 = vld [vmem:[#allocation3 + $0x6d4] ss:$8 sps:$4 sm:$0xff]  }
 0x1ca   :  { %5056 = vmatpush1.bf16.msra.mxu1 %v15813_v3  ;;  %3342 = vmatprep.subr.bf16.mxu0 %v15818_v55  ;;  %v15899_v3 = vld [vmem:[#allocation3 + $0xed4] ss:$8 sps:$4 sm:$0xff]   ;;  %v15894_v55 = vld [vmem:[#allocation3 + $0x6d0] ss:$8 sps:$4 sm:$0xff]  }
 0x1cb   :  { %5066 = vmatprep.subr.bf16.mxu1 %v15821_v4  ;;  %v15897_v4 = vld [vmem:[#allocation3 + $0xed0] ss:$8 sps:$4 sm:$0xff]  }
 0x1cc   :  { %3334 = vmatmul.mubr.bf16.vlgmr.msra.gmra.mrb[0].mxu0 %v1796_v8  ;;  %v15908_v8 = vld [vmem:[#allocation3 + $0x6f4] ss:$8 sps:$4 sm:$0xff]  }
 0x1cd   :  { %5058 = vmatmul.mubr.bf16.vlgmr.msra.gmra.mrb[0].mxu1 %v3520_v9  ;;  %3343 = vmatpush1.bf16.msra.mxu0 %v15816_v57  ;;  %v15902_v57 = vld [vmem:[#allocation3 + $0x6e4] ss:$8 sps:$4 sm:$0xff]   ;;  %v15911_v9 = vld [vmem:[#allocation3 + $0xef4] ss:$8 sps:$4 sm:$0xff]  }
 0x1ce   :  { %5067 = vmatpush1.bf16.msra.mxu1 %v15819_v5  ;;  %3344 = vmatprep.subr.bf16.mxu0 %v15824_v10  ;;  %v15905_v5 = vld [vmem:[#allocation3 + $0xee4] ss:$8 sps:$4 sm:$0xff]   ;;  %v15906_v10 = vld [vmem:[#allocation3 + $0x6f0] ss:$8 sps:$4 sm:$0xff]  }
 0x1cf   :  { %5068 = vmatprep.subr.bf16.mxu1 %v15827_v11  ;;  %3374 = vmatprep.mubr.bf16.mxu0 %v17977_v12  ;;  %v15909_v11 = vld [vmem:[#allocation3 + $0xef0] ss:$8 sps:$4 sm:$0xff]  }
 0x1d0   :  { %5098 = vmatprep.mubr.bf16.mxu1 %v17980_v13 }
 0x1d1   :  { %3345 = vmatpush1.bf16.msra.mxu0 %v15822_v38  ;;  %v15915_v38 = vld [vmem:[#allocation3 + $0x704] ss:$8 sps:$4 sm:$0xff]  }
 0x1d2   :  { %5069 = vmatpush1.bf16.msra.mxu1 %v15825_v14  ;;  %3346 = vmatprep.subr.bf16.mxu0 %v15830_v39  ;;  %v15919_v14 = vld [vmem:[#allocation3 + $0xf04] ss:$8 sps:$4 sm:$0xff]   ;;  %v17986_v39 = vrot.slane %v17963_v40, %v17850_v49  ;;  %v15920_v40 = vld [vmem:[#allocation3 + $0x710] ss:$8 sps:$4 sm:$0xff]  }
 0x1d3   :  { %5070 = vmatprep.subr.bf16.mxu1 %v15833_v15  ;;  %v17990_v15 = vrot.slane %v17966_v41, %v17850_v49  ;;  %v15923_v41 = vld [vmem:[#allocation3 + $0xf10] ss:$8 sps:$4 sm:$0xff]  }
 0x1d5   :  { %3347 = vmatpush1.bf16.msra.mxu0 %v15828_v18  ;;  %v15913_v18 = vld [vmem:[#allocation3 + $0x700] ss:$8 sps:$4 sm:$0xff]  }
 0x1d6   :  { %5071 = vmatpush1.bf16.msra.mxu1 %v15831_v19  ;;  %3348 = vmatprep.subr.bf16.mxu0 %v15836_v20  ;;  %v15917_v19 = vld [vmem:[#allocation3 + $0xf00] ss:$8 sps:$4 sm:$0xff]   ;;  %v15922_v20 = vld [vmem:[#allocation3 + $0x714] ss:$8 sps:$4 sm:$0xff]  }
 0x1d7   :  { %5072 = vmatprep.subr.bf16.mxu1 %v15839_v21  ;;  %v15925_v21 = vld [vmem:[#allocation3 + $0xf14] ss:$8 sps:$4 sm:$0xff]  }
 0x1d9   :  { %3349 = vmatpush1.bf16.msra.mxu0 %v15834_v22  ;;  %v1799_v22 = vcombine.high %v17977_v12, %v17977_v12  ;;  %v15926_v12 = vld [vmem:[#allocation3 + $0x720] ss:$8 sps:$4 sm:$0xff]  }
 0x1da   :  { %5073 = vmatpush1.bf16.msra.mxu1 %v15837_v23  ;;  %3350 = vmatprep.subr.bf16.mxu0 %v15842_v52  ;;  %v3523_v23 = vcombine.high %v17980_v13, %v17980_v13  ;;  %v15928_v52 = vld [vmem:[#allocation3 + $0x724] ss:$8 sps:$4 sm:$0xff]   ;;  %v15934_v13 = vld [vmem:[#allocation3 + $0x734] ss:$8 sps:$4 sm:$0xff]  }
 0x1db   :  { %5074 = vmatprep.subr.bf16.mxu1 %v15845_v26  ;;  %v15931_v26 = vld [vmem:[#allocation3 + $0xf24] ss:$8 sps:$4 sm:$0xff]  }
 0x1dd   :  { %3351 = vmatpush1.bf16.msra.mxu0 %v15840_v56  ;;  %v15929_v56 = vld [vmem:[#allocation3 + $0xf20] ss:$8 sps:$4 sm:$0xff]  }
 0x1de   :  { %5075 = vmatpush1.bf16.msra.mxu1 %v15843_v27  ;;  %3352 = vmatprep.subr.bf16.mxu0 %v15848_v28  ;;  %v15937_v27 = vld [vmem:[#allocation3 + $0xf34] ss:$8 sps:$4 sm:$0xff]   ;;  %v15932_v28 = vld [vmem:[#allocation3 + $0x730] ss:$8 sps:$4 sm:$0xff]  }
 0x1df   :  { %5076 = vmatprep.subr.bf16.mxu1 %v15851_v29  ;;  %v15935_v29 = vld [vmem:[#allocation3 + $0xf30] ss:$8 sps:$4 sm:$0xff]  }
 0x1e1   :  { %3353 = vmatpush1.bf16.msra.mxu0 %v15846_v30  ;;  %v15940_v30 = vld [vmem:[#allocation3 + $0x744] ss:$8 sps:$4 sm:$0xff]  }
 0x1e2   :  { %5077 = vmatpush1.bf16.msra.mxu1 %v15849_v31  ;;  %3354 = vmatprep.subr.bf16.mxu0 %v15854_v32  ;;  %v15943_v31 = vld [vmem:[#allocation3 + $0xf44] ss:$8 sps:$4 sm:$0xff]   ;;  %v15938_v32 = vld [vmem:[#allocation3 + $0x740] ss:$8 sps:$4 sm:$0xff]  }
 0x1e3   :  { %5078 = vmatprep.subr.bf16.mxu1 %v15857_v33  ;;  %v15941_v33 = vld [vmem:[#allocation3 + $0xf40] ss:$8 sps:$4 sm:$0xff]  }
 0x1e5   :  { %3355 = vmatpush1.bf16.msra.mxu0 %v15852_v34  ;;  %v15946_v34 = vld [vmem:[#allocation3 + $0x754] ss:$8 sps:$4 sm:$0xff]  }
 0x1e6   :  { %5079 = vmatpush1.bf16.msra.mxu1 %v15855_v35  ;;  %3356 = vmatprep.subr.bf16.mxu0 %v15860_v16  ;;  %v15949_v35 = vld [vmem:[#allocation3 + $0xf54] ss:$8 sps:$4 sm:$0xff]   ;;  %v15944_v16 = vld [vmem:[#allocation3 + $0x750] ss:$8 sps:$4 sm:$0xff]  }
 0x1e7   :  { %5080 = vmatprep.subr.bf16.mxu1 %v15863_v17  ;;  %v15947_v17 = vld [vmem:[#allocation3 + $0xf50] ss:$8 sps:$4 sm:$0xff]  }
 0x1e9   :  { %3357 = vmatpush1.bf16.msra.mxu0 %v15858_v43  ;;  %v15952_v43 = vld [vmem:[#allocation3 + $0x764] ss:$8 sps:$4 sm:$0xff]  }
 0x1ea   :  { %5081 = vmatpush1.bf16.msra.mxu1 %v15861_v44  ;;  %3358 = vmatprep.subr.bf16.mxu0 %v15866_v45  ;;  %v15955_v44 = vld [vmem:[#allocation3 + $0xf64] ss:$8 sps:$4 sm:$0xff]   ;;  %v15950_v45 = vld [vmem:[#allocation3 + $0x760] ss:$8 sps:$4 sm:$0xff]  }
 0x1eb   :  { %5082 = vmatprep.subr.bf16.mxu1 %v15869_v46  ;;  %v15953_v46 = vld [vmem:[#allocation3 + $0xf60] ss:$8 sps:$4 sm:$0xff]  }
 0x1ed   :  { %3359 = vmatpush1.bf16.msra.mxu0 %v15864_v24  ;;  %v15958_v24 = vld [vmem:[#allocation3 + $0x774] ss:$8 sps:$4 sm:$0xff]  }
 0x1ee   :  { %5083 = vmatpush1.bf16.msra.mxu1 %v15867_v25  ;;  %3360 = vmatprep.subr.bf16.mxu0 %v15872_v47  ;;  %v15961_v25 = vld [vmem:[#allocation3 + $0xf74] ss:$8 sps:$4 sm:$0xff]   ;;  %v15956_v47 = vld [vmem:[#allocation3 + $0x770] ss:$8 sps:$4 sm:$0xff]  }
 0x1ef   :  { %5084 = vmatprep.subr.bf16.mxu1 %v15875_v48  ;;  %v15959_v48 = vld [vmem:[#allocation3 + $0xf70] ss:$8 sps:$4 sm:$0xff]  }
 0x1f1   :  { %3361 = vmatpush1.bf16.msra.mxu0 %v15870_v36  ;;  %v15964_v36 = vld [vmem:[#allocation3 + $0x784] ss:$8 sps:$4 sm:$0xff]  }
 0x1f2   :  { %5085 = vmatpush1.bf16.msra.mxu1 %v15873_v50  ;;  %3362 = vmatprep.subr.bf16.mxu0 %v15878_v37  ;;  %v15967_v50 = vld [vmem:[#allocation3 + $0xf84] ss:$8 sps:$4 sm:$0xff]   ;;  %v15962_v37 = vld [vmem:[#allocation3 + $0x780] ss:$8 sps:$4 sm:$0xff]  }
 0x1f3   :  { %5086 = vmatprep.subr.bf16.mxu1 %v15881_v51  ;;  %v15965_v51 = vld [vmem:[#allocation3 + $0xf80] ss:$8 sps:$4 sm:$0xff]  }
 0x1f5   :  { %3363 = vmatpush1.bf16.msra.mxu0 %v15876_v53  ;;  %v15970_v53 = vld [vmem:[#allocation3 + $0x794] ss:$8 sps:$4 sm:$0xff]  }
 0x1f6   :  { %5087 = vmatpush1.bf16.msra.mxu1 %v15879_v54  ;;  %3364 = vmatprep.subr.bf16.mxu0 %v15884_v58  ;;  %v15973_v54 = vld [vmem:[#allocation3 + $0xf94] ss:$8 sps:$4 sm:$0xff]   ;;  %v15968_v58 = vld [vmem:[#allocation3 + $0x790] ss:$8 sps:$4 sm:$0xff]  }
 0x1f7   :  { %5088 = vmatprep.subr.bf16.mxu1 %v15887_v59  ;;  %v15971_v59 = vld [vmem:[#allocation3 + $0xf90] ss:$8 sps:$4 sm:$0xff]  }
 0x1f9   :  { %3365 = vmatpush1.bf16.msra.mxu0 %v15882_v60  ;;  %v15976_v60 = vld [vmem:[#allocation3 + $0x7a4] ss:$8 sps:$4 sm:$0xff]  }
 0x1fa   :  { %5089 = vmatpush1.bf16.msra.mxu1 %v15885_v61  ;;  %3366 = vmatprep.subr.bf16.mxu0 %v15890_v62  ;;  %v15979_v61 = vld [vmem:[#allocation3 + $0xfa4] ss:$8 sps:$4 sm:$0xff]   ;;  %v15974_v62 = vld [vmem:[#allocation3 + $0x7a0] ss:$8 sps:$4 sm:$0xff]  }
 0x1fb   :  { %5090 = vmatprep.subr.bf16.mxu1 %v15893_v63  ;;  %v15977_v63 = vld [vmem:[#allocation3 + $0xfa0] ss:$8 sps:$4 sm:$0xff]  }
 0x1fd   :  { %3367 = vmatpush1.bf16.msra.mxu0 %v15888_v0  ;;  %v15982_v0 = vld [vmem:[#allocation3 + $0x7b4] ss:$8 sps:$4 sm:$0xff]  }
 0x1fe   :  { %5091 = vmatpush1.bf16.msra.mxu1 %v15891_v1  ;;  %3368 = vmatprep.subr.bf16.mxu0 %v15896_v2  ;;  %v15985_v1 = vld [vmem:[#allocation3 + $0xfb4] ss:$8 sps:$4 sm:$0xff]   ;;  %v15980_v2 = vld [vmem:[#allocation3 + $0x7b0] ss:$8 sps:$4 sm:$0xff]  }
 0x1ff   :  { %5092 = vmatprep.subr.bf16.mxu1 %v15899_v3  ;;  %v15983_v3 = vld [vmem:[#allocation3 + $0xfb0] ss:$8 sps:$4 sm:$0xff]  }
 0x201   :  { %3369 = vmatpush1.bf16.msra.mxu0 %v15894_v55  ;;  %v15988_v55 = vld [vmem:[#allocation3 + $0x7c4] ss:$8 sps:$4 sm:$0xff]  }
 0x202   :  { %5093 = vmatpush1.bf16.msra.mxu1 %v15897_v4  ;;  %3370 = vmatprep.subr.bf16.mxu0 %v15902_v57  ;;  %v15991_v4 = vld [vmem:[#allocation3 + $0xfc4] ss:$8 sps:$4 sm:$0xff]   ;;  %v15986_v57 = vld [vmem:[#allocation3 + $0x7c0] ss:$8 sps:$4 sm:$0xff]  }
 0x203   :  { %5094 = vmatprep.subr.bf16.mxu1 %v15905_v5  ;;  %v15989_v5 = vld [vmem:[#allocation3 + $0xfc0] ss:$8 sps:$4 sm:$0xff]  }
 0x205   :  { %3371 = vmatpush1.bf16.msra.mxu0 %v15900_v6  ;;  %v15994_v6 = vld [vmem:[#allocation3 + $0x7d4] ss:$8 sps:$4 sm:$0xff]  }
 0x206   :  { %5095 = vmatpush1.bf16.msra.mxu1 %v15903_v7  ;;  %3372 = vmatprep.subr.bf16.mxu0 %v15908_v8  ;;  %v15997_v7 = vld [vmem:[#allocation3 + $0xfd4] ss:$8 sps:$4 sm:$0xff]   ;;  %v15992_v8 = vld [vmem:[#allocation3 + $0x7d0] ss:$8 sps:$4 sm:$0xff]  }
 0x207   :  { %5096 = vmatprep.subr.bf16.mxu1 %v15911_v9  ;;  %v15995_v9 = vld [vmem:[#allocation3 + $0xfd0] ss:$8 sps:$4 sm:$0xff]  }
 0x209   :  { %3373 = vmatpush1.bf16.msra.mxu0 %v15906_v10  ;;  %v16000_v10 = vld [vmem:[#allocation3 + $0x7e4] ss:$8 sps:$4 sm:$0xff]  }
 0x20a   :  { %5097 = vmatpush1.bf16.msra.mxu1 %v15909_v11  ;;  %3383 = vmatprep.subr.bf16.mxu0 %v15915_v38  ;;  %v16003_v11 = vld [vmem:[#allocation3 + $0xfe4] ss:$8 sps:$4 sm:$0xff]  }
 0x20b   :  { %5107 = vmatprep.subr.bf16.mxu1 %v15919_v14  ;;  %v18001_v38 = vld.sshfl [vmem:[%s18402_s0 + $0x20] sm:$0xff pattern:$0x75316420]  ;;  %v18006_v14 = vld.sshfl [vmem:[%s18402_s0 + $0x30] sm:$0xff pattern:$0x75316420] }
 0x20c   :  { %3375 = vmatmul.mubr.bf16.vlgmr.msra.gmra.mrb[0].mxu0 %v17986_v39 }
 0x20d   :  { %5099 = vmatmul.mubr.bf16.vlgmr.msra.gmra.mrb[0].mxu1 %v17990_v15  ;;  %3384 = vmatpush1.bf16.msra.mxu0 %v15913_v18  ;;  %v15998_v18 = vld [vmem:[#allocation3 + $0x7e0] ss:$8 sps:$4 sm:$0xff]  }
 0x20e   :  { %5108 = vmatpush1.bf16.msra.mxu1 %v15917_v19  ;;  %3385 = vmatprep.subr.bf16.mxu0 %v15922_v20  ;;  %v16001_v19 = vld [vmem:[#allocation3 + $0xfe0] ss:$8 sps:$4 sm:$0xff]   ;;  %v16006_v20 = vld [vmem:[#allocation3 + $0x7f4] ss:$8 sps:$4 sm:$0xff]  }
 0x20f   :  { %5109 = vmatprep.subr.bf16.mxu1 %v15925_v21  ;;  %3415 = vmatprep.mubr.bf16.mxu0 %v1799_v22  ;;  %v16009_v21 = vld [vmem:[#allocation3 + $0xff4] ss:$8 sps:$4 sm:$0xff]   ;;  %v16004_v22 = vld [vmem:[#allocation3 + $0x7f0] ss:$8 sps:$4 sm:$0xff]  }
 0x210   :  { %5139 = vmatprep.mubr.bf16.mxu1 %v3523_v23  ;;  %v16007_v23 = vld [vmem:[#allocation3 + $0xff0] ss:$8 sps:$4 sm:$0xff]  }
 0x211   :  { %3386 = vmatpush1.bf16.msra.mxu0 %v15920_v40  ;;  %v16012_v40 = vld [vmem:[#allocation3 + $0x1004] ss:$8 sps:$4 sm:$0xff]  }
 0x212   :  { %5110 = vmatpush1.bf16.msra.mxu1 %v15923_v41  ;;  %3387 = vmatprep.subr.bf16.mxu0 %v15928_v52  ;;  %v16015_v41 = vld [vmem:[#allocation3 + $0x1804] ss:$8 sps:$4 sm:$0xff]   ;;  %v5165_v52 = vcombine.high %v18001_v38, %v18001_v38 }
 0x213   :  { %5111 = vmatprep.subr.bf16.mxu1 %v15931_v26  ;;  %v6889_v26 = vcombine.high %v18006_v14, %v18006_v14 }
 0x215   :  { %3388 = vmatpush1.bf16.msra.mxu0 %v15926_v12  ;;  %v1797_v12 = vcombine.high %v17986_v39, %v17986_v39  ;;  %v16016_v39 = vld [vmem:[#allocation3 + $0x1010] ss:$8 sps:$4 sm:$0xff]  }
 0x216   :  { %5112 = vmatpush1.bf16.msra.mxu1 %v15929_v56  ;;  %3389 = vmatprep.subr.bf16.mxu0 %v15934_v13  ;;  %v3521_v56 = vcombine.high %v17990_v15, %v17990_v15  ;;  %v16010_v13 = vld [vmem:[#allocation3 + $0x1000] ss:$8 sps:$4 sm:$0xff]   ;;  %v16019_v15 = vld [vmem:[#allocation3 + $0x1810] ss:$8 sps:$4 sm:$0xff]  }
 0x217   :  { %5113 = vmatprep.subr.bf16.mxu1 %v15937_v27  ;;  %v16013_v27 = vld [vmem:[#allocation3 + $0x1800] ss:$8 sps:$4 sm:$0xff]  }
 0x219   :  { %3390 = vmatpush1.bf16.msra.mxu0 %v15932_v28  ;;  %v16018_v28 = vld [vmem:[#allocation3 + $0x1014] ss:$8 sps:$4 sm:$0xff]  }
 0x21a   :  { %5114 = vmatpush1.bf16.msra.mxu1 %v15935_v29  ;;  %3391 = vmatprep.subr.bf16.mxu0 %v15940_v30  ;;  %v16021_v29 = vld [vmem:[#allocation3 + $0x1814] ss:$8 sps:$4 sm:$0xff]   ;;  %v18017_v30 = vrot.slane %v5165_v52, %v17850_v49  ;;  %v16096_v52 = vld [vmem:[#allocation3 + $0x10e4] ss:$8 sps:$4 sm:$0xff]  }
 0x21b   :  { %5115 = vmatprep.subr.bf16.mxu1 %v15943_v31  ;;  %v18020_v31 = vrot.slane %v6889_v26, %v17850_v49  ;;  %v16099_v26 = vld [vmem:[#allocation3 + $0x18e4] ss:$8 sps:$4 sm:$0xff]  }
 0x21d   :  { %3392 = vmatpush1.bf16.msra.mxu0 %v15938_v32  ;;  %v16024_v32 = vld [vmem:[#allocation3 + $0x1024] ss:$8 sps:$4 sm:$0xff]  }
 0x21e   :  { %5116 = vmatpush1.bf16.msra.mxu1 %v15941_v33  ;;  %3393 = vmatprep.subr.bf16.mxu0 %v15946_v34  ;;  %v16027_v33 = vld [vmem:[#allocation3 + $0x1824] ss:$8 sps:$4 sm:$0xff]   ;;  %v16022_v34 = vld [vmem:[#allocation3 + $0x1020] ss:$8 sps:$4 sm:$0xff]  }
 0x21f   :  { %5117 = vmatprep.subr.bf16.mxu1 %v15949_v35  ;;  %v16025_v35 = vld [vmem:[#allocation3 + $0x1820] ss:$8 sps:$4 sm:$0xff]  }
 0x221   :  { %3394 = vmatpush1.bf16.msra.mxu0 %v15944_v16  ;;  %v16030_v16 = vld [vmem:[#allocation3 + $0x1034] ss:$8 sps:$4 sm:$0xff]  }
 0x222   :  { %5118 = vmatpush1.bf16.msra.mxu1 %v15947_v17  ;;  %3395 = vmatprep.subr.bf16.mxu0 %v15952_v43  ;;  %v16033_v17 = vld [vmem:[#allocation3 + $0x1834] ss:$8 sps:$4 sm:$0xff]   ;;  %v16028_v43 = vld [vmem:[#allocation3 + $0x1030] ss:$8 sps:$4 sm:$0xff]  }
 0x223   :  { %5119 = vmatprep.subr.bf16.mxu1 %v15955_v44  ;;  %v16031_v44 = vld [vmem:[#allocation3 + $0x1830] ss:$8 sps:$4 sm:$0xff]  }
 0x225   :  { %3396 = vmatpush1.bf16.msra.mxu0 %v15950_v45  ;;  %v16036_v45 = vld [vmem:[#allocation3 + $0x1044] ss:$8 sps:$4 sm:$0xff]  }
 0x226   :  { %5120 = vmatpush1.bf16.msra.mxu1 %v15953_v46  ;;  %3397 = vmatprep.subr.bf16.mxu0 %v15958_v24  ;;  %v16039_v46 = vld [vmem:[#allocation3 + $0x1844] ss:$8 sps:$4 sm:$0xff]   ;;  %v16034_v24 = vld [vmem:[#allocation3 + $0x1040] ss:$8 sps:$4 sm:$0xff]  }
 0x227   :  { %5121 = vmatprep.subr.bf16.mxu1 %v15961_v25  ;;  %v16037_v25 = vld [vmem:[#allocation3 + $0x1840] ss:$8 sps:$4 sm:$0xff]  }
 0x229   :  { %3398 = vmatpush1.bf16.msra.mxu0 %v15956_v47  ;;  %v16042_v47 = vld [vmem:[#allocation3 + $0x1054] ss:$8 sps:$4 sm:$0xff]  }
 0x22a   :  { %5122 = vmatpush1.bf16.msra.mxu1 %v15959_v48  ;;  %3399 = vmatprep.subr.bf16.mxu0 %v15964_v36  ;;  %v16045_v48 = vld [vmem:[#allocation3 + $0x1854] ss:$8 sps:$4 sm:$0xff]   ;;  %v16040_v36 = vld [vmem:[#allocation3 + $0x1050] ss:$8 sps:$4 sm:$0xff]  }
 0x22b   :  { %5123 = vmatprep.subr.bf16.mxu1 %v15967_v50  ;;  %v16043_v50 = vld [vmem:[#allocation3 + $0x1850] ss:$8 sps:$4 sm:$0xff]  }
 0x22d   :  { %3400 = vmatpush1.bf16.msra.mxu0 %v15962_v37  ;;  %v16048_v37 = vld [vmem:[#allocation3 + $0x1064] ss:$8 sps:$4 sm:$0xff]  }
 0x22e   :  { %5124 = vmatpush1.bf16.msra.mxu1 %v15965_v51  ;;  %3401 = vmatprep.subr.bf16.mxu0 %v15970_v53  ;;  %v16051_v51 = vld [vmem:[#allocation3 + $0x1864] ss:$8 sps:$4 sm:$0xff]   ;;  %v16046_v53 = vld [vmem:[#allocation3 + $0x1060] ss:$8 sps:$4 sm:$0xff]  }
 0x22f   :  { %5125 = vmatprep.subr.bf16.mxu1 %v15973_v54  ;;  %v16049_v54 = vld [vmem:[#allocation3 + $0x1860] ss:$8 sps:$4 sm:$0xff]  }
 0x231   :  { %3402 = vmatpush1.bf16.msra.mxu0 %v15968_v58  ;;  %v16054_v58 = vld [vmem:[#allocation3 + $0x1074] ss:$8 sps:$4 sm:$0xff]  }
 0x232   :  { %5126 = vmatpush1.bf16.msra.mxu1 %v15971_v59  ;;  %3403 = vmatprep.subr.bf16.mxu0 %v15976_v60  ;;  %v16057_v59 = vld [vmem:[#allocation3 + $0x1874] ss:$8 sps:$4 sm:$0xff]   ;;  %v16052_v60 = vld [vmem:[#allocation3 + $0x1070] ss:$8 sps:$4 sm:$0xff]  }
 0x233   :  { %5127 = vmatprep.subr.bf16.mxu1 %v15979_v61  ;;  %v16055_v61 = vld [vmem:[#allocation3 + $0x1870] ss:$8 sps:$4 sm:$0xff]  }
 0x235   :  { %3404 = vmatpush1.bf16.msra.mxu0 %v15974_v62  ;;  %v16060_v62 = vld [vmem:[#allocation3 + $0x1084] ss:$8 sps:$4 sm:$0xff]  }
 0x236   :  { %5128 = vmatpush1.bf16.msra.mxu1 %v15977_v63  ;;  %3405 = vmatprep.subr.bf16.mxu0 %v15982_v0  ;;  %v16063_v63 = vld [vmem:[#allocation3 + $0x1884] ss:$8 sps:$4 sm:$0xff]   ;;  %v16058_v0 = vld [vmem:[#allocation3 + $0x1080] ss:$8 sps:$4 sm:$0xff]  }
 0x237   :  { %5129 = vmatprep.subr.bf16.mxu1 %v15985_v1  ;;  %v16061_v1 = vld [vmem:[#allocation3 + $0x1880] ss:$8 sps:$4 sm:$0xff]  }
 0x239   :  { %3406 = vmatpush1.bf16.msra.mxu0 %v15980_v2  ;;  %v16066_v2 = vld [vmem:[#allocation3 + $0x1094] ss:$8 sps:$4 sm:$0xff]  }
 0x23a   :  { %5130 = vmatpush1.bf16.msra.mxu1 %v15983_v3  ;;  %3407 = vmatprep.subr.bf16.mxu0 %v15988_v55  ;;  %v16069_v3 = vld [vmem:[#allocation3 + $0x1894] ss:$8 sps:$4 sm:$0xff]   ;;  %v16064_v55 = vld [vmem:[#allocation3 + $0x1090] ss:$8 sps:$4 sm:$0xff]  }
 0x23b   :  { %5131 = vmatprep.subr.bf16.mxu1 %v15991_v4  ;;  %v16067_v4 = vld [vmem:[#allocation3 + $0x1890] ss:$8 sps:$4 sm:$0xff]  }
 0x23d   :  { %3408 = vmatpush1.bf16.msra.mxu0 %v15986_v57  ;;  %v16072_v57 = vld [vmem:[#allocation3 + $0x10a4] ss:$8 sps:$4 sm:$0xff]  }
 0x23e   :  { %5132 = vmatpush1.bf16.msra.mxu1 %v15989_v5  ;;  %3409 = vmatprep.subr.bf16.mxu0 %v15994_v6  ;;  %v16075_v5 = vld [vmem:[#allocation3 + $0x18a4] ss:$8 sps:$4 sm:$0xff]   ;;  %v16070_v6 = vld [vmem:[#allocation3 + $0x10a0] ss:$8 sps:$4 sm:$0xff]  }
 0x23f   :  { %5133 = vmatprep.subr.bf16.mxu1 %v15997_v7  ;;  %v16073_v7 = vld [vmem:[#allocation3 + $0x18a0] ss:$8 sps:$4 sm:$0xff]  }
 0x241   :  { %3410 = vmatpush1.bf16.msra.mxu0 %v15992_v8  ;;  %v16078_v8 = vld [vmem:[#allocation3 + $0x10b4] ss:$8 sps:$4 sm:$0xff]  }
 0x242   :  { %5134 = vmatpush1.bf16.msra.mxu1 %v15995_v9  ;;  %3411 = vmatprep.subr.bf16.mxu0 %v16000_v10  ;;  %v16081_v9 = vld [vmem:[#allocation3 + $0x18b4] ss:$8 sps:$4 sm:$0xff]   ;;  %v16076_v10 = vld [vmem:[#allocation3 + $0x10b0] ss:$8 sps:$4 sm:$0xff]  }
 0x243   :  { %5135 = vmatprep.subr.bf16.mxu1 %v16003_v11  ;;  %v16079_v11 = vld [vmem:[#allocation3 + $0x18b0] ss:$8 sps:$4 sm:$0xff]  }
 0x245   :  { %3412 = vmatpush1.bf16.msra.mxu0 %v15998_v18  ;;  %v16084_v18 = vld [vmem:[#allocation3 + $0x10c4] ss:$8 sps:$4 sm:$0xff]  }
 0x246   :  { %5136 = vmatpush1.bf16.msra.mxu1 %v16001_v19  ;;  %3413 = vmatprep.subr.bf16.mxu0 %v16006_v20  ;;  %v16087_v19 = vld [vmem:[#allocation3 + $0x18c4] ss:$8 sps:$4 sm:$0xff]   ;;  %v16082_v20 = vld [vmem:[#allocation3 + $0x10c0] ss:$8 sps:$4 sm:$0xff]  }
 0x247   :  { %5137 = vmatprep.subr.bf16.mxu1 %v16009_v21  ;;  %v16085_v21 = vld [vmem:[#allocation3 + $0x18c0] ss:$8 sps:$4 sm:$0xff]  }
 0x249   :  { %3414 = vmatpush1.bf16.msra.mxu0 %v16004_v22  ;;  %v16090_v22 = vld [vmem:[#allocation3 + $0x10d4] ss:$8 sps:$4 sm:$0xff]  }
 0x24a   :  { %5138 = vmatpush1.bf16.msra.mxu1 %v16007_v23  ;;  %6544 = vmatprep.subr.bf16.mxu0 %v16012_v40  ;;  %v16093_v23 = vld [vmem:[#allocation3 + $0x18d4] ss:$8 sps:$4 sm:$0xff]   ;;  %v16088_v40 = vld [vmem:[#allocation3 + $0x10d0] ss:$8 sps:$4 sm:$0xff]  }
 0x24b   :  { %8268 = vmatprep.subr.bf16.mxu1 %v16015_v41  ;;  %v16091_v41 = vld [vmem:[#allocation3 + $0x18d0] ss:$8 sps:$4 sm:$0xff]  }
 0x24c   :  { %3416 = vmatmul.mubr.bf16.vlgmr.msra.gmra.mrb[0].mxu0 %v1797_v12  ;;  %v16094_v12 = vld [vmem:[#allocation3 + $0x10e0] ss:$8 sps:$4 sm:$0xff]  }
 0x24d   :  { %5140 = vmatmul.mubr.bf16.vlgmr.msra.gmra.mrb[0].mxu1 %v3521_v56  ;;  %6545 = vmatpush1.bf16.msra.mxu0 %v16010_v13  ;;  %v16097_v56 = vld [vmem:[#allocation3 + $0x18e0] ss:$8 sps:$4 sm:$0xff]   ;;  %v16102_v13 = vld [vmem:[#allocation3 + $0x10f4] ss:$8 sps:$4 sm:$0xff]  }
 0x24e   :  { %8269 = vmatpush1.bf16.msra.mxu1 %v16013_v27  ;;  %6546 = vmatprep.subr.bf16.mxu0 %v16018_v28  ;;  %v16105_v27 = vld [vmem:[#allocation3 + $0x18f4] ss:$8 sps:$4 sm:$0xff]   ;;  %v16100_v28 = vld [vmem:[#allocation3 + $0x10f0] ss:$8 sps:$4 sm:$0xff]  }
 0x24f   :  { %8270 = vmatprep.subr.bf16.mxu1 %v16021_v29  ;;  %6576 = vmatprep.mubr.bf16.mxu0 %v18017_v30  ;;  %v16103_v29 = vld [vmem:[#allocation3 + $0x18f0] ss:$8 sps:$4 sm:$0xff]  }
 0x250   :  { %8300 = vmatprep.mubr.bf16.mxu1 %v18020_v31 }
 0x251   :  { %6547 = vmatpush1.bf16.msra.mxu0 %v16016_v39  ;;  %v16108_v39 = vld [vmem:[#allocation3 + $0x1104] ss:$8 sps:$4 sm:$0xff]  }
 0x252   :  { %8271 = vmatpush1.bf16.msra.mxu1 %v16019_v15  ;;  %6548 = vmatprep.subr.bf16.mxu0 %v16024_v32  ;;  %v16111_v15 = vld [vmem:[#allocation3 + $0x1904] ss:$8 sps:$4 sm:$0xff]   ;;  %v18026_v32 = vrot.slane %v18001_v38, %v17850_v49  ;;  %v16112_v38 = vld [vmem:[#allocation3 + $0x1110] ss:$8 sps:$4 sm:$0xff]  }
 0x253   :  { %8272 = vmatprep.subr.bf16.mxu1 %v16027_v33  ;;  %v18030_v33 = vrot.slane %v18006_v14, %v17850_v49  ;;  %v16115_v14 = vld [vmem:[#allocation3 + $0x1910] ss:$8 sps:$4 sm:$0xff]  }
 0x255   :  { %6549 = vmatpush1.bf16.msra.mxu0 %v16022_v34  ;;  %v16106_v34 = vld [vmem:[#allocation3 + $0x1100] ss:$8 sps:$4 sm:$0xff]  }
 0x256   :  { %8273 = vmatpush1.bf16.msra.mxu1 %v16025_v35  ;;  %6550 = vmatprep.subr.bf16.mxu0 %v16030_v16  ;;  %v16109_v35 = vld [vmem:[#allocation3 + $0x1900] ss:$8 sps:$4 sm:$0xff]   ;;  %v16114_v16 = vld [vmem:[#allocation3 + $0x1114] ss:$8 sps:$4 sm:$0xff]  }
 0x257   :  { %8274 = vmatprep.subr.bf16.mxu1 %v16033_v17  ;;  %v16117_v17 = vld [vmem:[#allocation3 + $0x1914] ss:$8 sps:$4 sm:$0xff]  }
 0x259   :  { %6551 = vmatpush1.bf16.msra.mxu0 %v16028_v43  ;;  %v5197_v43 = vcombine.high %v18017_v30, %v18017_v30  ;;  %v16118_v30 = vld [vmem:[#allocation3 + $0x1120] ss:$8 sps:$4 sm:$0xff]  }
 0x25a   :  { %8275 = vmatpush1.bf16.msra.mxu1 %v16031_v44  ;;  %6552 = vmatprep.subr.bf16.mxu0 %v16036_v45  ;;  %v6921_v44 = vcombine.high %v18020_v31, %v18020_v31  ;;  %v16120_v45 = vld [vmem:[#allocation3 + $0x1124] ss:$8 sps:$4 sm:$0xff]   ;;  %v16126_v31 = vld [vmem:[#allocation3 + $0x1134] ss:$8 sps:$4 sm:$0xff]  }
 0x25b   :  { %8276 = vmatprep.subr.bf16.mxu1 %v16039_v46  ;;  %v16123_v46 = vld [vmem:[#allocation3 + $0x1924] ss:$8 sps:$4 sm:$0xff]  }
 0x25d   :  { %6553 = vmatpush1.bf16.msra.mxu0 %v16034_v24  ;;  %v16121_v24 = vld [vmem:[#allocation3 + $0x1920] ss:$8 sps:$4 sm:$0xff]  }
 0x25e   :  { %8277 = vmatpush1.bf16.msra.mxu1 %v16037_v25  ;;  %6554 = vmatprep.subr.bf16.mxu0 %v16042_v47  ;;  %v16129_v25 = vld [vmem:[#allocation3 + $0x1934] ss:$8 sps:$4 sm:$0xff]   ;;  %v16124_v47 = vld [vmem:[#allocation3 + $0x1130] ss:$8 sps:$4 sm:$0xff]  }
 0x25f   :  { %8278 = vmatprep.subr.bf16.mxu1 %v16045_v48  ;;  %v16127_v48 = vld [vmem:[#allocation3 + $0x1930] ss:$8 sps:$4 sm:$0xff]  }
 0x261   :  { %6555 = vmatpush1.bf16.msra.mxu0 %v16040_v36  ;;  %v16132_v36 = vld [vmem:[#allocation3 + $0x1144] ss:$8 sps:$4 sm:$0xff]  }
 0x262   :  { %8279 = vmatpush1.bf16.msra.mxu1 %v16043_v50  ;;  %6556 = vmatprep.subr.bf16.mxu0 %v16048_v37  ;;  %v16135_v50 = vld [vmem:[#allocation3 + $0x1944] ss:$8 sps:$4 sm:$0xff]   ;;  %v16130_v37 = vld [vmem:[#allocation3 + $0x1140] ss:$8 sps:$4 sm:$0xff]  }
 0x263   :  { %8280 = vmatprep.subr.bf16.mxu1 %v16051_v51  ;;  %v16133_v51 = vld [vmem:[#allocation3 + $0x1940] ss:$8 sps:$4 sm:$0xff]  }
 0x265   :  { %6557 = vmatpush1.bf16.msra.mxu0 %v16046_v53  ;;  %v16138_v53 = vld [vmem:[#allocation3 + $0x1154] ss:$8 sps:$4 sm:$0xff]  }
 0x266   :  { %8281 = vmatpush1.bf16.msra.mxu1 %v16049_v54  ;;  %6558 = vmatprep.subr.bf16.mxu0 %v16054_v58  ;;  %v16141_v54 = vld [vmem:[#allocation3 + $0x1954] ss:$8 sps:$4 sm:$0xff]   ;;  %v16136_v58 = vld [vmem:[#allocation3 + $0x1150] ss:$8 sps:$4 sm:$0xff]  }
 0x267   :  { %8282 = vmatprep.subr.bf16.mxu1 %v16057_v59  ;;  %v16139_v59 = vld [vmem:[#allocation3 + $0x1950] ss:$8 sps:$4 sm:$0xff]  }
 0x269   :  { %6559 = vmatpush1.bf16.msra.mxu0 %v16052_v60  ;;  %v16144_v60 = vld [vmem:[#allocation3 + $0x1164] ss:$8 sps:$4 sm:$0xff]  }
 0x26a   :  { %8283 = vmatpush1.bf16.msra.mxu1 %v16055_v61  ;;  %6560 = vmatprep.subr.bf16.mxu0 %v16060_v62  ;;  %v16147_v61 = vld [vmem:[#allocation3 + $0x1964] ss:$8 sps:$4 sm:$0xff]   ;;  %v16142_v62 = vld [vmem:[#allocation3 + $0x1160] ss:$8 sps:$4 sm:$0xff]  }
 0x26b   :  { %8284 = vmatprep.subr.bf16.mxu1 %v16063_v63  ;;  %v16145_v63 = vld [vmem:[#allocation3 + $0x1960] ss:$8 sps:$4 sm:$0xff]  }
 0x26d   :  { %6561 = vmatpush1.bf16.msra.mxu0 %v16058_v0  ;;  %v16150_v0 = vld [vmem:[#allocation3 + $0x1174] ss:$8 sps:$4 sm:$0xff]  }
 0x26e   :  { %8285 = vmatpush1.bf16.msra.mxu1 %v16061_v1  ;;  %6562 = vmatprep.subr.bf16.mxu0 %v16066_v2  ;;  %v16153_v1 = vld [vmem:[#allocation3 + $0x1974] ss:$8 sps:$4 sm:$0xff]   ;;  %v16148_v2 = vld [vmem:[#allocation3 + $0x1170] ss:$8 sps:$4 sm:$0xff]  }
 0x26f   :  { %8286 = vmatprep.subr.bf16.mxu1 %v16069_v3  ;;  %v16151_v3 = vld [vmem:[#allocation3 + $0x1970] ss:$8 sps:$4 sm:$0xff]  }
 0x271   :  { %6563 = vmatpush1.bf16.msra.mxu0 %v16064_v55  ;;  %v16156_v55 = vld [vmem:[#allocation3 + $0x1184] ss:$8 sps:$4 sm:$0xff]  }
 0x272   :  { %8287 = vmatpush1.bf16.msra.mxu1 %v16067_v4  ;;  %6564 = vmatprep.subr.bf16.mxu0 %v16072_v57  ;;  %v16159_v4 = vld [vmem:[#allocation3 + $0x1984] ss:$8 sps:$4 sm:$0xff]   ;;  %v16154_v57 = vld [vmem:[#allocation3 + $0x1180] ss:$8 sps:$4 sm:$0xff]  }
 0x273   :  { %8288 = vmatprep.subr.bf16.mxu1 %v16075_v5  ;;  %v16157_v5 = vld [vmem:[#allocation3 + $0x1980] ss:$8 sps:$4 sm:$0xff]  }
 0x275   :  { %6565 = vmatpush1.bf16.msra.mxu0 %v16070_v6  ;;  %v16162_v6 = vld [vmem:[#allocation3 + $0x1194] ss:$8 sps:$4 sm:$0xff]  }
 0x276   :  { %8289 = vmatpush1.bf16.msra.mxu1 %v16073_v7  ;;  %6566 = vmatprep.subr.bf16.mxu0 %v16078_v8  ;;  %v16165_v7 = vld [vmem:[#allocation3 + $0x1994] ss:$8 sps:$4 sm:$0xff]   ;;  %v16160_v8 = vld [vmem:[#allocation3 + $0x1190] ss:$8 sps:$4 sm:$0xff]  }
 0x277   :  { %8290 = vmatprep.subr.bf16.mxu1 %v16081_v9  ;;  %v16163_v9 = vld [vmem:[#allocation3 + $0x1990] ss:$8 sps:$4 sm:$0xff]  }
 0x279   :  { %6567 = vmatpush1.bf16.msra.mxu0 %v16076_v10  ;;  %v16168_v10 = vld [vmem:[#allocation3 + $0x11a4] ss:$8 sps:$4 sm:$0xff]  }
 0x27a   :  { %8291 = vmatpush1.bf16.msra.mxu1 %v16079_v11  ;;  %6568 = vmatprep.subr.bf16.mxu0 %v16084_v18  ;;  %v16171_v11 = vld [vmem:[#allocation3 + $0x19a4] ss:$8 sps:$4 sm:$0xff]   ;;  %v16166_v18 = vld [vmem:[#allocation3 + $0x11a0] ss:$8 sps:$4 sm:$0xff]  }
 0x27b   :  { %8292 = vmatprep.subr.bf16.mxu1 %v16087_v19  ;;  %v16169_v19 = vld [vmem:[#allocation3 + $0x19a0] ss:$8 sps:$4 sm:$0xff]  }
 0x27d   :  { %6569 = vmatpush1.bf16.msra.mxu0 %v16082_v20  ;;  %v16174_v20 = vld [vmem:[#allocation3 + $0x11b4] ss:$8 sps:$4 sm:$0xff]  }
 0x27e   :  { %8293 = vmatpush1.bf16.msra.mxu1 %v16085_v21  ;;  %6570 = vmatprep.subr.bf16.mxu0 %v16090_v22  ;;  %v16177_v21 = vld [vmem:[#allocation3 + $0x19b4] ss:$8 sps:$4 sm:$0xff]   ;;  %v16172_v22 = vld [vmem:[#allocation3 + $0x11b0] ss:$8 sps:$4 sm:$0xff]  }
 0x27f   :  { %8294 = vmatprep.subr.bf16.mxu1 %v16093_v23  ;;  %v16175_v23 = vld [vmem:[#allocation3 + $0x19b0] ss:$8 sps:$4 sm:$0xff]  }
 0x281   :  { %6571 = vmatpush1.bf16.msra.mxu0 %v16088_v40  ;;  %v16180_v40 = vld [vmem:[#allocation3 + $0x11c4] ss:$8 sps:$4 sm:$0xff]  }
 0x282   :  { %8295 = vmatpush1.bf16.msra.mxu1 %v16091_v41  ;;  %6572 = vmatprep.subr.bf16.mxu0 %v16096_v52  ;;  %v16183_v41 = vld [vmem:[#allocation3 + $0x19c4] ss:$8 sps:$4 sm:$0xff]   ;;  %v16178_v52 = vld [vmem:[#allocation3 + $0x11c0] ss:$8 sps:$4 sm:$0xff]  }
 0x283   :  { %8296 = vmatprep.subr.bf16.mxu1 %v16099_v26  ;;  %v16181_v26 = vld [vmem:[#allocation3 + $0x19c0] ss:$8 sps:$4 sm:$0xff]  }
 0x285   :  { %6573 = vmatpush1.bf16.msra.mxu0 %v16094_v12  ;;  %v16186_v12 = vld [vmem:[#allocation3 + $0x11d4] ss:$8 sps:$4 sm:$0xff]  }
 0x286   :  { %8297 = vmatpush1.bf16.msra.mxu1 %v16097_v56  ;;  %6574 = vmatprep.subr.bf16.mxu0 %v16102_v13  ;;  %v16189_v56 = vld [vmem:[#allocation3 + $0x19d4] ss:$8 sps:$4 sm:$0xff]   ;;  %v16184_v13 = vld [vmem:[#allocation3 + $0x11d0] ss:$8 sps:$4 sm:$0xff]  }
 0x287   :  { %8298 = vmatprep.subr.bf16.mxu1 %v16105_v27  ;;  %v16187_v27 = vld [vmem:[#allocation3 + $0x19d0] ss:$8 sps:$4 sm:$0xff]  }
 0x289   :  { %6575 = vmatpush1.bf16.msra.mxu0 %v16100_v28  ;;  %v16192_v28 = vld [vmem:[#allocation3 + $0x11e4] ss:$8 sps:$4 sm:$0xff]  }
 0x28a   :  { %8299 = vmatpush1.bf16.msra.mxu1 %v16103_v29  ;;  %6585 = vmatprep.subr.bf16.mxu0 %v16108_v39  ;;  %v16195_v29 = vld [vmem:[#allocation3 + $0x19e4] ss:$8 sps:$4 sm:$0xff]  }
 0x28b   :  { %8309 = vmatprep.subr.bf16.mxu1 %v16111_v15  ;;  %v17652_v39 = vld [vmem:[%s18402_s0 + $0x20] sm:$0xff] }
 0x28c   :  { %6577 = vmatmul.mubr.bf16.vlgmr.msra.gmra.mrb[4].mxu0 %v18026_v32  ;;  %v5150_v15 = vcombine.high %v17652_v39, %v17652_v39  ;;  %v16270_v39 = vld [vmem:[#allocation3 + $0x12b4] ss:$8 sps:$4 sm:$0xff]  }
 0x28d   :  { %8301 = vmatmul.mubr.bf16.vlgmr.msra.gmra.mrb[4].mxu1 %v18030_v33  ;;  %6586 = vmatpush1.bf16.msra.mxu0 %v16106_v34  ;;  %v17653_v34 = vld [vmem:[%s18402_s0 + $0x30] sm:$0xff] }
 0x28e   :  { %8310 = vmatpush1.bf16.msra.mxu1 %v16109_v35  ;;  %6587 = vmatprep.subr.bf16.mxu0 %v16114_v16  ;;  %v6874_v35 = vcombine.high %v17653_v34, %v17653_v34  ;;  %v16190_v16 = vld [vmem:[#allocation3 + $0x11e0] ss:$8 sps:$4 sm:$0xff]   ;;  %v16268_v34 = vld [vmem:[#allocation3 + $0x12b0] ss:$8 sps:$4 sm:$0xff]  }
 0x28f   :  { %8311 = vmatprep.subr.bf16.mxu1 %v16117_v17  ;;  %6617 = vmatprep.mubr.bf16.mxu0 %v5197_v43  ;;  %v16193_v17 = vld [vmem:[#allocation3 + $0x19e0] ss:$8 sps:$4 sm:$0xff]   ;;  %v16198_v43 = vld [vmem:[#allocation3 + $0x11f4] ss:$8 sps:$4 sm:$0xff]  }
 0x290   :  { %8341 = vmatprep.mubr.bf16.mxu1 %v6921_v44  ;;  %v16201_v44 = vld [vmem:[#allocation3 + $0x19f4] ss:$8 sps:$4 sm:$0xff]  }
 0x291   :  { %6588 = vmatpush1.bf16.msra.mxu0 %v16112_v38  ;;  %v18045_v38 = vrot.slane %v5150_v15, %v17850_v49  ;;  %v16273_v15 = vld [vmem:[#allocation3 + $0x1ab4] ss:$8 sps:$4 sm:$0xff]  }
 0x292   :  { %8312 = vmatpush1.bf16.msra.mxu1 %v16115_v14  ;;  %6589 = vmatprep.subr.bf16.mxu0 %v16120_v45  ;;  %v18048_v14 = vrot.slane %v6874_v35, %v17850_v49  ;;  %v16196_v45 = vld [vmem:[#allocation3 + $0x11f0] ss:$8 sps:$4 sm:$0xff]  }
 0x293   :  { %8313 = vmatprep.subr.bf16.mxu1 %v16123_v46  ;;  %v16199_v46 = vld [vmem:[#allocation3 + $0x19f0] ss:$8 sps:$4 sm:$0xff]  }
 0x294   :  { %v16271_v35 = vld [vmem:[#allocation3 + $0x1ab0] ss:$8 sps:$4 sm:$0xff]  }
 0x295   :  { %6590 = vmatpush1.bf16.msra.mxu0 %v16118_v30  ;;  %v16204_v30 = vld [vmem:[#allocation3 + $0x1204] ss:$8 sps:$4 sm:$0xff]  }
 0x296   :  { %8314 = vmatpush1.bf16.msra.mxu1 %v16121_v24  ;;  %6591 = vmatprep.subr.bf16.mxu0 %v16126_v31  ;;  %v16207_v24 = vld [vmem:[#allocation3 + $0x1a04] ss:$8 sps:$4 sm:$0xff]   ;;  %v5166_v31 = vcombine.high %v18045_v38, %v18045_v38 }
 0x297   :  { %8315 = vmatprep.subr.bf16.mxu1 %v16129_v25  ;;  %v6890_v25 = vcombine.high %v18048_v14, %v18048_v14 }
 0x299   :  { %6592 = vmatpush1.bf16.msra.mxu0 %v16124_v47  ;;  %v5195_v47 = vcombine.high %v18026_v32, %v18026_v32  ;;  %v16208_v32 = vld [vmem:[#allocation3 + $0x1210] ss:$8 sps:$4 sm:$0xff]  }
 0x29a   :  { %8316 = vmatpush1.bf16.msra.mxu1 %v16127_v48  ;;  %6593 = vmatprep.subr.bf16.mxu0 %v16132_v36  ;;  %v6919_v48 = vcombine.high %v18030_v33, %v18030_v33  ;;  %v16202_v36 = vld [vmem:[#allocation3 + $0x1200] ss:$8 sps:$4 sm:$0xff]   ;;  %v16211_v33 = vld [vmem:[#allocation3 + $0x1a10] ss:$8 sps:$4 sm:$0xff]  }
 0x29b   :  { %8317 = vmatprep.subr.bf16.mxu1 %v16135_v50  ;;  %v16205_v50 = vld [vmem:[#allocation3 + $0x1a00] ss:$8 sps:$4 sm:$0xff]  }
 0x29d   :  { %6594 = vmatpush1.bf16.msra.mxu0 %v16130_v37  ;;  %v16210_v37 = vld [vmem:[#allocation3 + $0x1214] ss:$8 sps:$4 sm:$0xff]  }
 0x29e   :  { %8318 = vmatpush1.bf16.msra.mxu1 %v16133_v51  ;;  %6595 = vmatprep.subr.bf16.mxu0 %v16138_v53  ;;  %v16213_v51 = vld [vmem:[#allocation3 + $0x1a14] ss:$8 sps:$4 sm:$0xff]   ;;  %v18059_v53 = vrot.slane %v5166_v31, %v17850_v49  ;;  %v16288_v31 = vld [vmem:[#allocation3 + $0x12e4] ss:$8 sps:$4 sm:$0xff]  }
 0x29f   :  { %8319 = vmatprep.subr.bf16.mxu1 %v16141_v54  ;;  %v18062_v54 = vrot.slane %v6890_v25, %v17850_v49  ;;  %v16291_v25 = vld [vmem:[#allocation3 + $0x1ae4] ss:$8 sps:$4 sm:$0xff]  }
 0x2a1   :  { %6596 = vmatpush1.bf16.msra.mxu0 %v16136_v58  ;;  %v16216_v58 = vld [vmem:[#allocation3 + $0x1224] ss:$8 sps:$4 sm:$0xff]  }
 0x2a2   :  { %8320 = vmatpush1.bf16.msra.mxu1 %v16139_v59  ;;  %6597 = vmatprep.subr.bf16.mxu0 %v16144_v60  ;;  %v16219_v59 = vld [vmem:[#allocation3 + $0x1a24] ss:$8 sps:$4 sm:$0xff]   ;;  %v16214_v60 = vld [vmem:[#allocation3 + $0x1220] ss:$8 sps:$4 sm:$0xff]  }
 0x2a3   :  { %8321 = vmatprep.subr.bf16.mxu1 %v16147_v61  ;;  %v16217_v61 = vld [vmem:[#allocation3 + $0x1a20] ss:$8 sps:$4 sm:$0xff]  }
 0x2a5   :  { %6598 = vmatpush1.bf16.msra.mxu0 %v16142_v62  ;;  %v16222_v62 = vld [vmem:[#allocation3 + $0x1234] ss:$8 sps:$4 sm:$0xff]  }
 0x2a6   :  { %8322 = vmatpush1.bf16.msra.mxu1 %v16145_v63  ;;  %6599 = vmatprep.subr.bf16.mxu0 %v16150_v0  ;;  %v16225_v63 = vld [vmem:[#allocation3 + $0x1a34] ss:$8 sps:$4 sm:$0xff]   ;;  %v16220_v0 = vld [vmem:[#allocation3 + $0x1230] ss:$8 sps:$4 sm:$0xff]  }
 0x2a7   :  { %8323 = vmatprep.subr.bf16.mxu1 %v16153_v1  ;;  %v16223_v1 = vld [vmem:[#allocation3 + $0x1a30] ss:$8 sps:$4 sm:$0xff]  }
 0x2a9   :  { %6600 = vmatpush1.bf16.msra.mxu0 %v16148_v2  ;;  %v16228_v2 = vld [vmem:[#allocation3 + $0x1244] ss:$8 sps:$4 sm:$0xff]  }
 0x2aa   :  { %8324 = vmatpush1.bf16.msra.mxu1 %v16151_v3  ;;  %6601 = vmatprep.subr.bf16.mxu0 %v16156_v55  ;;  %v16231_v3 = vld [vmem:[#allocation3 + $0x1a44] ss:$8 sps:$4 sm:$0xff]   ;;  %v16226_v55 = vld [vmem:[#allocation3 + $0x1240] ss:$8 sps:$4 sm:$0xff]  }
 0x2ab   :  { %8325 = vmatprep.subr.bf16.mxu1 %v16159_v4  ;;  %v16229_v4 = vld [vmem:[#allocation3 + $0x1a40] ss:$8 sps:$4 sm:$0xff]  }
 0x2ad   :  { %6602 = vmatpush1.bf16.msra.mxu0 %v16154_v57  ;;  %v16234_v57 = vld [vmem:[#allocation3 + $0x1254] ss:$8 sps:$4 sm:$0xff]  }
 0x2ae   :  { %8326 = vmatpush1.bf16.msra.mxu1 %v16157_v5  ;;  %6603 = vmatprep.subr.bf16.mxu0 %v16162_v6  ;;  %v16237_v5 = vld [vmem:[#allocation3 + $0x1a54] ss:$8 sps:$4 sm:$0xff]   ;;  %v16232_v6 = vld [vmem:[#allocation3 + $0x1250] ss:$8 sps:$4 sm:$0xff]  }
 0x2af   :  { %8327 = vmatprep.subr.bf16.mxu1 %v16165_v7  ;;  %v16235_v7 = vld [vmem:[#allocation3 + $0x1a50] ss:$8 sps:$4 sm:$0xff]  }
 0x2b1   :  { %6604 = vmatpush1.bf16.msra.mxu0 %v16160_v8  ;;  %v16240_v8 = vld [vmem:[#allocation3 + $0x1264] ss:$8 sps:$4 sm:$0xff]  }
 0x2b2   :  { %8328 = vmatpush1.bf16.msra.mxu1 %v16163_v9  ;;  %6605 = vmatprep.subr.bf16.mxu0 %v16168_v10  ;;  %v16243_v9 = vld [vmem:[#allocation3 + $0x1a64] ss:$8 sps:$4 sm:$0xff]   ;;  %v16238_v10 = vld [vmem:[#allocation3 + $0x1260] ss:$8 sps:$4 sm:$0xff]  }
 0x2b3   :  { %8329 = vmatprep.subr.bf16.mxu1 %v16171_v11  ;;  %v16241_v11 = vld [vmem:[#allocation3 + $0x1a60] ss:$8 sps:$4 sm:$0xff]  }
 0x2b5   :  { %6606 = vmatpush1.bf16.msra.mxu0 %v16166_v18  ;;  %v16246_v18 = vld [vmem:[#allocation3 + $0x1274] ss:$8 sps:$4 sm:$0xff]  }
 0x2b6   :  { %8330 = vmatpush1.bf16.msra.mxu1 %v16169_v19  ;;  %6607 = vmatprep.subr.bf16.mxu0 %v16174_v20  ;;  %v16249_v19 = vld [vmem:[#allocation3 + $0x1a74] ss:$8 sps:$4 sm:$0xff]   ;;  %v16244_v20 = vld [vmem:[#allocation3 + $0x1270] ss:$8 sps:$4 sm:$0xff]  }
 0x2b7   :  { %8331 = vmatprep.subr.bf16.mxu1 %v16177_v21  ;;  %v16247_v21 = vld [vmem:[#allocation3 + $0x1a70] ss:$8 sps:$4 sm:$0xff]  }
 0x2b9   :  { %6608 = vmatpush1.bf16.msra.mxu0 %v16172_v22  ;;  %v16252_v22 = vld [vmem:[#allocation3 + $0x1284] ss:$8 sps:$4 sm:$0xff]  }
 0x2ba   :  { %8332 = vmatpush1.bf16.msra.mxu1 %v16175_v23  ;;  %6609 = vmatprep.subr.bf16.mxu0 %v16180_v40  ;;  %v16255_v23 = vld [vmem:[#allocation3 + $0x1a84] ss:$8 sps:$4 sm:$0xff]   ;;  %v16250_v40 = vld [vmem:[#allocation3 + $0x1280] ss:$8 sps:$4 sm:$0xff]  }
 0x2bb   :  { %8333 = vmatprep.subr.bf16.mxu1 %v16183_v41  ;;  %v16253_v41 = vld [vmem:[#allocation3 + $0x1a80] ss:$8 sps:$4 sm:$0xff]  }
 0x2bd   :  { %6610 = vmatpush1.bf16.msra.mxu0 %v16178_v52  ;;  %v16258_v52 = vld [vmem:[#allocation3 + $0x1294] ss:$8 sps:$4 sm:$0xff]  }
 0x2be   :  { %8334 = vmatpush1.bf16.msra.mxu1 %v16181_v26  ;;  %6611 = vmatprep.subr.bf16.mxu0 %v16186_v12  ;;  %v16261_v26 = vld [vmem:[#allocation3 + $0x1a94] ss:$8 sps:$4 sm:$0xff]   ;;  %v16256_v12 = vld [vmem:[#allocation3 + $0x1290] ss:$8 sps:$4 sm:$0xff]  }
 0x2bf   :  { %8335 = vmatprep.subr.bf16.mxu1 %v16189_v56  ;;  %v16259_v56 = vld [vmem:[#allocation3 + $0x1a90] ss:$8 sps:$4 sm:$0xff]  }
 0x2c1   :  { %6612 = vmatpush1.bf16.msra.mxu0 %v16184_v13  ;;  %v16264_v13 = vld [vmem:[#allocation3 + $0x12a4] ss:$8 sps:$4 sm:$0xff]  }
 0x2c2   :  { %8336 = vmatpush1.bf16.msra.mxu1 %v16187_v27  ;;  %6613 = vmatprep.subr.bf16.mxu0 %v16192_v28  ;;  %v16267_v27 = vld [vmem:[#allocation3 + $0x1aa4] ss:$8 sps:$4 sm:$0xff]   ;;  %v16262_v28 = vld [vmem:[#allocation3 + $0x12a0] ss:$8 sps:$4 sm:$0xff]  }
 0x2c3   :  { %8337 = vmatprep.subr.bf16.mxu1 %v16195_v29  ;;  %v16265_v29 = vld [vmem:[#allocation3 + $0x1aa0] ss:$8 sps:$4 sm:$0xff]  }
 0x2c5   :  { %6614 = vmatpush1.bf16.msra.mxu0 %v16190_v16  ;;  %v16276_v16 = vld [vmem:[#allocation3 + $0x12c4] ss:$8 sps:$4 sm:$0xff]  }
 0x2c6   :  { %8338 = vmatpush1.bf16.msra.mxu1 %v16193_v17  ;;  %6615 = vmatprep.subr.bf16.mxu0 %v16198_v43  ;;  %v16279_v17 = vld [vmem:[#allocation3 + $0x1ac4] ss:$8 sps:$4 sm:$0xff]   ;;  %v16274_v43 = vld [vmem:[#allocation3 + $0x12c0] ss:$8 sps:$4 sm:$0xff]  }
 0x2c7   :  { %8339 = vmatprep.subr.bf16.mxu1 %v16201_v44  ;;  %v16277_v44 = vld [vmem:[#allocation3 + $0x1ac0] ss:$8 sps:$4 sm:$0xff]  }
 0x2c9   :  { %6616 = vmatpush1.bf16.msra.mxu0 %v16196_v45  ;;  %v16282_v45 = vld [vmem:[#allocation3 + $0x12d4] ss:$8 sps:$4 sm:$0xff]  }
 0x2ca   :  { %8340 = vmatpush1.bf16.msra.mxu1 %v16199_v46  ;;  %6626 = vmatprep.subr.bf16.mxu0 %v16204_v30  ;;  %v16285_v46 = vld [vmem:[#allocation3 + $0x1ad4] ss:$8 sps:$4 sm:$0xff]   ;;  %v16280_v30 = vld [vmem:[#allocation3 + $0x12d0] ss:$8 sps:$4 sm:$0xff]  }
 0x2cb   :  { %8350 = vmatprep.subr.bf16.mxu1 %v16207_v24  ;;  %v16283_v24 = vld [vmem:[#allocation3 + $0x1ad0] ss:$8 sps:$4 sm:$0xff]  }
 0x2cc   :  { %6618 = vmatmul.mubr.bf16.vlgmr.msra.gmra.mrb[4].mxu0 %v5195_v47  ;;  %v16286_v47 = vld [vmem:[#allocation3 + $0x12e0] ss:$8 sps:$4 sm:$0xff]  }
 0x2cd   :  { %8342 = vmatmul.mubr.bf16.vlgmr.msra.gmra.mrb[4].mxu1 %v6919_v48  ;;  %6627 = vmatpush1.bf16.msra.mxu0 %v16202_v36  ;;  %v16289_v48 = vld [vmem:[#allocation3 + $0x1ae0] ss:$8 sps:$4 sm:$0xff]   ;;  %v16294_v36 = vld [vmem:[#allocation3 + $0x12f4] ss:$8 sps:$4 sm:$0xff]  }
 0x2ce   :  { %8351 = vmatpush1.bf16.msra.mxu1 %v16205_v50  ;;  %6628 = vmatprep.subr.bf16.mxu0 %v16210_v37  ;;  %v16297_v50 = vld [vmem:[#allocation3 + $0x1af4] ss:$8 sps:$4 sm:$0xff]   ;;  %v16292_v37 = vld [vmem:[#allocation3 + $0x12f0] ss:$8 sps:$4 sm:$0xff]  }
 0x2cf   :  { %8352 = vmatprep.subr.bf16.mxu1 %v16213_v51  ;;  %6658 = vmatprep.mubr.bf16.mxu0 %v18059_v53  ;;  %v16295_v51 = vld [vmem:[#allocation3 + $0x1af0] ss:$8 sps:$4 sm:$0xff]  }
 0x2d0   :  { %8382 = vmatprep.mubr.bf16.mxu1 %v18062_v54 }
 0x2d1   :  { %6629 = vmatpush1.bf16.msra.mxu0 %v16208_v32  ;;  %v16301_v32 = vld [vmem:[#allocation3 + $0x1304] ss:$8 sps:$4 sm:$0xff]  }
 0x2d2   :  { %8353 = vmatpush1.bf16.msra.mxu1 %v16211_v33  ;;  %6630 = vmatprep.subr.bf16.mxu0 %v16216_v58  ;;  %v16305_v33 = vld [vmem:[#allocation3 + $0x1b04] ss:$8 sps:$4 sm:$0xff]   ;;  %v18068_v58 = vrot.slane %v18045_v38, %v17850_v49  ;;  %v16306_v38 = vld [vmem:[#allocation3 + $0x1310] ss:$8 sps:$4 sm:$0xff]  }
 0x2d3   :  { %8354 = vmatprep.subr.bf16.mxu1 %v16219_v59  ;;  %v18072_v59 = vrot.slane %v18048_v14, %v17850_v49  ;;  %v16309_v14 = vld [vmem:[#allocation3 + $0x1b10] ss:$8 sps:$4 sm:$0xff]  }
 0x2d5   :  { %6631 = vmatpush1.bf16.msra.mxu0 %v16214_v60  ;;  %v16299_v60 = vld [vmem:[#allocation3 + $0x1300] ss:$8 sps:$4 sm:$0xff]  }
 0x2d6   :  { %8355 = vmatpush1.bf16.msra.mxu1 %v16217_v61  ;;  %6632 = vmatprep.subr.bf16.mxu0 %v16222_v62  ;;  %v16303_v61 = vld [vmem:[#allocation3 + $0x1b00] ss:$8 sps:$4 sm:$0xff]   ;;  %v16308_v62 = vld [vmem:[#allocation3 + $0x1314] ss:$8 sps:$4 sm:$0xff]  }
 0x2d7   :  { %8356 = vmatprep.subr.bf16.mxu1 %v16225_v63  ;;  %v16311_v63 = vld [vmem:[#allocation3 + $0x1b14] ss:$8 sps:$4 sm:$0xff]  }
 0x2d9   :  { %6633 = vmatpush1.bf16.msra.mxu0 %v16220_v0  ;;  %v5198_v0 = vcombine.high %v18059_v53, %v18059_v53  ;;  %v16312_v53 = vld [vmem:[#allocation3 + $0x1320] ss:$8 sps:$4 sm:$0xff]  }
 0x2da   :  { %8357 = vmatpush1.bf16.msra.mxu1 %v16223_v1  ;;  %6634 = vmatprep.subr.bf16.mxu0 %v16228_v2  ;;  %v6922_v1 = vcombine.high %v18062_v54, %v18062_v54  ;;  %v16314_v2 = vld [vmem:[#allocation3 + $0x1324] ss:$8 sps:$4 sm:$0xff]   ;;  %v16320_v54 = vld [vmem:[#allocation3 + $0x1334] ss:$8 sps:$4 sm:$0xff]  }
 0x2db   :  { %8358 = vmatprep.subr.bf16.mxu1 %v16231_v3  ;;  %v16317_v3 = vld [vmem:[#allocation3 + $0x1b24] ss:$8 sps:$4 sm:$0xff]  }
 0x2dd   :  { %6635 = vmatpush1.bf16.msra.mxu0 %v16226_v55  ;;  %v16315_v55 = vld [vmem:[#allocation3 + $0x1b20] ss:$8 sps:$4 sm:$0xff]  }
 0x2de   :  { %8359 = vmatpush1.bf16.msra.mxu1 %v16229_v4  ;;  %6636 = vmatprep.subr.bf16.mxu0 %v16234_v57  ;;  %v16323_v4 = vld [vmem:[#allocation3 + $0x1b34] ss:$8 sps:$4 sm:$0xff]   ;;  %v16318_v57 = vld [vmem:[#allocation3 + $0x1330] ss:$8 sps:$4 sm:$0xff]  }
 0x2df   :  { %8360 = vmatprep.subr.bf16.mxu1 %v16237_v5  ;;  %v16321_v5 = vld [vmem:[#allocation3 + $0x1b30] ss:$8 sps:$4 sm:$0xff]  }
 0x2e1   :  { %6637 = vmatpush1.bf16.msra.mxu0 %v16232_v6  ;;  %v16326_v6 = vld [vmem:[#allocation3 + $0x1344] ss:$8 sps:$4 sm:$0xff]  }
 0x2e2   :  { %8361 = vmatpush1.bf16.msra.mxu1 %v16235_v7  ;;  %6638 = vmatprep.subr.bf16.mxu0 %v16240_v8  ;;  %v16329_v7 = vld [vmem:[#allocation3 + $0x1b44] ss:$8 sps:$4 sm:$0xff]   ;;  %v16324_v8 = vld [vmem:[#allocation3 + $0x1340] ss:$8 sps:$4 sm:$0xff]  }
 0x2e3   :  { %8362 = vmatprep.subr.bf16.mxu1 %v16243_v9  ;;  %v16327_v9 = vld [vmem:[#allocation3 + $0x1b40] ss:$8 sps:$4 sm:$0xff]  }
 0x2e5   :  { %6639 = vmatpush1.bf16.msra.mxu0 %v16238_v10  ;;  %v18081_v10 = vsub.s32 0, %v17847_v42 }
 0x2e6   :  { %8363 = vmatpush1.bf16.msra.mxu1 %v16241_v11  ;;  %6640 = vmatprep.subr.bf16.mxu0 %v16246_v18  ;;  %v1628_v11 = vld [vmem:[#allocation5] sm:$0x3]  ;;  %v1629_v18 = vld [vmem:[#allocation5 + $0x2] sm:$0x3] }
 0x2e7   :  { %8364 = vmatprep.subr.bf16.mxu1 %v16249_v19  ;;  %v18084_v19 = vsub.s32 1, %v17847_v42  ;;  %v16338_v42 = vld [vmem:[#allocation3 + $0x1364] ss:$8 sps:$4 sm:$0xff]  }
 0x2e9   :  { %6641 = vmatpush1.bf16.msra.mxu0 %v16244_v20  ;;  %v16332_v20 = vld [vmem:[#allocation3 + $0x1354] ss:$8 sps:$4 sm:$0xff]  }
 0x2ea   :  { %8365 = vmatpush1.bf16.msra.mxu1 %v16247_v21  ;;  %6642 = vmatprep.subr.bf16.mxu0 %v16252_v22  ;;  %v16335_v21 = vld [vmem:[#allocation3 + $0x1b54] ss:$8 sps:$4 sm:$0xff]   ;;  %v1643_v22 = vrot.slane %v1628_v11, %v18081_v10 }
 0x2eb   :  { %8366 = vmatprep.subr.bf16.mxu1 %v16255_v23  ;;  %v1651_v23 = vrot.slane %v1629_v18, %v18081_v10 }
 0x2ed   :  { %6643 = vmatpush1.bf16.msra.mxu0 %v16250_v40  ;;  %v1647_v40 = vrot.slane %v1628_v11, %v18084_v19  ;;  %v18098_v11 = vld.sshfl [vmem:[%s18402_s0 + $0x38] sm:$0xff pattern:$0x75316420] }
 0x2ee   :  { %8367 = vmatpush1.bf16.msra.mxu1 %v16253_v41  ;;  %6644 = vmatprep.subr.bf16.mxu0 %v16258_v52  ;;  %v1655_v41 = vrot.slane %v1629_v18, %v18084_v19  ;;  %v16330_v52 = vld [vmem:[#allocation3 + $0x1350] ss:$8 sps:$4 sm:$0xff]   ;;  %v16384_v18 = vld [vmem:[#allocation3 + $0x13e0] ss:$8 sps:$4 sm:$0xff]  }
 0x2ef   :  { %8368 = vmatprep.subr.bf16.mxu1 %v16261_v26  ;;  %v16333_v26 = vld [vmem:[#allocation3 + $0x1b50] ss:$8 sps:$4 sm:$0xff]  }
 0x2f1   :  { %6645 = vmatpush1.bf16.msra.mxu0 %v16256_v12  ;;  %v16341_v12 = vld [vmem:[#allocation3 + $0x1b64] ss:$8 sps:$4 sm:$0xff]  }
 0x2f2   :  { %8369 = vmatpush1.bf16.msra.mxu1 %v16259_v56  ;;  %6646 = vmatprep.subr.bf16.mxu0 %v16264_v13 }
 0x2f3   :  { %8370 = vmatprep.subr.bf16.mxu1 %v16267_v27 }
 0x2f5   :  { %6647 = vmatpush1.bf16.msra.mxu0 %v16262_v28 }
 0x2f6   :  { %8371 = vmatpush1.bf16.msra.mxu1 %v16265_v29  ;;  %6648 = vmatprep.subr.bf16.mxu0 %v16270_v39 }
 0x2f7   :  { %8372 = vmatprep.subr.bf16.mxu1 %v16273_v15 }
 0x2f9   :  { %6649 = vmatpush1.bf16.msra.mxu0 %v16268_v34 }
 0x2fa   :  { %8373 = vmatpush1.bf16.msra.mxu1 %v16271_v35  ;;  %6650 = vmatprep.subr.bf16.mxu0 %v16276_v16 }
 0x2fb   :  { %8374 = vmatprep.subr.bf16.mxu1 %v16279_v17  ;;  %v16336_v17 = vld [vmem:[#allocation3 + $0x1360] ss:$8 sps:$4 sm:$0xff]  }
 0x2fd   :  { %6651 = vmatpush1.bf16.msra.mxu0 %v16274_v43  ;;  %v16339_v43 = vld [vmem:[#allocation3 + $0x1b60] ss:$8 sps:$4 sm:$0xff]  }
 0x2fe   :  { %8375 = vmatpush1.bf16.msra.mxu1 %v16277_v44  ;;  %6652 = vmatprep.subr.bf16.mxu0 %v16282_v45 }
 0x2ff   :  { %8376 = vmatprep.subr.bf16.mxu1 %v16285_v46  ;;  %v16344_v46 = vld [vmem:[#allocation3 + $0x1374] ss:$8 sps:$4 sm:$0xff]  }
 0x301   :  { %6653 = vmatpush1.bf16.msra.mxu0 %v16280_v30  ;;  %v16347_v30 = vld [vmem:[#allocation3 + $0x1b74] ss:$8 sps:$4 sm:$0xff]  }
 0x302   :  { %8377 = vmatpush1.bf16.msra.mxu1 %v16283_v24  ;;  %6654 = vmatprep.subr.bf16.mxu0 %v16288_v31 }
 0x303   :  { %8378 = vmatprep.subr.bf16.mxu1 %v16291_v25  ;;  %v16342_v25 = vld [vmem:[#allocation3 + $0x1370] ss:$8 sps:$4 sm:$0xff]  }
 0x305   :  { %6655 = vmatpush1.bf16.msra.mxu0 %v16286_v47  ;;  %v16345_v47 = vld [vmem:[#allocation3 + $0x1b70] ss:$8 sps:$4 sm:$0xff]  }
 0x306   :  { %8379 = vmatpush1.bf16.msra.mxu1 %v16289_v48  ;;  %6656 = vmatprep.subr.bf16.mxu0 %v16294_v36  ;;  %v16350_v48 = vld [vmem:[#allocation3 + $0x1384] ss:$8 sps:$4 sm:$0xff]  }
 0x307   :  { %8380 = vmatprep.subr.bf16.mxu1 %v16297_v50  ;;  %v16353_v36 = vld [vmem:[#allocation3 + $0x1b84] ss:$8 sps:$4 sm:$0xff]   ;;  %v16348_v50 = vld [vmem:[#allocation3 + $0x1380] ss:$8 sps:$4 sm:$0xff]  }
 0x309   :  { %6657 = vmatpush1.bf16.msra.mxu0 %v16292_v37  ;;  %v16351_v37 = vld [vmem:[#allocation3 + $0x1b80] ss:$8 sps:$4 sm:$0xff]  }
 0x30a   :  { %8381 = vmatpush1.bf16.msra.mxu1 %v16295_v51  ;;  %6667 = vmatprep.subr.bf16.mxu0 %v16301_v32  ;;  %v16356_v51 = vld [vmem:[#allocation3 + $0x1394] ss:$8 sps:$4 sm:$0xff]  }
 0x30b   :  { %8391 = vmatprep.subr.bf16.mxu1 %v16305_v33  ;;  %v16359_v32 = vld [vmem:[#allocation3 + $0x1b94] ss:$8 sps:$4 sm:$0xff]   ;;  %v16354_v33 = vld [vmem:[#allocation3 + $0x1390] ss:$8 sps:$4 sm:$0xff]  }
 0x30c   :  { %6659 = vmatmul.mubr.bf16.vlgmr.msra.gmra.mrb[4].mxu0 %v18068_v58 }
 0x30d   :  { %8383 = vmatmul.mubr.bf16.vlgmr.msra.gmra.mrb[4].mxu1 %v18072_v59  ;;  %6668 = vmatpush1.bf16.msra.mxu0 %v16299_v60  ;;  %v16357_v60 = vld [vmem:[#allocation3 + $0x1b90] ss:$8 sps:$4 sm:$0xff]  }
 0x30e   :  { %8392 = vmatpush1.bf16.msra.mxu1 %v16303_v61  ;;  %6669 = vmatprep.subr.bf16.mxu0 %v16308_v62  ;;  %v16362_v61 = vld [vmem:[#allocation3 + $0x13a4] ss:$8 sps:$4 sm:$0xff]  }
 0x30f   :  { %8393 = vmatprep.subr.bf16.mxu1 %v16311_v63  ;;  %6699 = vmatprep.mubr.bf16.mxu0 %v5198_v0  ;;  %v16365_v62 = vld [vmem:[#allocation3 + $0x1ba4] ss:$8 sps:$4 sm:$0xff]   ;;  %v16360_v63 = vld [vmem:[#allocation3 + $0x13a0] ss:$8 sps:$4 sm:$0xff]  }
 0x310   :  { %8423 = vmatprep.mubr.bf16.mxu1 %v6922_v1  ;;  %v16363_v0 = vld [vmem:[#allocation3 + $0x1ba0] ss:$8 sps:$4 sm:$0xff]   ;;  %v16368_v1 = vld [vmem:[#allocation3 + $0x13b4] ss:$8 sps:$4 sm:$0xff]  }
 0x311   :  { %6670 = vmatpush1.bf16.msra.mxu0 %v16306_v38  ;;  %v16371_v38 = vld [vmem:[#allocation3 + $0x1bb4] ss:$8 sps:$4 sm:$0xff]  }
 0x312   :  { %8394 = vmatpush1.bf16.msra.mxu1 %v16309_v14  ;;  %6671 = vmatprep.subr.bf16.mxu0 %v16314_v2  ;;  %v16366_v14 = vld [vmem:[#allocation3 + $0x13b0] ss:$8 sps:$4 sm:$0xff]  }
 0x313   :  { %8395 = vmatprep.subr.bf16.mxu1 %v16317_v3  ;;  %v16369_v2 = vld [vmem:[#allocation3 + $0x1bb0] ss:$8 sps:$4 sm:$0xff]   ;;  %v16374_v3 = vld [vmem:[#allocation3 + $0x13c4] ss:$8 sps:$4 sm:$0xff]  }
 0x315   :  { %6672 = vmatpush1.bf16.msra.mxu0 %v16312_v53  ;;  %v16377_v53 = vld [vmem:[#allocation3 + $0x1bc4] ss:$8 sps:$4 sm:$0xff]  }
 0x316   :  { %8396 = vmatpush1.bf16.msra.mxu1 %v16315_v55  ;;  %6673 = vmatprep.subr.bf16.mxu0 %v16320_v54  ;;  %v16372_v55 = vld [vmem:[#allocation3 + $0x13c0] ss:$8 sps:$4 sm:$0xff]  }
 0x317   :  { %8397 = vmatprep.subr.bf16.mxu1 %v16323_v4  ;;  %v16375_v54 = vld [vmem:[#allocation3 + $0x1bc0] ss:$8 sps:$4 sm:$0xff]   ;;  %v16380_v4 = vld [vmem:[#allocation3 + $0x13d4] ss:$8 sps:$4 sm:$0xff]  }
 0x319   :  { %6674 = vmatpush1.bf16.msra.mxu0 %v16318_v57  ;;  %v16383_v57 = vld [vmem:[#allocation3 + $0x1bd4] ss:$8 sps:$4 sm:$0xff]  }
 0x31a   :  { %8398 = vmatpush1.bf16.msra.mxu1 %v16321_v5  ;;  %6675 = vmatprep.subr.bf16.mxu0 %v16326_v6  ;;  %v16378_v5 = vld [vmem:[#allocation3 + $0x13d0] ss:$8 sps:$4 sm:$0xff]  }
 0x31b   :  { %8399 = vmatprep.subr.bf16.mxu1 %v16329_v7  ;;  %v16381_v6 = vld [vmem:[#allocation3 + $0x1bd0] ss:$8 sps:$4 sm:$0xff]   ;;  %v16386_v7 = vld [vmem:[#allocation3 + $0x13e4] ss:$8 sps:$4 sm:$0xff]  }
 0x31d   :  { %6676 = vmatpush1.bf16.msra.mxu0 %v16324_v8  ;;  %v16389_v8 = vld [vmem:[#allocation3 + $0x1be4] ss:$8 sps:$4 sm:$0xff]  }
 0x31e   :  { %8400 = vmatpush1.bf16.msra.mxu1 %v16327_v9  ;;  %6677 = vmatprep.subr.bf16.mxu0 %v16332_v20  ;;  %v18093_v9 = vld.sshfl [vmem:[%s18402_s0 + $0x28] sm:$0xff pattern:$0x75316420]  ;;  %v16387_v20 = vld [vmem:[#allocation3 + $0x1be0] ss:$8 sps:$4 sm:$0xff]  }
 0x31f   :  { %8401 = vmatprep.subr.bf16.mxu1 %v16335_v21  ;;  %v3417_v56 = vpop.f32.mrb[0].mxu0  ;;  %v16392_v21 = vld [vmem:[#allocation3 + $0x13f4] ss:$8 sps:$4 sm:$0xff]  }
 0x320   :  { %v5141_v13 = vpop.f32.mrb[0].mxu1  ;;  %v15045_v27 = vadd.f32 %v3417_v56, %v1643_v22  ;;  %v3419_v29 = vpop.f32.mrb[1].mxu0  ;;  %v16395_v22 = vld [vmem:[#allocation3 + $0x1bf4] ss:$8 sps:$4 sm:$0xff]   ;;  %v6920_v56 = vcombine.high %v18072_v59, %v18072_v59  ;;  %v16405_v59 = vld [vmem:[#allocation3 + $0x1c10] ss:$8 sps:$4 sm:$0xff]  }
 0x321   :  { %v15047_v28 = vadd.f32 %v5141_v13, %v1651_v23  ;;  %v5143_v39 = vpop.f32.mrb[1].mxu1  ;;  %v15046_v15 = vadd.f32 %v3419_v29, %v1647_v40  ;;  %v3421_v35 = vpop.f32.mrb[2].mxu0  ;;  %6678 = vmatpush1.bf16.msra.mxu0 %v16330_v52  ;;  %v16390_v23 = vld [vmem:[#allocation3 + $0x13f0] ss:$8 sps:$4 sm:$0xff]   ;;  %v16401_v52 = vld [vmem:[#allocation3 + $0x1c04] ss:$8 sps:$4 sm:$0xff]  }
 0x322   :  { %v15048_v34 = vadd.f32 %v5143_v39, %v1655_v41  ;;  %v5145_v16 = vpop.f32.mrb[2].mxu1  ;;  %8402 = vmatpush1.bf16.msra.mxu1 %v16333_v26  ;;  %v3422_v44 = vpop.f32.mrb[3].mxu0  ;;  %6679 = vmatprep.subr.bf16.mxu0 %v16338_v42  ;;  %v16393_v40 = vld [vmem:[#allocation3 + $0x1bf0] ss:$8 sps:$4 sm:$0xff]   ;;  %v16398_v41 = vld [vmem:[#allocation3 + $0x1404] ss:$8 sps:$4 sm:$0xff]   ;;  %v5214_v26 = vcombine.high %v18093_v9, %v18093_v9  ;;  %v6938_v42 = vcombine.high %v18098_v11, %v18098_v11 }
 0x323   :  { %v5146_v45 = vpop.f32.mrb[3].mxu1  ;;  %8403 = vmatprep.subr.bf16.mxu1 %v16341_v12  ;;  %v12056_v24 = vcombine.low %v15045_v27, %v15046_v15  ;;  %v5196_v12 = vcombine.high %v18068_v58, %v18068_v58  ;;  %v16396_v13 = vld [vmem:[#allocation3 + $0x1400] ss:$8 sps:$4 sm:$0xff]   ;;  %v16407_v29 = vld [vmem:[#allocation3 + $0x1c14] ss:$8 sps:$4 sm:$0xff]  }
 0x324   :  { %v12064_v31 = vcombine.low %v15047_v28, %v15048_v34  ;;  %v16399_v27 = vld [vmem:[#allocation3 + $0x1c00] ss:$8 sps:$4 sm:$0xff]   ;;  %v16404_v28 = vld [vmem:[#allocation3 + $0x1414] ss:$8 sps:$4 sm:$0xff]   ;;  %v18109_v39 = vrot.slane %v5214_v26, %v17850_v49  ;;  %v18112_v15 = vrot.slane %v6938_v42, %v17850_v49  ;;  %v16402_v58 = vld [vmem:[#allocation3 + $0x1410] ss:$8 sps:$4 sm:$0xff]  }
 0x325   :  { %14799 = vst.sshfl [vmem:[#allocation2] sm:$0x33 pattern:$0x76325410] %v12056_v24  ;;  %6680 = vmatpush1.bf16.msra.mxu0 %v16336_v17  ;;  %v16410_v34 = vld [vmem:[#allocation3 + $0x1424] ss:$8 sps:$4 sm:$0xff]  }
 0x326   :  { %14800 = vst.sshfl [vmem:[#allocation2 + $0x4] sm:$0x33 pattern:$0x76325410] %v12064_v31  ;;  %8404 = vmatpush1.bf16.msra.mxu1 %v16339_v43  ;;  %6681 = vmatprep.subr.bf16.mxu0 %v16344_v46  ;;  %v16413_v35 = vld [vmem:[#allocation3 + $0x1c24] ss:$8 sps:$4 sm:$0xff]  }
 0x327   :  { %8405 = vmatprep.subr.bf16.mxu1 %v16347_v30  ;;  %v16408_v16 = vld [vmem:[#allocation3 + $0x1420] ss:$8 sps:$4 sm:$0xff]   ;;  %v16416_v43 = vld [vmem:[#allocation3 + $0x1434] ss:$8 sps:$4 sm:$0xff]   ;;  %v16414_v45 = vld [vmem:[#allocation3 + $0x1430] ss:$8 sps:$4 sm:$0xff]  }
 0x328   :  { %v16411_v17 = vld [vmem:[#allocation3 + $0x1c20] ss:$8 sps:$4 sm:$0xff]   ;;  %v16419_v44 = vld [vmem:[#allocation3 + $0x1c34] ss:$8 sps:$4 sm:$0xff]   ;;  %v16417_v46 = vld [vmem:[#allocation3 + $0x1c30] ss:$8 sps:$4 sm:$0xff]  }
 0x329   :  { %6682 = vmatpush1.bf16.msra.mxu0 %v16342_v25  ;;  %v16422_v30 = vld [vmem:[#allocation3 + $0x1444] ss:$8 sps:$4 sm:$0xff]   ;;  %v16420_v31 = vld [vmem:[#allocation3 + $0x1440] ss:$8 sps:$4 sm:$0xff]   ;;  %v16477_v26 = vld [vmem:[#allocation3 + $0x1cd0] ss:$8 sps:$4 sm:$0xff]  }
 0x32a   :  { %8406 = vmatpush1.bf16.msra.mxu1 %v16345_v47  ;;  %6683 = vmatprep.subr.bf16.mxu0 %v16350_v48  ;;  %v16425_v24 = vld [vmem:[#allocation3 + $0x1c44] ss:$8 sps:$4 sm:$0xff]   ;;  %v16423_v25 = vld [vmem:[#allocation3 + $0x1c40] ss:$8 sps:$4 sm:$0xff]   ;;  %v16428_v47 = vld [vmem:[#allocation3 + $0x1454] ss:$8 sps:$4 sm:$0xff]  }
 0x32b   :  { %8407 = vmatprep.subr.bf16.mxu1 %v16353_v36  ;;  %v16431_v48 = vld [vmem:[#allocation3 + $0x1c54] ss:$8 sps:$4 sm:$0xff]   ;;  %v16426_v36 = vld [vmem:[#allocation3 + $0x1450] ss:$8 sps:$4 sm:$0xff]   ;;  %v16482_v42 = vld [vmem:[#allocation3 + $0x14e4] ss:$8 sps:$4 sm:$0xff]  }
 0x32d   :  { %6684 = vmatpush1.bf16.msra.mxu0 %v16348_v50  ;;  %v16429_v50 = vld [vmem:[#allocation3 + $0x1c50] ss:$8 sps:$4 sm:$0xff]  }
 0x32e   :  { %8408 = vmatpush1.bf16.msra.mxu1 %v16351_v37  ;;  %6685 = vmatprep.subr.bf16.mxu0 %v16356_v51  ;;  %v16434_v37 = vld [vmem:[#allocation3 + $0x1464] ss:$8 sps:$4 sm:$0xff]  }
 0x32f   :  { %8409 = vmatprep.subr.bf16.mxu1 %v16359_v32  ;;  %v16437_v51 = vld [vmem:[#allocation3 + $0x1c64] ss:$8 sps:$4 sm:$0xff]   ;;  %v16432_v32 = vld [vmem:[#allocation3 + $0x1460] ss:$8 sps:$4 sm:$0xff]  }
 0x331   :  { %6686 = vmatpush1.bf16.msra.mxu0 %v16354_v33  ;;  %v16435_v33 = vld [vmem:[#allocation3 + $0x1c60] ss:$8 sps:$4 sm:$0xff]  }
 0x332   :  { %8410 = vmatpush1.bf16.msra.mxu1 %v16357_v60  ;;  %6687 = vmatprep.subr.bf16.mxu0 %v16362_v61  ;;  %v16440_v60 = vld [vmem:[#allocation3 + $0x1474] ss:$8 sps:$4 sm:$0xff]  }
 0x333   :  { %8411 = vmatprep.subr.bf16.mxu1 %v16365_v62  ;;  %v16443_v61 = vld [vmem:[#allocation3 + $0x1c74] ss:$8 sps:$4 sm:$0xff]   ;;  %v16438_v62 = vld [vmem:[#allocation3 + $0x1470] ss:$8 sps:$4 sm:$0xff]  }
 0x335   :  { %6688 = vmatpush1.bf16.msra.mxu0 %v16360_v63  ;;  %v16441_v63 = vld [vmem:[#allocation3 + $0x1c70] ss:$8 sps:$4 sm:$0xff]  }
 0x336   :  { %8412 = vmatpush1.bf16.msra.mxu1 %v16363_v0  ;;  %6689 = vmatprep.subr.bf16.mxu0 %v16368_v1  ;;  %v16446_v0 = vld [vmem:[#allocation3 + $0x1484] ss:$8 sps:$4 sm:$0xff]  }
 0x337   :  { %8413 = vmatprep.subr.bf16.mxu1 %v16371_v38  ;;  %v16449_v1 = vld [vmem:[#allocation3 + $0x1c84] ss:$8 sps:$4 sm:$0xff]   ;;  %v16444_v38 = vld [vmem:[#allocation3 + $0x1480] ss:$8 sps:$4 sm:$0xff]  }
 0x339   :  { %6690 = vmatpush1.bf16.msra.mxu0 %v16366_v14  ;;  %v16447_v14 = vld [vmem:[#allocation3 + $0x1c80] ss:$8 sps:$4 sm:$0xff]  }
 0x33a   :  { %8414 = vmatpush1.bf16.msra.mxu1 %v16369_v2  ;;  %6691 = vmatprep.subr.bf16.mxu0 %v16374_v3  ;;  %v16452_v2 = vld [vmem:[#allocation3 + $0x1494] ss:$8 sps:$4 sm:$0xff]  }
 0x33b   :  { %8415 = vmatprep.subr.bf16.mxu1 %v16377_v53  ;;  %v16455_v3 = vld [vmem:[#allocation3 + $0x1c94] ss:$8 sps:$4 sm:$0xff]   ;;  %v16450_v53 = vld [vmem:[#allocation3 + $0x1490] ss:$8 sps:$4 sm:$0xff]  }
 0x33d   :  { %6692 = vmatpush1.bf16.msra.mxu0 %v16372_v55  ;;  %v16453_v55 = vld [vmem:[#allocation3 + $0x1c90] ss:$8 sps:$4 sm:$0xff]  }
 0x33e   :  { %8416 = vmatpush1.bf16.msra.mxu1 %v16375_v54  ;;  %6693 = vmatprep.subr.bf16.mxu0 %v16380_v4  ;;  %v16458_v54 = vld [vmem:[#allocation3 + $0x14a4] ss:$8 sps:$4 sm:$0xff]  }
 0x33f   :  { %8417 = vmatprep.subr.bf16.mxu1 %v16383_v57  ;;  %v16461_v4 = vld [vmem:[#allocation3 + $0x1ca4] ss:$8 sps:$4 sm:$0xff]   ;;  %v16456_v57 = vld [vmem:[#allocation3 + $0x14a0] ss:$8 sps:$4 sm:$0xff]  }
 0x341   :  { %6694 = vmatpush1.bf16.msra.mxu0 %v16378_v5  ;;  %v16459_v5 = vld [vmem:[#allocation3 + $0x1ca0] ss:$8 sps:$4 sm:$0xff]  }
 0x342   :  { %8418 = vmatpush1.bf16.msra.mxu1 %v16381_v6  ;;  %6695 = vmatprep.subr.bf16.mxu0 %v16386_v7  ;;  %v16464_v6 = vld [vmem:[#allocation3 + $0x14b4] ss:$8 sps:$4 sm:$0xff]  }
 0x343   :  { %8419 = vmatprep.subr.bf16.mxu1 %v16389_v8  ;;  %v16467_v7 = vld [vmem:[#allocation3 + $0x1cb4] ss:$8 sps:$4 sm:$0xff]   ;;  %v16462_v8 = vld [vmem:[#allocation3 + $0x14b0] ss:$8 sps:$4 sm:$0xff]  }
 0x345   :  { %6696 = vmatpush1.bf16.msra.mxu0 %v16384_v18  ;;  %v16465_v18 = vld [vmem:[#allocation3 + $0x1cb0] ss:$8 sps:$4 sm:$0xff]  }
 0x346   :  { %8420 = vmatpush1.bf16.msra.mxu1 %v16387_v20  ;;  %6697 = vmatprep.subr.bf16.mxu0 %v16392_v21  ;;  %v16470_v20 = vld [vmem:[#allocation3 + $0x14c4] ss:$8 sps:$4 sm:$0xff]  }
 0x347   :  { %8421 = vmatprep.subr.bf16.mxu1 %v16395_v22  ;;  %v16473_v21 = vld [vmem:[#allocation3 + $0x1cc4] ss:$8 sps:$4 sm:$0xff]   ;;  %v16468_v22 = vld [vmem:[#allocation3 + $0x14c0] ss:$8 sps:$4 sm:$0xff]  }
 0x349   :  { %6698 = vmatpush1.bf16.msra.mxu0 %v16390_v23  ;;  %v16471_v23 = vld [vmem:[#allocation3 + $0x1cc0] ss:$8 sps:$4 sm:$0xff]  }
 0x34a   :  { %8422 = vmatpush1.bf16.msra.mxu1 %v16393_v40  ;;  %6708 = vmatprep.subr.bf16.mxu0 %v16398_v41  ;;  %v16476_v40 = vld [vmem:[#allocation3 + $0x14d4] ss:$8 sps:$4 sm:$0xff]  }
 0x34b   :  { %8432 = vmatprep.subr.bf16.mxu1 %v16401_v52  ;;  %v16479_v41 = vld [vmem:[#allocation3 + $0x1cd4] ss:$8 sps:$4 sm:$0xff]   ;;  %v16474_v52 = vld [vmem:[#allocation3 + $0x14d0] ss:$8 sps:$4 sm:$0xff]  }
 0x34c   :  { %6700 = vmatmul.mubr.bf16.vlgmr.msra.gmra.mrb[4].mxu0 %v5196_v12  ;;  %v16485_v12 = vld [vmem:[#allocation3 + $0x1ce4] ss:$8 sps:$4 sm:$0xff]  }
 0x34d   :  { %8424 = vmatmul.mubr.bf16.vlgmr.msra.gmra.mrb[4].mxu1 %v6920_v56  ;;  %6709 = vmatpush1.bf16.msra.mxu0 %v16396_v13  ;;  %v16480_v56 = vld [vmem:[#allocation3 + $0x14e0] ss:$8 sps:$4 sm:$0xff]  }
 0x34e   :  { %8433 = vmatpush1.bf16.msra.mxu1 %v16399_v27  ;;  %6710 = vmatprep.subr.bf16.mxu0 %v16404_v28  ;;  %v16483_v13 = vld [vmem:[#allocation3 + $0x1ce0] ss:$8 sps:$4 sm:$0xff]   ;;  %v16488_v27 = vld [vmem:[#allocation3 + $0x14f4] ss:$8 sps:$4 sm:$0xff]  }
 0x34f   :  { %8434 = vmatprep.subr.bf16.mxu1 %v16407_v29  ;;  %6740 = vmatprep.mubr.bf16.mxu0 %v18109_v39  ;;  %v16491_v28 = vld [vmem:[#allocation3 + $0x1cf4] ss:$8 sps:$4 sm:$0xff]   ;;  %v16486_v29 = vld [vmem:[#allocation3 + $0x14f0] ss:$8 sps:$4 sm:$0xff]  }
 0x350   :  { %8464 = vmatprep.mubr.bf16.mxu1 %v18112_v15 }
 0x351   :  { %6711 = vmatpush1.bf16.msra.mxu0 %v16402_v58  ;;  %v16489_v58 = vld [vmem:[#allocation3 + $0x1cf0] ss:$8 sps:$4 sm:$0xff]  }
 0x352   :  { %8435 = vmatpush1.bf16.msra.mxu1 %v16405_v59  ;;  %6712 = vmatprep.subr.bf16.mxu0 %v16410_v34  ;;  %v16494_v59 = vld [vmem:[#allocation3 + $0x1504] ss:$8 sps:$4 sm:$0xff]  }
 0x353   :  { %8436 = vmatprep.subr.bf16.mxu1 %v16413_v35  ;;  %v16497_v34 = vld [vmem:[#allocation3 + $0x1d04] ss:$8 sps:$4 sm:$0xff]   ;;  %v18118_v35 = vrot.slane %v18093_v9, %v17850_v49  ;;  %v16498_v9 = vld [vmem:[#allocation3 + $0x1510] ss:$8 sps:$4 sm:$0xff]  }
 0x355   :  { %6713 = vmatpush1.bf16.msra.mxu0 %v16408_v16  ;;  %v18122_v16 = vrot.slane %v18098_v11, %v17850_v49  ;;  %v16501_v11 = vld [vmem:[#allocation3 + $0x1d10] ss:$8 sps:$4 sm:$0xff]  }
 0x356   :  { %8437 = vmatpush1.bf16.msra.mxu1 %v16411_v17  ;;  %6714 = vmatprep.subr.bf16.mxu0 %v16416_v43  ;;  %v16492_v17 = vld [vmem:[#allocation3 + $0x1500] ss:$8 sps:$4 sm:$0xff]  }
 0x357   :  { %8438 = vmatprep.subr.bf16.mxu1 %v16419_v44  ;;  %v16495_v43 = vld [vmem:[#allocation3 + $0x1d00] ss:$8 sps:$4 sm:$0xff]   ;;  %v16500_v44 = vld [vmem:[#allocation3 + $0x1514] ss:$8 sps:$4 sm:$0xff]  }
 0x359   :  { %6715 = vmatpush1.bf16.msra.mxu0 %v16414_v45  ;;  %v16503_v45 = vld [vmem:[#allocation3 + $0x1d14] ss:$8 sps:$4 sm:$0xff]  }
 0x35a   :  { %8439 = vmatpush1.bf16.msra.mxu1 %v16417_v46  ;;  %6716 = vmatprep.subr.bf16.mxu0 %v16422_v30  ;;  %v5246_v46 = vcombine.high %v18109_v39, %v18109_v39  ;;  %v6970_v30 = vcombine.high %v18112_v15, %v18112_v15  ;;  %v16504_v39 = vld [vmem:[#allocation3 + $0x1520] ss:$8 sps:$4 sm:$0xff]   ;;  %v16512_v15 = vld [vmem:[#allocation3 + $0x1534] ss:$8 sps:$4 sm:$0xff]  }
 0x35b   :  { %8440 = vmatprep.subr.bf16.mxu1 %v16425_v24  ;;  %v16506_v24 = vld [vmem:[#allocation3 + $0x1524] ss:$8 sps:$4 sm:$0xff]  }
 0x35d   :  { %6717 = vmatpush1.bf16.msra.mxu0 %v16420_v31  ;;  %v16509_v31 = vld [vmem:[#allocation3 + $0x1d24] ss:$8 sps:$4 sm:$0xff]  }
 0x35e   :  { %8441 = vmatpush1.bf16.msra.mxu1 %v16423_v25  ;;  %6718 = vmatprep.subr.bf16.mxu0 %v16428_v47  ;;  %v16507_v25 = vld [vmem:[#allocation3 + $0x1d20] ss:$8 sps:$4 sm:$0xff]   ;;  %v16515_v47 = vld [vmem:[#allocation3 + $0x1d34] ss:$8 sps:$4 sm:$0xff]  }
 0x35f   :  { %8442 = vmatprep.subr.bf16.mxu1 %v16431_v48  ;;  %v16510_v48 = vld [vmem:[#allocation3 + $0x1530] ss:$8 sps:$4 sm:$0xff]  }
 0x361   :  { %6719 = vmatpush1.bf16.msra.mxu0 %v16426_v36  ;;  %v16513_v36 = vld [vmem:[#allocation3 + $0x1d30] ss:$8 sps:$4 sm:$0xff]  }
 0x362   :  { %8443 = vmatpush1.bf16.msra.mxu1 %v16429_v50  ;;  %6720 = vmatprep.subr.bf16.mxu0 %v16434_v37  ;;  %v16518_v50 = vld [vmem:[#allocation3 + $0x1544] ss:$8 sps:$4 sm:$0xff]  }
 0x363   :  { %8444 = vmatprep.subr.bf16.mxu1 %v16437_v51  ;;  %v16521_v37 = vld [vmem:[#allocation3 + $0x1d44] ss:$8 sps:$4 sm:$0xff]   ;;  %v16516_v51 = vld [vmem:[#allocation3 + $0x1540] ss:$8 sps:$4 sm:$0xff]  }
 0x365   :  { %6721 = vmatpush1.bf16.msra.mxu0 %v16432_v32  ;;  %v16519_v32 = vld [vmem:[#allocation3 + $0x1d40] ss:$8 sps:$4 sm:$0xff]  }
 0x366   :  { %8445 = vmatpush1.bf16.msra.mxu1 %v16435_v33  ;;  %6722 = vmatprep.subr.bf16.mxu0 %v16440_v60  ;;  %v16524_v33 = vld [vmem:[#allocation3 + $0x1554] ss:$8 sps:$4 sm:$0xff]  }
 0x367   :  { %8446 = vmatprep.subr.bf16.mxu1 %v16443_v61  ;;  %v16527_v60 = vld [vmem:[#allocation3 + $0x1d54] ss:$8 sps:$4 sm:$0xff]   ;;  %v16522_v61 = vld [vmem:[#allocation3 + $0x1550] ss:$8 sps:$4 sm:$0xff]  }
 0x369   :  { %6723 = vmatpush1.bf16.msra.mxu0 %v16438_v62  ;;  %v16525_v62 = vld [vmem:[#allocation3 + $0x1d50] ss:$8 sps:$4 sm:$0xff]  }
 0x36a   :  { %8447 = vmatpush1.bf16.msra.mxu1 %v16441_v63  ;;  %6724 = vmatprep.subr.bf16.mxu0 %v16446_v0  ;;  %v16530_v63 = vld [vmem:[#allocation3 + $0x1564] ss:$8 sps:$4 sm:$0xff]  }
 0x36b   :  { %8448 = vmatprep.subr.bf16.mxu1 %v16449_v1  ;;  %v16533_v0 = vld [vmem:[#allocation3 + $0x1d64] ss:$8 sps:$4 sm:$0xff]   ;;  %v16528_v1 = vld [vmem:[#allocation3 + $0x1560] ss:$8 sps:$4 sm:$0xff]  }
 0x36d   :  { %6725 = vmatpush1.bf16.msra.mxu0 %v16444_v38  ;;  %v16531_v38 = vld [vmem:[#allocation3 + $0x1d60] ss:$8 sps:$4 sm:$0xff]  }
 0x36e   :  { %8449 = vmatpush1.bf16.msra.mxu1 %v16447_v14  ;;  %6726 = vmatprep.subr.bf16.mxu0 %v16452_v2  ;;  %v16536_v14 = vld [vmem:[#allocation3 + $0x1574] ss:$8 sps:$4 sm:$0xff]  }
 0x36f   :  { %8450 = vmatprep.subr.bf16.mxu1 %v16455_v3  ;;  %v16539_v2 = vld [vmem:[#allocation3 + $0x1d74] ss:$8 sps:$4 sm:$0xff]   ;;  %v16534_v3 = vld [vmem:[#allocation3 + $0x1570] ss:$8 sps:$4 sm:$0xff]  }
 0x371   :  { %6727 = vmatpush1.bf16.msra.mxu0 %v16450_v53  ;;  %v16537_v53 = vld [vmem:[#allocation3 + $0x1d70] ss:$8 sps:$4 sm:$0xff]  }
 0x372   :  { %8451 = vmatpush1.bf16.msra.mxu1 %v16453_v55  ;;  %6728 = vmatprep.subr.bf16.mxu0 %v16458_v54  ;;  %v16542_v55 = vld [vmem:[#allocation3 + $0x1584] ss:$8 sps:$4 sm:$0xff]  }
 0x373   :  { %8452 = vmatprep.subr.bf16.mxu1 %v16461_v4  ;;  %v16545_v54 = vld [vmem:[#allocation3 + $0x1d84] ss:$8 sps:$4 sm:$0xff]   ;;  %v16540_v4 = vld [vmem:[#allocation3 + $0x1580] ss:$8 sps:$4 sm:$0xff]  }
 0x375   :  { %6729 = vmatpush1.bf16.msra.mxu0 %v16456_v57  ;;  %v16543_v57 = vld [vmem:[#allocation3 + $0x1d80] ss:$8 sps:$4 sm:$0xff]  }
 0x376   :  { %8453 = vmatpush1.bf16.msra.mxu1 %v16459_v5  ;;  %6730 = vmatprep.subr.bf16.mxu0 %v16464_v6  ;;  %v16548_v5 = vld [vmem:[#allocation3 + $0x1594] ss:$8 sps:$4 sm:$0xff]  }
 0x377   :  { %8454 = vmatprep.subr.bf16.mxu1 %v16467_v7  ;;  %v16551_v6 = vld [vmem:[#allocation3 + $0x1d94] ss:$8 sps:$4 sm:$0xff]   ;;  %v16546_v7 = vld [vmem:[#allocation3 + $0x1590] ss:$8 sps:$4 sm:$0xff]  }
 0x379   :  { %6731 = vmatpush1.bf16.msra.mxu0 %v16462_v8  ;;  %v16549_v8 = vld [vmem:[#allocation3 + $0x1d90] ss:$8 sps:$4 sm:$0xff]  }
 0x37a   :  { %8455 = vmatpush1.bf16.msra.mxu1 %v16465_v18  ;;  %6732 = vmatprep.subr.bf16.mxu0 %v16470_v20  ;;  %v16554_v18 = vld [vmem:[#allocation3 + $0x15a4] ss:$8 sps:$4 sm:$0xff]  }
 0x37b   :  { %8456 = vmatprep.subr.bf16.mxu1 %v16473_v21  ;;  %v16557_v20 = vld [vmem:[#allocation3 + $0x1da4] ss:$8 sps:$4 sm:$0xff]   ;;  %v16552_v21 = vld [vmem:[#allocation3 + $0x15a0] ss:$8 sps:$4 sm:$0xff]  }
 0x37d   :  { %6733 = vmatpush1.bf16.msra.mxu0 %v16468_v22  ;;  %v16555_v22 = vld [vmem:[#allocation3 + $0x1da0] ss:$8 sps:$4 sm:$0xff]  }
 0x37e   :  { %8457 = vmatpush1.bf16.msra.mxu1 %v16471_v23  ;;  %6734 = vmatprep.subr.bf16.mxu0 %v16476_v40  ;;  %v16560_v23 = vld [vmem:[#allocation3 + $0x15b4] ss:$8 sps:$4 sm:$0xff]  }
 0x37f   :  { %8458 = vmatprep.subr.bf16.mxu1 %v16479_v41  ;;  %v16563_v40 = vld [vmem:[#allocation3 + $0x1db4] ss:$8 sps:$4 sm:$0xff]   ;;  %v16558_v41 = vld [vmem:[#allocation3 + $0x15b0] ss:$8 sps:$4 sm:$0xff]  }
 0x381   :  { %6735 = vmatpush1.bf16.msra.mxu0 %v16474_v52  ;;  %v16561_v52 = vld [vmem:[#allocation3 + $0x1db0] ss:$8 sps:$4 sm:$0xff]  }
 0x382   :  { %8459 = vmatpush1.bf16.msra.mxu1 %v16477_v26  ;;  %6736 = vmatprep.subr.bf16.mxu0 %v16482_v42  ;;  %v16566_v26 = vld [vmem:[#allocation3 + $0x15c4] ss:$8 sps:$4 sm:$0xff]  }
 0x383   :  { %8460 = vmatprep.subr.bf16.mxu1 %v16485_v12  ;;  %v16569_v42 = vld [vmem:[#allocation3 + $0x1dc4] ss:$8 sps:$4 sm:$0xff]   ;;  %v16564_v12 = vld [vmem:[#allocation3 + $0x15c0] ss:$8 sps:$4 sm:$0xff]  }
 0x385   :  { %6737 = vmatpush1.bf16.msra.mxu0 %v16480_v56  ;;  %v16567_v56 = vld [vmem:[#allocation3 + $0x1dc0] ss:$8 sps:$4 sm:$0xff]  }
 0x386   :  { %8461 = vmatpush1.bf16.msra.mxu1 %v16483_v13  ;;  %6738 = vmatprep.subr.bf16.mxu0 %v16488_v27  ;;  %v16572_v13 = vld [vmem:[#allocation3 + $0x15d4] ss:$8 sps:$4 sm:$0xff]  }
 0x387   :  { %8462 = vmatprep.subr.bf16.mxu1 %v16491_v28  ;;  %v16575_v27 = vld [vmem:[#allocation3 + $0x1dd4] ss:$8 sps:$4 sm:$0xff]   ;;  %v16570_v28 = vld [vmem:[#allocation3 + $0x15d0] ss:$8 sps:$4 sm:$0xff]  }
 0x389   :  { %6739 = vmatpush1.bf16.msra.mxu0 %v16486_v29  ;;  %v16573_v29 = vld [vmem:[#allocation3 + $0x1dd0] ss:$8 sps:$4 sm:$0xff]  }
 0x38a   :  { %8463 = vmatpush1.bf16.msra.mxu1 %v16489_v58  ;;  %6749 = vmatprep.subr.bf16.mxu0 %v16494_v59  ;;  %v16578_v58 = vld [vmem:[#allocation3 + $0x15e4] ss:$8 sps:$4 sm:$0xff]  }
 0x38b   :  { %8473 = vmatprep.subr.bf16.mxu1 %v16497_v34  ;;  %v16581_v59 = vld [vmem:[#allocation3 + $0x1de4] ss:$8 sps:$4 sm:$0xff]   ;;  %v17654_v34 = vld [vmem:[%s18402_s0 + $0x28] sm:$0xff] }
 0x38c   :  { %6741 = vmatmul.mubr.bf16.vlgmr.msra.gmra.mrb[4].mxu0 %v18118_v35 }
 0x38d   :  { %8465 = vmatmul.mubr.bf16.vlgmr.msra.gmra.mrb[4].mxu1 %v18122_v16  ;;  %6750 = vmatpush1.bf16.msra.mxu0 %v16492_v17  ;;  %v5199_v17 = vcombine.high %v17654_v34, %v17654_v34  ;;  %v16651_v34 = vld [vmem:[#allocation3 + $0x1ea0] ss:$8 sps:$4 sm:$0xff]  }
 0x38e   :  { %8474 = vmatpush1.bf16.msra.mxu1 %v16495_v43  ;;  %6751 = vmatprep.subr.bf16.mxu0 %v16500_v44  ;;  %v17655_v43 = vld [vmem:[%s18402_s0 + $0x38] sm:$0xff] }
 0x38f   :  { %8475 = vmatprep.subr.bf16.mxu1 %v16503_v45  ;;  %6781 = vmatprep.mubr.bf16.mxu0 %v5246_v46  ;;  %v6923_v44 = vcombine.high %v17655_v43, %v17655_v43  ;;  %v16576_v45 = vld [vmem:[#allocation3 + $0x15e0] ss:$8 sps:$4 sm:$0xff]   ;;  %v16659_v43 = vld [vmem:[#allocation3 + $0x1eb4] ss:$8 sps:$4 sm:$0xff]  }
 0x390   :  { %8505 = vmatprep.mubr.bf16.mxu1 %v6970_v30  ;;  %v16579_v46 = vld [vmem:[#allocation3 + $0x1de0] ss:$8 sps:$4 sm:$0xff]   ;;  %v16584_v30 = vld [vmem:[#allocation3 + $0x15f4] ss:$8 sps:$4 sm:$0xff]  }
 0x391   :  { %6752 = vmatpush1.bf16.msra.mxu0 %v16498_v9  ;;  %v16587_v9 = vld [vmem:[#allocation3 + $0x1df4] ss:$8 sps:$4 sm:$0xff]  }
 0x392   :  { %8476 = vmatpush1.bf16.msra.mxu1 %v16501_v11  ;;  %6753 = vmatprep.subr.bf16.mxu0 %v16506_v24  ;;  %v18137_v11 = vrot.slane %v5199_v17, %v17850_v49  ;;  %v18140_v24 = vrot.slane %v6923_v44, %v17850_v49  ;;  %v16656_v17 = vld [vmem:[#allocation3 + $0x16b4] ss:$8 sps:$4 sm:$0xff]   ;;  %v16654_v44 = vld [vmem:[#allocation3 + $0x16b0] ss:$8 sps:$4 sm:$0xff]  }
 0x393   :  { %8477 = vmatprep.subr.bf16.mxu1 %v16509_v31  ;;  %v16582_v31 = vld [vmem:[#allocation3 + $0x15f0] ss:$8 sps:$4 sm:$0xff]  }
 0x395   :  { %6754 = vmatpush1.bf16.msra.mxu0 %v16504_v39  ;;  %v16585_v39 = vld [vmem:[#allocation3 + $0x1df0] ss:$8 sps:$4 sm:$0xff]  }
 0x396   :  { %8478 = vmatpush1.bf16.msra.mxu1 %v16507_v25  ;;  %6755 = vmatprep.subr.bf16.mxu0 %v16512_v15  ;;  %v16590_v25 = vld [vmem:[#allocation3 + $0x1604] ss:$8 sps:$4 sm:$0xff]  }
 0x397   :  { %8479 = vmatprep.subr.bf16.mxu1 %v16515_v47  ;;  %v16593_v15 = vld [vmem:[#allocation3 + $0x1e04] ss:$8 sps:$4 sm:$0xff]   ;;  %v16588_v47 = vld [vmem:[#allocation3 + $0x1600] ss:$8 sps:$4 sm:$0xff]  }
 0x399   :  { %6756 = vmatpush1.bf16.msra.mxu0 %v16510_v48  ;;  %v16591_v48 = vld [vmem:[#allocation3 + $0x1e00] ss:$8 sps:$4 sm:$0xff]  }
 0x39a   :  { %8480 = vmatpush1.bf16.msra.mxu1 %v16513_v36  ;;  %6757 = vmatprep.subr.bf16.mxu0 %v16518_v50  ;;  %v5215_v36 = vcombine.high %v18137_v11, %v18137_v11  ;;  %v6939_v50 = vcombine.high %v18140_v24, %v18140_v24 }
 0x39b   :  { %8481 = vmatprep.subr.bf16.mxu1 %v16521_v37  ;;  %v5244_v37 = vcombine.high %v18118_v35, %v18118_v35  ;;  %v16594_v35 = vld [vmem:[#allocation3 + $0x1610] ss:$8 sps:$4 sm:$0xff]  }
 0x39d   :  { %6758 = vmatpush1.bf16.msra.mxu0 %v16516_v51  ;;  %v6968_v51 = vcombine.high %v18122_v16, %v18122_v16  ;;  %v16602_v16 = vld [vmem:[#allocation3 + $0x1624] ss:$8 sps:$4 sm:$0xff]  }
 0x39e   :  { %8482 = vmatpush1.bf16.msra.mxu1 %v16519_v32  ;;  %6759 = vmatprep.subr.bf16.mxu0 %v16524_v33  ;;  %v16596_v32 = vld [vmem:[#allocation3 + $0x1614] ss:$8 sps:$4 sm:$0xff]  }
 0x39f   :  { %8483 = vmatprep.subr.bf16.mxu1 %v16527_v60  ;;  %v16599_v33 = vld [vmem:[#allocation3 + $0x1e14] ss:$8 sps:$4 sm:$0xff]   ;;  %v18151_v60 = vrot.slane %v5215_v36, %v17850_v49  ;;  %v16677_v36 = vld [vmem:[#allocation3 + $0x1ee4] ss:$8 sps:$4 sm:$0xff]  }
 0x3a1   :  { %6760 = vmatpush1.bf16.msra.mxu0 %v16522_v61  ;;  %v18154_v61 = vrot.slane %v6939_v50, %v17850_v49  ;;  %v16672_v50 = vld [vmem:[#allocation3 + $0x16e0] ss:$8 sps:$4 sm:$0xff]  }
 0x3a2   :  { %8484 = vmatpush1.bf16.msra.mxu1 %v16525_v62  ;;  %6761 = vmatprep.subr.bf16.mxu0 %v16530_v63  ;;  %v16597_v62 = vld [vmem:[#allocation3 + $0x1e10] ss:$8 sps:$4 sm:$0xff]   ;;  %v16605_v63 = vld [vmem:[#allocation3 + $0x1e24] ss:$8 sps:$4 sm:$0xff]  }
 0x3a3   :  { %8485 = vmatprep.subr.bf16.mxu1 %v16533_v0  ;;  %v16600_v0 = vld [vmem:[#allocation3 + $0x1620] ss:$8 sps:$4 sm:$0xff]  }
 0x3a5   :  { %6762 = vmatpush1.bf16.msra.mxu0 %v16528_v1  ;;  %v16603_v1 = vld [vmem:[#allocation3 + $0x1e20] ss:$8 sps:$4 sm:$0xff]  }
 0x3a6   :  { %8486 = vmatpush1.bf16.msra.mxu1 %v16531_v38  ;;  %6763 = vmatprep.subr.bf16.mxu0 %v16536_v14  ;;  %v16608_v38 = vld [vmem:[#allocation3 + $0x1634] ss:$8 sps:$4 sm:$0xff]  }
 0x3a7   :  { %8487 = vmatprep.subr.bf16.mxu1 %v16539_v2  ;;  %v16611_v14 = vld [vmem:[#allocation3 + $0x1e34] ss:$8 sps:$4 sm:$0xff]   ;;  %v16606_v2 = vld [vmem:[#allocation3 + $0x1630] ss:$8 sps:$4 sm:$0xff]  }
 0x3a9   :  { %6764 = vmatpush1.bf16.msra.mxu0 %v16534_v3  ;;  %v16609_v3 = vld [vmem:[#allocation3 + $0x1e30] ss:$8 sps:$4 sm:$0xff]  }
 0x3aa   :  { %8488 = vmatpush1.bf16.msra.mxu1 %v16537_v53  ;;  %6765 = vmatprep.subr.bf16.mxu0 %v16542_v55  ;;  %v16614_v53 = vld [vmem:[#allocation3 + $0x1644] ss:$8 sps:$4 sm:$0xff]  }
 0x3ab   :  { %8489 = vmatprep.subr.bf16.mxu1 %v16545_v54  ;;  %v16617_v55 = vld [vmem:[#allocation3 + $0x1e44] ss:$8 sps:$4 sm:$0xff]   ;;  %v16612_v54 = vld [vmem:[#allocation3 + $0x1640] ss:$8 sps:$4 sm:$0xff]  }
 0x3ad   :  { %6766 = vmatpush1.bf16.msra.mxu0 %v16540_v4  ;;  %v16615_v4 = vld [vmem:[#allocation3 + $0x1e40] ss:$8 sps:$4 sm:$0xff]  }
 0x3ae   :  { %8490 = vmatpush1.bf16.msra.mxu1 %v16543_v57  ;;  %6767 = vmatprep.subr.bf16.mxu0 %v16548_v5  ;;  %v16620_v57 = vld [vmem:[#allocation3 + $0x1654] ss:$8 sps:$4 sm:$0xff]  }
 0x3af   :  { %8491 = vmatprep.subr.bf16.mxu1 %v16551_v6  ;;  %v16623_v5 = vld [vmem:[#allocation3 + $0x1e54] ss:$8 sps:$4 sm:$0xff]   ;;  %v16618_v6 = vld [vmem:[#allocation3 + $0x1650] ss:$8 sps:$4 sm:$0xff]  }
 0x3b1   :  { %6768 = vmatpush1.bf16.msra.mxu0 %v16546_v7  ;;  %v16621_v7 = vld [vmem:[#allocation3 + $0x1e50] ss:$8 sps:$4 sm:$0xff]  }
 0x3b2   :  { %8492 = vmatpush1.bf16.msra.mxu1 %v16549_v8  ;;  %6769 = vmatprep.subr.bf16.mxu0 %v16554_v18  ;;  %v16626_v8 = vld [vmem:[#allocation3 + $0x1664] ss:$8 sps:$4 sm:$0xff]  }
 0x3b3   :  { %8493 = vmatprep.subr.bf16.mxu1 %v16557_v20  ;;  %v16629_v18 = vld [vmem:[#allocation3 + $0x1e64] ss:$8 sps:$4 sm:$0xff]   ;;  %v16624_v20 = vld [vmem:[#allocation3 + $0x1660] ss:$8 sps:$4 sm:$0xff]  }
 0x3b5   :  { %6770 = vmatpush1.bf16.msra.mxu0 %v16552_v21  ;;  %v16627_v21 = vld [vmem:[#allocation3 + $0x1e60] ss:$8 sps:$4 sm:$0xff]  }
 0x3b6   :  { %8494 = vmatpush1.bf16.msra.mxu1 %v16555_v22  ;;  %6771 = vmatprep.subr.bf16.mxu0 %v16560_v23  ;;  %v16632_v22 = vld [vmem:[#allocation3 + $0x1674] ss:$8 sps:$4 sm:$0xff]  }
 0x3b7   :  { %8495 = vmatprep.subr.bf16.mxu1 %v16563_v40  ;;  %v16635_v23 = vld [vmem:[#allocation3 + $0x1e74] ss:$8 sps:$4 sm:$0xff]   ;;  %v16630_v40 = vld [vmem:[#allocation3 + $0x1670] ss:$8 sps:$4 sm:$0xff]  }
 0x3b9   :  { %6772 = vmatpush1.bf16.msra.mxu0 %v16558_v41  ;;  %v16633_v41 = vld [vmem:[#allocation3 + $0x1e70] ss:$8 sps:$4 sm:$0xff]  }
 0x3ba   :  { %8496 = vmatpush1.bf16.msra.mxu1 %v16561_v52  ;;  %6773 = vmatprep.subr.bf16.mxu0 %v16566_v26  ;;  %v16638_v52 = vld [vmem:[#allocation3 + $0x1684] ss:$8 sps:$4 sm:$0xff]  }
 0x3bb   :  { %8497 = vmatprep.subr.bf16.mxu1 %v16569_v42  ;;  %v16641_v26 = vld [vmem:[#allocation3 + $0x1e84] ss:$8 sps:$4 sm:$0xff]   ;;  %v16636_v42 = vld [vmem:[#allocation3 + $0x1680] ss:$8 sps:$4 sm:$0xff]  }
 0x3bd   :  { %6774 = vmatpush1.bf16.msra.mxu0 %v16564_v12  ;;  %v16639_v12 = vld [vmem:[#allocation3 + $0x1e80] ss:$8 sps:$4 sm:$0xff]  }
 0x3be   :  { %8498 = vmatpush1.bf16.msra.mxu1 %v16567_v56  ;;  %6775 = vmatprep.subr.bf16.mxu0 %v16572_v13  ;;  %v16644_v56 = vld [vmem:[#allocation3 + $0x1694] ss:$8 sps:$4 sm:$0xff]  }
 0x3bf   :  { %8499 = vmatprep.subr.bf16.mxu1 %v16575_v27  ;;  %v16647_v13 = vld [vmem:[#allocation3 + $0x1e94] ss:$8 sps:$4 sm:$0xff]   ;;  %v16642_v27 = vld [vmem:[#allocation3 + $0x1690] ss:$8 sps:$4 sm:$0xff]  }
 0x3c1   :  { %6776 = vmatpush1.bf16.msra.mxu0 %v16570_v28  ;;  %v16645_v28 = vld [vmem:[#allocation3 + $0x1e90] ss:$8 sps:$4 sm:$0xff]  }
 0x3c2   :  { %8500 = vmatpush1.bf16.msra.mxu1 %v16573_v29  ;;  %6777 = vmatprep.subr.bf16.mxu0 %v16578_v58  ;;  %v16650_v29 = vld [vmem:[#allocation3 + $0x16a4] ss:$8 sps:$4 sm:$0xff]  }
 0x3c3   :  { %8501 = vmatprep.subr.bf16.mxu1 %v16581_v59  ;;  %v16653_v58 = vld [vmem:[#allocation3 + $0x1ea4] ss:$8 sps:$4 sm:$0xff]   ;;  %v16648_v59 = vld [vmem:[#allocation3 + $0x16a0] ss:$8 sps:$4 sm:$0xff]  }
 0x3c5   :  { %6778 = vmatpush1.bf16.msra.mxu0 %v16576_v45  ;;  %v16657_v45 = vld [vmem:[#allocation3 + $0x1eb0] ss:$8 sps:$4 sm:$0xff]  }
 0x3c6   :  { %8502 = vmatpush1.bf16.msra.mxu1 %v16579_v46  ;;  %6779 = vmatprep.subr.bf16.mxu0 %v16584_v30  ;;  %v16662_v46 = vld [vmem:[#allocation3 + $0x16c4] ss:$8 sps:$4 sm:$0xff]  }
 0x3c7   :  { %8503 = vmatprep.subr.bf16.mxu1 %v16587_v9  ;;  %v16665_v30 = vld [vmem:[#allocation3 + $0x1ec4] ss:$8 sps:$4 sm:$0xff]   ;;  %v16660_v9 = vld [vmem:[#allocation3 + $0x16c0] ss:$8 sps:$4 sm:$0xff]  }
 0x3c9   :  { %6780 = vmatpush1.bf16.msra.mxu0 %v16582_v31  ;;  %v16663_v31 = vld [vmem:[#allocation3 + $0x1ec0] ss:$8 sps:$4 sm:$0xff]  }
 0x3ca   :  { %8504 = vmatpush1.bf16.msra.mxu1 %v16585_v39  ;;  %6790 = vmatprep.subr.bf16.mxu0 %v16590_v25  ;;  %v16668_v39 = vld [vmem:[#allocation3 + $0x16d4] ss:$8 sps:$4 sm:$0xff]  }
 0x3cb   :  { %8514 = vmatprep.subr.bf16.mxu1 %v16593_v15  ;;  %v16671_v25 = vld [vmem:[#allocation3 + $0x1ed4] ss:$8 sps:$4 sm:$0xff]   ;;  %v16666_v15 = vld [vmem:[#allocation3 + $0x16d0] ss:$8 sps:$4 sm:$0xff]  }
 0x3cc   :  { %6782 = vmatmul.mubr.bf16.vlgmr.msra.gmra.mrb[4].mxu0 %v5244_v37  ;;  %v16675_v37 = vld [vmem:[#allocation3 + $0x1ee0] ss:$8 sps:$4 sm:$0xff]  }
 0x3cd   :  { %8506 = vmatmul.mubr.bf16.vlgmr.msra.gmra.mrb[4].mxu1 %v6968_v51  ;;  %6791 = vmatpush1.bf16.msra.mxu0 %v16588_v47  ;;  %v16669_v47 = vld [vmem:[#allocation3 + $0x1ed0] ss:$8 sps:$4 sm:$0xff]   ;;  %v16680_v51 = vld [vmem:[#allocation3 + $0x16f4] ss:$8 sps:$4 sm:$0xff]  }
 0x3ce   :  { %8515 = vmatpush1.bf16.msra.mxu1 %v16591_v48  ;;  %6792 = vmatprep.subr.bf16.mxu0 %v16596_v32  ;;  %v16674_v48 = vld [vmem:[#allocation3 + $0x16e4] ss:$8 sps:$4 sm:$0xff]   ;;  %v16683_v32 = vld [vmem:[#allocation3 + $0x1ef4] ss:$8 sps:$4 sm:$0xff]  }
 0x3cf   :  { %8516 = vmatprep.subr.bf16.mxu1 %v16599_v33  ;;  %6822 = vmatprep.mubr.bf16.mxu0 %v18151_v60  ;;  %v16678_v33 = vld [vmem:[#allocation3 + $0x16f0] ss:$8 sps:$4 sm:$0xff]  }
 0x3d0   :  { %8546 = vmatprep.mubr.bf16.mxu1 %v18154_v61 }
 0x3d1   :  { %6793 = vmatpush1.bf16.msra.mxu0 %v16594_v35  ;;  %v16681_v35 = vld [vmem:[#allocation3 + $0x1ef0] ss:$8 sps:$4 sm:$0xff]  }
 0x3d2   :  { %8517 = vmatpush1.bf16.msra.mxu1 %v16597_v62  ;;  %6794 = vmatprep.subr.bf16.mxu0 %v16602_v16  ;;  %v16687_v62 = vld [vmem:[#allocation3 + $0x1704] ss:$8 sps:$4 sm:$0xff]  }
 0x3d3   :  { %8518 = vmatprep.subr.bf16.mxu1 %v16605_v63  ;;  %v16691_v16 = vld [vmem:[#allocation3 + $0x1f04] ss:$8 sps:$4 sm:$0xff]   ;;  %v18160_v63 = vrot.slane %v18137_v11, %v17850_v49  ;;  %v16692_v11 = vld [vmem:[#allocation3 + $0x1710] ss:$8 sps:$4 sm:$0xff]  }
 0x3d5   :  { %6795 = vmatpush1.bf16.msra.mxu0 %v16600_v0  ;;  %v18164_v0 = vrot.slane %v18140_v24, %v17850_v49  ;;  %v16695_v24 = vld [vmem:[#allocation3 + $0x1f10] ss:$8 sps:$4 sm:$0xff]  }
 0x3d6   :  { %8519 = vmatpush1.bf16.msra.mxu1 %v16603_v1  ;;  %6796 = vmatprep.subr.bf16.mxu0 %v16608_v38  ;;  %v16685_v1 = vld [vmem:[#allocation3 + $0x1700] ss:$8 sps:$4 sm:$0xff]  }
 0x3d7   :  { %8520 = vmatprep.subr.bf16.mxu1 %v16611_v14  ;;  %v16689_v38 = vld [vmem:[#allocation3 + $0x1f00] ss:$8 sps:$4 sm:$0xff]   ;;  %v16694_v14 = vld [vmem:[#allocation3 + $0x1714] ss:$8 sps:$4 sm:$0xff]  }
 0x3d9   :  { %6797 = vmatpush1.bf16.msra.mxu0 %v16606_v2  ;;  %v16697_v2 = vld [vmem:[#allocation3 + $0x1f14] ss:$8 sps:$4 sm:$0xff]  }
 0x3da   :  { %8521 = vmatpush1.bf16.msra.mxu1 %v16609_v3  ;;  %6798 = vmatprep.subr.bf16.mxu0 %v16614_v53  ;;  %v5247_v3 = vcombine.high %v18151_v60, %v18151_v60  ;;  %v6971_v53 = vcombine.high %v18154_v61, %v18154_v61  ;;  %v16698_v60 = vld [vmem:[#allocation3 + $0x1720] ss:$8 sps:$4 sm:$0xff]   ;;  %v16706_v61 = vld [vmem:[#allocation3 + $0x1734] ss:$8 sps:$4 sm:$0xff]  }
 0x3db   :  { %8522 = vmatprep.subr.bf16.mxu1 %v16617_v55  ;;  %v16700_v55 = vld [vmem:[#allocation3 + $0x1724] ss:$8 sps:$4 sm:$0xff]  }
 0x3dd   :  { %6799 = vmatpush1.bf16.msra.mxu0 %v16612_v54  ;;  %v16703_v54 = vld [vmem:[#allocation3 + $0x1f24] ss:$8 sps:$4 sm:$0xff]  }
 0x3de   :  { %8523 = vmatpush1.bf16.msra.mxu1 %v16615_v4  ;;  %6800 = vmatprep.subr.bf16.mxu0 %v16620_v57  ;;  %v16701_v4 = vld [vmem:[#allocation3 + $0x1f20] ss:$8 sps:$4 sm:$0xff]   ;;  %v16709_v57 = vld [vmem:[#allocation3 + $0x1f34] ss:$8 sps:$4 sm:$0xff]  }
 0x3df   :  { %8524 = vmatprep.subr.bf16.mxu1 %v16623_v5  ;;  %v16704_v5 = vld [vmem:[#allocation3 + $0x1730] ss:$8 sps:$4 sm:$0xff]  }
 0x3e1   :  { %6801 = vmatpush1.bf16.msra.mxu0 %v16618_v6  ;;  %v16707_v6 = vld [vmem:[#allocation3 + $0x1f30] ss:$8 sps:$4 sm:$0xff]  }
 0x3e2   :  { %8525 = vmatpush1.bf16.msra.mxu1 %v16621_v7  ;;  %6802 = vmatprep.subr.bf16.mxu0 %v16626_v8  ;;  %v16712_v7 = vld [vmem:[#allocation3 + $0x1744] ss:$8 sps:$4 sm:$0xff]  }
 0x3e3   :  { %8526 = vmatprep.subr.bf16.mxu1 %v16629_v18  ;;  %v16715_v8 = vld [vmem:[#allocation3 + $0x1f44] ss:$8 sps:$4 sm:$0xff]   ;;  %v16710_v18 = vld [vmem:[#allocation3 + $0x1740] ss:$8 sps:$4 sm:$0xff]  }
 0x3e5   :  { %6803 = vmatpush1.bf16.msra.mxu0 %v16624_v20  ;;  %v16713_v20 = vld [vmem:[#allocation3 + $0x1f40] ss:$8 sps:$4 sm:$0xff]  }
 0x3e6   :  { %8527 = vmatpush1.bf16.msra.mxu1 %v16627_v21  ;;  %6804 = vmatprep.subr.bf16.mxu0 %v16632_v22  ;;  %v16718_v21 = vld [vmem:[#allocation3 + $0x1754] ss:$8 sps:$4 sm:$0xff]  }
 0x3e7   :  { %8528 = vmatprep.subr.bf16.mxu1 %v16635_v23  ;;  %v16721_v22 = vld [vmem:[#allocation3 + $0x1f54] ss:$8 sps:$4 sm:$0xff]   ;;  %v16716_v23 = vld [vmem:[#allocation3 + $0x1750] ss:$8 sps:$4 sm:$0xff]  }
 0x3e9   :  { %6805 = vmatpush1.bf16.msra.mxu0 %v16630_v40  ;;  %v16719_v40 = vld [vmem:[#allocation3 + $0x1f50] ss:$8 sps:$4 sm:$0xff]  }
 0x3ea   :  { %8529 = vmatpush1.bf16.msra.mxu1 %v16633_v41  ;;  %6806 = vmatprep.subr.bf16.mxu0 %v16638_v52  ;;  %v16724_v41 = vld [vmem:[#allocation3 + $0x1764] ss:$8 sps:$4 sm:$0xff]  }
 0x3eb   :  { %8530 = vmatprep.subr.bf16.mxu1 %v16641_v26  ;;  %v16727_v52 = vld [vmem:[#allocation3 + $0x1f64] ss:$8 sps:$4 sm:$0xff]   ;;  %v16722_v26 = vld [vmem:[#allocation3 + $0x1760] ss:$8 sps:$4 sm:$0xff]  }
 0x3ed   :  { %6807 = vmatpush1.bf16.msra.mxu0 %v16636_v42  ;;  %v16725_v42 = vld [vmem:[#allocation3 + $0x1f60] ss:$8 sps:$4 sm:$0xff]  }
 0x3ee   :  { %8531 = vmatpush1.bf16.msra.mxu1 %v16639_v12  ;;  %6808 = vmatprep.subr.bf16.mxu0 %v16644_v56  ;;  %v16730_v12 = vld [vmem:[#allocation3 + $0x1774] ss:$8 sps:$4 sm:$0xff]  }
 0x3ef   :  { %8532 = vmatprep.subr.bf16.mxu1 %v16647_v13  ;;  %v16733_v56 = vld [vmem:[#allocation3 + $0x1f74] ss:$8 sps:$4 sm:$0xff]   ;;  %v16728_v13 = vld [vmem:[#allocation3 + $0x1770] ss:$8 sps:$4 sm:$0xff]  }
 0x3f1   :  { %6809 = vmatpush1.bf16.msra.mxu0 %v16642_v27  ;;  %v16731_v27 = vld [vmem:[#allocation3 + $0x1f70] ss:$8 sps:$4 sm:$0xff]  }
 0x3f2   :  { %8533 = vmatpush1.bf16.msra.mxu1 %v16645_v28  ;;  %6810 = vmatprep.subr.bf16.mxu0 %v16650_v29  ;;  %v16736_v28 = vld [vmem:[#allocation3 + $0x1784] ss:$8 sps:$4 sm:$0xff]  }
 0x3f3   :  { %8534 = vmatprep.subr.bf16.mxu1 %v16653_v58  ;;  %v16739_v29 = vld [vmem:[#allocation3 + $0x1f84] ss:$8 sps:$4 sm:$0xff]   ;;  %v16734_v58 = vld [vmem:[#allocation3 + $0x1780] ss:$8 sps:$4 sm:$0xff]  }
 0x3f5   :  { %6811 = vmatpush1.bf16.msra.mxu0 %v16648_v59  ;;  %v16737_v59 = vld [vmem:[#allocation3 + $0x1f80] ss:$8 sps:$4 sm:$0xff]  }
 0x3f6   :  { %8535 = vmatpush1.bf16.msra.mxu1 %v16651_v34  ;;  %6812 = vmatprep.subr.bf16.mxu0 %v16656_v17  ;;  %v16742_v34 = vld [vmem:[#allocation3 + $0x1794] ss:$8 sps:$4 sm:$0xff]  }
 0x3f7   :  { %8536 = vmatprep.subr.bf16.mxu1 %v16659_v43  ;;  %v16745_v17 = vld [vmem:[#allocation3 + $0x1f94] ss:$8 sps:$4 sm:$0xff]   ;;  %v16740_v43 = vld [vmem:[#allocation3 + $0x1790] ss:$8 sps:$4 sm:$0xff]  }
 0x3f9   :  { %6813 = vmatpush1.bf16.msra.mxu0 %v16654_v44  ;;  %v16743_v44 = vld [vmem:[#allocation3 + $0x1f90] ss:$8 sps:$4 sm:$0xff]  }
 0x3fa   :  { %8537 = vmatpush1.bf16.msra.mxu1 %v16657_v45  ;;  %6814 = vmatprep.subr.bf16.mxu0 %v16662_v46  ;;  %v16748_v45 = vld [vmem:[#allocation3 + $0x17a4] ss:$8 sps:$4 sm:$0xff]  }
 0x3fb   :  { %8538 = vmatprep.subr.bf16.mxu1 %v16665_v30  ;;  %v16751_v46 = vld [vmem:[#allocation3 + $0x1fa4] ss:$8 sps:$4 sm:$0xff]   ;;  %v16746_v30 = vld [vmem:[#allocation3 + $0x17a0] ss:$8 sps:$4 sm:$0xff]  }
 0x3fd   :  { %6815 = vmatpush1.bf16.msra.mxu0 %v16660_v9  ;;  %v16749_v9 = vld [vmem:[#allocation3 + $0x1fa0] ss:$8 sps:$4 sm:$0xff]  }
 0x3fe   :  { %8539 = vmatpush1.bf16.msra.mxu1 %v16663_v31  ;;  %6816 = vmatprep.subr.bf16.mxu0 %v16668_v39  ;;  %v16754_v31 = vld [vmem:[#allocation3 + $0x17b4] ss:$8 sps:$4 sm:$0xff]  }
 0x3ff   :  { %8540 = vmatprep.subr.bf16.mxu1 %v16671_v25  ;;  %v16757_v39 = vld [vmem:[#allocation3 + $0x1fb4] ss:$8 sps:$4 sm:$0xff]   ;;  %v16752_v25 = vld [vmem:[#allocation3 + $0x17b0] ss:$8 sps:$4 sm:$0xff]  }
 0x401   :  { %6817 = vmatpush1.bf16.msra.mxu0 %v16666_v15  ;;  %v16755_v15 = vld [vmem:[#allocation3 + $0x1fb0] ss:$8 sps:$4 sm:$0xff]  }
 0x402   :  { %8541 = vmatpush1.bf16.msra.mxu1 %v16669_v47  ;;  %6818 = vmatprep.subr.bf16.mxu0 %v16674_v48  ;;  %v16760_v47 = vld [vmem:[#allocation3 + $0x17c4] ss:$8 sps:$4 sm:$0xff]  }
 0x403   :  { %8542 = vmatprep.subr.bf16.mxu1 %v16677_v36  ;;  %v16763_v48 = vld [vmem:[#allocation3 + $0x1fc4] ss:$8 sps:$4 sm:$0xff]   ;;  %v16758_v36 = vld [vmem:[#allocation3 + $0x17c0] ss:$8 sps:$4 sm:$0xff]  }
 0x405   :  { %6819 = vmatpush1.bf16.msra.mxu0 %v16672_v50  ;;  %v16761_v50 = vld [vmem:[#allocation3 + $0x1fc0] ss:$8 sps:$4 sm:$0xff]  }
 0x406   :  { %8543 = vmatpush1.bf16.msra.mxu1 %v16675_v37  ;;  %6820 = vmatprep.subr.bf16.mxu0 %v16680_v51  ;;  %v16766_v37 = vld [vmem:[#allocation3 + $0x17d4] ss:$8 sps:$4 sm:$0xff]  }
 0x407   :  { %8544 = vmatprep.subr.bf16.mxu1 %v16683_v32  ;;  %v16769_v51 = vld [vmem:[#allocation3 + $0x1fd4] ss:$8 sps:$4 sm:$0xff]   ;;  %v16764_v32 = vld [vmem:[#allocation3 + $0x17d0] ss:$8 sps:$4 sm:$0xff]  }
 0x409   :  { %6821 = vmatpush1.bf16.msra.mxu0 %v16678_v33  ;;  %v16767_v33 = vld [vmem:[#allocation3 + $0x1fd0] ss:$8 sps:$4 sm:$0xff]  }
 0x40a   :  { %8545 = vmatpush1.bf16.msra.mxu1 %v16681_v35  ;;  %6831 = vmatprep.subr.bf16.mxu0 %v16687_v62  ;;  %v16772_v35 = vld [vmem:[#allocation3 + $0x17e4] ss:$8 sps:$4 sm:$0xff]  }
 0x40b   :  { %8555 = vmatprep.subr.bf16.mxu1 %v16691_v16  ;;  %v16775_v62 = vld [vmem:[#allocation3 + $0x1fe4] ss:$8 sps:$4 sm:$0xff]  }
 0x40c   :  { %6823 = vmatmul.mubr.bf16.vlgmr.msra.gmra.mrb[4].mxu0 %v18160_v63  ;;  %v18175_v16 = vld [vmem:[%s18402_s0 + $0x40] sm:$0xff] }
 0x40d   :  { %8547 = vmatmul.mubr.bf16.vlgmr.msra.gmra.mrb[4].mxu1 %v18164_v0  ;;  %6832 = vmatpush1.bf16.msra.mxu0 %v16685_v1  ;;  %v18180_v1 = vld [vmem:[%s18402_s0 + $0x50] sm:$0xff] }
 0x40e   :  { %8556 = vmatpush1.bf16.msra.mxu1 %v16689_v38  ;;  %6833 = vmatprep.subr.bf16.mxu0 %v16694_v14  ;;  %v16770_v38 = vld [vmem:[#allocation3 + $0x17e0] ss:$8 sps:$4 sm:$0xff]  }
 0x40f   :  { %8557 = vmatprep.subr.bf16.mxu1 %v16697_v2  ;;  %6863 = vmatprep.mubr.bf16.mxu0 %v5247_v3  ;;  %v16773_v14 = vld [vmem:[#allocation3 + $0x1fe0] ss:$8 sps:$4 sm:$0xff]   ;;  %v16778_v2 = vld [vmem:[#allocation3 + $0x17f4] ss:$8 sps:$4 sm:$0xff]  }
 0x410   :  { %8587 = vmatprep.mubr.bf16.mxu1 %v6971_v53  ;;  %v16781_v3 = vld [vmem:[#allocation3 + $0x1ff4] ss:$8 sps:$4 sm:$0xff]   ;;  %v18184_v53 = vrot.slane %v18175_v16, %v17850_v49 }
 0x411   :  { %6834 = vmatpush1.bf16.msra.mxu0 %v16692_v11  ;;  %v18188_v11 = vrot.slane %v18180_v1, %v17850_v49 }
 0x412   :  { %8558 = vmatpush1.bf16.msra.mxu1 %v16695_v24  ;;  %6835 = vmatprep.subr.bf16.mxu0 %v16700_v55  ;;  %v16776_v24 = vld [vmem:[#allocation3 + $0x17f0] ss:$8 sps:$4 sm:$0xff]  }
 0x413   :  { %8559 = vmatprep.subr.bf16.mxu1 %v16703_v54  ;;  %v16779_v55 = vld [vmem:[#allocation3 + $0x1ff0] ss:$8 sps:$4 sm:$0xff]   ;;  %v16784_v54 = vld [vmem:[#allocation3 + $0x2004] ss:$8 sps:$4 sm:$0xff]  }
 0x415   :  { %6836 = vmatpush1.bf16.msra.mxu0 %v16698_v60  ;;  %v16787_v60 = vld [vmem:[#allocation3 + $0x2804] ss:$8 sps:$4 sm:$0xff]  }
 0x416   :  { %8560 = vmatpush1.bf16.msra.mxu1 %v16701_v4  ;;  %6837 = vmatprep.subr.bf16.mxu0 %v16706_v61  ;;  %v8613_v4 = vcombine.high %v18184_v53, %v18184_v53  ;;  %v10337_v61 = vcombine.high %v18188_v11, %v18188_v11 }
 0x417   :  { %8561 = vmatprep.subr.bf16.mxu1 %v16709_v57  ;;  %v5245_v57 = vcombine.high %v18160_v63, %v18160_v63  ;;  %v16788_v63 = vld [vmem:[#allocation3 + $0x2010] ss:$8 sps:$4 sm:$0xff]  }
 0x419   :  { %6838 = vmatpush1.bf16.msra.mxu0 %v16704_v5  ;;  %v6969_v5 = vcombine.high %v18164_v0, %v18164_v0  ;;  %v16791_v0 = vld [vmem:[#allocation3 + $0x2810] ss:$8 sps:$4 sm:$0xff]  }
 0x41a   :  { %8562 = vmatpush1.bf16.msra.mxu1 %v16707_v6  ;;  %6839 = vmatprep.subr.bf16.mxu0 %v16712_v7  ;;  %v16782_v6 = vld [vmem:[#allocation3 + $0x2000] ss:$8 sps:$4 sm:$0xff]  }
 0x41b   :  { %8563 = vmatprep.subr.bf16.mxu1 %v16715_v8  ;;  %v16785_v7 = vld [vmem:[#allocation3 + $0x2800] ss:$8 sps:$4 sm:$0xff]   ;;  %v16790_v8 = vld [vmem:[#allocation3 + $0x2014] ss:$8 sps:$4 sm:$0xff]  }
 0x41d   :  { %6840 = vmatpush1.bf16.msra.mxu0 %v16710_v18  ;;  %v16793_v18 = vld [vmem:[#allocation3 + $0x2814] ss:$8 sps:$4 sm:$0xff]  }
 0x41e   :  { %8564 = vmatpush1.bf16.msra.mxu1 %v16713_v20  ;;  %6841 = vmatprep.subr.bf16.mxu0 %v16718_v21  ;;  %v18199_v20 = vrot.slane %v8613_v4, %v17850_v49  ;;  %v18202_v21 = vrot.slane %v10337_v61, %v17850_v49  ;;  %v16865_v4 = vld [vmem:[#allocation3 + $0x28d4] ss:$8 sps:$4 sm:$0xff]   ;;  %v16860_v61 = vld [vmem:[#allocation3 + $0x20d0] ss:$8 sps:$4 sm:$0xff]  }
 0x41f   :  { %8565 = vmatprep.subr.bf16.mxu1 %v16721_v22  ;;  %v16796_v22 = vld [vmem:[#allocation3 + $0x2024] ss:$8 sps:$4 sm:$0xff]  }
 0x421   :  { %6842 = vmatpush1.bf16.msra.mxu0 %v16716_v23  ;;  %v16799_v23 = vld [vmem:[#allocation3 + $0x2824] ss:$8 sps:$4 sm:$0xff]  }
 0x422   :  { %8566 = vmatpush1.bf16.msra.mxu1 %v16719_v40  ;;  %6843 = vmatprep.subr.bf16.mxu0 %v16724_v41  ;;  %v16794_v40 = vld [vmem:[#allocation3 + $0x2020] ss:$8 sps:$4 sm:$0xff]  }
 0x423   :  { %8567 = vmatprep.subr.bf16.mxu1 %v16727_v52  ;;  %v16797_v41 = vld [vmem:[#allocation3 + $0x2820] ss:$8 sps:$4 sm:$0xff]   ;;  %v16802_v52 = vld [vmem:[#allocation3 + $0x2034] ss:$8 sps:$4 sm:$0xff]  }
 0x425   :  { %6844 = vmatpush1.bf16.msra.mxu0 %v16722_v26  ;;  %v16805_v26 = vld [vmem:[#allocation3 + $0x2834] ss:$8 sps:$4 sm:$0xff]  }
 0x426   :  { %8568 = vmatpush1.bf16.msra.mxu1 %v16725_v42  ;;  %6845 = vmatprep.subr.bf16.mxu0 %v16730_v12  ;;  %v16800_v42 = vld [vmem:[#allocation3 + $0x2030] ss:$8 sps:$4 sm:$0xff]  }
 0x427   :  { %8569 = vmatprep.subr.bf16.mxu1 %v16733_v56  ;;  %v16803_v12 = vld [vmem:[#allocation3 + $0x2830] ss:$8 sps:$4 sm:$0xff]   ;;  %v16808_v56 = vld [vmem:[#allocation3 + $0x2044] ss:$8 sps:$4 sm:$0xff]  }
 0x429   :  { %6846 = vmatpush1.bf16.msra.mxu0 %v16728_v13  ;;  %v16811_v13 = vld [vmem:[#allocation3 + $0x2844] ss:$8 sps:$4 sm:$0xff]  }
 0x42a   :  { %8570 = vmatpush1.bf16.msra.mxu1 %v16731_v27  ;;  %6847 = vmatprep.subr.bf16.mxu0 %v16736_v28  ;;  %v16806_v27 = vld [vmem:[#allocation3 + $0x2040] ss:$8 sps:$4 sm:$0xff]  }
 0x42b   :  { %8571 = vmatprep.subr.bf16.mxu1 %v16739_v29  ;;  %v16809_v28 = vld [vmem:[#allocation3 + $0x2840] ss:$8 sps:$4 sm:$0xff]   ;;  %v16814_v29 = vld [vmem:[#allocation3 + $0x2054] ss:$8 sps:$4 sm:$0xff]  }
 0x42d   :  { %6848 = vmatpush1.bf16.msra.mxu0 %v16734_v58  ;;  %v16817_v58 = vld [vmem:[#allocation3 + $0x2854] ss:$8 sps:$4 sm:$0xff]  }
 0x42e   :  { %8572 = vmatpush1.bf16.msra.mxu1 %v16737_v59  ;;  %6849 = vmatprep.subr.bf16.mxu0 %v16742_v34  ;;  %v16812_v59 = vld [vmem:[#allocation3 + $0x2050] ss:$8 sps:$4 sm:$0xff]  }
 0x42f   :  { %8573 = vmatprep.subr.bf16.mxu1 %v16745_v17  ;;  %v16815_v34 = vld [vmem:[#allocation3 + $0x2850] ss:$8 sps:$4 sm:$0xff]   ;;  %v16820_v17 = vld [vmem:[#allocation3 + $0x2064] ss:$8 sps:$4 sm:$0xff]  }
 0x431   :  { %6850 = vmatpush1.bf16.msra.mxu0 %v16740_v43  ;;  %v16823_v43 = vld [vmem:[#allocation3 + $0x2864] ss:$8 sps:$4 sm:$0xff]  }
 0x432   :  { %8574 = vmatpush1.bf16.msra.mxu1 %v16743_v44  ;;  %6851 = vmatprep.subr.bf16.mxu0 %v16748_v45  ;;  %v16818_v44 = vld [vmem:[#allocation3 + $0x2060] ss:$8 sps:$4 sm:$0xff]  }
 0x433   :  { %8575 = vmatprep.subr.bf16.mxu1 %v16751_v46  ;;  %v16821_v45 = vld [vmem:[#allocation3 + $0x2860] ss:$8 sps:$4 sm:$0xff]   ;;  %v16826_v46 = vld [vmem:[#allocation3 + $0x2074] ss:$8 sps:$4 sm:$0xff]  }
 0x435   :  { %6852 = vmatpush1.bf16.msra.mxu0 %v16746_v30  ;;  %v16829_v30 = vld [vmem:[#allocation3 + $0x2874] ss:$8 sps:$4 sm:$0xff]  }
 0x436   :  { %8576 = vmatpush1.bf16.msra.mxu1 %v16749_v9  ;;  %6853 = vmatprep.subr.bf16.mxu0 %v16754_v31  ;;  %v16824_v9 = vld [vmem:[#allocation3 + $0x2070] ss:$8 sps:$4 sm:$0xff]  }
 0x437   :  { %8577 = vmatprep.subr.bf16.mxu1 %v16757_v39  ;;  %v16827_v31 = vld [vmem:[#allocation3 + $0x2870] ss:$8 sps:$4 sm:$0xff]   ;;  %v16832_v39 = vld [vmem:[#allocation3 + $0x2084] ss:$8 sps:$4 sm:$0xff]  }
 0x439   :  { %6854 = vmatpush1.bf16.msra.mxu0 %v16752_v25  ;;  %v16835_v25 = vld [vmem:[#allocation3 + $0x2884] ss:$8 sps:$4 sm:$0xff]  }
 0x43a   :  { %8578 = vmatpush1.bf16.msra.mxu1 %v16755_v15  ;;  %6855 = vmatprep.subr.bf16.mxu0 %v16760_v47  ;;  %v16830_v15 = vld [vmem:[#allocation3 + $0x2080] ss:$8 sps:$4 sm:$0xff]  }
 0x43b   :  { %8579 = vmatprep.subr.bf16.mxu1 %v16763_v48  ;;  %v16833_v47 = vld [vmem:[#allocation3 + $0x2880] ss:$8 sps:$4 sm:$0xff]   ;;  %v16838_v48 = vld [vmem:[#allocation3 + $0x2094] ss:$8 sps:$4 sm:$0xff]  }
 0x43d   :  { %6856 = vmatpush1.bf16.msra.mxu0 %v16758_v36  ;;  %v16841_v36 = vld [vmem:[#allocation3 + $0x2894] ss:$8 sps:$4 sm:$0xff]  }
 0x43e   :  { %8580 = vmatpush1.bf16.msra.mxu1 %v16761_v50  ;;  %6857 = vmatprep.subr.bf16.mxu0 %v16766_v37  ;;  %v16836_v50 = vld [vmem:[#allocation3 + $0x2090] ss:$8 sps:$4 sm:$0xff]  }
 0x43f   :  { %8581 = vmatprep.subr.bf16.mxu1 %v16769_v51  ;;  %v16839_v37 = vld [vmem:[#allocation3 + $0x2890] ss:$8 sps:$4 sm:$0xff]   ;;  %v16844_v51 = vld [vmem:[#allocation3 + $0x20a4] ss:$8 sps:$4 sm:$0xff]  }
 0x441   :  { %6858 = vmatpush1.bf16.msra.mxu0 %v16764_v32  ;;  %v16847_v32 = vld [vmem:[#allocation3 + $0x28a4] ss:$8 sps:$4 sm:$0xff]  }
 0x442   :  { %8582 = vmatpush1.bf16.msra.mxu1 %v16767_v33  ;;  %6859 = vmatprep.subr.bf16.mxu0 %v16772_v35  ;;  %v16842_v33 = vld [vmem:[#allocation3 + $0x20a0] ss:$8 sps:$4 sm:$0xff]  }
 0x443   :  { %8583 = vmatprep.subr.bf16.mxu1 %v16775_v62  ;;  %v16845_v35 = vld [vmem:[#allocation3 + $0x28a0] ss:$8 sps:$4 sm:$0xff]   ;;  %v16850_v62 = vld [vmem:[#allocation3 + $0x20b4] ss:$8 sps:$4 sm:$0xff]  }
 0x445   :  { %6860 = vmatpush1.bf16.msra.mxu0 %v16770_v38  ;;  %v16853_v38 = vld [vmem:[#allocation3 + $0x28b4] ss:$8 sps:$4 sm:$0xff]  }
 0x446   :  { %8584 = vmatpush1.bf16.msra.mxu1 %v16773_v14  ;;  %6861 = vmatprep.subr.bf16.mxu0 %v16778_v2  ;;  %v16848_v14 = vld [vmem:[#allocation3 + $0x20b0] ss:$8 sps:$4 sm:$0xff]  }
 0x447   :  { %8585 = vmatprep.subr.bf16.mxu1 %v16781_v3  ;;  %v16851_v2 = vld [vmem:[#allocation3 + $0x28b0] ss:$8 sps:$4 sm:$0xff]   ;;  %v16856_v3 = vld [vmem:[#allocation3 + $0x20c4] ss:$8 sps:$4 sm:$0xff]  }
 0x449   :  { %6862 = vmatpush1.bf16.msra.mxu0 %v16776_v24  ;;  %v16859_v24 = vld [vmem:[#allocation3 + $0x28c4] ss:$8 sps:$4 sm:$0xff]  }
 0x44a   :  { %8586 = vmatpush1.bf16.msra.mxu1 %v16779_v55  ;;  %9992 = vmatprep.subr.bf16.mxu0 %v16784_v54  ;;  %v16854_v55 = vld [vmem:[#allocation3 + $0x20c0] ss:$8 sps:$4 sm:$0xff]  }
 0x44b   :  { %11716 = vmatprep.subr.bf16.mxu1 %v16787_v60  ;;  %v16857_v54 = vld [vmem:[#allocation3 + $0x28c0] ss:$8 sps:$4 sm:$0xff]   ;;  %v16862_v60 = vld [vmem:[#allocation3 + $0x20d4] ss:$8 sps:$4 sm:$0xff]  }
 0x44c   :  { %6864 = vmatmul.mubr.bf16.vlgmr.msra.gmra.mrb[4].mxu0 %v5245_v57  ;;  %v16863_v57 = vld [vmem:[#allocation3 + $0x28d0] ss:$8 sps:$4 sm:$0xff]  }
 0x44d   :  { %8588 = vmatmul.mubr.bf16.vlgmr.msra.gmra.mrb[4].mxu1 %v6969_v5  ;;  %9993 = vmatpush1.bf16.msra.mxu0 %v16782_v6  ;;  %v16868_v5 = vld [vmem:[#allocation3 + $0x20e4] ss:$8 sps:$4 sm:$0xff]  }
 0x44e   :  { %11717 = vmatpush1.bf16.msra.mxu1 %v16785_v7  ;;  %9994 = vmatprep.subr.bf16.mxu0 %v16790_v8  ;;  %v16871_v6 = vld [vmem:[#allocation3 + $0x28e4] ss:$8 sps:$4 sm:$0xff]   ;;  %v16866_v7 = vld [vmem:[#allocation3 + $0x20e0] ss:$8 sps:$4 sm:$0xff]  }
 0x44f   :  { %11718 = vmatprep.subr.bf16.mxu1 %v16793_v18  ;;  %10024 = vmatprep.mubr.bf16.mxu0 %v18199_v20  ;;  %v16869_v8 = vld [vmem:[#allocation3 + $0x28e0] ss:$8 sps:$4 sm:$0xff]   ;;  %v16874_v18 = vld [vmem:[#allocation3 + $0x20f4] ss:$8 sps:$4 sm:$0xff]  }
 0x450   :  { %11748 = vmatprep.mubr.bf16.mxu1 %v18202_v21 }
 0x451   :  { %9995 = vmatpush1.bf16.msra.mxu0 %v16788_v63  ;;  %v16877_v63 = vld [vmem:[#allocation3 + $0x28f4] ss:$8 sps:$4 sm:$0xff]  }
 0x452   :  { %11719 = vmatpush1.bf16.msra.mxu1 %v16791_v0  ;;  %9996 = vmatprep.subr.bf16.mxu0 %v16796_v22  ;;  %v16872_v0 = vld [vmem:[#allocation3 + $0x20f0] ss:$8 sps:$4 sm:$0xff]  }
 0x453   :  { %11720 = vmatprep.subr.bf16.mxu1 %v16799_v23  ;;  %v16875_v22 = vld [vmem:[#allocation3 + $0x28f0] ss:$8 sps:$4 sm:$0xff]   ;;  %v16880_v23 = vld [vmem:[#allocation3 + $0x2104] ss:$8 sps:$4 sm:$0xff]  }
 0x455   :  { %9997 = vmatpush1.bf16.msra.mxu0 %v16794_v40  ;;  %v16883_v40 = vld [vmem:[#allocation3 + $0x2904] ss:$8 sps:$4 sm:$0xff]  }
 0x456   :  { %11721 = vmatpush1.bf16.msra.mxu1 %v16797_v41  ;;  %9998 = vmatprep.subr.bf16.mxu0 %v16802_v52  ;;  %v18208_v41 = vrot.slane %v18184_v53, %v17850_v49  ;;  %v18212_v52 = vrot.slane %v18188_v11, %v17850_v49  ;;  %v16884_v53 = vld [vmem:[#allocation3 + $0x2110] ss:$8 sps:$4 sm:$0xff]  }
 0x457   :  { %11722 = vmatprep.subr.bf16.mxu1 %v16805_v26  ;;  %v16878_v26 = vld [vmem:[#allocation3 + $0x2100] ss:$8 sps:$4 sm:$0xff]   ;;  %v16887_v11 = vld [vmem:[#allocation3 + $0x2910] ss:$8 sps:$4 sm:$0xff]  }
 0x459   :  { %9999 = vmatpush1.bf16.msra.mxu0 %v16800_v42  ;;  %v16881_v42 = vld [vmem:[#allocation3 + $0x2900] ss:$8 sps:$4 sm:$0xff]  }
 0x45a   :  { %11723 = vmatpush1.bf16.msra.mxu1 %v16803_v12  ;;  %10000 = vmatprep.subr.bf16.mxu0 %v16808_v56  ;;  %v16886_v12 = vld [vmem:[#allocation3 + $0x2114] ss:$8 sps:$4 sm:$0xff]  }
 0x45b   :  { %11724 = vmatprep.subr.bf16.mxu1 %v16811_v13  ;;  %v16889_v56 = vld [vmem:[#allocation3 + $0x2914] ss:$8 sps:$4 sm:$0xff]   ;;  %v8645_v13 = vcombine.high %v18199_v20, %v18199_v20  ;;  %v16890_v20 = vld [vmem:[#allocation3 + $0x2120] ss:$8 sps:$4 sm:$0xff]  }
 0x45d   :  { %10001 = vmatpush1.bf16.msra.mxu0 %v16806_v27  ;;  %v10369_v27 = vcombine.high %v18202_v21, %v18202_v21  ;;  %v16898_v21 = vld [vmem:[#allocation3 + $0x2134] ss:$8 sps:$4 sm:$0xff]  }
 0x45e   :  { %11725 = vmatpush1.bf16.msra.mxu1 %v16809_v28  ;;  %10002 = vmatprep.subr.bf16.mxu0 %v16814_v29  ;;  %v16892_v28 = vld [vmem:[#allocation3 + $0x2124] ss:$8 sps:$4 sm:$0xff]  }
 0x45f   :  { %11726 = vmatprep.subr.bf16.mxu1 %v16817_v58  ;;  %v16895_v29 = vld [vmem:[#allocation3 + $0x2924] ss:$8 sps:$4 sm:$0xff]   ;;  %v16893_v58 = vld [vmem:[#allocation3 + $0x2920] ss:$8 sps:$4 sm:$0xff]  }
 0x461   :  { %10003 = vmatpush1.bf16.msra.mxu0 %v16812_v59  ;;  %v16901_v59 = vld [vmem:[#allocation3 + $0x2934] ss:$8 sps:$4 sm:$0xff]  }
 0x462   :  { %11727 = vmatpush1.bf16.msra.mxu1 %v16815_v34  ;;  %10004 = vmatprep.subr.bf16.mxu0 %v16820_v17  ;;  %v16896_v34 = vld [vmem:[#allocation3 + $0x2130] ss:$8 sps:$4 sm:$0xff]  }
 0x463   :  { %11728 = vmatprep.subr.bf16.mxu1 %v16823_v43  ;;  %v16899_v17 = vld [vmem:[#allocation3 + $0x2930] ss:$8 sps:$4 sm:$0xff]   ;;  %v16904_v43 = vld [vmem:[#allocation3 + $0x2144] ss:$8 sps:$4 sm:$0xff]  }
 0x465   :  { %10005 = vmatpush1.bf16.msra.mxu0 %v16818_v44  ;;  %v16907_v44 = vld [vmem:[#allocation3 + $0x2944] ss:$8 sps:$4 sm:$0xff]  }
 0x466   :  { %11729 = vmatpush1.bf16.msra.mxu1 %v16821_v45  ;;  %10006 = vmatprep.subr.bf16.mxu0 %v16826_v46  ;;  %v16902_v45 = vld [vmem:[#allocation3 + $0x2140] ss:$8 sps:$4 sm:$0xff]  }
 0x467   :  { %11730 = vmatprep.subr.bf16.mxu1 %v16829_v30  ;;  %v16905_v46 = vld [vmem:[#allocation3 + $0x2940] ss:$8 sps:$4 sm:$0xff]   ;;  %v16910_v30 = vld [vmem:[#allocation3 + $0x2154] ss:$8 sps:$4 sm:$0xff]  }
 0x469   :  { %10007 = vmatpush1.bf16.msra.mxu0 %v16824_v9  ;;  %v16913_v9 = vld [vmem:[#allocation3 + $0x2954] ss:$8 sps:$4 sm:$0xff]  }
 0x46a   :  { %11731 = vmatpush1.bf16.msra.mxu1 %v16827_v31  ;;  %10008 = vmatprep.subr.bf16.mxu0 %v16832_v39  ;;  %v16908_v31 = vld [vmem:[#allocation3 + $0x2150] ss:$8 sps:$4 sm:$0xff]  }
 0x46b   :  { %11732 = vmatprep.subr.bf16.mxu1 %v16835_v25  ;;  %v16911_v39 = vld [vmem:[#allocation3 + $0x2950] ss:$8 sps:$4 sm:$0xff]   ;;  %v16916_v25 = vld [vmem:[#allocation3 + $0x2164] ss:$8 sps:$4 sm:$0xff]  }
 0x46d   :  { %10009 = vmatpush1.bf16.msra.mxu0 %v16830_v15  ;;  %v16919_v15 = vld [vmem:[#allocation3 + $0x2964] ss:$8 sps:$4 sm:$0xff]  }
 0x46e   :  { %11733 = vmatpush1.bf16.msra.mxu1 %v16833_v47  ;;  %10010 = vmatprep.subr.bf16.mxu0 %v16838_v48  ;;  %v16914_v47 = vld [vmem:[#allocation3 + $0x2160] ss:$8 sps:$4 sm:$0xff]  }
 0x46f   :  { %11734 = vmatprep.subr.bf16.mxu1 %v16841_v36  ;;  %v16917_v48 = vld [vmem:[#allocation3 + $0x2960] ss:$8 sps:$4 sm:$0xff]   ;;  %v16922_v36 = vld [vmem:[#allocation3 + $0x2174] ss:$8 sps:$4 sm:$0xff]  }
 0x471   :  { %10011 = vmatpush1.bf16.msra.mxu0 %v16836_v50  ;;  %v16925_v50 = vld [vmem:[#allocation3 + $0x2974] ss:$8 sps:$4 sm:$0xff]  }
 0x472   :  { %11735 = vmatpush1.bf16.msra.mxu1 %v16839_v37  ;;  %10012 = vmatprep.subr.bf16.mxu0 %v16844_v51  ;;  %v16920_v37 = vld [vmem:[#allocation3 + $0x2170] ss:$8 sps:$4 sm:$0xff]  }
 0x473   :  { %11736 = vmatprep.subr.bf16.mxu1 %v16847_v32  ;;  %v16923_v51 = vld [vmem:[#allocation3 + $0x2970] ss:$8 sps:$4 sm:$0xff]   ;;  %v16928_v32 = vld [vmem:[#allocation3 + $0x2184] ss:$8 sps:$4 sm:$0xff]  }
 0x475   :  { %10013 = vmatpush1.bf16.msra.mxu0 %v16842_v33  ;;  %v16931_v33 = vld [vmem:[#allocation3 + $0x2984] ss:$8 sps:$4 sm:$0xff]  }
 0x476   :  { %11737 = vmatpush1.bf16.msra.mxu1 %v16845_v35  ;;  %10014 = vmatprep.subr.bf16.mxu0 %v16850_v62  ;;  %v16926_v35 = vld [vmem:[#allocation3 + $0x2180] ss:$8 sps:$4 sm:$0xff]  }
 0x477   :  { %11738 = vmatprep.subr.bf16.mxu1 %v16853_v38  ;;  %v16929_v62 = vld [vmem:[#allocation3 + $0x2980] ss:$8 sps:$4 sm:$0xff]   ;;  %v16934_v38 = vld [vmem:[#allocation3 + $0x2194] ss:$8 sps:$4 sm:$0xff]  }
 0x479   :  { %10015 = vmatpush1.bf16.msra.mxu0 %v16848_v14  ;;  %v16937_v14 = vld [vmem:[#allocation3 + $0x2994] ss:$8 sps:$4 sm:$0xff]  }
 0x47a   :  { %11739 = vmatpush1.bf16.msra.mxu1 %v16851_v2  ;;  %10016 = vmatprep.subr.bf16.mxu0 %v16856_v3  ;;  %v16932_v2 = vld [vmem:[#allocation3 + $0x2190] ss:$8 sps:$4 sm:$0xff]  }
 0x47b   :  { %11740 = vmatprep.subr.bf16.mxu1 %v16859_v24  ;;  %v16935_v3 = vld [vmem:[#allocation3 + $0x2990] ss:$8 sps:$4 sm:$0xff]   ;;  %v16940_v24 = vld [vmem:[#allocation3 + $0x21a4] ss:$8 sps:$4 sm:$0xff]  }
 0x47d   :  { %10017 = vmatpush1.bf16.msra.mxu0 %v16854_v55  ;;  %v16943_v55 = vld [vmem:[#allocation3 + $0x29a4] ss:$8 sps:$4 sm:$0xff]  }
 0x47e   :  { %11741 = vmatpush1.bf16.msra.mxu1 %v16857_v54  ;;  %10018 = vmatprep.subr.bf16.mxu0 %v16862_v60  ;;  %v16938_v54 = vld [vmem:[#allocation3 + $0x21a0] ss:$8 sps:$4 sm:$0xff]  }
 0x47f   :  { %11742 = vmatprep.subr.bf16.mxu1 %v16865_v4  ;;  %v16941_v60 = vld [vmem:[#allocation3 + $0x29a0] ss:$8 sps:$4 sm:$0xff]   ;;  %v16946_v4 = vld [vmem:[#allocation3 + $0x21b4] ss:$8 sps:$4 sm:$0xff]  }
 0x481   :  { %10019 = vmatpush1.bf16.msra.mxu0 %v16860_v61  ;;  %v16949_v61 = vld [vmem:[#allocation3 + $0x29b4] ss:$8 sps:$4 sm:$0xff]  }
 0x482   :  { %11743 = vmatpush1.bf16.msra.mxu1 %v16863_v57  ;;  %10020 = vmatprep.subr.bf16.mxu0 %v16868_v5  ;;  %v16944_v57 = vld [vmem:[#allocation3 + $0x21b0] ss:$8 sps:$4 sm:$0xff]  }
 0x483   :  { %11744 = vmatprep.subr.bf16.mxu1 %v16871_v6  ;;  %v16947_v5 = vld [vmem:[#allocation3 + $0x29b0] ss:$8 sps:$4 sm:$0xff]   ;;  %v16952_v6 = vld [vmem:[#allocation3 + $0x21c4] ss:$8 sps:$4 sm:$0xff]  }
 0x485   :  { %10021 = vmatpush1.bf16.msra.mxu0 %v16866_v7  ;;  %v16955_v7 = vld [vmem:[#allocation3 + $0x29c4] ss:$8 sps:$4 sm:$0xff]  }
 0x486   :  { %11745 = vmatpush1.bf16.msra.mxu1 %v16869_v8  ;;  %10022 = vmatprep.subr.bf16.mxu0 %v16874_v18  ;;  %v16950_v8 = vld [vmem:[#allocation3 + $0x21c0] ss:$8 sps:$4 sm:$0xff]  }
 0x487   :  { %11746 = vmatprep.subr.bf16.mxu1 %v16877_v63  ;;  %v16953_v18 = vld [vmem:[#allocation3 + $0x29c0] ss:$8 sps:$4 sm:$0xff]   ;;  %v16958_v63 = vld [vmem:[#allocation3 + $0x21d4] ss:$8 sps:$4 sm:$0xff]  }
 0x489   :  { %10023 = vmatpush1.bf16.msra.mxu0 %v16872_v0  ;;  %v16961_v0 = vld [vmem:[#allocation3 + $0x29d4] ss:$8 sps:$4 sm:$0xff]  }
 0x48a   :  { %11747 = vmatpush1.bf16.msra.mxu1 %v16875_v22  ;;  %10033 = vmatprep.subr.bf16.mxu0 %v16880_v23  ;;  %v16956_v22 = vld [vmem:[#allocation3 + $0x21d0] ss:$8 sps:$4 sm:$0xff]  }
 0x48b   :  { %11757 = vmatprep.subr.bf16.mxu1 %v16883_v40  ;;  %v16959_v23 = vld [vmem:[#allocation3 + $0x29d0] ss:$8 sps:$4 sm:$0xff]   ;;  %v16964_v40 = vld [vmem:[#allocation3 + $0x21e4] ss:$8 sps:$4 sm:$0xff]  }
 0x48c   :  { %10025 = vmatmul.mubr.bf16.vlgmr.msra.gmra.mrb[8].mxu0 %v18208_v41 }
 0x48d   :  { %11749 = vmatmul.mubr.bf16.vlgmr.msra.gmra.mrb[8].mxu1 %v18212_v52  ;;  %10034 = vmatpush1.bf16.msra.mxu0 %v16878_v26  ;;  %v16967_v26 = vld [vmem:[#allocation3 + $0x29e4] ss:$8 sps:$4 sm:$0xff]  }
 0x48e   :  { %11758 = vmatpush1.bf16.msra.mxu1 %v16881_v42  ;;  %10035 = vmatprep.subr.bf16.mxu0 %v16886_v12  ;;  %v8598_v42 = vcombine.high %v18175_v16, %v18175_v16  ;;  %v10322_v12 = vcombine.high %v18180_v1, %v18180_v1  ;;  %v16968_v16 = vld [vmem:[#allocation3 + $0x21f0] ss:$8 sps:$4 sm:$0xff]   ;;  %v16976_v1 = vld [vmem:[#allocation3 + $0x2204] ss:$8 sps:$4 sm:$0xff]  }
 0x48f   :  { %11759 = vmatprep.subr.bf16.mxu1 %v16889_v56  ;;  %10065 = vmatprep.mubr.bf16.mxu0 %v8645_v13  ;;  %v16962_v56 = vld [vmem:[#allocation3 + $0x21e0] ss:$8 sps:$4 sm:$0xff]  }
 0x490   :  { %11789 = vmatprep.mubr.bf16.mxu1 %v10369_v27  ;;  %v16965_v13 = vld [vmem:[#allocation3 + $0x29e0] ss:$8 sps:$4 sm:$0xff]   ;;  %v16970_v27 = vld [vmem:[#allocation3 + $0x21f4] ss:$8 sps:$4 sm:$0xff]  }
 0x491   :  { %10036 = vmatpush1.bf16.msra.mxu0 %v16884_v53  ;;  %v16973_v53 = vld [vmem:[#allocation3 + $0x29f4] ss:$8 sps:$4 sm:$0xff]  }
 0x492   :  { %11760 = vmatpush1.bf16.msra.mxu1 %v16887_v11  ;;  %10037 = vmatprep.subr.bf16.mxu0 %v16892_v28  ;;  %v18225_v11 = vrot.slane %v8598_v42, %v17850_v49  ;;  %v18228_v28 = vrot.slane %v10322_v12, %v17850_v49  ;;  %v17045_v42 = vld [vmem:[#allocation3 + $0x2ab4] ss:$8 sps:$4 sm:$0xff]   ;;  %v17040_v12 = vld [vmem:[#allocation3 + $0x22b0] ss:$8 sps:$4 sm:$0xff]  }
 0x493   :  { %11761 = vmatprep.subr.bf16.mxu1 %v16895_v29  ;;  %v16971_v29 = vld [vmem:[#allocation3 + $0x29f0] ss:$8 sps:$4 sm:$0xff]  }
 0x495   :  { %10038 = vmatpush1.bf16.msra.mxu0 %v16890_v20  ;;  %v16979_v20 = vld [vmem:[#allocation3 + $0x2a04] ss:$8 sps:$4 sm:$0xff]  }
 0x496   :  { %11762 = vmatpush1.bf16.msra.mxu1 %v16893_v58  ;;  %10039 = vmatprep.subr.bf16.mxu0 %v16898_v21  ;;  %v8614_v58 = vcombine.high %v18225_v11, %v18225_v11  ;;  %v10338_v21 = vcombine.high %v18228_v28, %v18228_v28 }
 0x497   :  { %11763 = vmatprep.subr.bf16.mxu1 %v16901_v59  ;;  %v8643_v59 = vcombine.high %v18208_v41, %v18208_v41  ;;  %v16980_v41 = vld [vmem:[#allocation3 + $0x2210] ss:$8 sps:$4 sm:$0xff]  }
 0x499   :  { %10040 = vmatpush1.bf16.msra.mxu0 %v16896_v34  ;;  %v10367_v34 = vcombine.high %v18212_v52, %v18212_v52  ;;  %v16983_v52 = vld [vmem:[#allocation3 + $0x2a10] ss:$8 sps:$4 sm:$0xff]  }
 0x49a   :  { %11764 = vmatpush1.bf16.msra.mxu1 %v16899_v17  ;;  %10041 = vmatprep.subr.bf16.mxu0 %v16904_v43  ;;  %v16974_v17 = vld [vmem:[#allocation3 + $0x2200] ss:$8 sps:$4 sm:$0xff]  }
 0x49b   :  { %11765 = vmatprep.subr.bf16.mxu1 %v16907_v44  ;;  %v16977_v43 = vld [vmem:[#allocation3 + $0x2a00] ss:$8 sps:$4 sm:$0xff]   ;;  %v16982_v44 = vld [vmem:[#allocation3 + $0x2214] ss:$8 sps:$4 sm:$0xff]  }
 0x49d   :  { %10042 = vmatpush1.bf16.msra.mxu0 %v16902_v45  ;;  %v16985_v45 = vld [vmem:[#allocation3 + $0x2a14] ss:$8 sps:$4 sm:$0xff]  }
 0x49e   :  { %11766 = vmatpush1.bf16.msra.mxu1 %v16905_v46  ;;  %10043 = vmatprep.subr.bf16.mxu0 %v16910_v30  ;;  %v18239_v46 = vrot.slane %v8614_v58, %v17850_v49  ;;  %v18242_v30 = vrot.slane %v10338_v21, %v17850_v49  ;;  %v17055_v58 = vld [vmem:[#allocation3 + $0x2ad0] ss:$8 sps:$4 sm:$0xff]   ;;  %v17060_v21 = vld [vmem:[#allocation3 + $0x22e4] ss:$8 sps:$4 sm:$0xff]  }
 0x49f   :  { %11767 = vmatprep.subr.bf16.mxu1 %v16913_v9  ;;  %v16988_v9 = vld [vmem:[#allocation3 + $0x2224] ss:$8 sps:$4 sm:$0xff]  }
 0x4a1   :  { %10044 = vmatpush1.bf16.msra.mxu0 %v16908_v31  ;;  %v16991_v31 = vld [vmem:[#allocation3 + $0x2a24] ss:$8 sps:$4 sm:$0xff]  }
 0x4a2   :  { %11768 = vmatpush1.bf16.msra.mxu1 %v16911_v39  ;;  %10045 = vmatprep.subr.bf16.mxu0 %v16916_v25  ;;  %v16986_v39 = vld [vmem:[#allocation3 + $0x2220] ss:$8 sps:$4 sm:$0xff]  }
 0x4a3   :  { %11769 = vmatprep.subr.bf16.mxu1 %v16919_v15  ;;  %v16989_v25 = vld [vmem:[#allocation3 + $0x2a20] ss:$8 sps:$4 sm:$0xff]   ;;  %v16994_v15 = vld [vmem:[#allocation3 + $0x2234] ss:$8 sps:$4 sm:$0xff]  }
 0x4a5   :  { %10046 = vmatpush1.bf16.msra.mxu0 %v16914_v47  ;;  %v16997_v47 = vld [vmem:[#allocation3 + $0x2a34] ss:$8 sps:$4 sm:$0xff]  }
 0x4a6   :  { %11770 = vmatpush1.bf16.msra.mxu1 %v16917_v48  ;;  %10047 = vmatprep.subr.bf16.mxu0 %v16922_v36  ;;  %v16992_v48 = vld [vmem:[#allocation3 + $0x2230] ss:$8 sps:$4 sm:$0xff]  }
 0x4a7   :  { %11771 = vmatprep.subr.bf16.mxu1 %v16925_v50  ;;  %v16995_v36 = vld [vmem:[#allocation3 + $0x2a30] ss:$8 sps:$4 sm:$0xff]   ;;  %v17000_v50 = vld [vmem:[#allocation3 + $0x2244] ss:$8 sps:$4 sm:$0xff]  }
 0x4a9   :  { %10048 = vmatpush1.bf16.msra.mxu0 %v16920_v37  ;;  %v17003_v37 = vld [vmem:[#allocation3 + $0x2a44] ss:$8 sps:$4 sm:$0xff]  }
 0x4aa   :  { %11772 = vmatpush1.bf16.msra.mxu1 %v16923_v51  ;;  %10049 = vmatprep.subr.bf16.mxu0 %v16928_v32  ;;  %v16998_v51 = vld [vmem:[#allocation3 + $0x2240] ss:$8 sps:$4 sm:$0xff]  }
 0x4ab   :  { %11773 = vmatprep.subr.bf16.mxu1 %v16931_v33  ;;  %v17001_v32 = vld [vmem:[#allocation3 + $0x2a40] ss:$8 sps:$4 sm:$0xff]   ;;  %v17006_v33 = vld [vmem:[#allocation3 + $0x2254] ss:$8 sps:$4 sm:$0xff]  }
 0x4ad   :  { %10050 = vmatpush1.bf16.msra.mxu0 %v16926_v35  ;;  %v17009_v35 = vld [vmem:[#allocation3 + $0x2a54] ss:$8 sps:$4 sm:$0xff]  }
 0x4ae   :  { %11774 = vmatpush1.bf16.msra.mxu1 %v16929_v62  ;;  %10051 = vmatprep.subr.bf16.mxu0 %v16934_v38  ;;  %v17004_v62 = vld [vmem:[#allocation3 + $0x2250] ss:$8 sps:$4 sm:$0xff]  }
 0x4af   :  { %11775 = vmatprep.subr.bf16.mxu1 %v16937_v14  ;;  %v17007_v38 = vld [vmem:[#allocation3 + $0x2a50] ss:$8 sps:$4 sm:$0xff]   ;;  %v17012_v14 = vld [vmem:[#allocation3 + $0x2264] ss:$8 sps:$4 sm:$0xff]  }
 0x4b1   :  { %10052 = vmatpush1.bf16.msra.mxu0 %v16932_v2  ;;  %v17015_v2 = vld [vmem:[#allocation3 + $0x2a64] ss:$8 sps:$4 sm:$0xff]  }
 0x4b2   :  { %11776 = vmatpush1.bf16.msra.mxu1 %v16935_v3  ;;  %10053 = vmatprep.subr.bf16.mxu0 %v16940_v24  ;;  %v17010_v3 = vld [vmem:[#allocation3 + $0x2260] ss:$8 sps:$4 sm:$0xff]  }
 0x4b3   :  { %11777 = vmatprep.subr.bf16.mxu1 %v16943_v55  ;;  %v17013_v24 = vld [vmem:[#allocation3 + $0x2a60] ss:$8 sps:$4 sm:$0xff]   ;;  %v17018_v55 = vld [vmem:[#allocation3 + $0x2274] ss:$8 sps:$4 sm:$0xff]  }
 0x4b5   :  { %10054 = vmatpush1.bf16.msra.mxu0 %v16938_v54  ;;  %v17021_v54 = vld [vmem:[#allocation3 + $0x2a74] ss:$8 sps:$4 sm:$0xff]  }
 0x4b6   :  { %11778 = vmatpush1.bf16.msra.mxu1 %v16941_v60  ;;  %10055 = vmatprep.subr.bf16.mxu0 %v16946_v4  ;;  %v17016_v60 = vld [vmem:[#allocation3 + $0x2270] ss:$8 sps:$4 sm:$0xff]  }
 0x4b7   :  { %11779 = vmatprep.subr.bf16.mxu1 %v16949_v61  ;;  %v17019_v4 = vld [vmem:[#allocation3 + $0x2a70] ss:$8 sps:$4 sm:$0xff]   ;;  %v17024_v61 = vld [vmem:[#allocation3 + $0x2284] ss:$8 sps:$4 sm:$0xff]  }
 0x4b9   :  { %10056 = vmatpush1.bf16.msra.mxu0 %v16944_v57  ;;  %v17027_v57 = vld [vmem:[#allocation3 + $0x2a84] ss:$8 sps:$4 sm:$0xff]  }
 0x4ba   :  { %11780 = vmatpush1.bf16.msra.mxu1 %v16947_v5  ;;  %10057 = vmatprep.subr.bf16.mxu0 %v16952_v6  ;;  %v17022_v5 = vld [vmem:[#allocation3 + $0x2280] ss:$8 sps:$4 sm:$0xff]  }
 0x4bb   :  { %11781 = vmatprep.subr.bf16.mxu1 %v16955_v7  ;;  %v17025_v6 = vld [vmem:[#allocation3 + $0x2a80] ss:$8 sps:$4 sm:$0xff]   ;;  %v17030_v7 = vld [vmem:[#allocation3 + $0x2294] ss:$8 sps:$4 sm:$0xff]  }
 0x4bd   :  { %10058 = vmatpush1.bf16.msra.mxu0 %v16950_v8  ;;  %v17033_v8 = vld [vmem:[#allocation3 + $0x2a94] ss:$8 sps:$4 sm:$0xff]  }
 0x4be   :  { %11782 = vmatpush1.bf16.msra.mxu1 %v16953_v18  ;;  %10059 = vmatprep.subr.bf16.mxu0 %v16958_v63  ;;  %v17028_v18 = vld [vmem:[#allocation3 + $0x2290] ss:$8 sps:$4 sm:$0xff]  }
 0x4bf   :  { %11783 = vmatprep.subr.bf16.mxu1 %v16961_v0  ;;  %v17031_v63 = vld [vmem:[#allocation3 + $0x2a90] ss:$8 sps:$4 sm:$0xff]   ;;  %v17036_v0 = vld [vmem:[#allocation3 + $0x22a4] ss:$8 sps:$4 sm:$0xff]  }
 0x4c1   :  { %10060 = vmatpush1.bf16.msra.mxu0 %v16956_v22  ;;  %v17039_v22 = vld [vmem:[#allocation3 + $0x2aa4] ss:$8 sps:$4 sm:$0xff]  }
 0x4c2   :  { %11784 = vmatpush1.bf16.msra.mxu1 %v16959_v23  ;;  %10061 = vmatprep.subr.bf16.mxu0 %v16964_v40  ;;  %v17034_v23 = vld [vmem:[#allocation3 + $0x22a0] ss:$8 sps:$4 sm:$0xff]  }
 0x4c3   :  { %11785 = vmatprep.subr.bf16.mxu1 %v16967_v26  ;;  %v17037_v40 = vld [vmem:[#allocation3 + $0x2aa0] ss:$8 sps:$4 sm:$0xff]   ;;  %v17042_v26 = vld [vmem:[#allocation3 + $0x22b4] ss:$8 sps:$4 sm:$0xff]  }
 0x4c5   :  { %10062 = vmatpush1.bf16.msra.mxu0 %v16962_v56  ;;  %v17043_v56 = vld [vmem:[#allocation3 + $0x2ab0] ss:$8 sps:$4 sm:$0xff]  }
 0x4c6   :  { %11786 = vmatpush1.bf16.msra.mxu1 %v16965_v13  ;;  %10063 = vmatprep.subr.bf16.mxu0 %v16970_v27  ;;  %v17048_v13 = vld [vmem:[#allocation3 + $0x22c4] ss:$8 sps:$4 sm:$0xff]  }
 0x4c7   :  { %11787 = vmatprep.subr.bf16.mxu1 %v16973_v53  ;;  %v17051_v27 = vld [vmem:[#allocation3 + $0x2ac4] ss:$8 sps:$4 sm:$0xff]   ;;  %v17046_v53 = vld [vmem:[#allocation3 + $0x22c0] ss:$8 sps:$4 sm:$0xff]  }
 0x4c9   :  { %10064 = vmatpush1.bf16.msra.mxu0 %v16968_v16  ;;  %v17049_v16 = vld [vmem:[#allocation3 + $0x2ac0] ss:$8 sps:$4 sm:$0xff]  }
 0x4ca   :  { %11788 = vmatpush1.bf16.msra.mxu1 %v16971_v29  ;;  %10074 = vmatprep.subr.bf16.mxu0 %v16976_v1  ;;  %v17054_v29 = vld [vmem:[#allocation3 + $0x22d4] ss:$8 sps:$4 sm:$0xff]  }
 0x4cb   :  { %11798 = vmatprep.subr.bf16.mxu1 %v16979_v20  ;;  %v17057_v1 = vld [vmem:[#allocation3 + $0x2ad4] ss:$8 sps:$4 sm:$0xff]   ;;  %v17052_v20 = vld [vmem:[#allocation3 + $0x22d0] ss:$8 sps:$4 sm:$0xff]  }
 0x4cc   :  { %10066 = vmatmul.mubr.bf16.vlgmr.msra.gmra.mrb[8].mxu0 %v8643_v59  ;;  %v17063_v59 = vld [vmem:[#allocation3 + $0x2ae4] ss:$8 sps:$4 sm:$0xff]  }
 0x4cd   :  { %11790 = vmatmul.mubr.bf16.vlgmr.msra.gmra.mrb[8].mxu1 %v10367_v34  ;;  %10075 = vmatpush1.bf16.msra.mxu0 %v16974_v17  ;;  %v17058_v34 = vld [vmem:[#allocation3 + $0x22e0] ss:$8 sps:$4 sm:$0xff]  }
 0x4ce   :  { %11799 = vmatpush1.bf16.msra.mxu1 %v16977_v43  ;;  %10076 = vmatprep.subr.bf16.mxu0 %v16982_v44  ;;  %v17061_v17 = vld [vmem:[#allocation3 + $0x2ae0] ss:$8 sps:$4 sm:$0xff]   ;;  %v17066_v43 = vld [vmem:[#allocation3 + $0x22f4] ss:$8 sps:$4 sm:$0xff]  }
 0x4cf   :  { %11800 = vmatprep.subr.bf16.mxu1 %v16985_v45  ;;  %10106 = vmatprep.mubr.bf16.mxu0 %v18239_v46  ;;  %v17069_v44 = vld [vmem:[#allocation3 + $0x2af4] ss:$8 sps:$4 sm:$0xff]   ;;  %v17064_v45 = vld [vmem:[#allocation3 + $0x22f0] ss:$8 sps:$4 sm:$0xff]  }
 0x4d0   :  { %11830 = vmatprep.mubr.bf16.mxu1 %v18242_v30 }
 0x4d1   :  { %10077 = vmatpush1.bf16.msra.mxu0 %v16980_v41  ;;  %v17067_v41 = vld [vmem:[#allocation3 + $0x2af0] ss:$8 sps:$4 sm:$0xff]  }
 0x4d2   :  { %11801 = vmatpush1.bf16.msra.mxu1 %v16983_v52  ;;  %10078 = vmatprep.subr.bf16.mxu0 %v16988_v9  ;;  %v17073_v52 = vld [vmem:[#allocation3 + $0x2304] ss:$8 sps:$4 sm:$0xff]  }
 0x4d3   :  { %11802 = vmatprep.subr.bf16.mxu1 %v16991_v31  ;;  %v17077_v9 = vld [vmem:[#allocation3 + $0x2b04] ss:$8 sps:$4 sm:$0xff]   ;;  %v18248_v31 = vrot.slane %v18225_v11, %v17850_v49  ;;  %v17078_v11 = vld [vmem:[#allocation3 + $0x2310] ss:$8 sps:$4 sm:$0xff]  }
 0x4d5   :  { %10079 = vmatpush1.bf16.msra.mxu0 %v16986_v39  ;;  %v18252_v39 = vrot.slane %v18228_v28, %v17850_v49  ;;  %v17081_v28 = vld [vmem:[#allocation3 + $0x2b10] ss:$8 sps:$4 sm:$0xff]  }
 0x4d6   :  { %11803 = vmatpush1.bf16.msra.mxu1 %v16989_v25  ;;  %10080 = vmatprep.subr.bf16.mxu0 %v16994_v15  ;;  %v17071_v25 = vld [vmem:[#allocation3 + $0x2300] ss:$8 sps:$4 sm:$0xff]  }
 0x4d7   :  { %11804 = vmatprep.subr.bf16.mxu1 %v16997_v47  ;;  %v17075_v15 = vld [vmem:[#allocation3 + $0x2b00] ss:$8 sps:$4 sm:$0xff]   ;;  %v17080_v47 = vld [vmem:[#allocation3 + $0x2314] ss:$8 sps:$4 sm:$0xff]  }
 0x4d9   :  { %10081 = vmatpush1.bf16.msra.mxu0 %v16992_v48  ;;  %v17083_v48 = vld [vmem:[#allocation3 + $0x2b14] ss:$8 sps:$4 sm:$0xff]  }
 0x4da   :  { %11805 = vmatpush1.bf16.msra.mxu1 %v16995_v36  ;;  %10082 = vmatprep.subr.bf16.mxu0 %v17000_v50  ;;  %v8646_v36 = vcombine.high %v18239_v46, %v18239_v46  ;;  %v10370_v50 = vcombine.high %v18242_v30, %v18242_v30  ;;  %v17084_v46 = vld [vmem:[#allocation3 + $0x2320] ss:$8 sps:$4 sm:$0xff]   ;;  %v17092_v30 = vld [vmem:[#allocation3 + $0x2334] ss:$8 sps:$4 sm:$0xff]  }
 0x4db   :  { %11806 = vmatprep.subr.bf16.mxu1 %v17003_v37  ;;  %v17086_v37 = vld [vmem:[#allocation3 + $0x2324] ss:$8 sps:$4 sm:$0xff]  }
 0x4dd   :  { %10083 = vmatpush1.bf16.msra.mxu0 %v16998_v51  ;;  %v17089_v51 = vld [vmem:[#allocation3 + $0x2b24] ss:$8 sps:$4 sm:$0xff]  }
 0x4de   :  { %11807 = vmatpush1.bf16.msra.mxu1 %v17001_v32  ;;  %10084 = vmatprep.subr.bf16.mxu0 %v17006_v33  ;;  %v17087_v32 = vld [vmem:[#allocation3 + $0x2b20] ss:$8 sps:$4 sm:$0xff]   ;;  %v17095_v33 = vld [vmem:[#allocation3 + $0x2b34] ss:$8 sps:$4 sm:$0xff]  }
 0x4df   :  { %11808 = vmatprep.subr.bf16.mxu1 %v17009_v35  ;;  %v17090_v35 = vld [vmem:[#allocation3 + $0x2330] ss:$8 sps:$4 sm:$0xff]  }
 0x4e1   :  { %10085 = vmatpush1.bf16.msra.mxu0 %v17004_v62  ;;  %v17093_v62 = vld [vmem:[#allocation3 + $0x2b30] ss:$8 sps:$4 sm:$0xff]  }
 0x4e2   :  { %11809 = vmatpush1.bf16.msra.mxu1 %v17007_v38  ;;  %10086 = vmatprep.subr.bf16.mxu0 %v17012_v14  ;;  %v17098_v38 = vld [vmem:[#allocation3 + $0x2344] ss:$8 sps:$4 sm:$0xff]  }
 0x4e3   :  { %11810 = vmatprep.subr.bf16.mxu1 %v17015_v2  ;;  %v17101_v14 = vld [vmem:[#allocation3 + $0x2b44] ss:$8 sps:$4 sm:$0xff]   ;;  %v17096_v2 = vld [vmem:[#allocation3 + $0x2340] ss:$8 sps:$4 sm:$0xff]  }
 0x4e5   :  { %10087 = vmatpush1.bf16.msra.mxu0 %v17010_v3  ;;  %v17099_v3 = vld [vmem:[#allocation3 + $0x2b40] ss:$8 sps:$4 sm:$0xff]  }
 0x4e6   :  { %11811 = vmatpush1.bf16.msra.mxu1 %v17013_v24  ;;  %10088 = vmatprep.subr.bf16.mxu0 %v17018_v55  ;;  %v1630_v24 = vld [vmem:[#allocation5 + $0x4] sm:$0x3]  ;;  %v1631_v55 = vld [vmem:[#allocation5 + $0x6] sm:$0x3] }
 0x4e7   :  { %11812 = vmatprep.subr.bf16.mxu1 %v17021_v54  ;;  %v17104_v54 = vld [vmem:[#allocation3 + $0x2354] ss:$8 sps:$4 sm:$0xff]  }
 0x4e9   :  { %10089 = vmatpush1.bf16.msra.mxu0 %v17016_v60  ;;  %v17107_v60 = vld [vmem:[#allocation3 + $0x2b54] ss:$8 sps:$4 sm:$0xff]  }
 0x4ea   :  { %11813 = vmatpush1.bf16.msra.mxu1 %v17019_v4  ;;  %10090 = vmatprep.subr.bf16.mxu0 %v17024_v61  ;;  %v1659_v4 = vrot.slane %v1630_v24, %v18081_v10  ;;  %v1667_v61 = vrot.slane %v1631_v55, %v18081_v10 }
 0x4eb   :  { %11814 = vmatprep.subr.bf16.mxu1 %v17027_v57  ;;  %v1663_v57 = vrot.slane %v1630_v24, %v18084_v19  ;;  %v18272_v24 = vld [vmem:[%s18402_s0 + $0x58] sm:$0xff] }
 0x4ed   :  { %10091 = vmatpush1.bf16.msra.mxu0 %v17022_v5  ;;  %v1671_v5 = vrot.slane %v1631_v55, %v18084_v19  ;;  %v17156_v55 = vld [vmem:[#allocation3 + $0x23e0] ss:$8 sps:$4 sm:$0xff]  }
 0x4ee   :  { %11815 = vmatpush1.bf16.msra.mxu1 %v17025_v6  ;;  %10092 = vmatprep.subr.bf16.mxu0 %v17030_v7  ;;  %v17102_v6 = vld [vmem:[#allocation3 + $0x2350] ss:$8 sps:$4 sm:$0xff]  }
 0x4ef   :  { %11816 = vmatprep.subr.bf16.mxu1 %v17033_v8  ;;  %v17105_v7 = vld [vmem:[#allocation3 + $0x2b50] ss:$8 sps:$4 sm:$0xff]   ;;  %v17110_v8 = vld [vmem:[#allocation3 + $0x2364] ss:$8 sps:$4 sm:$0xff]  }
 0x4f1   :  { %10093 = vmatpush1.bf16.msra.mxu0 %v17028_v18  ;;  %v17113_v18 = vld [vmem:[#allocation3 + $0x2b64] ss:$8 sps:$4 sm:$0xff]  }
 0x4f2   :  { %11817 = vmatpush1.bf16.msra.mxu1 %v17031_v63  ;;  %10094 = vmatprep.subr.bf16.mxu0 %v17036_v0 }
 0x4f3   :  { %11818 = vmatprep.subr.bf16.mxu1 %v17039_v22 }
 0x4f5   :  { %10095 = vmatpush1.bf16.msra.mxu0 %v17034_v23 }
 0x4f6   :  { %11819 = vmatpush1.bf16.msra.mxu1 %v17037_v40  ;;  %10096 = vmatprep.subr.bf16.mxu0 %v17042_v26 }
 0x4f7   :  { %11820 = vmatprep.subr.bf16.mxu1 %v17045_v42 }
 0x4f9   :  { %10097 = vmatpush1.bf16.msra.mxu0 %v17040_v12 }
 0x4fa   :  { %11821 = vmatpush1.bf16.msra.mxu1 %v17043_v56  ;;  %10098 = vmatprep.subr.bf16.mxu0 %v17048_v13 }
 0x4fb   :  { %11822 = vmatprep.subr.bf16.mxu1 %v17051_v27  ;;  %v17108_v27 = vld [vmem:[#allocation3 + $0x2360] ss:$8 sps:$4 sm:$0xff]  }
 0x4fd   :  { %10099 = vmatpush1.bf16.msra.mxu0 %v17046_v53  ;;  %v17111_v53 = vld [vmem:[#allocation3 + $0x2b60] ss:$8 sps:$4 sm:$0xff]  }
 0x4fe   :  { %11823 = vmatpush1.bf16.msra.mxu1 %v17049_v16  ;;  %10100 = vmatprep.subr.bf16.mxu0 %v17054_v29 }
 0x4ff   :  { %11824 = vmatprep.subr.bf16.mxu1 %v17057_v1  ;;  %v17116_v1 = vld [vmem:[#allocation3 + $0x2374] ss:$8 sps:$4 sm:$0xff]  }
 0x501   :  { %10101 = vmatpush1.bf16.msra.mxu0 %v17052_v20  ;;  %v17119_v20 = vld [vmem:[#allocation3 + $0x2b74] ss:$8 sps:$4 sm:$0xff]  }
 0x502   :  { %11825 = vmatpush1.bf16.msra.mxu1 %v17055_v58  ;;  %10102 = vmatprep.subr.bf16.mxu0 %v17060_v21 }
 0x503   :  { %11826 = vmatprep.subr.bf16.mxu1 %v17063_v59  ;;  %v17114_v59 = vld [vmem:[#allocation3 + $0x2370] ss:$8 sps:$4 sm:$0xff]  }
 0x505   :  { %10103 = vmatpush1.bf16.msra.mxu0 %v17058_v34  ;;  %v17117_v34 = vld [vmem:[#allocation3 + $0x2b70] ss:$8 sps:$4 sm:$0xff]  }
 0x506   :  { %11827 = vmatpush1.bf16.msra.mxu1 %v17061_v17  ;;  %10104 = vmatprep.subr.bf16.mxu0 %v17066_v43  ;;  %v17122_v17 = vld [vmem:[#allocation3 + $0x2384] ss:$8 sps:$4 sm:$0xff]  }
 0x507   :  { %11828 = vmatprep.subr.bf16.mxu1 %v17069_v44  ;;  %v17125_v43 = vld [vmem:[#allocation3 + $0x2b84] ss:$8 sps:$4 sm:$0xff]   ;;  %v17120_v44 = vld [vmem:[#allocation3 + $0x2380] ss:$8 sps:$4 sm:$0xff]  }
 0x509   :  { %10105 = vmatpush1.bf16.msra.mxu0 %v17064_v45  ;;  %v17123_v45 = vld [vmem:[#allocation3 + $0x2b80] ss:$8 sps:$4 sm:$0xff]  }
 0x50a   :  { %11829 = vmatpush1.bf16.msra.mxu1 %v17067_v41  ;;  %10115 = vmatprep.subr.bf16.mxu0 %v17073_v52  ;;  %v17128_v41 = vld [vmem:[#allocation3 + $0x2394] ss:$8 sps:$4 sm:$0xff]  }
 0x50b   :  { %11839 = vmatprep.subr.bf16.mxu1 %v17077_v9  ;;  %v17131_v52 = vld [vmem:[#allocation3 + $0x2b94] ss:$8 sps:$4 sm:$0xff]   ;;  %v17126_v9 = vld [vmem:[#allocation3 + $0x2390] ss:$8 sps:$4 sm:$0xff]  }
 0x50c   :  { %10107 = vmatmul.mubr.bf16.vlgmr.msra.gmra.mrb[8].mxu0 %v18248_v31 }
 0x50d   :  { %11831 = vmatmul.mubr.bf16.vlgmr.msra.gmra.mrb[8].mxu1 %v18252_v39  ;;  %10116 = vmatpush1.bf16.msra.mxu0 %v17071_v25  ;;  %v17129_v25 = vld [vmem:[#allocation3 + $0x2b90] ss:$8 sps:$4 sm:$0xff]  }
 0x50e   :  { %11840 = vmatpush1.bf16.msra.mxu1 %v17075_v15  ;;  %10117 = vmatprep.subr.bf16.mxu0 %v17080_v47  ;;  %v17134_v15 = vld [vmem:[#allocation3 + $0x23a4] ss:$8 sps:$4 sm:$0xff]  }
 0x50f   :  { %11841 = vmatprep.subr.bf16.mxu1 %v17083_v48  ;;  %10147 = vmatprep.mubr.bf16.mxu0 %v8646_v36  ;;  %v17137_v47 = vld [vmem:[#allocation3 + $0x2ba4] ss:$8 sps:$4 sm:$0xff]   ;;  %v17132_v48 = vld [vmem:[#allocation3 + $0x23a0] ss:$8 sps:$4 sm:$0xff]  }
 0x510   :  { %11871 = vmatprep.mubr.bf16.mxu1 %v10370_v50  ;;  %v17135_v36 = vld [vmem:[#allocation3 + $0x2ba0] ss:$8 sps:$4 sm:$0xff]   ;;  %v17140_v50 = vld [vmem:[#allocation3 + $0x23b4] ss:$8 sps:$4 sm:$0xff]  }
 0x511   :  { %10118 = vmatpush1.bf16.msra.mxu0 %v17078_v11  ;;  %v17143_v11 = vld [vmem:[#allocation3 + $0x2bb4] ss:$8 sps:$4 sm:$0xff]  }
 0x512   :  { %11842 = vmatpush1.bf16.msra.mxu1 %v17081_v28  ;;  %10119 = vmatprep.subr.bf16.mxu0 %v17086_v37  ;;  %v17138_v28 = vld [vmem:[#allocation3 + $0x23b0] ss:$8 sps:$4 sm:$0xff]  }
 0x513   :  { %11843 = vmatprep.subr.bf16.mxu1 %v17089_v51  ;;  %v17141_v37 = vld [vmem:[#allocation3 + $0x2bb0] ss:$8 sps:$4 sm:$0xff]   ;;  %v17146_v51 = vld [vmem:[#allocation3 + $0x23c4] ss:$8 sps:$4 sm:$0xff]  }
 0x515   :  { %10120 = vmatpush1.bf16.msra.mxu0 %v17084_v46  ;;  %v17149_v46 = vld [vmem:[#allocation3 + $0x2bc4] ss:$8 sps:$4 sm:$0xff]  }
 0x516   :  { %11844 = vmatpush1.bf16.msra.mxu1 %v17087_v32  ;;  %10121 = vmatprep.subr.bf16.mxu0 %v17092_v30  ;;  %v17144_v32 = vld [vmem:[#allocation3 + $0x23c0] ss:$8 sps:$4 sm:$0xff]  }
 0x517   :  { %11845 = vmatprep.subr.bf16.mxu1 %v17095_v33  ;;  %v17147_v30 = vld [vmem:[#allocation3 + $0x2bc0] ss:$8 sps:$4 sm:$0xff]   ;;  %v17152_v33 = vld [vmem:[#allocation3 + $0x23d4] ss:$8 sps:$4 sm:$0xff]  }
 0x519   :  { %10122 = vmatpush1.bf16.msra.mxu0 %v17090_v35  ;;  %v17155_v35 = vld [vmem:[#allocation3 + $0x2bd4] ss:$8 sps:$4 sm:$0xff]  }
 0x51a   :  { %11846 = vmatpush1.bf16.msra.mxu1 %v17093_v62  ;;  %10123 = vmatprep.subr.bf16.mxu0 %v17098_v38  ;;  %v17150_v62 = vld [vmem:[#allocation3 + $0x23d0] ss:$8 sps:$4 sm:$0xff]  }
 0x51b   :  { %11847 = vmatprep.subr.bf16.mxu1 %v17101_v14  ;;  %v17153_v38 = vld [vmem:[#allocation3 + $0x2bd0] ss:$8 sps:$4 sm:$0xff]   ;;  %v17158_v14 = vld [vmem:[#allocation3 + $0x23e4] ss:$8 sps:$4 sm:$0xff]  }
 0x51d   :  { %10124 = vmatpush1.bf16.msra.mxu0 %v17096_v2  ;;  %v17161_v2 = vld [vmem:[#allocation3 + $0x2be4] ss:$8 sps:$4 sm:$0xff]  }
 0x51e   :  { %11848 = vmatpush1.bf16.msra.mxu1 %v17099_v3  ;;  %10125 = vmatprep.subr.bf16.mxu0 %v17104_v54  ;;  %v18267_v3 = vld [vmem:[%s18402_s0 + $0x48] sm:$0xff]  ;;  %v17159_v54 = vld [vmem:[#allocation3 + $0x2be0] ss:$8 sps:$4 sm:$0xff]  }
 0x51f   :  { %11849 = vmatprep.subr.bf16.mxu1 %v17107_v60  ;;  %v6865_v63 = vpop.f32.mrb[4].mxu0  ;;  %v17164_v60 = vld [vmem:[#allocation3 + $0x23f4] ss:$8 sps:$4 sm:$0xff]  }
 0x520   :  { %v8589_v0 = vpop.f32.mrb[4].mxu1  ;;  %v15049_v22 = vadd.f32 %v6865_v63, %v1659_v4  ;;  %v6867_v40 = vpop.f32.mrb[5].mxu0  ;;  %v17167_v4 = vld [vmem:[#allocation3 + $0x2bf4] ss:$8 sps:$4 sm:$0xff]  }
 0x521   :  { %v15051_v23 = vadd.f32 %v8589_v0, %v1667_v61  ;;  %v8591_v26 = vpop.f32.mrb[5].mxu1  ;;  %v15050_v42 = vadd.f32 %v6867_v40, %v1663_v57  ;;  %v6869_v56 = vpop.f32.mrb[6].mxu0  ;;  %10126 = vmatpush1.bf16.msra.mxu0 %v17102_v6  ;;  %v18276_v61 = vrot.slane %v18267_v3, %v17850_v49  ;;  %v18280_v57 = vrot.slane %v18272_v24, %v17850_v49  ;;  %v17165_v6 = vld [vmem:[#allocation3 + $0x2bf0] ss:$8 sps:$4 sm:$0xff]   ;;  %v17171_v40 = vld [vmem:[#allocation3 + $0x2c00] ss:$8 sps:$4 sm:$0xff]  }
 0x522   :  { %v15052_v12 = vadd.f32 %v8591_v26, %v1671_v5  ;;  %v8593_v13 = vpop.f32.mrb[6].mxu1  ;;  %11850 = vmatpush1.bf16.msra.mxu1 %v17105_v7  ;;  %v6870_v16 = vpop.f32.mrb[7].mxu0  ;;  %10127 = vmatprep.subr.bf16.mxu0 %v17110_v8  ;;  %v17162_v5 = vld [vmem:[#allocation3 + $0x23f0] ss:$8 sps:$4 sm:$0xff]   ;;  %v17170_v7 = vld [vmem:[#allocation3 + $0x2404] ss:$8 sps:$4 sm:$0xff]   ;;  %v8644_v0 = vcombine.high %v18248_v31, %v18248_v31 }
 0x523   :  { %v8594_v29 = vpop.f32.mrb[7].mxu1  ;;  %11851 = vmatprep.subr.bf16.mxu1 %v17113_v18  ;;  %v12072_v58 = vcombine.low %v15049_v22, %v15050_v42  ;;  %v17173_v8 = vld [vmem:[#allocation3 + $0x2c04] ss:$8 sps:$4 sm:$0xff]   ;;  %v8662_v18 = vcombine.high %v18276_v61, %v18276_v61  ;;  %v10386_v63 = vcombine.high %v18280_v57, %v18280_v57  ;;  %v10368_v22 = vcombine.high %v18252_v39, %v18252_v39  ;;  %v17176_v26 = vld [vmem:[#allocation3 + $0x2414] ss:$8 sps:$4 sm:$0xff]  }
 0x524   :  { %v12080_v21 = vcombine.low %v15051_v23, %v15052_v12  ;;  %v17168_v23 = vld [vmem:[#allocation3 + $0x2400] ss:$8 sps:$4 sm:$0xff]   ;;  %v17179_v42 = vld [vmem:[#allocation3 + $0x2c14] ss:$8 sps:$4 sm:$0xff]   ;;  %v17174_v31 = vld [vmem:[#allocation3 + $0x2410] ss:$8 sps:$4 sm:$0xff]  }
 0x525   :  { %14801 = vst.sshfl [vmem:[#allocation2 + $0x8] sm:$0x33 pattern:$0x76325410] %v12072_v58  ;;  %10128 = vmatpush1.bf16.msra.mxu0 %v17108_v27  ;;  %v18291_v12 = vrot.slane %v8662_v18, %v17850_v49  ;;  %v18294_v56 = vrot.slane %v10386_v63, %v17850_v49  ;;  %v17177_v39 = vld [vmem:[#allocation3 + $0x2c10] ss:$8 sps:$4 sm:$0xff]  }
 0x526   :  { %14802 = vst.sshfl [vmem:[#allocation2 + $0xc] sm:$0x33 pattern:$0x76325410] %v12080_v21  ;;  %11852 = vmatpush1.bf16.msra.mxu1 %v17111_v53  ;;  %10129 = vmatprep.subr.bf16.mxu0 %v17116_v1  ;;  %v17182_v13 = vld [vmem:[#allocation3 + $0x2424] ss:$8 sps:$4 sm:$0xff]  }
 0x527   :  { %11853 = vmatprep.subr.bf16.mxu1 %v17119_v20  ;;  %v17185_v27 = vld [vmem:[#allocation3 + $0x2c24] ss:$8 sps:$4 sm:$0xff]   ;;  %v17180_v53 = vld [vmem:[#allocation3 + $0x2420] ss:$8 sps:$4 sm:$0xff]   ;;  %v17188_v29 = vld [vmem:[#allocation3 + $0x2434] ss:$8 sps:$4 sm:$0xff]  }
 0x528   :  { %v17183_v16 = vld [vmem:[#allocation3 + $0x2c20] ss:$8 sps:$4 sm:$0xff]   ;;  %v17191_v1 = vld [vmem:[#allocation3 + $0x2c34] ss:$8 sps:$4 sm:$0xff]   ;;  %v17186_v20 = vld [vmem:[#allocation3 + $0x2430] ss:$8 sps:$4 sm:$0xff]  }
 0x529   :  { %10130 = vmatpush1.bf16.msra.mxu0 %v17114_v59  ;;  %v17189_v58 = vld [vmem:[#allocation3 + $0x2c30] ss:$8 sps:$4 sm:$0xff]   ;;  %v17194_v21 = vld [vmem:[#allocation3 + $0x2444] ss:$8 sps:$4 sm:$0xff]   ;;  %v17251_v18 = vld [vmem:[#allocation3 + $0x2cd4] ss:$8 sps:$4 sm:$0xff]  }
 0x52a   :  { %11854 = vmatpush1.bf16.msra.mxu1 %v17117_v34  ;;  %10131 = vmatprep.subr.bf16.mxu0 %v17122_v17  ;;  %v17197_v59 = vld [vmem:[#allocation3 + $0x2c44] ss:$8 sps:$4 sm:$0xff]   ;;  %v17192_v34 = vld [vmem:[#allocation3 + $0x2440] ss:$8 sps:$4 sm:$0xff]   ;;  %v17246_v63 = vld [vmem:[#allocation3 + $0x24d0] ss:$8 sps:$4 sm:$0xff]  }
 0x52b   :  { %11855 = vmatprep.subr.bf16.mxu1 %v17125_v43  ;;  %v17195_v17 = vld [vmem:[#allocation3 + $0x2c40] ss:$8 sps:$4 sm:$0xff]   ;;  %v17200_v43 = vld [vmem:[#allocation3 + $0x2454] ss:$8 sps:$4 sm:$0xff]  }
 0x52d   :  { %10132 = vmatpush1.bf16.msra.mxu0 %v17120_v44  ;;  %v17203_v44 = vld [vmem:[#allocation3 + $0x2c54] ss:$8 sps:$4 sm:$0xff]  }
 0x52e   :  { %11856 = vmatpush1.bf16.msra.mxu1 %v17123_v45  ;;  %10133 = vmatprep.subr.bf16.mxu0 %v17128_v41  ;;  %v17198_v45 = vld [vmem:[#allocation3 + $0x2450] ss:$8 sps:$4 sm:$0xff]  }
 0x52f   :  { %11857 = vmatprep.subr.bf16.mxu1 %v17131_v52  ;;  %v17201_v41 = vld [vmem:[#allocation3 + $0x2c50] ss:$8 sps:$4 sm:$0xff]   ;;  %v17206_v52 = vld [vmem:[#allocation3 + $0x2464] ss:$8 sps:$4 sm:$0xff]  }
 0x531   :  { %10134 = vmatpush1.bf16.msra.mxu0 %v17126_v9  ;;  %v17209_v9 = vld [vmem:[#allocation3 + $0x2c64] ss:$8 sps:$4 sm:$0xff]  }
 0x532   :  { %11858 = vmatpush1.bf16.msra.mxu1 %v17129_v25  ;;  %10135 = vmatprep.subr.bf16.mxu0 %v17134_v15  ;;  %v17204_v25 = vld [vmem:[#allocation3 + $0x2460] ss:$8 sps:$4 sm:$0xff]  }
 0x533   :  { %11859 = vmatprep.subr.bf16.mxu1 %v17137_v47  ;;  %v17207_v15 = vld [vmem:[#allocation3 + $0x2c60] ss:$8 sps:$4 sm:$0xff]   ;;  %v17212_v47 = vld [vmem:[#allocation3 + $0x2474] ss:$8 sps:$4 sm:$0xff]  }
 0x535   :  { %10136 = vmatpush1.bf16.msra.mxu0 %v17132_v48  ;;  %v17215_v48 = vld [vmem:[#allocation3 + $0x2c74] ss:$8 sps:$4 sm:$0xff]  }
 0x536   :  { %11860 = vmatpush1.bf16.msra.mxu1 %v17135_v36  ;;  %10137 = vmatprep.subr.bf16.mxu0 %v17140_v50  ;;  %v17210_v36 = vld [vmem:[#allocation3 + $0x2470] ss:$8 sps:$4 sm:$0xff]  }
 0x537   :  { %11861 = vmatprep.subr.bf16.mxu1 %v17143_v11  ;;  %v17213_v50 = vld [vmem:[#allocation3 + $0x2c70] ss:$8 sps:$4 sm:$0xff]   ;;  %v17218_v11 = vld [vmem:[#allocation3 + $0x2484] ss:$8 sps:$4 sm:$0xff]  }
 0x539   :  { %10138 = vmatpush1.bf16.msra.mxu0 %v17138_v28  ;;  %v17221_v28 = vld [vmem:[#allocation3 + $0x2c84] ss:$8 sps:$4 sm:$0xff]  }
 0x53a   :  { %11862 = vmatpush1.bf16.msra.mxu1 %v17141_v37  ;;  %10139 = vmatprep.subr.bf16.mxu0 %v17146_v51  ;;  %v17216_v37 = vld [vmem:[#allocation3 + $0x2480] ss:$8 sps:$4 sm:$0xff]  }
 0x53b   :  { %11863 = vmatprep.subr.bf16.mxu1 %v17149_v46  ;;  %v17219_v51 = vld [vmem:[#allocation3 + $0x2c80] ss:$8 sps:$4 sm:$0xff]   ;;  %v17224_v46 = vld [vmem:[#allocation3 + $0x2494] ss:$8 sps:$4 sm:$0xff]  }
 0x53d   :  { %10140 = vmatpush1.bf16.msra.mxu0 %v17144_v32  ;;  %v17227_v32 = vld [vmem:[#allocation3 + $0x2c94] ss:$8 sps:$4 sm:$0xff]  }
 0x53e   :  { %11864 = vmatpush1.bf16.msra.mxu1 %v17147_v30  ;;  %10141 = vmatprep.subr.bf16.mxu0 %v17152_v33  ;;  %v17222_v30 = vld [vmem:[#allocation3 + $0x2490] ss:$8 sps:$4 sm:$0xff]  }
 0x53f   :  { %11865 = vmatprep.subr.bf16.mxu1 %v17155_v35  ;;  %v17225_v33 = vld [vmem:[#allocation3 + $0x2c90] ss:$8 sps:$4 sm:$0xff]   ;;  %v17230_v35 = vld [vmem:[#allocation3 + $0x24a4] ss:$8 sps:$4 sm:$0xff]  }
 0x541   :  { %10142 = vmatpush1.bf16.msra.mxu0 %v17150_v62  ;;  %v17233_v62 = vld [vmem:[#allocation3 + $0x2ca4] ss:$8 sps:$4 sm:$0xff]  }
 0x542   :  { %11866 = vmatpush1.bf16.msra.mxu1 %v17153_v38  ;;  %10143 = vmatprep.subr.bf16.mxu0 %v17158_v14  ;;  %v17228_v38 = vld [vmem:[#allocation3 + $0x24a0] ss:$8 sps:$4 sm:$0xff]  }
 0x543   :  { %11867 = vmatprep.subr.bf16.mxu1 %v17161_v2  ;;  %v17231_v14 = vld [vmem:[#allocation3 + $0x2ca0] ss:$8 sps:$4 sm:$0xff]   ;;  %v17236_v2 = vld [vmem:[#allocation3 + $0x24b4] ss:$8 sps:$4 sm:$0xff]  }
 0x545   :  { %10144 = vmatpush1.bf16.msra.mxu0 %v17156_v55  ;;  %v17239_v55 = vld [vmem:[#allocation3 + $0x2cb4] ss:$8 sps:$4 sm:$0xff]  }
 0x546   :  { %11868 = vmatpush1.bf16.msra.mxu1 %v17159_v54  ;;  %10145 = vmatprep.subr.bf16.mxu0 %v17164_v60  ;;  %v17234_v54 = vld [vmem:[#allocation3 + $0x24b0] ss:$8 sps:$4 sm:$0xff]  }
 0x547   :  { %11869 = vmatprep.subr.bf16.mxu1 %v17167_v4  ;;  %v17237_v60 = vld [vmem:[#allocation3 + $0x2cb0] ss:$8 sps:$4 sm:$0xff]   ;;  %v17242_v4 = vld [vmem:[#allocation3 + $0x24c4] ss:$8 sps:$4 sm:$0xff]  }
 0x549   :  { %10146 = vmatpush1.bf16.msra.mxu0 %v17162_v5  ;;  %v17245_v5 = vld [vmem:[#allocation3 + $0x2cc4] ss:$8 sps:$4 sm:$0xff]  }
 0x54a   :  { %11870 = vmatpush1.bf16.msra.mxu1 %v17165_v6  ;;  %10156 = vmatprep.subr.bf16.mxu0 %v17170_v7  ;;  %v17240_v6 = vld [vmem:[#allocation3 + $0x24c0] ss:$8 sps:$4 sm:$0xff]  }
 0x54b   :  { %11880 = vmatprep.subr.bf16.mxu1 %v17173_v8  ;;  %v17243_v7 = vld [vmem:[#allocation3 + $0x2cc0] ss:$8 sps:$4 sm:$0xff]   ;;  %v17248_v8 = vld [vmem:[#allocation3 + $0x24d4] ss:$8 sps:$4 sm:$0xff]  }
 0x54c   :  { %10148 = vmatmul.mubr.bf16.vlgmr.msra.gmra.mrb[8].mxu0 %v8644_v0  ;;  %v17249_v0 = vld [vmem:[#allocation3 + $0x2cd0] ss:$8 sps:$4 sm:$0xff]  }
 0x54d   :  { %11872 = vmatmul.mubr.bf16.vlgmr.msra.gmra.mrb[8].mxu1 %v10368_v22  ;;  %10157 = vmatpush1.bf16.msra.mxu0 %v17168_v23  ;;  %v17254_v22 = vld [vmem:[#allocation3 + $0x24e4] ss:$8 sps:$4 sm:$0xff]  }
 0x54e   :  { %11881 = vmatpush1.bf16.msra.mxu1 %v17171_v40  ;;  %10158 = vmatprep.subr.bf16.mxu0 %v17176_v26  ;;  %v17257_v23 = vld [vmem:[#allocation3 + $0x2ce4] ss:$8 sps:$4 sm:$0xff]   ;;  %v17252_v40 = vld [vmem:[#allocation3 + $0x24e0] ss:$8 sps:$4 sm:$0xff]  }
 0x54f   :  { %11882 = vmatprep.subr.bf16.mxu1 %v17179_v42  ;;  %10188 = vmatprep.mubr.bf16.mxu0 %v18291_v12  ;;  %v17255_v26 = vld [vmem:[#allocation3 + $0x2ce0] ss:$8 sps:$4 sm:$0xff]   ;;  %v17260_v42 = vld [vmem:[#allocation3 + $0x24f4] ss:$8 sps:$4 sm:$0xff]  }
 0x550   :  { %11912 = vmatprep.mubr.bf16.mxu1 %v18294_v56 }
 0x551   :  { %10159 = vmatpush1.bf16.msra.mxu0 %v17174_v31  ;;  %v17263_v31 = vld [vmem:[#allocation3 + $0x2cf4] ss:$8 sps:$4 sm:$0xff]  }
 0x552   :  { %11883 = vmatpush1.bf16.msra.mxu1 %v17177_v39  ;;  %10160 = vmatprep.subr.bf16.mxu0 %v17182_v13  ;;  %v17258_v39 = vld [vmem:[#allocation3 + $0x24f0] ss:$8 sps:$4 sm:$0xff]  }
 0x553   :  { %11884 = vmatprep.subr.bf16.mxu1 %v17185_v27  ;;  %v17261_v13 = vld [vmem:[#allocation3 + $0x2cf0] ss:$8 sps:$4 sm:$0xff]   ;;  %v17266_v27 = vld [vmem:[#allocation3 + $0x2504] ss:$8 sps:$4 sm:$0xff]  }
 0x555   :  { %10161 = vmatpush1.bf16.msra.mxu0 %v17180_v53  ;;  %v17269_v53 = vld [vmem:[#allocation3 + $0x2d04] ss:$8 sps:$4 sm:$0xff]  }
 0x556   :  { %11885 = vmatpush1.bf16.msra.mxu1 %v17183_v16  ;;  %10162 = vmatprep.subr.bf16.mxu0 %v17188_v29  ;;  %v18300_v16 = vrot.slane %v18276_v61, %v17850_v49  ;;  %v18304_v29 = vrot.slane %v18280_v57, %v17850_v49  ;;  %v17270_v61 = vld [vmem:[#allocation3 + $0x2510] ss:$8 sps:$4 sm:$0xff]  }
 0x557   :  { %11886 = vmatprep.subr.bf16.mxu1 %v17191_v1  ;;  %v17264_v1 = vld [vmem:[#allocation3 + $0x2500] ss:$8 sps:$4 sm:$0xff]   ;;  %v17273_v57 = vld [vmem:[#allocation3 + $0x2d10] ss:$8 sps:$4 sm:$0xff]  }
 0x559   :  { %10163 = vmatpush1.bf16.msra.mxu0 %v17186_v20  ;;  %v17267_v20 = vld [vmem:[#allocation3 + $0x2d00] ss:$8 sps:$4 sm:$0xff]  }
 0x55a   :  { %11887 = vmatpush1.bf16.msra.mxu1 %v17189_v58  ;;  %10164 = vmatprep.subr.bf16.mxu0 %v17194_v21  ;;  %v17272_v58 = vld [vmem:[#allocation3 + $0x2514] ss:$8 sps:$4 sm:$0xff]  }
 0x55b   :  { %11888 = vmatprep.subr.bf16.mxu1 %v17197_v59  ;;  %v17275_v21 = vld [vmem:[#allocation3 + $0x2d14] ss:$8 sps:$4 sm:$0xff]   ;;  %v8694_v59 = vcombine.high %v18291_v12, %v18291_v12  ;;  %v17276_v12 = vld [vmem:[#allocation3 + $0x2520] ss:$8 sps:$4 sm:$0xff]  }
 0x55d   :  { %10165 = vmatpush1.bf16.msra.mxu0 %v17192_v34  ;;  %v10418_v34 = vcombine.high %v18294_v56, %v18294_v56  ;;  %v17284_v56 = vld [vmem:[#allocation3 + $0x2534] ss:$8 sps:$4 sm:$0xff]  }
 0x55e   :  { %11889 = vmatpush1.bf16.msra.mxu1 %v17195_v17  ;;  %10166 = vmatprep.subr.bf16.mxu0 %v17200_v43  ;;  %v17278_v17 = vld [vmem:[#allocation3 + $0x2524] ss:$8 sps:$4 sm:$0xff]  }
 0x55f   :  { %11890 = vmatprep.subr.bf16.mxu1 %v17203_v44  ;;  %v17281_v43 = vld [vmem:[#allocation3 + $0x2d24] ss:$8 sps:$4 sm:$0xff]   ;;  %v17279_v44 = vld [vmem:[#allocation3 + $0x2d20] ss:$8 sps:$4 sm:$0xff]  }
 0x561   :  { %10167 = vmatpush1.bf16.msra.mxu0 %v17198_v45  ;;  %v17287_v45 = vld [vmem:[#allocation3 + $0x2d34] ss:$8 sps:$4 sm:$0xff]  }
 0x562   :  { %11891 = vmatpush1.bf16.msra.mxu1 %v17201_v41  ;;  %10168 = vmatprep.subr.bf16.mxu0 %v17206_v52  ;;  %v17282_v41 = vld [vmem:[#allocation3 + $0x2530] ss:$8 sps:$4 sm:$0xff]  }
 0x563   :  { %11892 = vmatprep.subr.bf16.mxu1 %v17209_v9  ;;  %v17285_v52 = vld [vmem:[#allocation3 + $0x2d30] ss:$8 sps:$4 sm:$0xff]   ;;  %v17290_v9 = vld [vmem:[#allocation3 + $0x2544] ss:$8 sps:$4 sm:$0xff]  }
 0x565   :  { %10169 = vmatpush1.bf16.msra.mxu0 %v17204_v25  ;;  %v17293_v25 = vld [vmem:[#allocation3 + $0x2d44] ss:$8 sps:$4 sm:$0xff]  }
 0x566   :  { %11893 = vmatpush1.bf16.msra.mxu1 %v17207_v15  ;;  %10170 = vmatprep.subr.bf16.mxu0 %v17212_v47  ;;  %v17288_v15 = vld [vmem:[#allocation3 + $0x2540] ss:$8 sps:$4 sm:$0xff]  }
 0x567   :  { %11894 = vmatprep.subr.bf16.mxu1 %v17215_v48  ;;  %v17291_v47 = vld [vmem:[#allocation3 + $0x2d40] ss:$8 sps:$4 sm:$0xff]   ;;  %v17296_v48 = vld [vmem:[#allocation3 + $0x2554] ss:$8 sps:$4 sm:$0xff]  }
 0x569   :  { %10171 = vmatpush1.bf16.msra.mxu0 %v17210_v36  ;;  %v17299_v36 = vld [vmem:[#allocation3 + $0x2d54] ss:$8 sps:$4 sm:$0xff]  }
 0x56a   :  { %11895 = vmatpush1.bf16.msra.mxu1 %v17213_v50  ;;  %10172 = vmatprep.subr.bf16.mxu0 %v17218_v11  ;;  %v17294_v50 = vld [vmem:[#allocation3 + $0x2550] ss:$8 sps:$4 sm:$0xff]  }
 0x56b   :  { %11896 = vmatprep.subr.bf16.mxu1 %v17221_v28  ;;  %v17297_v11 = vld [vmem:[#allocation3 + $0x2d50] ss:$8 sps:$4 sm:$0xff]   ;;  %v17302_v28 = vld [vmem:[#allocation3 + $0x2564] ss:$8 sps:$4 sm:$0xff]  }
 0x56d   :  { %10173 = vmatpush1.bf16.msra.mxu0 %v17216_v37  ;;  %v17305_v37 = vld [vmem:[#allocation3 + $0x2d64] ss:$8 sps:$4 sm:$0xff]  }
 0x56e   :  { %11897 = vmatpush1.bf16.msra.mxu1 %v17219_v51  ;;  %10174 = vmatprep.subr.bf16.mxu0 %v17224_v46  ;;  %v17300_v51 = vld [vmem:[#allocation3 + $0x2560] ss:$8 sps:$4 sm:$0xff]  }
 0x56f   :  { %11898 = vmatprep.subr.bf16.mxu1 %v17227_v32  ;;  %v17303_v46 = vld [vmem:[#allocation3 + $0x2d60] ss:$8 sps:$4 sm:$0xff]   ;;  %v17308_v32 = vld [vmem:[#allocation3 + $0x2574] ss:$8 sps:$4 sm:$0xff]  }
 0x571   :  { %10175 = vmatpush1.bf16.msra.mxu0 %v17222_v30  ;;  %v17311_v30 = vld [vmem:[#allocation3 + $0x2d74] ss:$8 sps:$4 sm:$0xff]  }
 0x572   :  { %11899 = vmatpush1.bf16.msra.mxu1 %v17225_v33  ;;  %10176 = vmatprep.subr.bf16.mxu0 %v17230_v35  ;;  %v17306_v33 = vld [vmem:[#allocation3 + $0x2570] ss:$8 sps:$4 sm:$0xff]  }
 0x573   :  { %11900 = vmatprep.subr.bf16.mxu1 %v17233_v62  ;;  %v17309_v35 = vld [vmem:[#allocation3 + $0x2d70] ss:$8 sps:$4 sm:$0xff]   ;;  %v17314_v62 = vld [vmem:[#allocation3 + $0x2584] ss:$8 sps:$4 sm:$0xff]  }
 0x575   :  { %10177 = vmatpush1.bf16.msra.mxu0 %v17228_v38  ;;  %v17317_v38 = vld [vmem:[#allocation3 + $0x2d84] ss:$8 sps:$4 sm:$0xff]  }
 0x576   :  { %11901 = vmatpush1.bf16.msra.mxu1 %v17231_v14  ;;  %10178 = vmatprep.subr.bf16.mxu0 %v17236_v2  ;;  %v17312_v14 = vld [vmem:[#allocation3 + $0x2580] ss:$8 sps:$4 sm:$0xff]  }
 0x577   :  { %11902 = vmatprep.subr.bf16.mxu1 %v17239_v55  ;;  %v17315_v2 = vld [vmem:[#allocation3 + $0x2d80] ss:$8 sps:$4 sm:$0xff]   ;;  %v17320_v55 = vld [vmem:[#allocation3 + $0x2594] ss:$8 sps:$4 sm:$0xff]  }
 0x579   :  { %10179 = vmatpush1.bf16.msra.mxu0 %v17234_v54  ;;  %v17323_v54 = vld [vmem:[#allocation3 + $0x2d94] ss:$8 sps:$4 sm:$0xff]  }
 0x57a   :  { %11903 = vmatpush1.bf16.msra.mxu1 %v17237_v60  ;;  %10180 = vmatprep.subr.bf16.mxu0 %v17242_v4  ;;  %v17318_v60 = vld [vmem:[#allocation3 + $0x2590] ss:$8 sps:$4 sm:$0xff]  }
 0x57b   :  { %11904 = vmatprep.subr.bf16.mxu1 %v17245_v5  ;;  %v17321_v4 = vld [vmem:[#allocation3 + $0x2d90] ss:$8 sps:$4 sm:$0xff]   ;;  %v17326_v5 = vld [vmem:[#allocation3 + $0x25a4] ss:$8 sps:$4 sm:$0xff]  }
 0x57d   :  { %10181 = vmatpush1.bf16.msra.mxu0 %v17240_v6  ;;  %v17329_v6 = vld [vmem:[#allocation3 + $0x2da4] ss:$8 sps:$4 sm:$0xff]  }
 0x57e   :  { %11905 = vmatpush1.bf16.msra.mxu1 %v17243_v7  ;;  %10182 = vmatprep.subr.bf16.mxu0 %v17248_v8  ;;  %v17324_v7 = vld [vmem:[#allocation3 + $0x25a0] ss:$8 sps:$4 sm:$0xff]  }
 0x57f   :  { %11906 = vmatprep.subr.bf16.mxu1 %v17251_v18  ;;  %v17327_v8 = vld [vmem:[#allocation3 + $0x2da0] ss:$8 sps:$4 sm:$0xff]   ;;  %v17332_v18 = vld [vmem:[#allocation3 + $0x25b4] ss:$8 sps:$4 sm:$0xff]  }
 0x581   :  { %10183 = vmatpush1.bf16.msra.mxu0 %v17246_v63  ;;  %v17335_v63 = vld [vmem:[#allocation3 + $0x2db4] ss:$8 sps:$4 sm:$0xff]  }
 0x582   :  { %11907 = vmatpush1.bf16.msra.mxu1 %v17249_v0  ;;  %10184 = vmatprep.subr.bf16.mxu0 %v17254_v22  ;;  %v17330_v0 = vld [vmem:[#allocation3 + $0x25b0] ss:$8 sps:$4 sm:$0xff]  }
 0x583   :  { %11908 = vmatprep.subr.bf16.mxu1 %v17257_v23  ;;  %v17333_v22 = vld [vmem:[#allocation3 + $0x2db0] ss:$8 sps:$4 sm:$0xff]   ;;  %v17338_v23 = vld [vmem:[#allocation3 + $0x25c4] ss:$8 sps:$4 sm:$0xff]  }
 0x585   :  { %10185 = vmatpush1.bf16.msra.mxu0 %v17252_v40  ;;  %v17341_v40 = vld [vmem:[#allocation3 + $0x2dc4] ss:$8 sps:$4 sm:$0xff]  }
 0x586   :  { %11909 = vmatpush1.bf16.msra.mxu1 %v17255_v26  ;;  %10186 = vmatprep.subr.bf16.mxu0 %v17260_v42  ;;  %v17336_v26 = vld [vmem:[#allocation3 + $0x25c0] ss:$8 sps:$4 sm:$0xff]  }
 0x587   :  { %11910 = vmatprep.subr.bf16.mxu1 %v17263_v31  ;;  %v17339_v42 = vld [vmem:[#allocation3 + $0x2dc0] ss:$8 sps:$4 sm:$0xff]   ;;  %v17344_v31 = vld [vmem:[#allocation3 + $0x25d4] ss:$8 sps:$4 sm:$0xff]  }
 0x589   :  { %10187 = vmatpush1.bf16.msra.mxu0 %v17258_v39  ;;  %v17347_v39 = vld [vmem:[#allocation3 + $0x2dd4] ss:$8 sps:$4 sm:$0xff]  }
 0x58a   :  { %11911 = vmatpush1.bf16.msra.mxu1 %v17261_v13  ;;  %10197 = vmatprep.subr.bf16.mxu0 %v17266_v27  ;;  %v17342_v13 = vld [vmem:[#allocation3 + $0x25d0] ss:$8 sps:$4 sm:$0xff]  }
 0x58b   :  { %11921 = vmatprep.subr.bf16.mxu1 %v17269_v53  ;;  %v17345_v27 = vld [vmem:[#allocation3 + $0x2dd0] ss:$8 sps:$4 sm:$0xff]   ;;  %v17350_v53 = vld [vmem:[#allocation3 + $0x25e4] ss:$8 sps:$4 sm:$0xff]  }
 0x58c   :  { %10189 = vmatmul.mubr.bf16.vlgmr.msra.gmra.mrb[8].mxu0 %v18300_v16 }
 0x58d   :  { %11913 = vmatmul.mubr.bf16.vlgmr.msra.gmra.mrb[8].mxu1 %v18304_v29  ;;  %10198 = vmatpush1.bf16.msra.mxu0 %v17264_v1  ;;  %v17353_v1 = vld [vmem:[#allocation3 + $0x2de4] ss:$8 sps:$4 sm:$0xff]  }
 0x58e   :  { %11922 = vmatpush1.bf16.msra.mxu1 %v17267_v20  ;;  %10199 = vmatprep.subr.bf16.mxu0 %v17272_v58  ;;  %v8647_v20 = vcombine.high %v18267_v3, %v18267_v3  ;;  %v10371_v58 = vcombine.high %v18272_v24, %v18272_v24  ;;  %v17354_v3 = vld [vmem:[#allocation3 + $0x25f0] ss:$8 sps:$4 sm:$0xff]   ;;  %v17362_v24 = vld [vmem:[#allocation3 + $0x2604] ss:$8 sps:$4 sm:$0xff]  }
 0x58f   :  { %11923 = vmatprep.subr.bf16.mxu1 %v17275_v21  ;;  %10229 = vmatprep.mubr.bf16.mxu0 %v8694_v59  ;;  %v17348_v21 = vld [vmem:[#allocation3 + $0x25e0] ss:$8 sps:$4 sm:$0xff]  }
 0x590   :  { %11953 = vmatprep.mubr.bf16.mxu1 %v10418_v34  ;;  %v17351_v59 = vld [vmem:[#allocation3 + $0x2de0] ss:$8 sps:$4 sm:$0xff]   ;;  %v17356_v34 = vld [vmem:[#allocation3 + $0x25f4] ss:$8 sps:$4 sm:$0xff]  }
 0x591   :  { %10200 = vmatpush1.bf16.msra.mxu0 %v17270_v61  ;;  %v17359_v61 = vld [vmem:[#allocation3 + $0x2df4] ss:$8 sps:$4 sm:$0xff]  }
 0x592   :  { %11924 = vmatpush1.bf16.msra.mxu1 %v17273_v57  ;;  %10201 = vmatprep.subr.bf16.mxu0 %v17278_v17  ;;  %v18317_v57 = vrot.slane %v8647_v20, %v17850_v49  ;;  %v18320_v17 = vrot.slane %v10371_v58, %v17850_v49  ;;  %v17431_v20 = vld [vmem:[#allocation3 + $0x2eb4] ss:$8 sps:$4 sm:$0xff]   ;;  %v17426_v58 = vld [vmem:[#allocation3 + $0x26b0] ss:$8 sps:$4 sm:$0xff]  }
 0x593   :  { %11925 = vmatprep.subr.bf16.mxu1 %v17281_v43  ;;  %v17357_v43 = vld [vmem:[#allocation3 + $0x2df0] ss:$8 sps:$4 sm:$0xff]  }
 0x595   :  { %10202 = vmatpush1.bf16.msra.mxu0 %v17276_v12  ;;  %v17365_v12 = vld [vmem:[#allocation3 + $0x2e04] ss:$8 sps:$4 sm:$0xff]  }
 0x596   :  { %11926 = vmatpush1.bf16.msra.mxu1 %v17279_v44  ;;  %10203 = vmatprep.subr.bf16.mxu0 %v17284_v56  ;;  %v8663_v44 = vcombine.high %v18317_v57, %v18317_v57  ;;  %v10387_v56 = vcombine.high %v18320_v17, %v18320_v17 }
 0x597   :  { %11927 = vmatprep.subr.bf16.mxu1 %v17287_v45  ;;  %v8692_v45 = vcombine.high %v18300_v16, %v18300_v16  ;;  %v17366_v16 = vld [vmem:[#allocation3 + $0x2610] ss:$8 sps:$4 sm:$0xff]  }
 0x599   :  { %10204 = vmatpush1.bf16.msra.mxu0 %v17282_v41  ;;  %v10416_v41 = vcombine.high %v18304_v29, %v18304_v29  ;;  %v17369_v29 = vld [vmem:[#allocation3 + $0x2e10] ss:$8 sps:$4 sm:$0xff]  }
 0x59a   :  { %11928 = vmatpush1.bf16.msra.mxu1 %v17285_v52  ;;  %10205 = vmatprep.subr.bf16.mxu0 %v17290_v9  ;;  %v17360_v52 = vld [vmem:[#allocation3 + $0x2600] ss:$8 sps:$4 sm:$0xff]  }
 0x59b   :  { %11929 = vmatprep.subr.bf16.mxu1 %v17293_v25  ;;  %v17363_v9 = vld [vmem:[#allocation3 + $0x2e00] ss:$8 sps:$4 sm:$0xff]   ;;  %v17368_v25 = vld [vmem:[#allocation3 + $0x2614] ss:$8 sps:$4 sm:$0xff]  }
 0x59d   :  { %10206 = vmatpush1.bf16.msra.mxu0 %v17288_v15  ;;  %v17371_v15 = vld [vmem:[#allocation3 + $0x2e14] ss:$8 sps:$4 sm:$0xff]  }
 0x59e   :  { %11930 = vmatpush1.bf16.msra.mxu1 %v17291_v47  ;;  %10207 = vmatprep.subr.bf16.mxu0 %v17296_v48  ;;  %v18331_v47 = vrot.slane %v8663_v44, %v17850_v49  ;;  %v18334_v48 = vrot.slane %v10387_v56, %v17850_v49  ;;  %v17441_v44 = vld [vmem:[#allocation3 + $0x2ed0] ss:$8 sps:$4 sm:$0xff]   ;;  %v17446_v56 = vld [vmem:[#allocation3 + $0x26e4] ss:$8 sps:$4 sm:$0xff]  }
 0x59f   :  { %11931 = vmatprep.subr.bf16.mxu1 %v17299_v36  ;;  %v17374_v36 = vld [vmem:[#allocation3 + $0x2624] ss:$8 sps:$4 sm:$0xff]  }
 0x5a1   :  { %10208 = vmatpush1.bf16.msra.mxu0 %v17294_v50  ;;  %v17377_v50 = vld [vmem:[#allocation3 + $0x2e24] ss:$8 sps:$4 sm:$0xff]  }
 0x5a2   :  { %11932 = vmatpush1.bf16.msra.mxu1 %v17297_v11  ;;  %10209 = vmatprep.subr.bf16.mxu0 %v17302_v28  ;;  %v17372_v11 = vld [vmem:[#allocation3 + $0x2620] ss:$8 sps:$4 sm:$0xff]  }
 0x5a3   :  { %11933 = vmatprep.subr.bf16.mxu1 %v17305_v37  ;;  %v17375_v28 = vld [vmem:[#allocation3 + $0x2e20] ss:$8 sps:$4 sm:$0xff]   ;;  %v17380_v37 = vld [vmem:[#allocation3 + $0x2634] ss:$8 sps:$4 sm:$0xff]  }
 0x5a5   :  { %10210 = vmatpush1.bf16.msra.mxu0 %v17300_v51  ;;  %v17383_v51 = vld [vmem:[#allocation3 + $0x2e34] ss:$8 sps:$4 sm:$0xff]  }
 0x5a6   :  { %11934 = vmatpush1.bf16.msra.mxu1 %v17303_v46  ;;  %10211 = vmatprep.subr.bf16.mxu0 %v17308_v32  ;;  %v17378_v46 = vld [vmem:[#allocation3 + $0x2630] ss:$8 sps:$4 sm:$0xff]  }
 0x5a7   :  { %11935 = vmatprep.subr.bf16.mxu1 %v17311_v30  ;;  %v17381_v32 = vld [vmem:[#allocation3 + $0x2e30] ss:$8 sps:$4 sm:$0xff]   ;;  %v17386_v30 = vld [vmem:[#allocation3 + $0x2644] ss:$8 sps:$4 sm:$0xff]  }
 0x5a9   :  { %10212 = vmatpush1.bf16.msra.mxu0 %v17306_v33  ;;  %v17389_v33 = vld [vmem:[#allocation3 + $0x2e44] ss:$8 sps:$4 sm:$0xff]  }
 0x5aa   :  { %11936 = vmatpush1.bf16.msra.mxu1 %v17309_v35  ;;  %10213 = vmatprep.subr.bf16.mxu0 %v17314_v62  ;;  %v17384_v35 = vld [vmem:[#allocation3 + $0x2640] ss:$8 sps:$4 sm:$0xff]  }
 0x5ab   :  { %11937 = vmatprep.subr.bf16.mxu1 %v17317_v38  ;;  %v17387_v62 = vld [vmem:[#allocation3 + $0x2e40] ss:$8 sps:$4 sm:$0xff]   ;;  %v17392_v38 = vld [vmem:[#allocation3 + $0x2654] ss:$8 sps:$4 sm:$0xff]  }
 0x5ad   :  { %10214 = vmatpush1.bf16.msra.mxu0 %v17312_v14  ;;  %v17395_v14 = vld [vmem:[#allocation3 + $0x2e54] ss:$8 sps:$4 sm:$0xff]  }
 0x5ae   :  { %11938 = vmatpush1.bf16.msra.mxu1 %v17315_v2  ;;  %10215 = vmatprep.subr.bf16.mxu0 %v17320_v55  ;;  %v17390_v2 = vld [vmem:[#allocation3 + $0x2650] ss:$8 sps:$4 sm:$0xff]  }
 0x5af   :  { %11939 = vmatprep.subr.bf16.mxu1 %v17323_v54  ;;  %v17393_v55 = vld [vmem:[#allocation3 + $0x2e50] ss:$8 sps:$4 sm:$0xff]   ;;  %v17398_v54 = vld [vmem:[#allocation3 + $0x2664] ss:$8 sps:$4 sm:$0xff]  }
 0x5b1   :  { %10216 = vmatpush1.bf16.msra.mxu0 %v17318_v60  ;;  %v17401_v60 = vld [vmem:[#allocation3 + $0x2e64] ss:$8 sps:$4 sm:$0xff]  }
 0x5b2   :  { %11940 = vmatpush1.bf16.msra.mxu1 %v17321_v4  ;;  %10217 = vmatprep.subr.bf16.mxu0 %v17326_v5  ;;  %v17396_v4 = vld [vmem:[#allocation3 + $0x2660] ss:$8 sps:$4 sm:$0xff]  }
 0x5b3   :  { %11941 = vmatprep.subr.bf16.mxu1 %v17329_v6  ;;  %v17399_v5 = vld [vmem:[#allocation3 + $0x2e60] ss:$8 sps:$4 sm:$0xff]   ;;  %v17404_v6 = vld [vmem:[#allocation3 + $0x2674] ss:$8 sps:$4 sm:$0xff]  }
 0x5b5   :  { %10218 = vmatpush1.bf16.msra.mxu0 %v17324_v7  ;;  %v17407_v7 = vld [vmem:[#allocation3 + $0x2e74] ss:$8 sps:$4 sm:$0xff]  }
 0x5b6   :  { %11942 = vmatpush1.bf16.msra.mxu1 %v17327_v8  ;;  %10219 = vmatprep.subr.bf16.mxu0 %v17332_v18  ;;  %v17402_v8 = vld [vmem:[#allocation3 + $0x2670] ss:$8 sps:$4 sm:$0xff]  }
 0x5b7   :  { %11943 = vmatprep.subr.bf16.mxu1 %v17335_v63  ;;  %v17405_v18 = vld [vmem:[#allocation3 + $0x2e70] ss:$8 sps:$4 sm:$0xff]   ;;  %v17410_v63 = vld [vmem:[#allocation3 + $0x2684] ss:$8 sps:$4 sm:$0xff]  }
 0x5b9   :  { %10220 = vmatpush1.bf16.msra.mxu0 %v17330_v0  ;;  %v17413_v0 = vld [vmem:[#allocation3 + $0x2e84] ss:$8 sps:$4 sm:$0xff]  }
 0x5ba   :  { %11944 = vmatpush1.bf16.msra.mxu1 %v17333_v22  ;;  %10221 = vmatprep.subr.bf16.mxu0 %v17338_v23  ;;  %v17408_v22 = vld [vmem:[#allocation3 + $0x2680] ss:$8 sps:$4 sm:$0xff]  }
 0x5bb   :  { %11945 = vmatprep.subr.bf16.mxu1 %v17341_v40  ;;  %v17411_v23 = vld [vmem:[#allocation3 + $0x2e80] ss:$8 sps:$4 sm:$0xff]   ;;  %v17416_v40 = vld [vmem:[#allocation3 + $0x2694] ss:$8 sps:$4 sm:$0xff]  }
 0x5bd   :  { %10222 = vmatpush1.bf16.msra.mxu0 %v17336_v26  ;;  %v17419_v26 = vld [vmem:[#allocation3 + $0x2e94] ss:$8 sps:$4 sm:$0xff]  }
 0x5be   :  { %11946 = vmatpush1.bf16.msra.mxu1 %v17339_v42  ;;  %10223 = vmatprep.subr.bf16.mxu0 %v17344_v31  ;;  %v17414_v42 = vld [vmem:[#allocation3 + $0x2690] ss:$8 sps:$4 sm:$0xff]  }
 0x5bf   :  { %11947 = vmatprep.subr.bf16.mxu1 %v17347_v39  ;;  %v17417_v31 = vld [vmem:[#allocation3 + $0x2e90] ss:$8 sps:$4 sm:$0xff]   ;;  %v17422_v39 = vld [vmem:[#allocation3 + $0x26a4] ss:$8 sps:$4 sm:$0xff]  }
 0x5c1   :  { %10224 = vmatpush1.bf16.msra.mxu0 %v17342_v13  ;;  %v17425_v13 = vld [vmem:[#allocation3 + $0x2ea4] ss:$8 sps:$4 sm:$0xff]  }
 0x5c2   :  { %11948 = vmatpush1.bf16.msra.mxu1 %v17345_v27  ;;  %10225 = vmatprep.subr.bf16.mxu0 %v17350_v53  ;;  %v17420_v27 = vld [vmem:[#allocation3 + $0x26a0] ss:$8 sps:$4 sm:$0xff]  }
 0x5c3   :  { %11949 = vmatprep.subr.bf16.mxu1 %v17353_v1  ;;  %v17423_v53 = vld [vmem:[#allocation3 + $0x2ea0] ss:$8 sps:$4 sm:$0xff]   ;;  %v17428_v1 = vld [vmem:[#allocation3 + $0x26b4] ss:$8 sps:$4 sm:$0xff]  }
 0x5c5   :  { %10226 = vmatpush1.bf16.msra.mxu0 %v17348_v21  ;;  %v17429_v21 = vld [vmem:[#allocation3 + $0x2eb0] ss:$8 sps:$4 sm:$0xff]  }
 0x5c6   :  { %11950 = vmatpush1.bf16.msra.mxu1 %v17351_v59  ;;  %10227 = vmatprep.subr.bf16.mxu0 %v17356_v34  ;;  %v17434_v59 = vld [vmem:[#allocation3 + $0x26c4] ss:$8 sps:$4 sm:$0xff]  }
 0x5c7   :  { %11951 = vmatprep.subr.bf16.mxu1 %v17359_v61  ;;  %v17437_v34 = vld [vmem:[#allocation3 + $0x2ec4] ss:$8 sps:$4 sm:$0xff]   ;;  %v17432_v61 = vld [vmem:[#allocation3 + $0x26c0] ss:$8 sps:$4 sm:$0xff]  }
 0x5c9   :  { %10228 = vmatpush1.bf16.msra.mxu0 %v17354_v3  ;;  %v17435_v3 = vld [vmem:[#allocation3 + $0x2ec0] ss:$8 sps:$4 sm:$0xff]  }
 0x5ca   :  { %11952 = vmatpush1.bf16.msra.mxu1 %v17357_v43  ;;  %10238 = vmatprep.subr.bf16.mxu0 %v17362_v24  ;;  %v17440_v43 = vld [vmem:[#allocation3 + $0x26d4] ss:$8 sps:$4 sm:$0xff]  }
 0x5cb   :  { %11962 = vmatprep.subr.bf16.mxu1 %v17365_v12  ;;  %v17443_v24 = vld [vmem:[#allocation3 + $0x2ed4] ss:$8 sps:$4 sm:$0xff]   ;;  %v17438_v12 = vld [vmem:[#allocation3 + $0x26d0] ss:$8 sps:$4 sm:$0xff]  }
 0x5cc   :  { %10230 = vmatmul.mubr.bf16.vlgmr.msra.gmra.mrb[8].mxu0 %v8692_v45  ;;  %v17449_v45 = vld [vmem:[#allocation3 + $0x2ee4] ss:$8 sps:$4 sm:$0xff]  }
 0x5cd   :  { %11954 = vmatmul.mubr.bf16.vlgmr.msra.gmra.mrb[8].mxu1 %v10416_v41  ;;  %10239 = vmatpush1.bf16.msra.mxu0 %v17360_v52  ;;  %v17444_v41 = vld [vmem:[#allocation3 + $0x26e0] ss:$8 sps:$4 sm:$0xff]  }
 0x5ce   :  { %11963 = vmatpush1.bf16.msra.mxu1 %v17363_v9  ;;  %10240 = vmatprep.subr.bf16.mxu0 %v17368_v25  ;;  %v17447_v52 = vld [vmem:[#allocation3 + $0x2ee0] ss:$8 sps:$4 sm:$0xff]   ;;  %v17452_v9 = vld [vmem:[#allocation3 + $0x26f4] ss:$8 sps:$4 sm:$0xff]  }
 0x5cf   :  { %11964 = vmatprep.subr.bf16.mxu1 %v17371_v15  ;;  %10270 = vmatprep.mubr.bf16.mxu0 %v18331_v47  ;;  %v17455_v25 = vld [vmem:[#allocation3 + $0x2ef4] ss:$8 sps:$4 sm:$0xff]   ;;  %v17450_v15 = vld [vmem:[#allocation3 + $0x26f0] ss:$8 sps:$4 sm:$0xff]  }
 0x5d0   :  { %11994 = vmatprep.mubr.bf16.mxu1 %v18334_v48 }
 0x5d1   :  { %10241 = vmatpush1.bf16.msra.mxu0 %v17366_v16  ;;  %v17453_v16 = vld [vmem:[#allocation3 + $0x2ef0] ss:$8 sps:$4 sm:$0xff]  }
 0x5d2   :  { %11965 = vmatpush1.bf16.msra.mxu1 %v17369_v29  ;;  %10242 = vmatprep.subr.bf16.mxu0 %v17374_v36  ;;  %v17459_v29 = vld [vmem:[#allocation3 + $0x2704] ss:$8 sps:$4 sm:$0xff]  }
 0x5d3   :  { %11966 = vmatprep.subr.bf16.mxu1 %v17377_v50  ;;  %v17463_v36 = vld [vmem:[#allocation3 + $0x2f04] ss:$8 sps:$4 sm:$0xff]   ;;  %v18340_v50 = vrot.slane %v18317_v57, %v17850_v49  ;;  %v17467_v57 = vld [vmem:[#allocation3 + $0x2f10] ss:$8 sps:$4 sm:$0xff]  }
 0x5d5   :  { %10243 = vmatpush1.bf16.msra.mxu0 %v17372_v11  ;;  %v18344_v11 = vrot.slane %v18320_v17, %v17850_v49  ;;  %v17464_v49 = vld [vmem:[#allocation3 + $0x2710] ss:$8 sps:$4 sm:$0xff]   ;;  %v17472_v17 = vld [vmem:[#allocation3 + $0x2724] ss:$8 sps:$4 sm:$0xff]  }
 0x5d6   :  { %11967 = vmatpush1.bf16.msra.mxu1 %v17375_v28  ;;  %10244 = vmatprep.subr.bf16.mxu0 %v17380_v37  ;;  %v17457_v28 = vld [vmem:[#allocation3 + $0x2700] ss:$8 sps:$4 sm:$0xff]  }
 0x5d7   :  { %11968 = vmatprep.subr.bf16.mxu1 %v17383_v51  ;;  %v17461_v37 = vld [vmem:[#allocation3 + $0x2f00] ss:$8 sps:$4 sm:$0xff]   ;;  %v17466_v51 = vld [vmem:[#allocation3 + $0x2714] ss:$8 sps:$4 sm:$0xff]  }
 0x5d9   :  { %10245 = vmatpush1.bf16.msra.mxu0 %v17378_v46  ;;  %v17469_v46 = vld [vmem:[#allocation3 + $0x2f14] ss:$8 sps:$4 sm:$0xff]  }
 0x5da   :  { %11969 = vmatpush1.bf16.msra.mxu1 %v17381_v32  ;;  %10246 = vmatprep.subr.bf16.mxu0 %v17386_v30  ;;  %v8695_v32 = vcombine.high %v18331_v47, %v18331_v47  ;;  %v10419_v30 = vcombine.high %v18334_v48, %v18334_v48  ;;  %v17470_v47 = vld [vmem:[#allocation3 + $0x2720] ss:$8 sps:$4 sm:$0xff]   ;;  %v17478_v48 = vld [vmem:[#allocation3 + $0x2734] ss:$8 sps:$4 sm:$0xff]  }
 0x5db   :  { %11970 = vmatprep.subr.bf16.mxu1 %v17389_v33  ;;  %v17475_v33 = vld [vmem:[#allocation3 + $0x2f24] ss:$8 sps:$4 sm:$0xff]  }
 0x5dd   :  { %10247 = vmatpush1.bf16.msra.mxu0 %v17384_v35  ;;  %v17473_v35 = vld [vmem:[#allocation3 + $0x2f20] ss:$8 sps:$4 sm:$0xff]  }
 0x5de   :  { %11971 = vmatpush1.bf16.msra.mxu1 %v17387_v62  ;;  %10248 = vmatprep.subr.bf16.mxu0 %v17392_v38  ;;  %v17481_v62 = vld [vmem:[#allocation3 + $0x2f34] ss:$8 sps:$4 sm:$0xff]   ;;  %v17476_v38 = vld [vmem:[#allocation3 + $0x2730] ss:$8 sps:$4 sm:$0xff]  }
 0x5df   :  { %11972 = vmatprep.subr.bf16.mxu1 %v17395_v14  ;;  %v17479_v14 = vld [vmem:[#allocation3 + $0x2f30] ss:$8 sps:$4 sm:$0xff]  }
 0x5e1   :  { %10249 = vmatpush1.bf16.msra.mxu0 %v17390_v2  ;;  %v17484_v2 = vld [vmem:[#allocation3 + $0x2744] ss:$8 sps:$4 sm:$0xff]  }
 0x5e2   :  { %11973 = vmatpush1.bf16.msra.mxu1 %v17393_v55  ;;  %10250 = vmatprep.subr.bf16.mxu0 %v17398_v54  ;;  %v17487_v55 = vld [vmem:[#allocation3 + $0x2f44] ss:$8 sps:$4 sm:$0xff]   ;;  %v17482_v54 = vld [vmem:[#allocation3 + $0x2740] ss:$8 sps:$4 sm:$0xff]  }
 0x5e3   :  { %11974 = vmatprep.subr.bf16.mxu1 %v17401_v60  ;;  %v17485_v60 = vld [vmem:[#allocation3 + $0x2f40] ss:$8 sps:$4 sm:$0xff]  }
 0x5e5   :  { %10251 = vmatpush1.bf16.msra.mxu0 %v17396_v4  ;;  %v17490_v4 = vld [vmem:[#allocation3 + $0x2754] ss:$8 sps:$4 sm:$0xff]  }
 0x5e6   :  { %11975 = vmatpush1.bf16.msra.mxu1 %v17399_v5  ;;  %10252 = vmatprep.subr.bf16.mxu0 %v17404_v6  ;;  %v17493_v5 = vld [vmem:[#allocation3 + $0x2f54] ss:$8 sps:$4 sm:$0xff]   ;;  %v17488_v6 = vld [vmem:[#allocation3 + $0x2750] ss:$8 sps:$4 sm:$0xff]  }
 0x5e7   :  { %11976 = vmatprep.subr.bf16.mxu1 %v17407_v7  ;;  %v17491_v7 = vld [vmem:[#allocation3 + $0x2f50] ss:$8 sps:$4 sm:$0xff]  }
 0x5e9   :  { %10253 = vmatpush1.bf16.msra.mxu0 %v17402_v8  ;;  %v17496_v8 = vld [vmem:[#allocation3 + $0x2764] ss:$8 sps:$4 sm:$0xff]  }
 0x5ea   :  { %11977 = vmatpush1.bf16.msra.mxu1 %v17405_v18  ;;  %10254 = vmatprep.subr.bf16.mxu0 %v17410_v63  ;;  %v17499_v18 = vld [vmem:[#allocation3 + $0x2f64] ss:$8 sps:$4 sm:$0xff]   ;;  %v17494_v63 = vld [vmem:[#allocation3 + $0x2760] ss:$8 sps:$4 sm:$0xff]  }
 0x5eb   :  { %11978 = vmatprep.subr.bf16.mxu1 %v17413_v0  ;;  %v17497_v0 = vld [vmem:[#allocation3 + $0x2f60] ss:$8 sps:$4 sm:$0xff]  }
 0x5ed   :  { %10255 = vmatpush1.bf16.msra.mxu0 %v17408_v22  ;;  %v17502_v22 = vld [vmem:[#allocation3 + $0x2774] ss:$8 sps:$4 sm:$0xff]  }
 0x5ee   :  { %11979 = vmatpush1.bf16.msra.mxu1 %v17411_v23  ;;  %10256 = vmatprep.subr.bf16.mxu0 %v17416_v40  ;;  %v17505_v23 = vld [vmem:[#allocation3 + $0x2f74] ss:$8 sps:$4 sm:$0xff]   ;;  %v17500_v40 = vld [vmem:[#allocation3 + $0x2770] ss:$8 sps:$4 sm:$0xff]  }
 0x5ef   :  { %11980 = vmatprep.subr.bf16.mxu1 %v17419_v26  ;;  %v17503_v26 = vld [vmem:[#allocation3 + $0x2f70] ss:$8 sps:$4 sm:$0xff]  }
 0x5f1   :  { %10257 = vmatpush1.bf16.msra.mxu0 %v17414_v42  ;;  %v17508_v42 = vld [vmem:[#allocation3 + $0x2784] ss:$8 sps:$4 sm:$0xff]  }
 0x5f2   :  { %11981 = vmatpush1.bf16.msra.mxu1 %v17417_v31  ;;  %10258 = vmatprep.subr.bf16.mxu0 %v17422_v39  ;;  %v17511_v31 = vld [vmem:[#allocation3 + $0x2f84] ss:$8 sps:$4 sm:$0xff]   ;;  %v17506_v39 = vld [vmem:[#allocation3 + $0x2780] ss:$8 sps:$4 sm:$0xff]  }
 0x5f3   :  { %11982 = vmatprep.subr.bf16.mxu1 %v17425_v13  ;;  %v17509_v13 = vld [vmem:[#allocation3 + $0x2f80] ss:$8 sps:$4 sm:$0xff]  }
 0x5f5   :  { %10259 = vmatpush1.bf16.msra.mxu0 %v17420_v27  ;;  %v17514_v27 = vld [vmem:[#allocation3 + $0x2794] ss:$8 sps:$4 sm:$0xff]  }
 0x5f6   :  { %11983 = vmatpush1.bf16.msra.mxu1 %v17423_v53  ;;  %10260 = vmatprep.subr.bf16.mxu0 %v17428_v1  ;;  %v17517_v53 = vld [vmem:[#allocation3 + $0x2f94] ss:$8 sps:$4 sm:$0xff]   ;;  %v17512_v1 = vld [vmem:[#allocation3 + $0x2790] ss:$8 sps:$4 sm:$0xff]  }
 0x5f7   :  { %11984 = vmatprep.subr.bf16.mxu1 %v17431_v20  ;;  %v17515_v20 = vld [vmem:[#allocation3 + $0x2f90] ss:$8 sps:$4 sm:$0xff]  }
 0x5f9   :  { %10261 = vmatpush1.bf16.msra.mxu0 %v17426_v58  ;;  %v17520_v58 = vld [vmem:[#allocation3 + $0x27a4] ss:$8 sps:$4 sm:$0xff]  }
 0x5fa   :  { %11985 = vmatpush1.bf16.msra.mxu1 %v17429_v21  ;;  %10262 = vmatprep.subr.bf16.mxu0 %v17434_v59  ;;  %v17523_v21 = vld [vmem:[#allocation3 + $0x2fa4] ss:$8 sps:$4 sm:$0xff]   ;;  %v17518_v59 = vld [vmem:[#allocation3 + $0x27a0] ss:$8 sps:$4 sm:$0xff]  }
 0x5fb   :  { %11986 = vmatprep.subr.bf16.mxu1 %v17437_v34  ;;  %v17521_v34 = vld [vmem:[#allocation3 + $0x2fa0] ss:$8 sps:$4 sm:$0xff]  }
 0x5fd   :  { %10263 = vmatpush1.bf16.msra.mxu0 %v17432_v61  ;;  %v17526_v61 = vld [vmem:[#allocation3 + $0x27b4] ss:$8 sps:$4 sm:$0xff]  }
 0x5fe   :  { %11987 = vmatpush1.bf16.msra.mxu1 %v17435_v3  ;;  %10264 = vmatprep.subr.bf16.mxu0 %v17440_v43  ;;  %v17529_v3 = vld [vmem:[#allocation3 + $0x2fb4] ss:$8 sps:$4 sm:$0xff]   ;;  %v17524_v43 = vld [vmem:[#allocation3 + $0x27b0] ss:$8 sps:$4 sm:$0xff]  }
 0x5ff   :  { %11988 = vmatprep.subr.bf16.mxu1 %v17443_v24  ;;  %v17527_v24 = vld [vmem:[#allocation3 + $0x2fb0] ss:$8 sps:$4 sm:$0xff]  }
 0x601   :  { %10265 = vmatpush1.bf16.msra.mxu0 %v17438_v12  ;;  %v17532_v12 = vld [vmem:[#allocation3 + $0x27c4] ss:$8 sps:$4 sm:$0xff]  }
 0x602   :  { %11989 = vmatpush1.bf16.msra.mxu1 %v17441_v44  ;;  %10266 = vmatprep.subr.bf16.mxu0 %v17446_v56  ;;  %v17535_v44 = vld [vmem:[#allocation3 + $0x2fc4] ss:$8 sps:$4 sm:$0xff]   ;;  %v17530_v56 = vld [vmem:[#allocation3 + $0x27c0] ss:$8 sps:$4 sm:$0xff]  }
 0x603   :  { %11990 = vmatprep.subr.bf16.mxu1 %v17449_v45  ;;  %v17533_v45 = vld [vmem:[#allocation3 + $0x2fc0] ss:$8 sps:$4 sm:$0xff]  }
 0x605   :  { %10267 = vmatpush1.bf16.msra.mxu0 %v17444_v41  ;;  %v17538_v41 = vld [vmem:[#allocation3 + $0x27d4] ss:$8 sps:$4 sm:$0xff]  }
 0x606   :  { %11991 = vmatpush1.bf16.msra.mxu1 %v17447_v52  ;;  %10268 = vmatprep.subr.bf16.mxu0 %v17452_v9  ;;  %v17541_v52 = vld [vmem:[#allocation3 + $0x2fd4] ss:$8 sps:$4 sm:$0xff]   ;;  %v17536_v9 = vld [vmem:[#allocation3 + $0x27d0] ss:$8 sps:$4 sm:$0xff]  }
 0x607   :  { %11992 = vmatprep.subr.bf16.mxu1 %v17455_v25  ;;  %v17539_v25 = vld [vmem:[#allocation3 + $0x2fd0] ss:$8 sps:$4 sm:$0xff]  }
 0x609   :  { %10269 = vmatpush1.bf16.msra.mxu0 %v17450_v15  ;;  %v17544_v15 = vld [vmem:[#allocation3 + $0x27e4] ss:$8 sps:$4 sm:$0xff]  }
 0x60a   :  { %11993 = vmatpush1.bf16.msra.mxu1 %v17453_v16  ;;  %10279 = vmatprep.subr.bf16.mxu0 %v17459_v29  ;;  %v17547_v16 = vld [vmem:[#allocation3 + $0x2fe4] ss:$8 sps:$4 sm:$0xff]   ;;  %v17542_v29 = vld [vmem:[#allocation3 + $0x27e0] ss:$8 sps:$4 sm:$0xff]  }
 0x60b   :  { %12003 = vmatprep.subr.bf16.mxu1 %v17463_v36  ;;  %v17545_v36 = vld [vmem:[#allocation3 + $0x2fe0] ss:$8 sps:$4 sm:$0xff]  }
 0x60c   :  { %10271 = vmatmul.mubr.bf16.vlgmr.msra.gmra.mrb[8].mxu0 %v18340_v50 }
 0x60d   :  { %11995 = vmatmul.mubr.bf16.vlgmr.msra.gmra.mrb[8].mxu1 %v18344_v11  ;;  %10280 = vmatpush1.bf16.msra.mxu0 %v17457_v28  ;;  %v17550_v28 = vld [vmem:[#allocation3 + $0x27f4] ss:$8 sps:$4 sm:$0xff]  }
 0x60e   :  { %12004 = vmatpush1.bf16.msra.mxu1 %v17461_v37  ;;  %10281 = vmatprep.subr.bf16.mxu0 %v17466_v51  ;;  %v17553_v37 = vld [vmem:[#allocation3 + $0x2ff4] ss:$8 sps:$4 sm:$0xff]   ;;  %v18352_v51 = vld.sshfl [vmem:[#allocation2] sm:$0x33 pattern:$0x76325410] }
 0x60f   :  { %12005 = vmatprep.subr.bf16.mxu1 %v17469_v46  ;;  %10311 = vmatprep.mubr.bf16.mxu0 %v8695_v32  ;;  %v18354_v46 = vld.sshfl [vmem:[#allocation2 + $0x4] sm:$0x33 pattern:$0x76325410]  ;;  %v17548_v32 = vld [vmem:[#allocation3 + $0x27f0] ss:$8 sps:$4 sm:$0xff]  }
 0x610   :  { %12035 = vmatprep.mubr.bf16.mxu1 %v10419_v30  ;;  %v17551_v30 = vld [vmem:[#allocation3 + $0x2ff0] ss:$8 sps:$4 sm:$0xff]  }
 0x611   :  { %10282 = vmatpush1.bf16.msra.mxu0 %v17464_v49  ;;  %v17554_v49 = vld [vmem:[#allocation7 + $0x40] sm:$0xff]  }
 0x612   :  { %12006 = vmatpush1.bf16.msra.mxu1 %v17467_v57  ;;  %10283 = vmatprep.subr.bf16.mxu0 %v17472_v17  ;;  %v17555_v57 = vld [vmem:[#allocation7 + $0xc0] sm:$0xff]   ;;  %v12135_v17 = vcombine.high %v18352_v51, %v18352_v51 }
 0x613   :  { %12007 = vmatprep.subr.bf16.mxu1 %v17475_v33  ;;  %v8693_v33 = vcombine.high %v18340_v50, %v18340_v50  ;;  %v17560_v50 = vld [vmem:[#allocation7 + $0x8] sm:$0xff]  }
 0x615   :  { %10284 = vmatpush1.bf16.msra.mxu0 %v17470_v47  ;;  %v10417_v47 = vcombine.high %v18344_v11, %v18344_v11  ;;  %v17561_v11 = vld [vmem:[#allocation7 + $0x88] sm:$0xff]  }
 0x616   :  { %12008 = vmatpush1.bf16.msra.mxu1 %v17473_v35  ;;  %10285 = vmatprep.subr.bf16.mxu0 %v17478_v48  ;;  %v12143_v35 = vcombine.high %v18354_v46, %v18354_v46  ;;  %v17556_v48 = vld [vmem:[#allocation7] sm:$0xff]  }
 0x617   :  { %12009 = vmatprep.subr.bf16.mxu1 %v17481_v62  ;;  %v17557_v62 = vld [vmem:[#allocation7 + $0x80] sm:$0xff]  }
 0x619   :  { %10286 = vmatpush1.bf16.msra.mxu0 %v17476_v38  ;;  %v12189_v38 = vpack.c.bf16 %v12135_v17, %v12135_v17  ;;  %v17604_v17 = vld [vmem:[#allocation7 + $0x120] sm:$0xff]  }
 0x61a   :  { %12010 = vmatpush1.bf16.msra.mxu1 %v17479_v14  ;;  %10287 = vmatprep.subr.bf16.mxu0 %v17484_v2  ;;  %v17558_v14 = vld [vmem:[#allocation7 + $0x48] sm:$0xff]  }
 0x61b   :  { %12011 = vmatprep.subr.bf16.mxu1 %v17487_v55  ;;  %v17559_v2 = vld [vmem:[#allocation7 + $0xc8] sm:$0xff]   ;;  %v12191_v55 = vpack.c.bf16 %v12143_v35, %v12143_v35 }
 0x61c   :  { %v17607_v35 = vld [vmem:[#allocation7 + $0x1e8] sm:$0xff]  }
 0x61d   :  { %10288 = vmatpush1.bf16.msra.mxu0 %v17482_v54  ;;  %v17562_v54 = vld [vmem:[#allocation7 + $0x50] sm:$0xff]  }
 0x61e   :  { %12012 = vmatpush1.bf16.msra.mxu1 %v17485_v60  ;;  %10289 = vmatprep.subr.bf16.mxu0 %v17490_v4  ;;  %v17563_v60 = vld [vmem:[#allocation7 + $0xd0] sm:$0xff]  }
 0x61f   :  { %12013 = vmatprep.subr.bf16.mxu1 %v17493_v5  ;;  %v17564_v4 = vld [vmem:[#allocation7 + $0x10] sm:$0xff]  }
 0x620   :  { %v17565_v5 = vld [vmem:[#allocation7 + $0x90] sm:$0xff]  }
 0x621   :  { %10290 = vmatpush1.bf16.msra.mxu0 %v17488_v6  ;;  %v17566_v6 = vld [vmem:[#allocation7 + $0x58] sm:$0xff]  }
 0x622   :  { %12014 = vmatpush1.bf16.msra.mxu1 %v17491_v7  ;;  %10291 = vmatprep.subr.bf16.mxu0 %v17496_v8  ;;  %v17567_v7 = vld [vmem:[#allocation7 + $0xd8] sm:$0xff]  }
 0x623   :  { %12015 = vmatprep.subr.bf16.mxu1 %v17499_v18  ;;  %v17568_v8 = vld [vmem:[#allocation7 + $0x18] sm:$0xff]  }
 0x624   :  { %v17569_v18 = vld [vmem:[#allocation7 + $0x98] sm:$0xff]  }
 0x625   :  { %10292 = vmatpush1.bf16.msra.mxu0 %v17494_v63  ;;  %v17570_v63 = vld [vmem:[#allocation7 + $0x60] sm:$0xff]  }
 0x626   :  { %12016 = vmatpush1.bf16.msra.mxu1 %v17497_v0  ;;  %10293 = vmatprep.subr.bf16.mxu0 %v17502_v22  ;;  %v17571_v0 = vld [vmem:[#allocation7 + $0xe0] sm:$0xff]  }
 0x627   :  { %12017 = vmatprep.subr.bf16.mxu1 %v17505_v23  ;;  %v17572_v22 = vld [vmem:[#allocation7 + $0x20] sm:$0xff]  }
 0x628   :  { %v17573_v23 = vld [vmem:[#allocation7 + $0xa0] sm:$0xff]  }
 0x629   :  { %10294 = vmatpush1.bf16.msra.mxu0 %v17500_v40  ;;  %v17574_v40 = vld [vmem:[#allocation7 + $0x68] sm:$0xff]  }
 0x62a   :  { %12018 = vmatpush1.bf16.msra.mxu1 %v17503_v26  ;;  %10295 = vmatprep.subr.bf16.mxu0 %v17508_v42  ;;  %v17575_v26 = vld [vmem:[#allocation7 + $0xe8] sm:$0xff]  }
 0x62b   :  { %12019 = vmatprep.subr.bf16.mxu1 %v17511_v31  ;;  %v17576_v42 = vld [vmem:[#allocation7 + $0x28] sm:$0xff]  }
 0x62c   :  { %v17577_v31 = vld [vmem:[#allocation7 + $0xa8] sm:$0xff]  }
 0x62d   :  { %10296 = vmatpush1.bf16.msra.mxu0 %v17506_v39  ;;  %v17578_v39 = vld [vmem:[#allocation7 + $0x70] sm:$0xff]  }
 0x62e   :  { %12020 = vmatpush1.bf16.msra.mxu1 %v17509_v13  ;;  %10297 = vmatprep.subr.bf16.mxu0 %v17514_v27  ;;  %v17579_v13 = vld [vmem:[#allocation7 + $0xf0] sm:$0xff]  }
 0x62f   :  { %12021 = vmatprep.subr.bf16.mxu1 %v17517_v53  ;;  %v17580_v27 = vld [vmem:[#allocation7 + $0x30] sm:$0xff]  }
 0x630   :  { %v17581_v53 = vld [vmem:[#allocation7 + $0xb0] sm:$0xff]  }
 0x631   :  { %10298 = vmatpush1.bf16.msra.mxu0 %v17512_v1  ;;  %v17582_v1 = vld [vmem:[#allocation7 + $0x78] sm:$0xff]  }
 0x632   :  { %12022 = vmatpush1.bf16.msra.mxu1 %v17515_v20  ;;  %10299 = vmatprep.subr.bf16.mxu0 %v17520_v58  ;;  %v17583_v20 = vld [vmem:[#allocation7 + $0xf8] sm:$0xff]  }
 0x633   :  { %12023 = vmatprep.subr.bf16.mxu1 %v17523_v21  ;;  %v17584_v58 = vld [vmem:[#allocation7 + $0x38] sm:$0xff]   ;;  %v18364_v21 = vld.sshfl [vmem:[#allocation2 + $0x8] sm:$0x33 pattern:$0x76325410] }
 0x635   :  { %10300 = vmatpush1.bf16.msra.mxu0 %v17518_v59  ;;  %v17585_v59 = vld [vmem:[#allocation7 + $0xb8] sm:$0xff]  }
 0x636   :  { %12024 = vmatpush1.bf16.msra.mxu1 %v17521_v34  ;;  %10301 = vmatprep.subr.bf16.mxu0 %v17526_v61  ;;  %v17586_v34 = vld [vmem:[#allocation7 + $0x140] sm:$0xff]   ;;  %v18366_v61 = vld.sshfl [vmem:[#allocation2 + $0xc] sm:$0x33 pattern:$0x76325410] }
 0x637   :  { %12025 = vmatprep.subr.bf16.mxu1 %v17529_v3  ;;  %v17587_v3 = vld [vmem:[#allocation7 + $0x1c0] sm:$0xff]  }
 0x639   :  { %10302 = vmatpush1.bf16.msra.mxu0 %v17524_v43  ;;  %v12151_v43 = vcombine.high %v18364_v21, %v18364_v21 }
 0x63a   :  { %12026 = vmatpush1.bf16.msra.mxu1 %v17527_v24  ;;  %10303 = vmatprep.subr.bf16.mxu0 %v17532_v12  ;;  %v17588_v24 = vld [vmem:[#allocation7 + $0x100] sm:$0xff]   ;;  %v12159_v12 = vcombine.high %v18366_v61, %v18366_v61 }
 0x63b   :  { %12027 = vmatprep.subr.bf16.mxu1 %v17535_v44  ;;  %v12188_v44 = vpack.c.bf16 %v18352_v51, %v18352_v51  ;;  %v17598_v51 = vld [vmem:[#allocation7 + $0x158] sm:$0xff]  }
 0x63d   :  { %10304 = vmatpush1.bf16.msra.mxu0 %v17530_v56  ;;  %v17589_v56 = vld [vmem:[#allocation7 + $0x180] sm:$0xff]  }
 0x63e   :  { %12028 = vmatpush1.bf16.msra.mxu1 %v17533_v45  ;;  %10305 = vmatprep.subr.bf16.mxu0 %v17538_v41  ;;  %v12190_v45 = vpack.c.bf16 %v18354_v46, %v18354_v46  ;;  %v17590_v41 = vld [vmem:[#allocation7 + $0x148] sm:$0xff]   ;;  %v17599_v46 = vld [vmem:[#allocation7 + $0x1d8] sm:$0xff]  }
 0x63f   :  { %12029 = vmatprep.subr.bf16.mxu1 %v17541_v52  ;;  %v12193_v52 = vpack.c.bf16 %v12151_v43, %v12151_v43  ;;  %v17642_v43 = vld [vmem:[#allocation7 + $0x270] sm:$0xff]  }
 0x641   :  { %10306 = vmatpush1.bf16.msra.mxu0 %v17536_v9  ;;  %v17591_v9 = vld [vmem:[#allocation7 + $0x1c8] sm:$0xff]  }
 0x642   :  { %12030 = vmatpush1.bf16.msra.mxu1 %v17539_v25  ;;  %10307 = vmatprep.subr.bf16.mxu0 %v17544_v15  ;;  %v12195_v25 = vpack.c.bf16 %v12159_v12, %v12159_v12  ;;  %v17592_v15 = vld [vmem:[#allocation7 + $0x108] sm:$0xff]   ;;  %v17644_v12 = vld [vmem:[#allocation7 + $0x230] sm:$0xff]  }
 0x643   :  { %12031 = vmatprep.subr.bf16.mxu1 %v17547_v16  ;;  %v17593_v16 = vld [vmem:[#allocation7 + $0x188] sm:$0xff]  }
 0x645   :  { %10308 = vmatpush1.bf16.msra.mxu0 %v17542_v29  ;;  %v17594_v29 = vld [vmem:[#allocation7 + $0x150] sm:$0xff]  }
 0x646   :  { %12032 = vmatpush1.bf16.msra.mxu1 %v17545_v36  ;;  %10309 = vmatprep.subr.bf16.mxu0 %v17550_v28  ;;  %v17595_v36 = vld [vmem:[#allocation7 + $0x1d0] sm:$0xff]  }
 0x647   :  { %12033 = vmatprep.subr.bf16.mxu1 %v17553_v37  ;;  %v17596_v28 = vld [vmem:[#allocation7 + $0x110] sm:$0xff]  }
 0x648   :  { %v17597_v37 = vld [vmem:[#allocation7 + $0x190] sm:$0xff]  }
 0x649   :  { %10310 = vmatpush1.bf16.msra.mxu0 %v17548_v32  ;;  %v17600_v32 = vld [vmem:[#allocation7 + $0x118] sm:$0xff]  }
 0x64a   :  { %12034 = vmatpush1.bf16.msra.mxu1 %v17551_v30  ;;  %14913 = vmatprep.subr.bf16.mxu0 %v17554_v49  ;;  %v17601_v30 = vld [vmem:[#allocation7 + $0x198] sm:$0xff]   ;;  %v17602_v49 = vld [vmem:[#allocation7 + $0x160] sm:$0xff]  }
 0x64b   :  { %14935 = vmatprep.subr.bf16.mxu1 %v17555_v57  ;;  %v17603_v57 = vld [vmem:[#allocation7 + $0x1e0] sm:$0xff]  }
 0x64c   :  { %10312 = vmatmul.mubr.bf16.vlgmr.msra.gmra.mrb[8].mxu0 %v8693_v33  ;;  %v17605_v33 = vld [vmem:[#allocation7 + $0x1a0] sm:$0xff]  }
 0x64d   :  { %12036 = vmatmul.mubr.bf16.vlgmr.msra.gmra.mrb[8].mxu1 %v10417_v47  ;;  %14914 = vmatpush3.bf16.msra.mxu0 %v17556_v48  ;;  %v17606_v47 = vld [vmem:[#allocation7 + $0x168] sm:$0xff]  }
 0x64e   :  { %12562 = vmatprep.mubr.bf16.mxu0 %v12189_v38  ;;  %14936 = vmatpush3.bf16.msra.mxu1 %v17557_v62  ;;  %v17608_v48 = vld [vmem:[#allocation7 + $0x128] sm:$0xff]   ;;  %v17610_v38 = vld [vmem:[#allocation7 + $0x170] sm:$0xff]  }
 0x64f   :  { %12698 = vmatprep.mubr.bf16.mxu1 %v12191_v55  ;;  %14915 = vmatprep.subr.bf16.mxu0 %v17558_v14  ;;  %v17609_v62 = vld [vmem:[#allocation7 + $0x1a8] sm:$0xff]   ;;  %v17611_v14 = vld [vmem:[#allocation7 + $0x1f0] sm:$0xff]  }
 0x650   :  { %14937 = vmatprep.subr.bf16.mxu1 %v17559_v2  ;;  %v17612_v2 = vld [vmem:[#allocation7 + $0x130] sm:$0xff]  }
 0x651   :  { %14916 = vmatpush3.bf16.msra.mxu0 %v17560_v50  ;;  %v17613_v55 = vld [vmem:[#allocation7 + $0x1b0] sm:$0xff]   ;;  %v17614_v50 = vld [vmem:[#allocation7 + $0x178] sm:$0xff]  }
 0x652   :  { %14938 = vmatpush3.bf16.msra.mxu1 %v17561_v11  ;;  %14917 = vmatprep.subr.bf16.mxu0 %v17562_v54  ;;  %v17615_v11 = vld [vmem:[#allocation7 + $0x1f8] sm:$0xff]  }
 0x653   :  { %14939 = vmatprep.subr.bf16.mxu1 %v17563_v60  ;;  %v17616_v54 = vld [vmem:[#allocation7 + $0x138] sm:$0xff]  }
 0x654   :  { %v17617_v60 = vld [vmem:[#allocation7 + $0x1b8] sm:$0xff]  }
 0x655   :  { %14918 = vmatpush3.bf16.msra.mxu0 %v17564_v4  ;;  %v17618_v4 = vld [vmem:[#allocation7 + $0x240] sm:$0xff]  }
 0x656   :  { %14940 = vmatpush3.bf16.msra.mxu1 %v17565_v5  ;;  %14919 = vmatprep.subr.bf16.mxu0 %v17566_v6  ;;  %v17619_v5 = vld [vmem:[#allocation7 + $0x2c0] sm:$0xff]  }
 0x657   :  { %14941 = vmatprep.subr.bf16.mxu1 %v17567_v7  ;;  %v17620_v6 = vld [vmem:[#allocation7 + $0x200] sm:$0xff]   ;;  %v12192_v7 = vpack.c.bf16 %v18364_v21, %v18364_v21 }
 0x658   :  { %v17637_v21 = vld [vmem:[#allocation7 + $0x2a0] sm:$0xff]  }
 0x659   :  { %14920 = vmatpush3.bf16.msra.mxu0 %v17568_v8  ;;  %v17621_v8 = vld [vmem:[#allocation7 + $0x280] sm:$0xff]  }
 0x65a   :  { %14942 = vmatpush3.bf16.msra.mxu1 %v17569_v18  ;;  %14921 = vmatprep.subr.bf16.mxu0 %v17570_v63  ;;  %v17622_v18 = vld [vmem:[#allocation7 + $0x248] sm:$0xff]   ;;  %v12194_v63 = vpack.c.bf16 %v18366_v61, %v18366_v61 }
 0x65b   :  { %14943 = vmatprep.subr.bf16.mxu1 %v17571_v0  ;;  %v17623_v0 = vld [vmem:[#allocation7 + $0x2c8] sm:$0xff]  }
 0x65c   :  { %v17640_v61 = vld [vmem:[#allocation7 + $0x228] sm:$0xff]  }
 0x65d   :  { %14922 = vmatpush3.bf16.msra.mxu0 %v17572_v22  ;;  %v17624_v22 = vld [vmem:[#allocation7 + $0x208] sm:$0xff]  }
 0x65e   :  { %14944 = vmatpush3.bf16.msra.mxu1 %v17573_v23  ;;  %14923 = vmatprep.subr.bf16.mxu0 %v17574_v40  ;;  %v17625_v23 = vld [vmem:[#allocation7 + $0x288] sm:$0xff]   ;;  %v17626_v40 = vld [vmem:[#allocation7 + $0x250] sm:$0xff]  }
 0x65f   :  { %14945 = vmatprep.subr.bf16.mxu1 %v17575_v26  ;;  %v17627_v26 = vld [vmem:[#allocation7 + $0x2d0] sm:$0xff]  }
 0x661   :  { %14924 = vmatpush3.bf16.msra.mxu0 %v17576_v42  ;;  %v17628_v42 = vld [vmem:[#allocation7 + $0x210] sm:$0xff]  }
 0x662   :  { %14946 = vmatpush3.bf16.msra.mxu1 %v17577_v31  ;;  %14925 = vmatprep.subr.bf16.mxu0 %v17578_v39  ;;  %v17629_v31 = vld [vmem:[#allocation7 + $0x290] sm:$0xff]   ;;  %v17630_v39 = vld [vmem:[#allocation7 + $0x258] sm:$0xff]  }
 0x663   :  { %14947 = vmatprep.subr.bf16.mxu1 %v17579_v13  ;;  %v17631_v13 = vld [vmem:[#allocation7 + $0x2d8] sm:$0xff]  }
 0x665   :  { %14926 = vmatpush3.bf16.msra.mxu0 %v17580_v27  ;;  %v17632_v27 = vld [vmem:[#allocation7 + $0x218] sm:$0xff]  }
 0x666   :  { %14948 = vmatpush3.bf16.msra.mxu1 %v17581_v53  ;;  %14927 = vmatprep.subr.bf16.mxu0 %v17582_v1  ;;  %v17633_v53 = vld [vmem:[#allocation7 + $0x298] sm:$0xff]   ;;  %v17634_v1 = vld [vmem:[#allocation7 + $0x260] sm:$0xff]  }
 0x667   :  { %14949 = vmatprep.subr.bf16.mxu1 %v17583_v20  ;;  %v17635_v20 = vld [vmem:[#allocation7 + $0x2e0] sm:$0xff]  }
 0x669   :  { %14928 = vmatpush3.bf16.msra.mxu0 %v17584_v58  ;;  %v17636_v58 = vld [vmem:[#allocation7 + $0x220] sm:$0xff]  }
 0x66a   :  { %14950 = vmatpush3.bf16.msra.mxu1 %v17585_v59  ;;  %14957 = vmatprep.subr.bf16.mxu0 %v17586_v34  ;;  %v17638_v59 = vld [vmem:[#allocation7 + $0x268] sm:$0xff]  }
 0x66b   :  { %14979 = vmatprep.subr.bf16.mxu1 %v17587_v3  ;;  %v17639_v34 = vld [vmem:[#allocation7 + $0x2e8] sm:$0xff]  }
 0x66c   :  { %12563 = vmatmul.mubr.bf16.vlgmr.msra.gmra.mrb[12].mxu0 %v12188_v44  ;;  %v17641_v3 = vld [vmem:[#allocation7 + $0x2a8] sm:$0xff]   ;;  %v17645_v44 = vld [vmem:[#allocation7 + $0x2b0] sm:$0xff]  }
 0x66d   :  { %12699 = vmatmul.mubr.bf16.vlgmr.msra.gmra.mrb[12].mxu1 %v12190_v45  ;;  %14958 = vmatpush3.bf16.msra.mxu0 %v17588_v24  ;;  %v17643_v24 = vld [vmem:[#allocation7 + $0x2f0] sm:$0xff]   ;;  %v17647_v45 = vld [vmem:[#allocation7 + $0x2f8] sm:$0xff]  }
 0x66e   :  { %12834 = vmatprep.mubr.bf16.mxu0 %v12193_v52  ;;  %14980 = vmatpush3.bf16.msra.mxu1 %v17589_v56  ;;  %v17646_v56 = vld [vmem:[#allocation7 + $0x278] sm:$0xff]  }
 0x66f   :  { %12970 = vmatprep.mubr.bf16.mxu1 %v12195_v25  ;;  %14959 = vmatprep.subr.bf16.mxu0 %v17590_v41  ;;  %v17648_v41 = vld [vmem:[#allocation7 + $0x238] sm:$0xff]  }
 0x670   :  { %14981 = vmatprep.subr.bf16.mxu1 %v17591_v9  ;;  %v17649_v52 = vld [vmem:[#allocation7 + $0x2b8] sm:$0xff]  }
 0x671   :  { %14960 = vmatpush3.bf16.msra.mxu0 %v17592_v15  ;;  %v1632_v9 = vld [vmem:[#allocation5 + $0x8] sm:$0x3]  ;;  %v1633_v25 = vld [vmem:[#allocation5 + $0xa] sm:$0x3] }
 0x672   :  { %14982 = vmatpush3.bf16.msra.mxu1 %v17593_v16  ;;  %14961 = vmatprep.subr.bf16.mxu0 %v17594_v29  ;;  %v1675_v15 = vrot.slane %v1632_v9, %v18081_v10  ;;  %v1683_v16 = vrot.slane %v1633_v25, %v18081_v10  ;;  %v1679_v29 = vrot.slane %v1632_v9, %v18084_v19 }
 0x673   :  { %14983 = vmatprep.subr.bf16.mxu1 %v17595_v36  ;;  %v1687_v36 = vrot.slane %v1633_v25, %v18084_v19 }
 0x675   :  { %14962 = vmatpush3.bf16.msra.mxu0 %v17596_v28 }
 0x676   :  { %14984 = vmatpush3.bf16.msra.mxu1 %v17597_v37  ;;  %14963 = vmatprep.subr.bf16.mxu0 %v17598_v51 }
 0x677   :  { %14985 = vmatprep.subr.bf16.mxu1 %v17599_v46 }
 0x679   :  { %14964 = vmatpush3.bf16.msra.mxu0 %v17600_v32 }
 0x67a   :  { %14986 = vmatpush3.bf16.msra.mxu1 %v17601_v30  ;;  %14965 = vmatprep.subr.bf16.mxu0 %v17602_v49 }
 0x67b   :  { %14987 = vmatprep.subr.bf16.mxu1 %v17603_v57 }
 0x67d   :  { %14966 = vmatpush3.bf16.msra.mxu0 %v17604_v17 }
 0x67e   :  { %14988 = vmatpush3.bf16.msra.mxu1 %v17605_v33  ;;  %14967 = vmatprep.subr.bf16.mxu0 %v17606_v47 }
 0x67f   :  { %14989 = vmatprep.subr.bf16.mxu1 %v17607_v35 }
 0x681   :  { %14968 = vmatpush3.bf16.msra.mxu0 %v17608_v48 }
 0x682   :  { %14990 = vmatpush3.bf16.msra.mxu1 %v17609_v62  ;;  %14969 = vmatprep.subr.bf16.mxu0 %v17610_v38 }
 0x683   :  { %14991 = vmatprep.subr.bf16.mxu1 %v17611_v14 }
 0x685   :  { %14970 = vmatpush3.bf16.msra.mxu0 %v17612_v2 }
 0x686   :  { %14992 = vmatpush3.bf16.msra.mxu1 %v17613_v55  ;;  %14971 = vmatprep.subr.bf16.mxu0 %v17614_v50 }
 0x687   :  { %14993 = vmatprep.subr.bf16.mxu1 %v17615_v11 }
 0x689   :  { %14972 = vmatpush3.bf16.msra.mxu0 %v17616_v54 }
 0x68a   :  { %14994 = vmatpush3.bf16.msra.mxu1 %v17617_v60  ;;  %15001 = vmatprep.subr.bf16.mxu0 %v17618_v4  ;;  %v14811_v4 = vld [vmem:[#allocation8] ss:$0 sm:$0xff] }
 0x68b   :  { %15023 = vmatprep.subr.bf16.mxu1 %v17619_v5 }
 0x68c   :  { %12835 = vmatmul.mubr.bf16.vlgmr.msra.gmra.mrb[16].mxu0 %v12192_v7  ;;  %v14812_v7 = vld [vmem:[#allocation8 + $0x1] ss:$0 sm:$0xff] }
 0x68d   :  { %12971 = vmatmul.mubr.bf16.vlgmr.msra.gmra.mrb[16].mxu1 %v12194_v63  ;;  %15002 = vmatpush3.bf16.msra.mxu0 %v17620_v6 }
 0x68e   :  { %15024 = vmatpush3.bf16.msra.mxu1 %v17621_v8  ;;  %15003 = vmatprep.subr.bf16.mxu0 %v17622_v18 }
 0x68f   :  { %15025 = vmatprep.subr.bf16.mxu1 %v17623_v0 }
 0x691   :  { %15004 = vmatpush3.bf16.msra.mxu0 %v17624_v22 }
 0x692   :  { %15026 = vmatpush3.bf16.msra.mxu1 %v17625_v23  ;;  %15005 = vmatprep.subr.bf16.mxu0 %v17626_v40 }
 0x693   :  { %15027 = vmatprep.subr.bf16.mxu1 %v17627_v26 }
 0x695   :  { %15006 = vmatpush3.bf16.msra.mxu0 %v17628_v42 }
 0x696   :  { %15028 = vmatpush3.bf16.msra.mxu1 %v17629_v31  ;;  %15007 = vmatprep.subr.bf16.mxu0 %v17630_v39  ;;  %v14813_v39 = vld [vmem:[#allocation8 + $0x2] ss:$0 sm:$0xff] }
 0x697   :  { %15029 = vmatprep.subr.bf16.mxu1 %v17631_v13 }
 0x699   :  { %15008 = vmatpush3.bf16.msra.mxu0 %v17632_v27 }
 0x69a   :  { %15030 = vmatpush3.bf16.msra.mxu1 %v17633_v53  ;;  %15009 = vmatprep.subr.bf16.mxu0 %v17634_v1  ;;  %v14814_v53 = vld [vmem:[#allocation8 + $0x3] ss:$0 sm:$0xff] }
 0x69b   :  { %15031 = vmatprep.subr.bf16.mxu1 %v17635_v20 }
 0x69d   :  { %15010 = vmatpush3.bf16.msra.mxu0 %v17636_v58 }
 0x69e   :  { %15032 = vmatpush3.bf16.msra.mxu1 %v17637_v21  ;;  %15011 = vmatprep.subr.bf16.mxu0 %v17638_v59 }
 0x69f   :  { %15033 = vmatprep.subr.bf16.mxu1 %v17639_v34 }
 0x6a1   :  { %15012 = vmatpush3.bf16.msra.mxu0 %v17640_v61 }
 0x6a2   :  { %15034 = vmatpush3.bf16.msra.mxu1 %v17641_v3  ;;  %15013 = vmatprep.subr.bf16.mxu0 %v17642_v43 }
 0x6a3   :  { %15035 = vmatprep.subr.bf16.mxu1 %v17643_v24 }
 0x6a5   :  { %15014 = vmatpush3.bf16.msra.mxu0 %v17644_v12  ;;  %v14815_v12 = vld [vmem:[#allocation8 + $0x4] ss:$0 sm:$0xff] }
 0x6a6   :  { %15036 = vmatpush3.bf16.msra.mxu1 %v17645_v44  ;;  %15015 = vmatprep.subr.bf16.mxu0 %v17646_v56 }
 0x6a7   :  { %15037 = vmatprep.subr.bf16.mxu1 %v17647_v45  ;;  %v14816_v45 = vld [vmem:[#allocation8 + $0x5] ss:$0 sm:$0xff] }
 0x6a9   :  { %15016 = vmatpush3.bf16.msra.mxu0 %v17648_v41 }
 0x6aa   :  { %15038 = vmatpush3.bf16.msra.mxu1 %v17649_v52 }
 0x71f   :  { %v10313_v28 = vpop.f32.mrb[8].mxu0 }
 0x720   :  { %v12037_v37 = vpop.f32.mrb[8].mxu1  ;;  %v15053_v51 = vadd.f32 %v10313_v28, %v1675_v15  ;;  %v10315_v32 = vpop.f32.mrb[9].mxu0 }
 0x721   :  { %v15055_v46 = vadd.f32 %v12037_v37, %v1683_v16  ;;  %v12039_v30 = vpop.f32.mrb[9].mxu1  ;;  %v15054_v49 = vadd.f32 %v10315_v32, %v1679_v29  ;;  %v10317_v17 = vpop.f32.mrb[10].mxu0 }
 0x722   :  { %v15056_v57 = vadd.f32 %v12039_v30, %v1687_v36  ;;  %v12041_v33 = vpop.f32.mrb[10].mxu1  ;;  %v10318_v47 = vpop.f32.mrb[11].mxu0 }
 0x723   :  { %v12042_v35 = vpop.f32.mrb[11].mxu1  ;;  %v12088_v48 = vcombine.low %v15053_v51, %v15054_v49 }
 0x724   :  { %v12096_v62 = vcombine.low %v15055_v46, %v15056_v57 }
 0x725   :  { %14803 = vst.sshfl [vmem:[#allocation2 + $0x10] sm:$0x33 pattern:$0x76325410] %v12088_v48 }
 0x726   :  { %14804 = vst.sshfl [vmem:[#allocation2 + $0x14] sm:$0x33 pattern:$0x76325410] %v12096_v62 }
 0x72c   :  { %v14809_v10 = vld.sshfl [vmem:[#allocation2 + $0x10] sm:$0x33 pattern:$0x76325410] }
 0x72d   :  { %v12167_v38 = vcombine.high %v14809_v10, %v14809_v10  ;;  %v14810_v14 = vld.sshfl [vmem:[#allocation2 + $0x14] sm:$0x33 pattern:$0x76325410]  ;;  %v12196_v55 = vpack.c.bf16 %v14809_v10, %v14809_v10 }
 0x72e   :  { %v12175_v19 = vcombine.high %v14810_v14, %v14810_v14  ;;  %v12198_v11 = vpack.c.bf16 %v14810_v14, %v14810_v14 }
 0x72f   :  { %v12197_v2 = vpack.c.bf16 %v12167_v38, %v12167_v38 }
 0x730   :  { %v12199_v50 = vpack.c.bf16 %v12175_v19, %v12175_v19 }
 0x731   :  { %13106 = vmatprep.mubr.bf16.mxu0 %v12197_v2 }
 0x732   :  { %13242 = vmatprep.mubr.bf16.mxu1 %v12199_v50  ;;  %13107 = vmatmul.mubr.bf16.vlgmr.msra.gmra.mrb[20].mxu0 %v12196_v55 }
 0x733   :  { %13243 = vmatmul.mubr.bf16.vlgmr.msra.gmra.mrb[20].mxu1 %v12198_v11 }
 0x73f   :  { %v14929_v54 = vpop.f32.mrb[12].mxu0 }
 0x740   :  { %v14951_v60 = vpop.f32.mrb[12].mxu1  ;;  %v14930_v5 = vpop.f32.mrb[13].mxu0 }
 0x741   :  { %v14931_v6 = vadd.f32 %v14930_v5, %v14929_v54  ;;  %v14952_v8 = vpop.f32.mrb[13].mxu1  ;;  %v14932_v18 = vpop.f32.mrb[14].mxu0 }
 0x742   :  { %v14953_v63 = vadd.f32 %v14952_v8, %v14951_v60  ;;  %v14954_v0 = vpop.f32.mrb[14].mxu1  ;;  %v14933_v22 = vpop.f32.mrb[15].mxu0 }
 0x743   :  { %v12565_v23 = vadd.f32 %v14931_v6, %v14811_v4  ;;  %v14955_v40 = vpop.f32.mrb[15].mxu1 }
 0x744   :  { %v12701_v26 = vadd.f32 %v14953_v63, %v14812_v7 }
 0x745   :  { %13250 = vst [vmem:[%s18407_s5] sm:$0x3] %v12565_v23 }
 0x746   :  { %13251 = vst [vmem:[%s18407_s5 + $0x2] sm:$0x3] %v12701_v26 }
 0x75f   :  { %v14973_v42 = vpop.f32.mrb[16].mxu0 }
 0x760   :  { %v14995_v31 = vpop.f32.mrb[16].mxu1  ;;  %v14974_v13 = vpop.f32.mrb[17].mxu0 }
 0x761   :  { %v14975_v27 = vadd.f32 %v14974_v13, %v14973_v42  ;;  %v14996_v1 = vpop.f32.mrb[17].mxu1  ;;  %v14976_v20 = vpop.f32.mrb[18].mxu0 }
 0x762   :  { %v14997_v58 = vadd.f32 %v14996_v1, %v14995_v31  ;;  %v14998_v21 = vpop.f32.mrb[18].mxu1  ;;  %v14977_v59 = vpop.f32.mrb[19].mxu0 }
 0x763   :  { %v12837_v34 = vadd.f32 %v14975_v27, %v14813_v39  ;;  %v14999_v61 = vpop.f32.mrb[19].mxu1 }
 0x764   :  { %v12973_v3 = vadd.f32 %v14997_v58, %v14814_v53 }
 0x765   :  { %13252 = vst [vmem:[%s18407_s5 + $0x4] sm:$0x3] %v12837_v34 }
 0x766   :  { %13253 = vst [vmem:[%s18407_s5 + $0x6] sm:$0x3] %v12973_v3 }
 0x805   :  { %v15017_v43 = vpop.f32.mrb[20].mxu0 }
 0x806   :  { %v15039_v24 = vpop.f32.mrb[20].mxu1  ;;  %v15018_v44 = vpop.f32.mrb[21].mxu0 }
 0x807   :  { %v15019_v56 = vadd.f32 %v15018_v44, %v15017_v43  ;;  %v15040_v41 = vpop.f32.mrb[21].mxu1  ;;  %v15020_v52 = vpop.f32.mrb[22].mxu0 }
 0x808   :  { %v15041_v9 = vadd.f32 %v15040_v41, %v15039_v24  ;;  %v15042_v25 = vpop.f32.mrb[22].mxu1  ;;  %v15021_v15 = vpop.f32.mrb[23].mxu0 }
 0x809   :  { %v13109_v16 = vadd.f32 %v15019_v56, %v14815_v12  ;;  %v15043_v29 = vpop.f32.mrb[23].mxu1 }
 0x80a   :  { %v13245_v36 = vadd.f32 %v15041_v9, %v14816_v45 }
 0x80b   :  { %13254 = vst [vmem:[%s18407_s5 + $0x8] sm:$0x3] %v13109_v16 }
 0x80c   :  { %13255 = vst [vmem:[%s18407_s5 + $0xa] sm:$0x3] %v13245_v36 }
 0x80d   :  { %13260 = vsyncpa [#allocation4], 1 }
 0x80e   :  { %13261 = vsyncpa [#allocation6], 1 }
 0x80f   :  { %13262 = vsyncpa [#allocation9], 1 }

</bundles_post_ra>
